<compile_context>
chip_gen: v7x
topology: tpu7x:2x2x1
jax: 0.10.0
libtpu: 0.0.40
codegen_flags: <defaults>
</compile_context>

<pallas_src>
import functools

import jax
import jax.numpy as jnp
import numpy as np
from jax import lax
from jax.experimental import pallas as pl
from jax.experimental.pallas import tpu as pltpu

EPS = 1e-5
EXPANSION = 4
MXU_DTYPE = jnp.bfloat16            # MXU operand dtype (f32 accumulation)

try:
    _VMEM_BYTES = pltpu.get_tpu_info().vmem_capacity_bytes
except Exception:                    # conservative fallback (covers v7x's 64 MiB)
    _VMEM_BYTES = 64 * 1024 * 1024
_VMEM_LIMIT = int(min(_VMEM_BYTES // 2, 64 * 1024 * 1024))


def _cparams(semantics):
    return pltpu.CompilerParams(dimension_semantics=semantics,
                                vmem_limit_bytes=_VMEM_LIMIT)


def _pick_tile_m(m, row_bytes, max_rows=2048):
    """Largest row tile (multiple of 8, divides m) whose double-buffered footprint
    stays well inside the scoped VMEM budget."""
    cap = max(8, min(max_rows, _VMEM_LIMIT // (4 * max(row_bytes, 1))))
    for t in (2048, 1024, 512, 256, 128, 64, 32, 16, 8):
        if t <= cap and t <= m and m % t == 0:
            return t
    return m                          # fall back to full axis (full-dim block is legal)


def _row_spec(tm, ncols):
    return pl.BlockSpec((tm, ncols), lambda i: (i, 0))


def _bcast_spec(shape):
    nd = len(shape)
    return pl.BlockSpec(tuple(shape), lambda *_: (0,) * nd)


# --------------------------------- kernel bodies --------------------------------- #

def _bn_relu_affine(x, st, g, b, inv_m):
    """relu(batchnorm(x)) from precomputed per-channel [sum; sum_sq] (biased var)."""
    mean = st[0:1, :] * inv_m
    var = st[1:2, :] * inv_m - mean * mean
    scale = lax.rsqrt(var + EPS) * g
    shift = b - mean * scale
    return jnp.maximum(x * scale + shift, 0.0)


def _partial_stats(y):
    """(2, C) block: [sum(y); sum(y*y)] over rows."""
    return jnp.concatenate([jnp.sum(y, axis=0, keepdims=True),
                            jnp.sum(y * y, axis=0, keepdims=True)], axis=0)


def _stats_kernel(x_ref, o_ref):
    o_ref[0] = _partial_stats(x_ref[...])


def _make_stage1_kernel(inv_m, with_shortcut):
    """bn1 + relu + conv1 (1x1) [+ fused shortcut 1x1 conv]; emits bn2 partial stats."""
    if with_shortcut:
        def kernel(x_ref, st_ref, g_ref, b_ref, w1_ref, wsc_ref,
                   y1_ref, sc_ref, s2_ref):
            a = _bn_relu_affine(x_ref[...], st_ref[...], g_ref[...], b_ref[...],
                                inv_m).astype(MXU_DTYPE)
            y1 = jnp.dot(a, w1_ref[...], preferred_element_type=jnp.float32)
            y1_ref[...] = y1
            sc_ref[...] = jnp.dot(a, wsc_ref[...],
                                  preferred_element_type=jnp.float32)
            s2_ref[0] = _partial_stats(y1)
    else:
        def kernel(x_ref, st_ref, g_ref, b_ref, w1_ref, y1_ref, s2_ref):
            a = _bn_relu_affine(x_ref[...], st_ref[...], g_ref[...], b_ref[...],
                                inv_m).astype(MXU_DTYPE)
            y1 = jnp.dot(a, w1_ref[...], preferred_element_type=jnp.float32)
            y1_ref[...] = y1
            s2_ref[0] = _partial_stats(y1)
    return kernel


def _make_bn_relu_mm_kernel(inv_m):
    """relu(batchnorm(x)) @ w (used for the strided shortcut conv)."""
    def kernel(x_ref, st_ref, g_ref, b_ref, w_ref, o_ref):
        a = _bn_relu_affine(x_ref[...], st_ref[...], g_ref[...], b_ref[...],
                            inv_m).astype(MXU_DTYPE)
        o_ref[...] = jnp.dot(a, w_ref[...], preferred_element_type=jnp.float32)
    return kernel


def _make_conv2_kernel(H, W, planes, inv_m):
    """bn2 + relu + 3x3 conv (stride 1, pad 1) as 9 shifted MXU matmuls.

    One image per grid step.  The padded activation lives in a bf16 VMEM scratch so
    the zero halo is applied AFTER bn+relu (matching conv zero-padding semantics).
    Emits bn3 partial stats as an epilogue.
    """
    def kernel(y1_ref, st_ref, g_ref, b_ref, w2_ref, y2_ref, s3_ref, pad_ref):
        a2 = _bn_relu_affine(y1_ref[0], st_ref[...], g_ref[...], b_ref[...],
                             inv_m)                               # (H, W, Cin) f32
        pad_ref[...] = jnp.zeros_like(pad_ref)
        pad_ref[1:H + 1, 1:W + 1, :] = a2.astype(pad_ref.dtype)
        acc = jnp.zeros((H * W, planes), jnp.float32)
        for kh in range(3):
            for kw in range(3):
                win = pad_ref[kh:kh + H, kw:kw + W, :]            # (H, W, Cin) bf16
                acc = acc + jnp.dot(win.reshape(H * W, planes),
                                    w2_ref[kh * 3 + kw],
                                    preferred_element_type=jnp.float32)
        y2_ref[0] = acc
        s3_ref[0] = _partial_stats(acc)
    return kernel


def _make_bn_relu_kernel(inv_m):
    def kernel(x_ref, st_ref, g_ref, b_ref, o_ref):
        o_ref[...] = _bn_relu_affine(x_ref[...], st_ref[...], g_ref[...],
                                     b_ref[...], inv_m)
    return kernel


def _matmul_kernel(a_ref, w_ref, o_ref):
    o_ref[...] = jnp.dot(a_ref[...].astype(MXU_DTYPE), w_ref[...],
                         preferred_element_type=jnp.float32)


def _make_stage3_kernel(inv_m):
    """bn3 + relu + conv3 (1x1) + residual add."""
    def kernel(y2_ref, st_ref, g_ref, b_ref, w3_ref, sc_ref, o_ref):
        a = _bn_relu_affine(y2_ref[...], st_ref[...], g_ref[...], b_ref[...],
                            inv_m).astype(MXU_DTYPE)
        o_ref[...] = (jnp.dot(a, w3_ref[...], preferred_element_type=jnp.float32)
                      + sc_ref[...])
    return kernel


# --------------------------------- call drivers ---------------------------------- #

def _channel_stats(x2d):
    m, c = x2d.shape
    tm = _pick_tile_m(m, 4 * c)
    g = m // tm
    parts = pl.pallas_call(
        _stats_kernel,
        out_shape=jax.ShapeDtypeStruct((g, 2, c), jnp.float32),
        grid=(g,),
        in_specs=[_row_spec(tm, c)],
        out_specs=pl.BlockSpec((1, 2, c), lambda i: (i, 0, 0)),
        compiler_params=_cparams(("parallel",)),
    )(x2d)
    return parts.sum(axis=0)                                       # (2, C)


def _im2col_3x3(x, stride):
    # x: (N, H, W, C) -> (N*Ho*Wo, 9*C), column order (kh, kw, cin).  Fallback only.
    N, H, W, C = x.shape
    xp = jnp.pad(x, ((0, 0), (1, 1), (1, 1), (0, 0)))
    Ho = (H - 1) // stride + 1
    Wo = (W - 1) // stride + 1
    cols = []
    for dh in range(3):
        for dw in range(3):
            cols.append(xp[:, dh:dh + (Ho - 1) * stride + 1:stride,
                            dw:dw + (Wo - 1) * stride + 1:stride, :])
    patches = jnp.stack(cols, axis=3)                              # (N, Ho, Wo, 9, C)
    return patches.reshape(N * Ho * Wo, 9 * C)


def init_params(key, in_planes, planes, stride):
    out_planes = EXPANSION * planes
    ks = jax.random.split(key, 10)

    def conv_w(k, cout, cin, kh, kw):
        fan_in = cin * kh * kw
        return (jax.random.normal(k, (cout, cin, kh, kw), jnp.float32)
                / np.sqrt(fan_in))

    p = {
        "g1": 1.0 + 0.1 * jax.random.normal(ks[0], (1, in_planes), jnp.float32),
        "b1": 0.1 * jax.random.normal(ks[1], (1, in_planes), jnp.float32),
        "w1": conv_w(ks[2], planes, in_planes, 1, 1),
        "g2": 1.0 + 0.1 * jax.random.normal(ks[3], (1, planes), jnp.float32),
        "b2": 0.1 * jax.random.normal(ks[4], (1, planes), jnp.float32),
        "w2": conv_w(ks[5], planes, planes, 3, 3),
        "g3": 1.0 + 0.1 * jax.random.normal(ks[6], (1, planes), jnp.float32),
        "b3": 0.1 * jax.random.normal(ks[7], (1, planes), jnp.float32),
        "w3": conv_w(ks[8], out_planes, planes, 1, 1),
    }
    if stride != 1 or in_planes != out_planes:
        p["w_sc"] = conv_w(ks[9], out_planes, in_planes, 1, 1)
    return p


def preact_bottleneck_forward(x_nchw, params, in_planes, planes, stride=1):
    out_planes = EXPANSION * planes
    N, C, H, W = x_nchw.shape
    assert C == in_planes

    x = jnp.transpose(x_nchw, (0, 2, 3, 1)).astype(jnp.float32)    # NHWC
    M = N * H * W
    Ho = (H - 1) // stride + 1
    Wo = (W - 1) // stride + 1
    Mo = N * Ho * Wo
    x_flat = x.reshape(M, in_planes)
    has_sc = "w_sc" in params

    # conv weights as (Cin, Cout) matrices, cast once to the MXU operand dtype
    w1 = params["w1"][:, :, 0, 0].T.astype(MXU_DTYPE)              # (Cin, P)
    w2 = jnp.transpose(params["w2"], (2, 3, 1, 0)).reshape(
        9, planes, planes).astype(MXU_DTYPE)                       # (9, P, P)
    w3 = params["w3"][:, :, 0, 0].T.astype(MXU_DTYPE)              # (P, 4P)
    wsc = (params["w_sc"][:, :, 0, 0].T.astype(MXU_DTYPE) if has_sc else None)

    g1, b1 = params["g1"], params["b1"]
    g2, b2 = params["g2"], params["b2"]
    g3, b3 = params["g3"], params["b3"]

    # ---- pass 0: bn1 batch statistics over all N*H*W rows of x ------------------ #
    stats1 = _channel_stats(x_flat)                                # (2, Cin)

    # ---- pass 1: bn1 + relu + conv1 (+ fused shortcut conv) + bn2 stats --------- #
    fuse_sc = has_sc and stride == 1
    tm1 = _pick_tile_m(M, 4 * (in_planes + planes + (out_planes if fuse_sc else 0)))
    gm1 = M // tm1

    in_specs = [_row_spec(tm1, in_planes),
                _bcast_spec((2, in_planes)),
                _bcast_spec((1, in_planes)),
                _bcast_spec((1, in_planes)),
                _bcast_spec((in_planes, planes))]
    inputs = [x_flat, stats1, g1, b1, w1]
    out_shapes = [jax.ShapeDtypeStruct((M, planes), jnp.float32)]
    out_specs = [_row_spec(tm1, planes)]
    if fuse_sc:
        in_specs.append(_bcast_spec((in_planes, out_planes)))
        inputs.append(wsc)
        out_shapes.append(jax.ShapeDtypeStruct((M, out_planes), jnp.float32))
        out_specs.append(_row_spec(tm1, out_planes))
    out_shapes.append(jax.ShapeDtypeStruct((gm1, 2, planes), jnp.float32))
    out_specs.append(pl.BlockSpec((1, 2, planes), lambda i: (i, 0, 0)))

    res = pl.pallas_call(
        _make_stage1_kernel(1.0 / M, fuse_sc),
        out_shape=tuple(out_shapes),
        grid=(gm1,),
        in_specs=in_specs,
        out_specs=tuple(out_specs),
        compiler_params=_cparams(("parallel",)),
    )(*inputs)
    if fuse_sc:
        y1_flat, shortcut_flat, s2_parts = res
    else:
        y1_flat, s2_parts = res
    stats2 = s2_parts.sum(axis=0)                                  # (2, P)

    # ---- shortcut for the remaining cases ---------------------------------------- #
    if has_sc and stride != 1:
        # shortcut conv reads relu(bn1(x)) at strided spatial positions only
        x_str = x[:, ::stride, ::stride, :].reshape(Mo, in_planes)
        tms = _pick_tile_m(Mo, 4 * (in_planes + out_planes))
        shortcut_flat = pl.pallas_call(
            _make_bn_relu_mm_kernel(1.0 / M),
            out_shape=jax.ShapeDtypeStruct((Mo, out_planes), jnp.float32),
            grid=(Mo // tms,),
            in_specs=[_row_spec(tms, in_planes),
                      _bcast_spec((2, in_planes)),
                      _bcast_spec((1, in_planes)),
                      _bcast_spec((1, in_planes)),
                      _bcast_spec((in_planes, out_planes))],
            out_specs=_row_spec(tms, out_planes),
            compiler_params=_cparams(("parallel",)),
        )(x_str, stats1, g1, b1, wsc)
    elif not has_sc:
        shortcut_flat = x_flat            # identity (stride==1, Cin == 4*planes)

    # ---- pass 2: bn2 + relu + 3x3 conv (in-kernel) + bn3 stats ------------------- #
    if stride == 1:
        y1_nhwc = y1_flat.reshape(N, H, W, planes)
        y2_3d, s3_parts = pl.pallas_call(
            _make_conv2_kernel(H, W, planes, 1.0 / M),
            out_shape=(jax.ShapeDtypeStruct((N, H * W, planes), jnp.float32),
                       jax.ShapeDtypeStruct((N, 2, planes), jnp.float32)),
            grid=(N,),
            in_specs=[pl.BlockSpec((1, H, W, planes), lambda n: (n, 0, 0, 0)),
                      _bcast_spec((2, planes)),
                      _bcast_spec((1, planes)),
                      _bcast_spec((1, planes)),
                      _bcast_spec((9, planes, planes))],
            out_specs=(pl.BlockSpec((1, H * W, planes), lambda n: (n, 0, 0)),
                       pl.BlockSpec((1, 2, planes), lambda n: (n, 0, 0))),
            scratch_shapes=[pltpu.VMEM((H + 2, W + 2, planes), MXU_DTYPE)],
            compiler_params=_cparams(("parallel",)),
        )(y1_nhwc, stats2, g2, b2, w2)
        y2_flat = y2_3d.reshape(Mo, planes)
        stats3 = s3_parts.sum(axis=0)
    else:
        # TODO(synk): strided (stride>1) 3x3 path still builds im2col patches at the
        # JAX level; only the matmul runs on the MXU in Pallas.
        tma = _pick_tile_m(M, 4 * 2 * planes)
        a2_flat = pl.pallas_call(
            _make_bn_relu_kernel(1.0 / M),
            out_shape=jax.ShapeDtypeStruct((M, planes), jnp.float32),
            grid=(M // tma,),
            in_specs=[_row_spec(tma, planes),
                      _bcast_spec((2, planes)),
                      _bcast_spec((1, planes)),
                      _bcast_spec((1, planes))],
            out_specs=_row_spec(tma, planes),
            compiler_params=_cparams(("parallel",)),
        )(y1_flat, stats2, g2, b2)
        patches = _im2col_3x3(a2_flat.reshape(N, H, W, planes), stride)
        tmp = _pick_tile_m(Mo, 4 * (9 * planes + planes))
        y2_flat = pl.pallas_call(
            _matmul_kernel,
            out_shape=jax.ShapeDtypeStruct((Mo, planes), jnp.float32),
            grid=(Mo // tmp,),
            in_specs=[_row_spec(tmp, 9 * planes),
                      _bcast_spec((9 * planes, planes))],
            out_specs=_row_spec(tmp, planes),
            compiler_params=_cparams(("parallel",)),
        )(patches, w2.reshape(9 * planes, planes))
        stats3 = _channel_stats(y2_flat)

    # ---- pass 3: bn3 + relu + conv3 + residual add ------------------------------- #
    tm3 = _pick_tile_m(Mo, 4 * (planes + 2 * out_planes))
    out_flat = pl.pallas_call(
        _make_stage3_kernel(1.0 / Mo),
        out_shape=jax.ShapeDtypeStruct((Mo, out_planes), jnp.float32),
        grid=(Mo // tm3,),
        in_specs=[_row_spec(tm3, planes),
                  _bcast_spec((2, planes)),
                  _bcast_spec((1, planes)),
                  _bcast_spec((1, planes)),
                  _bcast_spec((planes, out_planes)),
                  _row_spec(tm3, out_planes)],
        out_specs=_row_spec(tm3, out_planes),
        compiler_params=_cparams(("parallel",)),
    )(y2_flat, stats3, g3, b3, w3, shortcut_flat)

    out = out_flat.reshape(N, Ho, Wo, out_planes)
    return jnp.transpose(out, (0, 3, 1, 2))                        # back to NCHW


# ------------------------------ pure-JAX reference -------------------------------- #

def _ref_forward(x_nchw, params, in_planes, planes, stride=1):
    x = jnp.transpose(x_nchw, (0, 2, 3, 1)).astype(jnp.float32)

    def bn_relu(t, g, b):
        mean = jnp.mean(t, axis=(0, 1, 2), keepdims=True)
        var = jnp.mean(jnp.square(t - mean), axis=(0, 1, 2), keepdims=True)
        return jnp.maximum((t - mean) * lax.rsqrt(var + EPS)
                           * g.reshape(1, 1, 1, -1) + b.reshape(1, 1, 1, -1), 0.0)

    out = bn_relu(x, params["g1"], params["b1"])
    if "w_sc" in params:
        shortcut = jnp.einsum("nhwc,cd->nhwd", out[:, ::stride, ::stride, :],
                              params["w_sc"][:, :, 0, 0].T)
    else:
        shortcut = x
    y1 = jnp.einsum("nhwc,cd->nhwd", out, params["w1"][:, :, 0, 0].T)
    a2 = bn_relu(y1, params["g2"], params["b2"])
    w2_hwio = jnp.transpose(params["w2"], (2, 3, 1, 0))
    y2 = lax.conv_general_dilated(a2, w2_hwio, (stride, stride),
                                  [(1, 1), (1, 1)],
                                  dimension_numbers=("NHWC", "HWIO", "NHWC"))
    a3 = bn_relu(y2, params["g3"], params["b3"])
    y3 = jnp.einsum("nhwc,cd->nhwd", a3, params["w3"][:, :, 0, 0].T) + shortcut
    return jnp.transpose(y3, (0, 3, 1, 2))


# -------------------------------------- main -------------------------------------- #

if __name__ == "__main__":
    # Toy config: in_planes=4, planes=4, stride=1 -> out channels 16, conv shortcut present.
    N, in_planes, H, W = 2, 4, 16, 16
    planes, stride = 4, 1

    key = jax.random.PRNGKey(0)
    kx, kp = jax.random.split(key)
    x = jax.random.normal(kx, (N, in_planes, H, W), jnp.float32)
    params = init_params(kp, in_planes, planes, stride)

    fwd = jax.jit(functools.partial(preact_bottleneck_forward,
                                    in_planes=in_planes, planes=planes,
                                    stride=stride))
    y = jax.block_until_ready(fwd(x, params))

    y_ref = jax.block_until_ready(
        _ref_forward(x, params, in_planes, planes, stride))
    assert y.shape == (N, EXPANSION * planes, H // stride, W // stride)
    # tolerance accounts for bf16 MXU operands (f32 accumulation) vs a pure-f32 reference
    assert jnp.allclose(y, y_ref, atol=5e-2, rtol=5e-2), "mismatch vs reference"

    print("KERNEL_OK")
</pallas_src>

<mosaic_0001>
module attributes {stable_mosaic.version = 11 : i64} {
  func.func @_stats_kernel(%arg0: i32, %arg1: memref<512x4xf32, #tpu.memory_space<vmem>>, %arg2: memref<1x2x4xf32, #tpu.memory_space<vmem>>) attributes {dimension_semantics = [#tpu.dimension_semantics<parallel>], iteration_bounds = array<i64: 1>, scalar_prefetch = 0 : i64, scratch_operands = 0 : i64, tpu.core_type = #tpu.core_type<tc>, window_params = [{transform_indices = @transform_0, window_bounds = array<i64: 512, 4>}, {transform_indices = @transform_1, window_bounds = array<i64: 1, 2, 4>}]} {
    %c0 = arith.constant 0 : index
    %c0_0 = arith.constant 0 : index
    %0 = vector.load %arg1[%c0, %c0_0] : memref<512x4xf32, #tpu.memory_space<vmem>>, vector<512x4xf32>
    %cst = arith.constant dense<0.000000e+00> : vector<4xf32>
    %1 = vector.multi_reduction <add>, %0, %cst [0] : vector<512x4xf32> to vector<4xf32>
    %2 = vector.shape_cast %1 : vector<4xf32> to vector<1x4xf32>
    %3 = arith.mulf %0, %0 : vector<512x4xf32>
    %cst_1 = arith.constant dense<0.000000e+00> : vector<4xf32>
    %4 = vector.multi_reduction <add>, %3, %cst_1 [0] : vector<512x4xf32> to vector<4xf32>
    %5 = vector.shape_cast %4 : vector<4xf32> to vector<1x4xf32>
    %6 = tpu.concatenate %2, %5 in 0 : vector<1x4xf32>, vector<1x4xf32> -> vector<2x4xf32>
    %c0_2 = arith.constant 0 : index
    %c0_3 = arith.constant 0 : index
    %c0_4 = arith.constant 0 : index
    %7 = vector.load %arg2[%c0_2, %c0_3, %c0_4] : memref<1x2x4xf32, #tpu.memory_space<vmem>>, vector<1x2x4xf32>
    %8 = vector.shape_cast %7 : vector<1x2x4xf32> to vector<2x4xf32>
    %9 = vector.shape_cast %6 : vector<2x4xf32> to vector<1x2x4xf32>
    tpu.vector_store %arg2[%c0_2, %c0_3, %c0_4], %9 {strides = array<i32>} : memref<1x2x4xf32, #tpu.memory_space<vmem>>, vector<1x2x4xf32>,
    return
  }
  func.func @transform_0(%arg0: i32) -> (i32, i32) {
    %c0_i32 = arith.constant 0 : i32
    %c0_i32_0 = arith.constant 0 : i32
    return %arg0, %c0_i32 : i32, i32
  }
  func.func @transform_1(%arg0: i32) -> (i32, i32, i32) {
    %c0_i32 = arith.constant 0 : i32
    %c0_i32_0 = arith.constant 0 : i32
    %c0_i32_1 = arith.constant 0 : i32
    return %arg0, %c0_i32, %c0_i32_0 : i32, i32, i32
  }
}

module attributes {stable_mosaic.version = 11 : i64} {
  func.func @kernel(%arg0: i32, %arg1: memref<512x4xf32, #tpu.memory_space<vmem>>, %arg2: memref<2x4xf32, #tpu.memory_space<vmem>>, %arg3: memref<1x4xf32, #tpu.memory_space<vmem>>, %arg4: memref<1x4xf32, #tpu.memory_space<vmem>>, %arg5: memref<4x4xbf16, #tpu.memory_space<vmem>>, %arg6: memref<4x16xbf16, #tpu.memory_space<vmem>>, %arg7: memref<512x4xf32, #tpu.memory_space<vmem>>, %arg8: memref<512x16xf32, #tpu.memory_space<vmem>>, %arg9: memref<1x2x4xf32, #tpu.memory_space<vmem>>) attributes {dimension_semantics = [#tpu.dimension_semantics<parallel>], iteration_bounds = array<i64: 1>, scalar_prefetch = 0 : i64, scratch_operands = 0 : i64, tpu.core_type = #tpu.core_type<tc>, window_params = [{transform_indices = @transform_0, window_bounds = array<i64: 512, 4>}, {pipeline_mode = #tpu.pipeline_mode<synchronous>, transform_indices = @transform_1, window_bounds = array<i64: 2, 4>}, {pipeline_mode = #tpu.pipeline_mode<synchronous>, transform_indices = @transform_2, window_bounds = array<i64: 1, 4>}, {pipeline_mode = #tpu.pipeline_mode<synchronous>, transform_indices = @transform_3, window_bounds = array<i64: 1, 4>}, {pipeline_mode = #tpu.pipeline_mode<synchronous>, transform_indices = @transform_4, window_bounds = array<i64: 4, 4>}, {pipeline_mode = #tpu.pipeline_mode<synchronous>, transform_indices = @transform_5, window_bounds = array<i64: 4, 16>}, {transform_indices = @transform_6, window_bounds = array<i64: 512, 4>}, {transform_indices = @transform_7, window_bounds = array<i64: 512, 16>}, {transform_indices = @transform_8, window_bounds = array<i64: 1, 2, 4>}]} {
    %c0 = arith.constant 0 : index
    %c0_0 = arith.constant 0 : index
    %0 = vector.load %arg1[%c0, %c0_0] : memref<512x4xf32, #tpu.memory_space<vmem>>, vector<512x4xf32>
    %c0_1 = arith.constant 0 : index
    %c0_2 = arith.constant 0 : index
    %1 = vector.load %arg2[%c0_1, %c0_2] : memref<2x4xf32, #tpu.memory_space<vmem>>, vector<2x4xf32>
    %c0_3 = arith.constant 0 : index
    %c0_4 = arith.constant 0 : index
    %2 = vector.load %arg3[%c0_3, %c0_4] : memref<1x4xf32, #tpu.memory_space<vmem>>, vector<1x4xf32>
    %c0_5 = arith.constant 0 : index
    %c0_6 = arith.constant 0 : index
    %3 = vector.load %arg4[%c0_5, %c0_6] : memref<1x4xf32, #tpu.memory_space<vmem>>, vector<1x4xf32>
    %4 = vector.extract_strided_slice %1 {offsets = [0, 0], sizes = [1, 4], strides = [1, 1]} : vector<2x4xf32> to vector<1x4xf32>
    %cst = arith.constant 0.001953125 : f32
    %5 = vector.broadcast %cst : f32 to vector<1x4xf32>
    %6 = arith.mulf %4, %5 : vector<1x4xf32>
    %7 = vector.extract_strided_slice %1 {offsets = [1, 0], sizes = [1, 4], strides = [1, 1]} : vector<2x4xf32> to vector<1x4xf32>
    %cst_7 = arith.constant 0.001953125 : f32
    %8 = vector.broadcast %cst_7 : f32 to vector<1x4xf32>
    %9 = arith.mulf %7, %8 : vector<1x4xf32>
    %10 = arith.mulf %6, %6 : vector<1x4xf32>
    %11 = arith.subf %9, %10 : vector<1x4xf32>
    %cst_8 = arith.constant 9.99999974E-6 : f32
    %12 = vector.broadcast %cst_8 : f32 to vector<1x4xf32>
    %13 = arith.addf %11, %12 : vector<1x4xf32>
    %14 = math.rsqrt %13 : vector<1x4xf32>
    %15 = arith.mulf %14, %2 : vector<1x4xf32>
    %16 = arith.mulf %6, %15 : vector<1x4xf32>
    %17 = arith.subf %3, %16 : vector<1x4xf32>
    %18 = vector.broadcast %15 : vector<1x4xf32> to vector<512x4xf32>
    %19 = arith.mulf %0, %18 : vector<512x4xf32>
    %20 = vector.broadcast %17 : vector<1x4xf32> to vector<512x4xf32>
    %21 = arith.addf %19, %20 : vector<512x4xf32>
    %cst_9 = arith.constant 0.000000e+00 : f32
    %22 = vector.broadcast %cst_9 : f32 to vector<512x4xf32>
    %23 = arith.maximumf %21, %22 : vector<512x4xf32>
    %24 = arith.truncf %23 : vector<512x4xf32> to vector<512x4xbf16>
    %c0_10 = arith.constant 0 : index
    %c0_11 = arith.constant 0 : index
    %25 = vector.load %arg5[%c0_10, %c0_11] : memref<4x4xbf16, #tpu.memory_space<vmem>>, vector<4x4xbf16>
    %cst_12 = arith.constant dense<0.000000e+00> : vector<512x4xf32>
    %26 = tpu.matmul %24, %25, %cst_12 {dimension_numbers = #tpu.dot_dimension_numbers<[1], [0], [0], [1], [0, 0, 1, 1], [], []>} : vector<512x4xbf16>, vector<4x4xbf16>, vector<512x4xf32> -> vector<512x4xf32>
    %c0_13 = arith.constant 0 : index
    %c0_14 = arith.constant 0 : index
    %27 = vector.load %arg7[%c0_13, %c0_14] : memref<512x4xf32, #tpu.memory_space<vmem>>, vector<512x4xf32>
    tpu.vector_store %arg7[%c0_13, %c0_14], %26 {strides = array<i32>} : memref<512x4xf32, #tpu.memory_space<vmem>>, vector<512x4xf32>,
    %c0_15 = arith.constant 0 : index
    %c0_16 = arith.constant 0 : index
    %28 = vector.load %arg6[%c0_15, %c0_16] : memref<4x16xbf16, #tpu.memory_space<vmem>>, vector<4x16xbf16>
    %cst_17 = arith.constant dense<0.000000e+00> : vector<512x16xf32>
    %29 = tpu.matmul %24, %28, %cst_17 {dimension_numbers = #tpu.dot_dimension_numbers<[1], [0], [0], [1], [0, 0, 1, 1], [], []>} : vector<512x4xbf16>, vector<4x16xbf16>, vector<512x16xf32> -> vector<512x16xf32>
    %c0_18 = arith.constant 0 : index
    %c0_19 = arith.constant 0 : index
    %30 = vector.load %arg8[%c0_18, %c0_19] : memref<512x16xf32, #tpu.memory_space<vmem>>, vector<512x16xf32>
    tpu.vector_store %arg8[%c0_18, %c0_19], %29 {strides = array<i32>} : memref<512x16xf32, #tpu.memory_space<vmem>>, vector<512x16xf32>,
    %cst_20 = arith.constant dense<0.000000e+00> : vector<4xf32>
    %31 = vector.multi_reduction <add>, %26, %cst_20 [0] : vector<512x4xf32> to vector<4xf32>
    %32 = vector.shape_cast %31 : vector<4xf32> to vector<1x4xf32>
    %33 = arith.mulf %26, %26 : vector<512x4xf32>
    %cst_21 = arith.constant dense<0.000000e+00> : vector<4xf32>
    %34 = vector.multi_reduction <add>, %33, %cst_21 [0] : vector<512x4xf32> to vector<4xf32>
    %35 = vector.shape_cast %34 : vector<4xf32> to vector<1x4xf32>
    %36 = tpu.concatenate %32, %35 in 0 : vector<1x4xf32>, vector<1x4xf32> -> vector<2x4xf32>
    %c0_22 = arith.constant 0 : index
    %c0_23 = arith.constant 0 : index
    %c0_24 = arith.constant 0 : index
    %37 = vector.load %arg9[%c0_22, %c0_23, %c0_24] : memref<1x2x4xf32, #tpu.memory_space<vmem>>, vector<1x2x4xf32>
    %38 = vector.shape_cast %37 : vector<1x2x4xf32> to vector<2x4xf32>
    %39 = vector.shape_cast %36 : vector<2x4xf32> to vector<1x2x4xf32>
    tpu.vector_store %arg9[%c0_22, %c0_23, %c0_24], %39 {strides = array<i32>} : memref<1x2x4xf32, #tpu.memory_space<vmem>>, vector<1x2x4xf32>,
    return
  }
  func.func @transform_0(%arg0: i32) -> (i32, i32) {
    %c0_i32 = arith.constant 0 : i32
    %c0_i32_0 = arith.constant 0 : i32
    return %arg0, %c0_i32 : i32, i32
  }
  func.func @transform_1(%arg0: i32) -> (i32, i32) {
    %c0_i32 = arith.constant 0 : i32
    %c0_i32_0 = arith.constant 0 : i32
    %c0_i32_1 = arith.constant 0 : i32
    return %c0_i32, %c0_i32_0 : i32, i32
  }
  func.func @transform_2(%arg0: i32) -> (i32, i32) {
    %c0_i32 = arith.constant 0 : i32
    %c0_i32_0 = arith.constant 0 : i32
    %c0_i32_1 = arith.constant 0 : i32
    return %c0_i32, %c0_i32_0 : i32, i32
  }
  func.func @transform_3(%arg0: i32) -> (i32, i32) {
    %c0_i32 = arith.constant 0 : i32
    %c0_i32_0 = arith.constant 0 : i32
    %c0_i32_1 = arith.constant 0 : i32
    return %c0_i32, %c0_i32_0 : i32, i32
  }
  func.func @transform_4(%arg0: i32) -> (i32, i32) {
    %c0_i32 = arith.constant 0 : i32
    %c0_i32_0 = arith.constant 0 : i32
    %c0_i32_1 = arith.constant 0 : i32
    return %c0_i32, %c0_i32_0 : i32, i32
  }
  func.func @transform_5(%arg0: i32) -> (i32, i32) {
    %c0_i32 = arith.constant 0 : i32
    %c0_i32_0 = arith.constant 0 : i32
    %c0_i32_1 = arith.constant 0 : i32
    return %c0_i32, %c0_i32_0 : i32, i32
  }
  func.func @transform_6(%arg0: i32) -> (i32, i32) {
    %c0_i32 = arith.constant 0 : i32
    %c0_i32_0 = arith.constant 0 : i32
    return %arg0, %c0_i32 : i32, i32
  }
  func.func @transform_7(%arg0: i32) -> (i32, i32) {
    %c0_i32 = arith.constant 0 : i32
    %c0_i32_0 = arith.constant 0 : i32
    return %arg0, %c0_i32 : i32, i32
  }
  func.func @transform_8(%arg0: i32) -> (i32, i32, i32) {
    %c0_i32 = arith.constant 0 : i32
    %c0_i32_0 = arith.constant 0 : i32
    %c0_i32_1 = arith.constant 0 : i32
    return %arg0, %c0_i32, %c0_i32_0 : i32, i32, i32
  }
}

module attributes {stable_mosaic.version = 11 : i64} {
  func.func @kernel(%arg0: i32, %arg1: memref<1x16x16x4xf32, #tpu.memory_space<vmem>>, %arg2: memref<2x4xf32, #tpu.memory_space<vmem>>, %arg3: memref<1x4xf32, #tpu.memory_space<vmem>>, %arg4: memref<1x4xf32, #tpu.memory_space<vmem>>, %arg5: memref<9x4x4xbf16, #tpu.memory_space<vmem>>, %arg6: memref<1x256x4xf32, #tpu.memory_space<vmem>>, %arg7: memref<1x2x4xf32, #tpu.memory_space<vmem>>, %arg8: memref<18x18x4xbf16, #tpu.memory_space<vmem>>) attributes {dimension_semantics = [#tpu.dimension_semantics<parallel>], iteration_bounds = array<i64: 2>, scalar_prefetch = 0 : i64, scratch_operands = 1 : i64, tpu.core_type = #tpu.core_type<tc>, window_params = [{transform_indices = @transform_0, window_bounds = array<i64: 1, 16, 16, 4>}, {pipeline_mode = #tpu.pipeline_mode<synchronous>, transform_indices = @transform_1, window_bounds = array<i64: 2, 4>}, {pipeline_mode = #tpu.pipeline_mode<synchronous>, transform_indices = @transform_2, window_bounds = array<i64: 1, 4>}, {pipeline_mode = #tpu.pipeline_mode<synchronous>, transform_indices = @transform_3, window_bounds = array<i64: 1, 4>}, {pipeline_mode = #tpu.pipeline_mode<synchronous>, transform_indices = @transform_4, window_bounds = array<i64: 9, 4, 4>}, {transform_indices = @transform_5, window_bounds = array<i64: 1, 256, 4>}, {transform_indices = @transform_6, window_bounds = array<i64: 1, 2, 4>}]} {
    %c0 = arith.constant 0 : index
    %c0_0 = arith.constant 0 : index
    %c0_1 = arith.constant 0 : index
    %c0_2 = arith.constant 0 : index
    %0 = vector.load %arg1[%c0, %c0_0, %c0_1, %c0_2] : memref<1x16x16x4xf32, #tpu.memory_space<vmem>>, vector<1x16x16x4xf32>
    %1 = vector.shape_cast %0 : vector<1x16x16x4xf32> to vector<16x16x4xf32>
    %c0_3 = arith.constant 0 : index
    %c0_4 = arith.constant 0 : index
    %2 = vector.load %arg2[%c0_3, %c0_4] : memref<2x4xf32, #tpu.memory_space<vmem>>, vector<2x4xf32>
    %c0_5 = arith.constant 0 : index
    %c0_6 = arith.constant 0 : index
    %3 = vector.load %arg3[%c0_5, %c0_6] : memref<1x4xf32, #tpu.memory_space<vmem>>, vector<1x4xf32>
    %c0_7 = arith.constant 0 : index
    %c0_8 = arith.constant 0 : index
    %4 = vector.load %arg4[%c0_7, %c0_8] : memref<1x4xf32, #tpu.memory_space<vmem>>, vector<1x4xf32>
    %5 = vector.extract_strided_slice %2 {offsets = [0, 0], sizes = [1, 4], strides = [1, 1]} : vector<2x4xf32> to vector<1x4xf32>
    %cst = arith.constant 0.001953125 : f32
    %6 = vector.broadcast %cst : f32 to vector<1x4xf32>
    %7 = arith.mulf %5, %6 : vector<1x4xf32>
    %8 = vector.extract_strided_slice %2 {offsets = [1, 0], sizes = [1, 4], strides = [1, 1]} : vector<2x4xf32> to vector<1x4xf32>
    %cst_9 = arith.constant 0.001953125 : f32
    %9 = vector.broadcast %cst_9 : f32 to vector<1x4xf32>
    %10 = arith.mulf %8, %9 : vector<1x4xf32>
    %11 = arith.mulf %7, %7 : vector<1x4xf32>
    %12 = arith.subf %10, %11 : vector<1x4xf32>
    %cst_10 = arith.constant 9.99999974E-6 : f32
    %13 = vector.broadcast %cst_10 : f32 to vector<1x4xf32>
    %14 = arith.addf %12, %13 : vector<1x4xf32>
    %15 = math.rsqrt %14 : vector<1x4xf32>
    %16 = arith.mulf %15, %3 : vector<1x4xf32>
    %17 = arith.mulf %7, %16 : vector<1x4xf32>
    %18 = arith.subf %4, %17 : vector<1x4xf32>
    %19 = vector.shape_cast %16 : vector<1x4xf32> to vector<1x1x4xf32>
    %20 = vector.broadcast %19 : vector<1x1x4xf32> to vector<16x16x4xf32>
    %21 = arith.mulf %1, %20 : vector<16x16x4xf32>
    %22 = vector.shape_cast %18 : vector<1x4xf32> to vector<1x1x4xf32>
    %23 = vector.broadcast %22 : vector<1x1x4xf32> to vector<16x16x4xf32>
    %24 = arith.addf %21, %23 : vector<16x16x4xf32>
    %cst_11 = arith.constant 0.000000e+00 : f32
    %25 = vector.broadcast %cst_11 : f32 to vector<16x16x4xf32>
    %26 = arith.maximumf %24, %25 : vector<16x16x4xf32>
    %cst_12 = arith.constant 0.000000e+00 : bf16
    %27 = vector.broadcast %cst_12 : bf16 to vector<18x18x4xbf16>
    %c0_13 = arith.constant 0 : index
    %c0_14 = arith.constant 0 : index
    %c0_15 = arith.constant 0 : index
    %28 = vector.load %arg8[%c0_13, %c0_14, %c0_15] : memref<18x18x4xbf16, #tpu.memory_space<vmem>>, vector<18x18x4xbf16>
    tpu.vector_store %arg8[%c0_13, %c0_14, %c0_15], %27 {strides = array<i32>} : memref<18x18x4xbf16, #tpu.memory_space<vmem>>, vector<18x18x4xbf16>,
    %29 = arith.truncf %26 : vector<16x16x4xf32> to vector<16x16x4xbf16>
    %c1 = arith.constant 1 : index
    %c1_16 = arith.constant 1 : index
    %c0_17 = arith.constant 0 : index
    %30 = vector.load %arg8[%c1, %c1_16, %c0_17] : memref<18x18x4xbf16, #tpu.memory_space<vmem>>, vector<16x16x4xbf16>
    tpu.vector_store %arg8[%c1, %c1_16, %c0_17], %29 {strides = array<i32>} : memref<18x18x4xbf16, #tpu.memory_space<vmem>>, vector<16x16x4xbf16>,
    %cst_18 = arith.constant 0.000000e+00 : f32
    %31 = vector.broadcast %cst_18 : f32 to vector<256x4xf32>
    %c0_19 = arith.constant 0 : index
    %c0_20 = arith.constant 0 : index
    %c0_21 = arith.constant 0 : index
    %32 = vector.load %arg8[%c0_19, %c0_20, %c0_21] : memref<18x18x4xbf16, #tpu.memory_space<vmem>>, vector<16x16x4xbf16>
    %33 = vector.shape_cast %32 : vector<16x16x4xbf16> to vector<256x4xbf16>
    %c0_22 = arith.constant 0 : index
    %c0_23 = arith.constant 0 : index
    %c0_24 = arith.constant 0 : index
    %34 = vector.load %arg5[%c0_22, %c0_23, %c0_24] : memref<9x4x4xbf16, #tpu.memory_space<vmem>>, vector<1x4x4xbf16>
    %35 = vector.shape_cast %34 : vector<1x4x4xbf16> to vector<4x4xbf16>
    %cst_25 = arith.constant dense<0.000000e+00> : vector<256x4xf32>
    %36 = tpu.matmul %33, %35, %cst_25 {dimension_numbers = #tpu.dot_dimension_numbers<[1], [0], [0], [1], [0, 0, 1, 1], [], []>} : vector<256x4xbf16>, vector<4x4xbf16>, vector<256x4xf32> -> vector<256x4xf32>
    %37 = arith.addf %31, %36 : vector<256x4xf32>
    %c0_26 = arith.constant 0 : index
    %c1_27 = arith.constant 1 : index
    %c0_28 = arith.constant 0 : index
    %38 = vector.load %arg8[%c0_26, %c1_27, %c0_28] : memref<18x18x4xbf16, #tpu.memory_space<vmem>>, vector<16x16x4xbf16>
    %39 = vector.shape_cast %38 : vector<16x16x4xbf16> to vector<256x4xbf16>
    %c1_29 = arith.constant 1 : index
    %c0_30 = arith.constant 0 : index
    %c0_31 = arith.constant 0 : index
    %40 = vector.load %arg5[%c1_29, %c0_30, %c0_31] : memref<9x4x4xbf16, #tpu.memory_space<vmem>>, vector<1x4x4xbf16>
    %41 = vector.shape_cast %40 : vector<1x4x4xbf16> to vector<4x4xbf16>
    %cst_32 = arith.constant dense<0.000000e+00> : vector<256x4xf32>
    %42 = tpu.matmul %39, %41, %cst_32 {dimension_numbers = #tpu.dot_dimension_numbers<[1], [0], [0], [1], [0, 0, 1, 1], [], []>} : vector<256x4xbf16>, vector<4x4xbf16>, vector<256x4xf32> -> vector<256x4xf32>
    %43 = arith.addf %37, %42 : vector<256x4xf32>
    %c0_33 = arith.constant 0 : index
    %c2 = arith.constant 2 : index
    %c0_34 = arith.constant 0 : index
    %44 = vector.load %arg8[%c0_33, %c2, %c0_34] : memref<18x18x4xbf16, #tpu.memory_space<vmem>>, vector<16x16x4xbf16>
    %45 = vector.shape_cast %44 : vector<16x16x4xbf16> to vector<256x4xbf16>
    %c2_35 = arith.constant 2 : index
    %c0_36 = arith.constant 0 : index
    %c0_37 = arith.constant 0 : index
    %46 = vector.load %arg5[%c2_35, %c0_36, %c0_37] : memref<9x4x4xbf16, #tpu.memory_space<vmem>>, vector<1x4x4xbf16>
    %47 = vector.shape_cast %46 : vector<1x4x4xbf16> to vector<4x4xbf16>
    %cst_38 = arith.constant dense<0.000000e+00> : vector<256x4xf32>
    %48 = tpu.matmul %45, %47, %cst_38 {dimension_numbers = #tpu.dot_dimension_numbers<[1], [0], [0], [1], [0, 0, 1, 1], [], []>} : vector<256x4xbf16>, vector<4x4xbf16>, vector<256x4xf32> -> vector<256x4xf32>
    %49 = arith.addf %43, %48 : vector<256x4xf32>
    %c1_39 = arith.constant 1 : index
    %c0_40 = arith.constant 0 : index
    %c0_41 = arith.constant 0 : index
    %50 = vector.load %arg8[%c1_39, %c0_40, %c0_41] : memref<18x18x4xbf16, #tpu.memory_space<vmem>>, vector<16x16x4xbf16>
    %51 = vector.shape_cast %50 : vector<16x16x4xbf16> to vector<256x4xbf16>
    %c3 = arith.constant 3 : index
    %c0_42 = arith.constant 0 : index
    %c0_43 = arith.constant 0 : index
    %52 = vector.load %arg5[%c3, %c0_42, %c0_43] : memref<9x4x4xbf16, #tpu.memory_space<vmem>>, vector<1x4x4xbf16>
    %53 = vector.shape_cast %52 : vector<1x4x4xbf16> to vector<4x4xbf16>
    %cst_44 = arith.constant dense<0.000000e+00> : vector<256x4xf32>
    %54 = tpu.matmul %51, %53, %cst_44 {dimension_numbers = #tpu.dot_dimension_numbers<[1], [0], [0], [1], [0, 0, 1, 1], [], []>} : vector<256x4xbf16>, vector<4x4xbf16>, vector<256x4xf32> -> vector<256x4xf32>
    %55 = arith.addf %49, %54 : vector<256x4xf32>
    %c1_45 = arith.constant 1 : index
    %c1_46 = arith.constant 1 : index
    %c0_47 = arith.constant 0 : index
    %56 = vector.load %arg8[%c1_45, %c1_46, %c0_47] : memref<18x18x4xbf16, #tpu.memory_space<vmem>>, vector<16x16x4xbf16>
    %57 = vector.shape_cast %56 : vector<16x16x4xbf16> to vector<256x4xbf16>
    %c4 = arith.constant 4 : index
    %c0_48 = arith.constant 0 : index
    %c0_49 = arith.constant 0 : index
    %58 = vector.load %arg5[%c4, %c0_48, %c0_49] : memref<9x4x4xbf16, #tpu.memory_space<vmem>>, vector<1x4x4xbf16>
    %59 = vector.shape_cast %58 : vector<1x4x4xbf16> to vector<4x4xbf16>
    %cst_50 = arith.constant dense<0.000000e+00> : vector<256x4xf32>
    %60 = tpu.matmul %57, %59, %cst_50 {dimension_numbers = #tpu.dot_dimension_numbers<[1], [0], [0], [1], [0, 0, 1, 1], [], []>} : vector<256x4xbf16>, vector<4x4xbf16>, vector<256x4xf32> -> vector<256x4xf32>
    %61 = arith.addf %55, %60 : vector<256x4xf32>
    %c1_51 = arith.constant 1 : index
    %c2_52 = arith.constant 2 : index
    %c0_53 = arith.constant 0 : index
    %62 = vector.load %arg8[%c1_51, %c2_52, %c0_53] : memref<18x18x4xbf16, #tpu.memory_space<vmem>>, vector<16x16x4xbf16>
    %63 = vector.shape_cast %62 : vector<16x16x4xbf16> to vector<256x4xbf16>
    %c5 = arith.constant 5 : index
    %c0_54 = arith.constant 0 : index
    %c0_55 = arith.constant 0 : index
    %64 = vector.load %arg5[%c5, %c0_54, %c0_55] : memref<9x4x4xbf16, #tpu.memory_space<vmem>>, vector<1x4x4xbf16>
    %65 = vector.shape_cast %64 : vector<1x4x4xbf16> to vector<4x4xbf16>
    %cst_56 = arith.constant dense<0.000000e+00> : vector<256x4xf32>
    %66 = tpu.matmul %63, %65, %cst_56 {dimension_numbers = #tpu.dot_dimension_numbers<[1], [0], [0], [1], [0, 0, 1, 1], [], []>} : vector<256x4xbf16>, vector<4x4xbf16>, vector<256x4xf32> -> vector<256x4xf32>
    %67 = arith.addf %61, %66 : vector<256x4xf32>
    %c2_57 = arith.constant 2 : index
    %c0_58 = arith.constant 0 : index
    %c0_59 = arith.constant 0 : index
    %68 = vector.load %arg8[%c2_57, %c0_58, %c0_59] : memref<18x18x4xbf16, #tpu.memory_space<vmem>>, vector<16x16x4xbf16>
    %69 = vector.shape_cast %68 : vector<16x16x4xbf16> to vector<256x4xbf16>
    %c6 = arith.constant 6 : index
    %c0_60 = arith.constant 0 : index
    %c0_61 = arith.constant 0 : index
    %70 = vector.load %arg5[%c6, %c0_60, %c0_61] : memref<9x4x4xbf16, #tpu.memory_space<vmem>>, vector<1x4x4xbf16>
    %71 = vector.shape_cast %70 : vector<1x4x4xbf16> to vector<4x4xbf16>
    %cst_62 = arith.constant dense<0.000000e+00> : vector<256x4xf32>
    %72 = tpu.matmul %69, %71, %cst_62 {dimension_numbers = #tpu.dot_dimension_numbers<[1], [0], [0], [1], [0, 0, 1, 1], [], []>} : vector<256x4xbf16>, vector<4x4xbf16>, vector<256x4xf32> -> vector<256x4xf32>
    %73 = arith.addf %67, %72 : vector<256x4xf32>
    %c2_63 = arith.constant 2 : index
    %c1_64 = arith.constant 1 : index
    %c0_65 = arith.constant 0 : index
    %74 = vector.load %arg8[%c2_63, %c1_64, %c0_65] : memref<18x18x4xbf16, #tpu.memory_space<vmem>>, vector<16x16x4xbf16>
    %75 = vector.shape_cast %74 : vector<16x16x4xbf16> to vector<256x4xbf16>
    %c7 = arith.constant 7 : index
    %c0_66 = arith.constant 0 : index
    %c0_67 = arith.constant 0 : index
    %76 = vector.load %arg5[%c7, %c0_66, %c0_67] : memref<9x4x4xbf16, #tpu.memory_space<vmem>>, vector<1x4x4xbf16>
    %77 = vector.shape_cast %76 : vector<1x4x4xbf16> to vector<4x4xbf16>
    %cst_68 = arith.constant dense<0.000000e+00> : vector<256x4xf32>
    %78 = tpu.matmul %75, %77, %cst_68 {dimension_numbers = #tpu.dot_dimension_numbers<[1], [0], [0], [1], [0, 0, 1, 1], [], []>} : vector<256x4xbf16>, vector<4x4xbf16>, vector<256x4xf32> -> vector<256x4xf32>
    %79 = arith.addf %73, %78 : vector<256x4xf32>
    %c2_69 = arith.constant 2 : index
    %c2_70 = arith.constant 2 : index
    %c0_71 = arith.constant 0 : index
    %80 = vector.load %arg8[%c2_69, %c2_70, %c0_71] : memref<18x18x4xbf16, #tpu.memory_space<vmem>>, vector<16x16x4xbf16>
    %81 = vector.shape_cast %80 : vector<16x16x4xbf16> to vector<256x4xbf16>
    %c8 = arith.constant 8 : index
    %c0_72 = arith.constant 0 : index
    %c0_73 = arith.constant 0 : index
    %82 = vector.load %arg5[%c8, %c0_72, %c0_73] : memref<9x4x4xbf16, #tpu.memory_space<vmem>>, vector<1x4x4xbf16>
    %83 = vector.shape_cast %82 : vector<1x4x4xbf16> to vector<4x4xbf16>
    %cst_74 = arith.constant dense<0.000000e+00> : vector<256x4xf32>
    %84 = tpu.matmul %81, %83, %cst_74 {dimension_numbers = #tpu.dot_dimension_numbers<[1], [0], [0], [1], [0, 0, 1, 1], [], []>} : vector<256x4xbf16>, vector<4x4xbf16>, vector<256x4xf32> -> vector<256x4xf32>
    %85 = arith.addf %79, %84 : vector<256x4xf32>
    %c0_75 = arith.constant 0 : index
    %c0_76 = arith.constant 0 : index
    %c0_77 = arith.constant 0 : index
    %86 = vector.load %arg6[%c0_75, %c0_76, %c0_77] : memref<1x256x4xf32, #tpu.memory_space<vmem>>, vector<1x256x4xf32>
    %87 = vector.shape_cast %86 : vector<1x256x4xf32> to vector<256x4xf32>
    %88 = vector.shape_cast %85 : vector<256x4xf32> to vector<1x256x4xf32>
    tpu.vector_store %arg6[%c0_75, %c0_76, %c0_77], %88 {strides = array<i32>} : memref<1x256x4xf32, #tpu.memory_space<vmem>>, vector<1x256x4xf32>,
    %cst_78 = arith.constant dense<0.000000e+00> : vector<4xf32>
    %89 = vector.multi_reduction <add>, %85, %cst_78 [0] : vector<256x4xf32> to vector<4xf32>
    %90 = vector.shape_cast %89 : vector<4xf32> to vector<1x4xf32>
    %91 = arith.mulf %85, %85 : vector<256x4xf32>
    %cst_79 = arith.constant dense<0.000000e+00> : vector<4xf32>
    %92 = vector.multi_reduction <add>, %91, %cst_79 [0] : vector<256x4xf32> to vector<4xf32>
    %93 = vector.shape_cast %92 : vector<4xf32> to vector<1x4xf32>
    %94 = tpu.concatenate %90, %93 in 0 : vector<1x4xf32>, vector<1x4xf32> -> vector<2x4xf32>
    %c0_80 = arith.constant 0 : index
    %c0_81 = arith.constant 0 : index
    %c0_82 = arith.constant 0 : index
    %95 = vector.load %arg7[%c0_80, %c0_81, %c0_82] : memref<1x2x4xf32, #tpu.memory_space<vmem>>, vector<1x2x4xf32>
    %96 = vector.shape_cast %95 : vector<1x2x4xf32> to vector<2x4xf32>
    %97 = vector.shape_cast %94 : vector<2x4xf32> to vector<1x2x4xf32>
    tpu.vector_store %arg7[%c0_80, %c0_81, %c0_82], %97 {strides = array<i32>} : memref<1x2x4xf32, #tpu.memory_space<vmem>>, vector<1x2x4xf32>,
    return
  }
  func.func @transform_0(%arg0: i32) -> (i32, i32, i32, i32) {
    %c0_i32 = arith.constant 0 : i32
    %c0_i32_0 = arith.constant 0 : i32
    %c0_i32_1 = arith.constant 0 : i32
    %c0_i32_2 = arith.constant 0 : i32
    return %arg0, %c0_i32, %c0_i32_0, %c0_i32_1 : i32, i32, i32, i32
  }
  func.func @transform_1(%arg0: i32) -> (i32, i32) {
    %c0_i32 = arith.constant 0 : i32
    %c0_i32_0 = arith.constant 0 : i32
    %c0_i32_1 = arith.constant 0 : i32
    return %c0_i32, %c0_i32_0 : i32, i32
  }
  func.func @transform_2(%arg0: i32) -> (i32, i32) {
    %c0_i32 = arith.constant 0 : i32
    %c0_i32_0 = arith.constant 0 : i32
    %c0_i32_1 = arith.constant 0 : i32
    return %c0_i32, %c0_i32_0 : i32, i32
  }
  func.func @transform_3(%arg0: i32) -> (i32, i32) {
    %c0_i32 = arith.constant 0 : i32
    %c0_i32_0 = arith.constant 0 : i32
    %c0_i32_1 = arith.constant 0 : i32
    return %c0_i32, %c0_i32_0 : i32, i32
  }
  func.func @transform_4(%arg0: i32) -> (i32, i32, i32) {
    %c0_i32 = arith.constant 0 : i32
    %c0_i32_0 = arith.constant 0 : i32
    %c0_i32_1 = arith.constant 0 : i32
    %c0_i32_2 = arith.constant 0 : i32
    return %c0_i32, %c0_i32_0, %c0_i32_1 : i32, i32, i32
  }
  func.func @transform_5(%arg0: i32) -> (i32, i32, i32) {
    %c0_i32 = arith.constant 0 : i32
    %c0_i32_0 = arith.constant 0 : i32
    %c0_i32_1 = arith.constant 0 : i32
    return %arg0, %c0_i32, %c0_i32_0 : i32, i32, i32
  }
  func.func @transform_6(%arg0: i32) -> (i32, i32, i32) {
    %c0_i32 = arith.constant 0 : i32
    %c0_i32_0 = arith.constant 0 : i32
    %c0_i32_1 = arith.constant 0 : i32
    return %arg0, %c0_i32, %c0_i32_0 : i32, i32, i32
  }
}

module attributes {stable_mosaic.version = 11 : i64} {
  func.func @kernel(%arg0: i32, %arg1: memref<512x4xf32, #tpu.memory_space<vmem>>, %arg2: memref<2x4xf32, #tpu.memory_space<vmem>>, %arg3: memref<1x4xf32, #tpu.memory_space<vmem>>, %arg4: memref<1x4xf32, #tpu.memory_space<vmem>>, %arg5: memref<4x16xbf16, #tpu.memory_space<vmem>>, %arg6: memref<512x16xf32, #tpu.memory_space<vmem>>, %arg7: memref<512x16xf32, #tpu.memory_space<vmem>>) attributes {dimension_semantics = [#tpu.dimension_semantics<parallel>], iteration_bounds = array<i64: 1>, scalar_prefetch = 0 : i64, scratch_operands = 0 : i64, tpu.core_type = #tpu.core_type<tc>, window_params = [{transform_indices = @transform_0, window_bounds = array<i64: 512, 4>}, {pipeline_mode = #tpu.pipeline_mode<synchronous>, transform_indices = @transform_1, window_bounds = array<i64: 2, 4>}, {pipeline_mode = #tpu.pipeline_mode<synchronous>, transform_indices = @transform_2, window_bounds = array<i64: 1, 4>}, {pipeline_mode = #tpu.pipeline_mode<synchronous>, transform_indices = @transform_3, window_bounds = array<i64: 1, 4>}, {pipeline_mode = #tpu.pipeline_mode<synchronous>, transform_indices = @transform_4, window_bounds = array<i64: 4, 16>}, {transform_indices = @transform_5, window_bounds = array<i64: 512, 16>}, {transform_indices = @transform_6, window_bounds = array<i64: 512, 16>}]} {
    %c0 = arith.constant 0 : index
    %c0_0 = arith.constant 0 : index
    %0 = vector.load %arg1[%c0, %c0_0] : memref<512x4xf32, #tpu.memory_space<vmem>>, vector<512x4xf32>
    %c0_1 = arith.constant 0 : index
    %c0_2 = arith.constant 0 : index
    %1 = vector.load %arg2[%c0_1, %c0_2] : memref<2x4xf32, #tpu.memory_space<vmem>>, vector<2x4xf32>
    %c0_3 = arith.constant 0 : index
    %c0_4 = arith.constant 0 : index
    %2 = vector.load %arg3[%c0_3, %c0_4] : memref<1x4xf32, #tpu.memory_space<vmem>>, vector<1x4xf32>
    %c0_5 = arith.constant 0 : index
    %c0_6 = arith.constant 0 : index
    %3 = vector.load %arg4[%c0_5, %c0_6] : memref<1x4xf32, #tpu.memory_space<vmem>>, vector<1x4xf32>
    %4 = vector.extract_strided_slice %1 {offsets = [0, 0], sizes = [1, 4], strides = [1, 1]} : vector<2x4xf32> to vector<1x4xf32>
    %cst = arith.constant 0.001953125 : f32
    %5 = vector.broadcast %cst : f32 to vector<1x4xf32>
    %6 = arith.mulf %4, %5 : vector<1x4xf32>
    %7 = vector.extract_strided_slice %1 {offsets = [1, 0], sizes = [1, 4], strides = [1, 1]} : vector<2x4xf32> to vector<1x4xf32>
    %cst_7 = arith.constant 0.001953125 : f32
    %8 = vector.broadcast %cst_7 : f32 to vector<1x4xf32>
    %9 = arith.mulf %7, %8 : vector<1x4xf32>
    %10 = arith.mulf %6, %6 : vector<1x4xf32>
    %11 = arith.subf %9, %10 : vector<1x4xf32>
    %cst_8 = arith.constant 9.99999974E-6 : f32
    %12 = vector.broadcast %cst_8 : f32 to vector<1x4xf32>
    %13 = arith.addf %11, %12 : vector<1x4xf32>
    %14 = math.rsqrt %13 : vector<1x4xf32>
    %15 = arith.mulf %14, %2 : vector<1x4xf32>
    %16 = arith.mulf %6, %15 : vector<1x4xf32>
    %17 = arith.subf %3, %16 : vector<1x4xf32>
    %18 = vector.broadcast %15 : vector<1x4xf32> to vector<512x4xf32>
    %19 = arith.mulf %0, %18 : vector<512x4xf32>
    %20 = vector.broadcast %17 : vector<1x4xf32> to vector<512x4xf32>
    %21 = arith.addf %19, %20 : vector<512x4xf32>
    %cst_9 = arith.constant 0.000000e+00 : f32
    %22 = vector.broadcast %cst_9 : f32 to vector<512x4xf32>
    %23 = arith.maximumf %21, %22 : vector<512x4xf32>
    %24 = arith.truncf %23 : vector<512x4xf32> to vector<512x4xbf16>
    %c0_10 = arith.constant 0 : index
    %c0_11 = arith.constant 0 : index
    %25 = vector.load %arg5[%c0_10, %c0_11] : memref<4x16xbf16, #tpu.memory_space<vmem>>, vector<4x16xbf16>
    %cst_12 = arith.constant dense<0.000000e+00> : vector<512x16xf32>
    %26 = tpu.matmul %24, %25, %cst_12 {dimension_numbers = #tpu.dot_dimension_numbers<[1], [0], [0], [1], [0, 0, 1, 1], [], []>} : vector<512x4xbf16>, vector<4x16xbf16>, vector<512x16xf32> -> vector<512x16xf32>
    %c0_13 = arith.constant 0 : index
    %c0_14 = arith.constant 0 : index
    %27 = vector.load %arg6[%c0_13, %c0_14] : memref<512x16xf32, #tpu.memory_space<vmem>>, vector<512x16xf32>
    %28 = arith.addf %26, %27 : vector<512x16xf32>
    %c0_15 = arith.constant 0 : index
    %c0_16 = arith.constant 0 : index
    %29 = vector.load %arg7[%c0_15, %c0_16] : memref<512x16xf32, #tpu.memory_space<vmem>>, vector<512x16xf32>
    tpu.vector_store %arg7[%c0_15, %c0_16], %28 {strides = array<i32>} : memref<512x16xf32, #tpu.memory_space<vmem>>, vector<512x16xf32>,
    return
  }
  func.func @transform_0(%arg0: i32) -> (i32, i32) {
    %c0_i32 = arith.constant 0 : i32
    %c0_i32_0 = arith.constant 0 : i32
    return %arg0, %c0_i32 : i32, i32
  }
  func.func @transform_1(%arg0: i32) -> (i32, i32) {
    %c0_i32 = arith.constant 0 : i32
    %c0_i32_0 = arith.constant 0 : i32
    %c0_i32_1 = arith.constant 0 : i32
    return %c0_i32, %c0_i32_0 : i32, i32
  }
  func.func @transform_2(%arg0: i32) -> (i32, i32) {
    %c0_i32 = arith.constant 0 : i32
    %c0_i32_0 = arith.constant 0 : i32
    %c0_i32_1 = arith.constant 0 : i32
    return %c0_i32, %c0_i32_0 : i32, i32
  }
  func.func @transform_3(%arg0: i32) -> (i32, i32) {
    %c0_i32 = arith.constant 0 : i32
    %c0_i32_0 = arith.constant 0 : i32
    %c0_i32_1 = arith.constant 0 : i32
    return %c0_i32, %c0_i32_0 : i32, i32
  }
  func.func @transform_4(%arg0: i32) -> (i32, i32) {
    %c0_i32 = arith.constant 0 : i32
    %c0_i32_0 = arith.constant 0 : i32
    %c0_i32_1 = arith.constant 0 : i32
    return %c0_i32, %c0_i32_0 : i32, i32
  }
  func.func @transform_5(%arg0: i32) -> (i32, i32) {
    %c0_i32 = arith.constant 0 : i32
    %c0_i32_0 = arith.constant 0 : i32
    return %arg0, %c0_i32 : i32, i32
  }
  func.func @transform_6(%arg0: i32) -> (i32, i32) {
    %c0_i32 = arith.constant 0 : i32
    %c0_i32_0 = arith.constant 0 : i32
    return %arg0, %c0_i32 : i32, i32
  }
}

</mosaic_0001>

<bundles_post_ra>
// kernel: preact_bottleneck_forward.4
= control target key start
LH: loop header
LB: loop body
LE: loop exit
PB: predicated region body
PF: predicated region fallthrough
CT: control target
= control target key end

     0   :  { %vm72_vm0 = vcmask 31744   ;;  %vm403_vm1 = vcmask 1040384   ;;  %vm405_vm2 = vcmask 25600   ;;  %s1276_s0 = inlined_call_operand.vmem [shape: f32[512,4], index: 0, kind: input, shape index: {}]   ;;  %s1277_s1 = inlined_call_operand.vmem [shape: f32[1,2,4], index: 1, kind: output, shape index: {}]  }
   0x1   :  { %v424_v0 = vld [vmem:[%s1276_s0] sm:$0xff]  ;;  %v429_v1 = vld [vmem:[%s1276_s0 + $0x8] sm:$0xff]  ;;  %v434_v2 = vld [vmem:[%s1276_s0 + $0x10] sm:$0xff] }
   0x2   :  { %v73_v3 = vsel %vm72_vm0, %v424_v0, 0.0  ;;  %v74_v4 = vsel %vm72_vm0, %v429_v1, 0.0  ;;  %v76_v5 = vsel %vm72_vm0, %v434_v2, 0.0  ;;  %v445_v6 = vld [vmem:[%s1276_s0 + $0x18] sm:$0xff]  ;;  %v452_v9 = vld [vmem:[%s1276_s0 + $0x20] sm:$0xff]  ;;  %v459_v12 = vld [vmem:[%s1276_s0 + $0x28] sm:$0xff] }
   0x3   :  { %v75_v7 = vadd.f32 %v74_v4, %v73_v3  ;;  %v78_v8 = vsel %vm72_vm0, %v445_v6, 0.0  ;;  %v80_v11 = vsel %vm72_vm0, %v452_v9, 0.0  ;;  %v82_v14 = vsel %vm72_vm0, %v459_v12, 0.0  ;;  %v466_v15 = vld [vmem:[%s1276_s0 + $0x30] sm:$0xff]  ;;  %v471_v17 = vld [vmem:[%s1276_s0 + $0x38] sm:$0xff]  ;;  %v476_v18 = vld [vmem:[%s1276_s0 + $0x40] sm:$0xff] }
   0x4   :  { %v84_v19 = vsel %vm72_vm0, %v466_v15, 0.0  ;;  %v483_v20 = vld [vmem:[%s1276_s0 + $0x48] sm:$0xff]  ;;  %v488_v21 = vld [vmem:[%s1276_s0 + $0x50] sm:$0xff]  ;;  %v493_v22 = vld [vmem:[%s1276_s0 + $0x58] sm:$0xff]  ;;  %v86_v24 = vsel %vm72_vm0, %v471_v17, 0.0  ;;  %v88_v25 = vsel %vm72_vm0, %v476_v18, 0.0 }
   0x5   :  { %v77_v10 = vadd.f32 %v76_v5, %v75_v7  ;;  %v502_v26 = vld [vmem:[%s1276_s0 + $0x108] sm:$0xff]  ;;  %v507_v27 = vld [vmem:[%s1276_s0 + $0x110] sm:$0xff]  ;;  %v512_v28 = vld [vmem:[%s1276_s0 + $0x118] sm:$0xff]  ;;  %v90_v29 = vsel %vm72_vm0, %v483_v20, 0.0  ;;  %v92_v30 = vsel %vm72_vm0, %v488_v21, 0.0  ;;  %v520_v31 = vsel %vm72_vm0, %v493_v22, 0.0 }
   0x6   :  { %v525_v32 = vld [vmem:[%s1276_s0 + $0x120] sm:$0xff]  ;;  %v530_v33 = vld [vmem:[%s1276_s0 + $0x128] sm:$0xff]  ;;  %v535_v34 = vld [vmem:[%s1276_s0 + $0x130] sm:$0xff]  ;;  %v539_v36 = vsel %vm72_vm0, %v502_v26, 0.0  ;;  %v543_v37 = vsel %vm72_vm0, %v507_v27, 0.0  ;;  %v547_v38 = vsel %vm72_vm0, %v512_v28, 0.0 }
   0x7   :  { %v79_v13 = vadd.f32 %v78_v8, %v77_v10  ;;  %1296 = vst [vmem:[#allocation2_spill] sm:$0xff] %v539_v36  ;;  %1297 = vst [vmem:[#allocation3_spill] sm:$0xff] %v543_v37  ;;  %v552_v39 = vld [vmem:[%s1276_s0 + $0x138] sm:$0xff]  ;;  %v557_v40 = vld [vmem:[%s1276_s0 + $0x140] sm:$0xff]  ;;  %v566_v42 = vsel %vm72_vm0, %v525_v32, 0.0  ;;  %v570_v43 = vsel %vm72_vm0, %v530_v33, 0.0  ;;  %v208_v36 = vmul.f32 %v434_v2, %v434_v2 }
   0x8   :  { %1298 = vst [vmem:[#allocation4_spill] sm:$0xff] %v547_v38  ;;  %v562_v41 = vld [vmem:[%s1276_s0 + $0x148] sm:$0xff]  ;;  %1299 = vst [vmem:[#allocation5_spill] sm:$0xff] %v566_v42  ;;  %v574_v44 = vsel %vm72_vm0, %v535_v34, 0.0  ;;  %v579_v45 = vld [vmem:[%s1276_s0 + $0x150] sm:$0xff]  ;;  %v593_v49 = vsel %vm72_vm0, %v552_v39, 0.0 }
   0x9   :  { %v81_v16 = vadd.f32 %v80_v11, %v79_v13  ;;  %1300 = vst [vmem:[#allocation6_spill] sm:$0xff] %v570_v43  ;;  %1301 = vst [vmem:[#allocation7_spill] sm:$0xff] %v574_v44  ;;  %v584_v46 = vld [vmem:[%s1276_s0 + $0x158] sm:$0xff]  ;;  %v589_v47 = vld [vmem:[%s1276_s0 + $0x160] sm:$0xff]  ;;  %v597_v50 = vsel %vm72_vm0, %v557_v40, 0.0  ;;  %v601_v51 = vsel %vm72_vm0, %v562_v41, 0.0 }
   0xa   :  { %1302 = vst [vmem:[#allocation8_spill] sm:$0xff] %v593_v49  ;;  %1303 = vst [vmem:[#allocation9_spill] sm:$0xff] %v597_v50  ;;  %v606_v52 = vld [vmem:[%s1276_s0 + $0x168] sm:$0xff]  ;;  %v611_v53 = vld [vmem:[%s1276_s0 + $0x170] sm:$0xff]  ;;  %v620_v55 = vsel %vm72_vm0, %v579_v45, 0.0  ;;  %v624_v56 = vsel %vm72_vm0, %v584_v46, 0.0 }
   0xb   :  { %v83_v23 = vadd.f32 %v82_v14, %v81_v16  ;;  %1304 = vst [vmem:[#allocation10_spill] sm:$0xff] %v601_v51  ;;  %v616_v54 = vld [vmem:[%s1276_s0 + $0x178] sm:$0xff]  ;;  %1305 = vst [vmem:[#allocation11_spill] sm:$0xff] %v620_v55  ;;  %v628_v57 = vsel %vm72_vm0, %v589_v47, 0.0  ;;  %v633_v58 = vld [vmem:[%s1276_s0 + $0x180] sm:$0xff]  ;;  %v647_v62 = vsel %vm72_vm0, %v606_v52, 0.0 }
   0xc   :  { %1306 = vst [vmem:[#allocation12_spill] sm:$0xff] %v624_v56  ;;  %1307 = vst [vmem:[#allocation13_spill] sm:$0xff] %v628_v57  ;;  %v638_v59 = vld [vmem:[%s1276_s0 + $0x188] sm:$0xff]  ;;  %v643_v60 = vld [vmem:[%s1276_s0 + $0x190] sm:$0xff]  ;;  %v651_v63 = vsel %vm72_vm0, %v611_v53, 0.0  ;;  %v655_v3 = vsel %vm72_vm0, %v616_v54, 0.0 }
   0xd   :  { %v85_v35 = vadd.f32 %v84_v19, %v83_v23  ;;  %1308 = vst [vmem:[#allocation14_spill] sm:$0xff] %v647_v62  ;;  %1309 = vst [vmem:[#allocation15_spill] sm:$0xff] %v651_v63  ;;  %v660_v4 = vld [vmem:[%s1276_s0 + $0x198] sm:$0xff]  ;;  %v665_v5 = vld [vmem:[%s1276_s0 + $0x1a0] sm:$0xff]  ;;  %v674_v8 = vsel %vm72_vm0, %v633_v58, 0.0  ;;  %v678_v10 = vsel %vm72_vm0, %v638_v59, 0.0 }
   0xe   :  { %1310 = vst [vmem:[#allocation16_spill] sm:$0xff] %v655_v3  ;;  %v670_v7 = vld [vmem:[%s1276_s0 + $0x1a8] sm:$0xff]  ;;  %1311 = vst [vmem:[#allocation17_spill] sm:$0xff] %v674_v8  ;;  %v682_v11 = vsel %vm72_vm0, %v643_v60, 0.0  ;;  %v687_v13 = vld [vmem:[%s1276_s0 + $0x60] sm:$0xff] }
   0xf   :  { %v87_v48 = vadd.f32 %v86_v24, %v85_v35  ;;  %1312 = vst [vmem:[#allocation18_spill] sm:$0xff] %v678_v10  ;;  %1313 = vst [vmem:[#allocation19_spill] sm:$0xff] %v682_v11  ;;  %v692_v14 = vld [vmem:[%s1276_s0 + $0x1b0] sm:$0xff]  ;;  %v697_v16 = vld [vmem:[%s1276_s0 + $0x1b8] sm:$0xff]  ;;  %v706_v24 = vsel %vm72_vm0, %v660_v4, 0.0  ;;  %v714_v35 = vsel %vm72_vm0, %v670_v7, 0.0 }
  0x10   :  { %v702_v19 = vld [vmem:[%s1276_s0 + $0x1c0] sm:$0xff]  ;;  %1314 = vst [vmem:[#allocation20_spill] sm:$0xff] %v706_v24  ;;  %1316 = vst [vmem:[#allocation22_spill] sm:$0xff] %v714_v35  ;;  %v737_v35 = vsel %vm72_vm0, %v697_v16, 0.0  ;;  %v751_v10 = vld [vmem:[%s1276_s0 + $0x1e8] sm:$0xff] }
  0x11   :  { %v89_v61 = vadd.f32 %v88_v25, %v87_v48  ;;  %v710_v25 = vsel %vm72_vm0, %v665_v5, 0.0  ;;  %v719_v48 = vld [vmem:[%s1276_s0 + $0x1c8] sm:$0xff]  ;;  %1318 = vst [vmem:[#allocation24_spill] sm:$0xff] %v737_v35  ;;  %v741_v24 = vsel %vm72_vm0, %v702_v19, 0.0  ;;  %v746_v11 = vld [vmem:[%s1276_s0 + $0x1e0] sm:$0xff]  ;;  %v773_v63 = vld [vmem:[%s1276_s0 + $0x1f8] sm:$0xff] }
  0x12   :  { %1315 = vst [vmem:[#allocation21_spill] sm:$0xff] %v710_v25  ;;  %v733_v25 = vsel %vm72_vm0, %v692_v14, 0.0  ;;  %1319 = vst [vmem:[#allocation25_spill] sm:$0xff] %v741_v24  ;;  %v760_v8 = vsel %vm72_vm0, %v719_v48, 0.0  ;;  %v795_v57 = vsel %vm72_vm0, %v773_v63, 0.0  ;;  %v824_v55 = vld [vmem:[%s1276_s0 + $0x90] sm:$0xff] }
  0x13   :  { %v91_v23 = vadd.f32 %v90_v29, %v89_v61  ;;  %v724_v29 = vld [vmem:[%s1276_s0 + $0x1d0] sm:$0xff]  ;;  %v729_v61 = vld [vmem:[%s1276_s0 + $0x1d8] sm:$0xff]  ;;  %1317 = vst [vmem:[#allocation23_spill] sm:$0xff] %v733_v25  ;;  %1321 = vst [vmem:[#allocation27_spill] sm:$0xff] %v760_v8  ;;  %v783_v8 = vsel %vm72_vm0, %v751_v10, 0.0 }
  0x14   :  { %v756_v25 = vld [vmem:[%s1276_s0 + $0x1f0] sm:$0xff]  ;;  %v764_v24 = vsel %vm72_vm0, %v724_v29, 0.0  ;;  %v768_v3 = vsel %vm72_vm0, %v729_v61, 0.0  ;;  %1324 = vst [vmem:[#allocation30_spill] sm:$0xff] %v773_v63  ;;  %1326 = vst [vmem:[#allocation32_spill] sm:$0xff] %v783_v8  ;;  %v829_v51 = vld [vmem:[%s1276_s0 + $0x98] sm:$0xff] }
  0x15   :  { %1320 = vst [vmem:[#allocation26_spill] sm:$0xff] %v756_v25  ;;  %v93_v35 = vadd.f32 %v92_v30, %v91_v23  ;;  %1322 = vst [vmem:[#allocation28_spill] sm:$0xff] %v764_v24  ;;  %v96_v30 = vsel %vm72_vm0, %v687_v13, 0.0  ;;  %v779_v23 = vsel %vm72_vm0, %v746_v11, 0.0  ;;  %v787_v24 = vsel %vm72_vm0, %v756_v25, 0.0  ;;  %v22_v8 = vld [vmem:[%s1276_s0 + $0x70] sm:$0xff] }
  0x16   :  { %1323 = vst [vmem:[#allocation29_spill] sm:$0xff] %v768_v3  ;;  %1325 = vst [vmem:[#allocation31_spill] sm:$0xff] %v779_v23  ;;  %v21_v3 = vld [vmem:[%s1276_s0 + $0x68] sm:$0xff]  ;;  %v834_v50 = vld [vmem:[%s1276_s0 + $0xa0] sm:$0xff]  ;;  %v110_v38 = vsel %vm72_vm0, %v829_v51, 0.0 }
  0x17   :  { %1327 = vst [vmem:[#allocation33_spill] sm:$0xff] %v787_v24  ;;  %v95_v62 = vadd.f32 %v520_v31, %v93_v35  ;;  %1328 = vst [vmem:[#allocation34_spill] sm:$0xff] %v795_v57  ;;  %v98_v23 = vsel %vm72_vm0, %v21_v3, 0.0  ;;  %v804_v24 = vld [vmem:[%s1276_s0 + $0x78] sm:$0xff]  ;;  %v809_v31 = vld [vmem:[%s1276_s0 + $0x80] sm:$0xff]  ;;  %v100_v57 = vsel %vm72_vm0, %v22_v8, 0.0 }
  0x18   :  { %1329 = vst [vmem:[#allocation35_spill] sm:$0xff] %v804_v24  ;;  %1330 = vst [vmem:[#allocation36_spill] sm:$0xff] %v809_v31  ;;  %v814_v35 = vld [vmem:[%s1276_s0 + $0x88] sm:$0xff]  ;;  %v850_v42 = vld [vmem:[%s1276_s0 + $0xb0] sm:$0xff]  ;;  %v112_v37 = vsel %vm72_vm0, %v834_v50, 0.0 }
  0x19   :  { %v97_v56 = vadd.f32 %v96_v30, %v95_v62  ;;  %1331 = vst [vmem:[#allocation37_spill] sm:$0xff] %v814_v35  ;;  %v206_v62 = vmul.f32 %v424_v0, %v424_v0  ;;  %v207_v30 = vmul.f32 %v429_v1, %v429_v1  ;;  %1332 = vst [vmem:[#allocation38_spill] sm:$0xff] %v824_v55  ;;  %v102_v0 = vsel %vm72_vm0, %v804_v24, 0.0  ;;  %v845_v43 = vld [vmem:[%s1276_s0 + $0xa8] sm:$0xff]  ;;  %v891_v63 = vld [vmem:[%s1276_s0 + $0xd8] sm:$0xff] }
  0x1a   :  { %1333 = vst [vmem:[#allocation39_spill] sm:$0xff] %v829_v51  ;;  %1334 = vst [vmem:[#allocation40_spill] sm:$0xff] %v834_v50  ;;  %v104_v1 = vsel %vm72_vm0, %v809_v31, 0.0  ;;  %v106_v44 = vsel %vm72_vm0, %v814_v35, 0.0  ;;  %v868_v35 = vld [vmem:[%s1276_s0 + $0xc0] sm:$0xff]  ;;  %v873_v31 = vld [vmem:[%s1276_s0 + $0xc8] sm:$0xff]  ;;  %v209_v24 = vmul.f32 %v445_v6, %v445_v6 }
  0x1b   :  { %v99_v49 = vadd.f32 %v98_v23, %v97_v56  ;;  %1335 = vst [vmem:[#allocation41_spill] sm:$0xff] %v845_v43  ;;  %1336 = vst [vmem:[#allocation42_spill] sm:$0xff] %v850_v42  ;;  %v855_v56 = vld [vmem:[%s1276_s0 + $0xb8] sm:$0xff]  ;;  %v108_v23 = vsel %vm72_vm0, %v824_v55, 0.0  ;;  %v878_v51 = vld [vmem:[%s1276_s0 + $0xd0] sm:$0xff]  ;;  %v114_v50 = vsel %vm72_vm0, %v845_v43, 0.0 }
  0x1c   :  { %1337 = vst [vmem:[#allocation43_spill] sm:$0xff] %v855_v56  ;;  %1338 = vst [vmem:[#allocation44_spill] sm:$0xff] %v868_v35  ;;  %v884_v2 = vsel %vm72_vm0, %v850_v42, 0.0  ;;  %v896_v25 = vld [vmem:[%s1276_s0 + $0xe0] sm:$0xff]  ;;  %v908_v6 = vsel %vm72_vm0, %v873_v31, 0.0  ;;  %v912_v42 = vsel %vm72_vm0, %v878_v51, 0.0 }
  0x1d   :  { %1339 = vst [vmem:[#allocation45_spill] sm:$0xff] %v873_v31  ;;  %1340 = vst [vmem:[#allocation46_spill] sm:$0xff] %v878_v51  ;;  %v101_v55 = vadd.f32 %v100_v57, %v99_v49  ;;  %v900_v49 = vsel %vm72_vm0, %v855_v56, 0.0  ;;  %v904_v57 = vsel %vm72_vm0, %v868_v35, 0.0  ;;  %v917_v43 = vld [vmem:[%s1276_s0 + $0xe8] sm:$0xff]  ;;  %v922_v56 = vld [vmem:[%s1276_s0 + $0xf0] sm:$0xff]  ;;  %v210_v51 = vmul.f32 %v452_v9, %v452_v9 }
  0x1e   :  { %1341 = vst [vmem:[#allocation47_spill] sm:$0xff] %v891_v63  ;;  %1342 = vst [vmem:[#allocation48_spill] sm:$0xff] %v896_v25  ;;  %v930_v31 = vsel %vm72_vm0, %v896_v25, 0.0  ;;  %v213_v25 = vmul.f32 %v471_v17, %v471_v17  ;;  %v214_v9 = vmul.f32 %v476_v18, %v476_v18  ;;  %v239_v17 = vmul.f32 %v502_v26, %v502_v26 }
  0x1f   :  { %1343 = vst [vmem:[#allocation49_spill] sm:$0xff] %v904_v57  ;;  %1344 = vst [vmem:[#allocation50_spill] sm:$0xff] %v908_v6  ;;  %v103_v35 = vadd.f32 %v102_v0, %v101_v55  ;;  %v926_v57 = vsel %vm72_vm0, %v891_v63, 0.0  ;;  %v940_v6 = vsel %vm72_vm0, %v922_v56, 0.0  ;;  %v211_v55 = vmul.f32 %v459_v12, %v459_v12 }
  0x20   :  { %1345 = vst [vmem:[#allocation51_spill] sm:$0xff] %v912_v42  ;;  %1346 = vst [vmem:[#allocation52_spill] sm:$0xff] %v917_v43  ;;  %v936_v42 = vsel %vm72_vm0, %v917_v43, 0.0  ;;  %v212_v0 = vmul.f32 %v466_v15, %v466_v15  ;;  %v215_v43 = vmul.f32 %v483_v20, %v483_v20  ;;  %v218_v12 = vmul.f32 %v687_v13, %v687_v13 }
  0x21   :  { %1347 = vst [vmem:[#allocation53_spill] sm:$0xff] %v922_v56  ;;  %1348 = vst [vmem:[#allocation54_spill] sm:$0xff] %v940_v6  ;;  %v105_v63 = vadd.f32 %v104_v1, %v103_v35  ;;  %v216_v56 = vmul.f32 %v488_v21, %v488_v21  ;;  %v217_v6 = vmul.f32 %v493_v22, %v493_v22 }
  0x22   :  { %v958_v15 = vmul.f32 %v21_v3, %v21_v3  ;;  %v960_v1 = vmul.f32 %v22_v8, %v22_v8  ;;  %v240_v18 = vmul.f32 %v507_v27, %v507_v27  ;;  %v241_v20 = vmul.f32 %v512_v28, %v512_v28 }
  0x23   :  { %v107_v35 = vadd.f32 %v106_v44, %v105_v63  ;;  %v242_v21 = vmul.f32 %v525_v32, %v525_v32  ;;  %v243_v22 = vmul.f32 %v530_v33, %v530_v33  ;;  %v244_v44 = vmul.f32 %v535_v34, %v535_v34 }
  0x24   :  { %v245_v3 = vmul.f32 %v552_v39, %v552_v39  ;;  %v246_v26 = vmul.f32 %v557_v40, %v557_v40  ;;  %v247_v27 = vmul.f32 %v562_v41, %v562_v41  ;;  %v248_v28 = vmul.f32 %v579_v45, %v579_v45 }
  0x25   :  { %v109_v63 = vadd.f32 %v108_v23, %v107_v35  ;;  %v249_v32 = vmul.f32 %v584_v46, %v584_v46  ;;  %v270_v33 = vsel %vm72_vm0, %v206_v62, 0.0  ;;  %v271_v34 = vsel %vm72_vm0, %v207_v30, 0.0 }
  0x26   :  { %v250_v39 = vmul.f32 %v589_v47, %v589_v47  ;;  %v272_v13 = vadd.f32 %v271_v34, %v270_v33  ;;  %v273_v40 = vsel %vm72_vm0, %v208_v36, 0.0  ;;  %v251_v41 = vmul.f32 %v606_v52, %v606_v52  ;;  %v1350_v33 = vld [vmem:[#allocation30_spill] sm:$0xff] }
  0x27   :  { %v111_v8 = vadd.f32 %v110_v38, %v109_v63  ;;  %v252_v45 = vmul.f32 %v611_v53, %v611_v53  ;;  %v253_v46 = vmul.f32 %v616_v54, %v616_v54  ;;  %v275_v62 = vsel %vm72_vm0, %v209_v24, 0.0  ;;  %v1349_v63 = vld [vmem:[#allocation26_spill] sm:$0xff] }
  0x28   :  { %v254_v38 = vmul.f32 %v633_v58, %v633_v58  ;;  %v255_v47 = vmul.f32 %v638_v59, %v638_v59  ;;  %v274_v30 = vadd.f32 %v273_v40, %v272_v13  ;;  %v256_v36 = vmul.f32 %v643_v60, %v643_v60  ;;  %v1351_v40 = vld [vmem:[#allocation49_spill] sm:$0xff] }
  0x29   :  { %v113_v23 = vadd.f32 %v112_v37, %v111_v8  ;;  %v257_v52 = vmul.f32 %v660_v4, %v660_v4  ;;  %v258_v53 = vmul.f32 %v665_v5, %v665_v5  ;;  %v277_v54 = vsel %vm72_vm0, %v210_v51, 0.0 }
  0x2a   :  { %v259_v37 = vmul.f32 %v670_v7, %v670_v7  ;;  %v260_v58 = vmul.f32 %v692_v14, %v692_v14  ;;  %v276_v59 = vadd.f32 %v275_v62, %v274_v30  ;;  %v261_v35 = vmul.f32 %v697_v16, %v697_v16 }
  0x2b   :  { %v115_v24 = vadd.f32 %v114_v50, %v113_v23  ;;  %v262_v60 = vmul.f32 %v702_v19, %v702_v19  ;;  %v263_v4 = vmul.f32 %v719_v48, %v719_v48  ;;  %v279_v5 = vsel %vm72_vm0, %v211_v55, 0.0 }
  0x2c   :  { %v264_v51 = vmul.f32 %v724_v29, %v724_v29  ;;  %v265_v7 = vmul.f32 %v729_v61, %v729_v61  ;;  %v278_v14 = vadd.f32 %v277_v54, %v276_v59  ;;  %v266_v16 = vmul.f32 %v746_v11, %v746_v11 }
  0x2d   :  { %v117_v50 = vadd.f32 %v884_v2, %v115_v24  ;;  %v267_v19 = vmul.f32 %v751_v10, %v751_v10  ;;  %v268_v48 = vmul.f32 %v1349_v63, %v1349_v63  ;;  %v281_v55 = vsel %vm72_vm0, %v212_v0, 0.0  ;;  %v1353_v24 = vld [vmem:[#allocation51_spill] sm:$0xff] }
  0x2e   :  { %v269_v29 = vmul.f32 %v1350_v33, %v1350_v33  ;;  %v280_v34 = vadd.f32 %v279_v5, %v278_v14  ;;  %v283_v61 = vsel %vm72_vm0, %v213_v25, 0.0  ;;  %v285_v8 = vsel %vm72_vm0, %v214_v9, 0.0  ;;  %v1355_v33 = vld [vmem:[#allocation54_spill] sm:$0xff] }
  0x2f   :  { %v119_v2 = vadd.f32 %v900_v49, %v117_v50  ;;  %v287_v11 = vsel %vm72_vm0, %v215_v43, 0.0  ;;  %v289_v13 = vsel %vm72_vm0, %v216_v56, 0.0  ;;  %v291_v10 = vsel %vm72_vm0, %v217_v6, 0.0  ;;  %v1352_v6 = vld [vmem:[#allocation50_spill] sm:$0xff] }
  0x30   :  { %v282_v23 = vadd.f32 %v281_v55, %v280_v34  ;;  %v293_v0 = vsel %vm72_vm0, %v218_v12, 0.0  ;;  %v1041_v49 = vsel %vm72_vm0, %v239_v17, 0.0  ;;  %v1044_v30 = vsel %vm72_vm0, %v240_v18, 0.0  ;;  %v1354_v55 = vld [vmem:[#allocation35_spill] sm:$0xff] }
  0x31   :  { %v121_v62 = vadd.f32 %v1351_v40, %v119_v2  ;;  %v1047_v25 = vsel %vm72_vm0, %v241_v20, 0.0  ;;  %v1050_v43 = vsel %vm72_vm0, %v242_v21, 0.0  ;;  %v1053_v56 = vsel %vm72_vm0, %v243_v22, 0.0 }
  0x32   :  { %v284_v54 = vadd.f32 %v283_v61, %v282_v23  ;;  %v1057_v12 = vsel %vm72_vm0, %v244_v44, 0.0  ;;  %v1060_v17 = vsel %vm72_vm0, %v245_v3, 0.0  ;;  %v1063_v18 = vsel %vm72_vm0, %v246_v26, 0.0  ;;  %v1356_v61 = vld [vmem:[#allocation36_spill] sm:$0xff] }
  0x33   :  { %v123_v9 = vadd.f32 %v1352_v6, %v121_v62  ;;  %v1066_v20 = vsel %vm72_vm0, %v247_v27, 0.0  ;;  %v1069_v21 = vsel %vm72_vm0, %v248_v28, 0.0  ;;  %v1072_v22 = vsel %vm72_vm0, %v249_v32, 0.0 }
  0x34   :  { %v286_v5 = vadd.f32 %v285_v8, %v284_v54  ;;  %v1076_v44 = vsel %vm72_vm0, %v250_v39, 0.0  ;;  %v1079_v3 = vsel %vm72_vm0, %v251_v41, 0.0  ;;  %v1082_v26 = vsel %vm72_vm0, %v252_v45, 0.0 }
  0x35   :  { %v125_v59 = vadd.f32 %v1353_v24, %v123_v9  ;;  %v1085_v27 = vsel %vm72_vm0, %v253_v46, 0.0  ;;  %v1088_v28 = vsel %vm72_vm0, %v254_v38, 0.0  ;;  %v1091_v32 = vsel %vm72_vm0, %v255_v47, 0.0  ;;  %v1358_v9 = vld [vmem:[#allocation38_spill] sm:$0xff] }
  0x36   :  { %v288_v14 = vadd.f32 %v287_v11, %v286_v5  ;;  %v1095_v39 = vsel %vm72_vm0, %v256_v36, 0.0  ;;  %v1098_v41 = vsel %vm72_vm0, %v257_v52, 0.0  ;;  %v1101_v45 = vsel %vm72_vm0, %v258_v53, 0.0  ;;  %v1359_v24 = vld [vmem:[#allocation2_spill] sm:$0xff] }
  0x37   :  { %v127_v50 = vadd.f32 %v926_v57, %v125_v59  ;;  %v1104_v46 = vsel %vm72_vm0, %v259_v37, 0.0  ;;  %v1107_v38 = vsel %vm72_vm0, %v260_v58, 0.0  ;;  %v1110_v47 = vsel %vm72_vm0, %v261_v35, 0.0 }
  0x38   :  { %v290_v63 = vadd.f32 %v289_v13, %v288_v14  ;;  %v1114_v36 = vsel %vm72_vm0, %v262_v60, 0.0  ;;  %v1117_v52 = vsel %vm72_vm0, %v263_v4, 0.0  ;;  %v1120_v53 = vsel %vm72_vm0, %v264_v51, 0.0 }
  0x39   :  { %v129_v57 = vadd.f32 %v930_v31, %v127_v50  ;;  %v1123_v37 = vsel %vm72_vm0, %v265_v7, 0.0  ;;  %v1126_v58 = vsel %vm72_vm0, %v266_v16, 0.0  ;;  %v1129_v35 = vsel %vm72_vm0, %v267_v19, 0.0  ;;  %v1134_v31 = vld [vmem:[%s1276_s0 + $0xf8] sm:$0xff]  ;;  %v1360_v50 = vld [vmem:[#allocation39_spill] sm:$0xff] }
  0x3a   :  { %v292_v4 = vadd.f32 %v291_v10, %v290_v63  ;;  %v1138_v51 = vsel %vm72_vm0, %v268_v48, 0.0  ;;  %v1141_v7 = vsel %vm72_vm0, %v269_v29, 0.0  ;;  %v134_v16 = vsel %vm72_vm0, %v1134_v31, 0.0 }
  0x3b   :  { %v131_v60 = vadd.f32 %v936_v42, %v129_v57  ;;  %v221_v19 = vmul.f32 %v1354_v55, %v1354_v55  ;;  %v295_v2 = vsel %vm72_vm0, %v958_v15, 0.0  ;;  %v1152_v42 = vld [vmem:[%s1276_s0 + $0x100] sm:$0xff]  ;;  %v222_v8 = vmul.f32 %v1356_v61, %v1356_v61  ;;  %v1357_v15 = vld [vmem:[#allocation37_spill] sm:$0xff]  ;;  %v1361_v57 = vld [vmem:[#allocation3_spill] sm:$0xff] }
  0x3c   :  { %v294_v34 = vadd.f32 %v293_v0, %v292_v4  ;;  %v136_v29 = vsel %vm72_vm0, %v1152_v42, 0.0  ;;  %v297_v11 = vsel %vm72_vm0, %v960_v1, 0.0  ;;  %v223_v40 = vmul.f32 %v1357_v15, %v1357_v15  ;;  %v1362_v4 = vld [vmem:[#allocation40_spill] sm:$0xff]  ;;  %v1365_v61 = vld [vmem:[#allocation5_spill] sm:$0xff] }
  0x3d   :  { %v133_v48 = vadd.f32 %v1355_v33, %v131_v60  ;;  %v299_v62 = vsel %vm72_vm0, %v221_v19, 0.0  ;;  %v224_v0 = vmul.f32 %v1358_v9, %v1358_v9  ;;  %v301_v54 = vsel %vm72_vm0, %v222_v8, 0.0  ;;  %v1363_v19 = vld [vmem:[#allocation4_spill] sm:$0xff] }
  0x3e   :  { %v296_v10 = vadd.f32 %v295_v2, %v294_v34  ;;  %v225_v1 = vmul.f32 %v1360_v50, %v1360_v50  ;;  %v303_v14 = vsel %vm72_vm0, %v223_v40, 0.0  ;;  %v1367_v40 = vld [vmem:[#allocation6_spill] sm:$0xff] }
  0x3f   :  { %v135_v13 = vadd.f32 %v134_v16, %v133_v48  ;;  %v226_v16 = vmul.f32 %v1362_v4, %v1362_v4  ;;  %v305_v55 = vsel %vm72_vm0, %v224_v0, 0.0  ;;  %v1364_v48 = vld [vmem:[#allocation41_spill] sm:$0xff] }
  0x40   :  { %v298_v6 = vadd.f32 %v297_v11, %v296_v10  ;;  %v227_v34 = vmul.f32 %v1364_v48, %v1364_v48 }
  0x41   :  { %v137_v23 = vadd.f32 %v136_v29, %v135_v13  ;;  %v307_v29 = vsel %vm72_vm0, %v225_v1, 0.0  ;;  %v1366_v13 = vld [vmem:[#allocation42_spill] sm:$0xff]  ;;  %v309_v15 = vsel %vm72_vm0, %v226_v16, 0.0 }
  0x42   :  { %v300_v5 = vadd.f32 %v299_v62, %v298_v6  ;;  %v228_v10 = vmul.f32 %v1366_v13, %v1366_v13  ;;  %v1368_v6 = vld [vmem:[#allocation43_spill] sm:$0xff]  ;;  %v311_v0 = vsel %vm72_vm0, %v227_v34, 0.0 }
  0x43   :  { %v139_v59 = vadd.f32 %v1359_v24, %v137_v23  ;;  %v229_v9 = vmul.f32 %v1368_v6, %v1368_v6 }
  0x44   :  { %v302_v60 = vadd.f32 %v301_v54, %v300_v5  ;;  %v1369_v54 = vld [vmem:[#allocation7_spill] sm:$0xff]  ;;  %v1370_v5 = vld [vmem:[#allocation44_spill] sm:$0xff]  ;;  %v313_v1 = vsel %vm72_vm0, %v228_v10, 0.0 }
  0x45   :  { %v141_v63 = vadd.f32 %v1361_v57, %v139_v59  ;;  %v230_v50 = vmul.f32 %v1370_v5, %v1370_v5  ;;  %v315_v16 = vsel %vm72_vm0, %v229_v9, 0.0 }
  0x46   :  { %v304_v33 = vadd.f32 %v303_v14, %v302_v60  ;;  %v1371_v14 = vld [vmem:[#allocation8_spill] sm:$0xff]  ;;  %v1372_v60 = vld [vmem:[#allocation45_spill] sm:$0xff] }
  0x47   :  { %v143_v2 = vadd.f32 %v1363_v19, %v141_v63  ;;  %v231_v4 = vmul.f32 %v1372_v60, %v1372_v60  ;;  %v317_v34 = vsel %vm72_vm0, %v230_v50, 0.0 }
  0x48   :  { %v306_v11 = vadd.f32 %v305_v55, %v304_v33  ;;  %v1373_v55 = vld [vmem:[#allocation9_spill] sm:$0xff]  ;;  %v1374_v33 = vld [vmem:[#allocation46_spill] sm:$0xff] }
  0x49   :  { %v145_v8 = vadd.f32 %v1365_v61, %v143_v2  ;;  %v232_v48 = vmul.f32 %v1374_v33, %v1374_v33  ;;  %v319_v10 = vsel %vm72_vm0, %v231_v4, 0.0 }
  0x4a   :  { %v308_v23 = vadd.f32 %v307_v29, %v306_v11  ;;  %v1375_v29 = vld [vmem:[#allocation10_spill] sm:$0xff]  ;;  %v1376_v11 = vld [vmem:[#allocation47_spill] sm:$0xff] }
  0x4b   :  { %v147_v62 = vadd.f32 %v1367_v40, %v145_v8  ;;  %v233_v13 = vmul.f32 %v1376_v11, %v1376_v11  ;;  %v321_v9 = vsel %vm72_vm0, %v232_v48, 0.0  ;;  %v1384_v48 = vld [vmem:[#allocation15_spill] sm:$0xff]  ;;  %v1385_v11 = vld [vmem:[#allocation16_spill] sm:$0xff] }
  0x4c   :  { %v310_v59 = vadd.f32 %v309_v15, %v308_v23  ;;  %v1377_v15 = vld [vmem:[#allocation11_spill] sm:$0xff]  ;;  %v1378_v23 = vld [vmem:[#allocation48_spill] sm:$0xff] }
  0x4d   :  { %v149_v24 = vadd.f32 %v1369_v54, %v147_v62  ;;  %v234_v6 = vmul.f32 %v1378_v23, %v1378_v23  ;;  %v323_v50 = vsel %vm72_vm0, %v233_v13, 0.0 }
  0x4e   :  { %v312_v63 = vadd.f32 %v311_v0, %v310_v59  ;;  %v1379_v0 = vld [vmem:[#allocation12_spill] sm:$0xff] }
  0x4f   :  { %v151_v57 = vadd.f32 %v1371_v14, %v149_v24  ;;  %v1380_v59 = vld [vmem:[#allocation52_spill] sm:$0xff]  ;;  %v325_v4 = vsel %vm72_vm0, %v234_v6, 0.0  ;;  %v1387_v6 = vld [vmem:[#allocation18_spill] sm:$0xff] }
  0x50   :  { %v314_v2 = vadd.f32 %v313_v1, %v312_v63  ;;  %v235_v5 = vmul.f32 %v1380_v59, %v1380_v59  ;;  %v1381_v1 = vld [vmem:[#allocation13_spill] sm:$0xff] }
  0x51   :  { %v153_v19 = vadd.f32 %v1373_v55, %v151_v57  ;;  %v1382_v63 = vld [vmem:[#allocation53_spill] sm:$0xff] }
  0x52   :  { %v316_v8 = vadd.f32 %v315_v16, %v314_v2  ;;  %v236_v60 = vmul.f32 %v1382_v63, %v1382_v63  ;;  %v1383_v16 = vld [vmem:[#allocation14_spill] sm:$0xff]  ;;  %v237_v2 = vmul.f32 %v1134_v31, %v1134_v31  ;;  %v327_v33 = vsel %vm72_vm0, %v235_v5, 0.0  ;;  %v1389_v5 = vld [vmem:[#allocation20_spill] sm:$0xff] }
  0x53   :  { %v155_v61 = vadd.f32 %v1375_v29, %v153_v19  ;;  %v1391_v63 = vld [vmem:[#allocation22_spill] sm:$0xff] }
  0x54   :  { %v318_v62 = vadd.f32 %v317_v34, %v316_v8  ;;  %v329_v8 = vsel %vm72_vm0, %v236_v60, 0.0 }
  0x55   :  { %v157_v40 = vadd.f32 %v1377_v15, %v155_v61  ;;  %v238_v61 = vmul.f32 %v1152_v42, %v1152_v42  ;;  %v331_v15 = vsel %vm72_vm0, %v237_v2, 0.0  ;;  %v1393_v2 = vld [vmem:[#allocation24_spill] sm:$0xff] }
  0x56   :  { %v320_v24 = vadd.f32 %v319_v10, %v318_v62 }
  0x57   :  { %v159_v54 = vadd.f32 %v1379_v0, %v157_v40  ;;  %v1386_v40 = vld [vmem:[#allocation17_spill] sm:$0xff]  ;;  %v333_v31 = vsel %vm72_vm0, %v238_v61, 0.0  ;;  %v1395_v61 = vld [vmem:[#allocation27_spill] sm:$0xff] }
  0x58   :  { %v322_v57 = vadd.f32 %v321_v9, %v320_v24 }
  0x59   :  { %v161_v14 = vadd.f32 %v1381_v1, %v159_v54  ;;  %v1388_v54 = vld [vmem:[#allocation19_spill] sm:$0xff]  ;;  %v1390_v1 = vld [vmem:[#allocation21_spill] sm:$0xff] }
  0x5a   :  { %v324_v19 = vadd.f32 %v323_v50, %v322_v57 }
  0x5b   :  { %v163_v55 = vadd.f32 %v1383_v16, %v161_v14  ;;  %v1392_v16 = vld [vmem:[#allocation23_spill] sm:$0xff] }
  0x5c   :  { %v326_v29 = vadd.f32 %v325_v4, %v324_v19 }
  0x5d   :  { %v165_v34 = vadd.f32 %v1384_v48, %v163_v55 }
  0x5e   :  { %v328_v10 = vadd.f32 %v327_v33, %v326_v29 }
  0x5f   :  { %v167_v13 = vadd.f32 %v1385_v11, %v165_v34  ;;  %v1394_v34 = vld [vmem:[#allocation25_spill] sm:$0xff]  ;;  %v1396_v11 = vld [vmem:[#allocation28_spill] sm:$0xff] }
  0x60   :  { %v330_v23 = vadd.f32 %v329_v8, %v328_v10  ;;  %v1397_v10 = vld [vmem:[#allocation29_spill] sm:$0xff] }
  0x61   :  { %v169_v62 = vadd.f32 %v1386_v40, %v167_v13  ;;  %v1398_v40 = vld [vmem:[#allocation31_spill] sm:$0xff] }
  0x62   :  { %v332_v0 = vadd.f32 %v331_v15, %v330_v23  ;;  %v1399_v23 = vld [vmem:[#allocation32_spill] sm:$0xff] }
  0x63   :  { %v171_v9 = vadd.f32 %v1387_v6, %v169_v62  ;;  %v1400_v6 = vld [vmem:[#allocation33_spill] sm:$0xff] }
  0x64   :  { %v334_v59 = vadd.f32 %v333_v31, %v332_v0  ;;  %v1401_v0 = vld [vmem:[#allocation34_spill] sm:$0xff] }
  0x65   :  { %v173_v24 = vadd.f32 %v1388_v54, %v171_v9 }
  0x66   :  { %v336_v50 = vadd.f32 %v1041_v49, %v334_v59 }
  0x67   :  { %v175_v42 = vadd.f32 %v1389_v5, %v173_v24 }
  0x68   :  { %v338_v57 = vadd.f32 %v1044_v30, %v336_v50 }
  0x69   :  { %v177_v14 = vadd.f32 %v1390_v1, %v175_v42 }
  0x6a   :  { %v340_v4 = vadd.f32 %v1047_v25, %v338_v57 }
  0x6b   :  { %v179_v60 = vadd.f32 %v1391_v63, %v177_v14 }
  0x6c   :  { %v342_v19 = vadd.f32 %v1050_v43, %v340_v4 }
  0x6d   :  { %v181_v55 = vadd.f32 %v1392_v16, %v179_v60 }
  0x6e   :  { %v344_v48 = vadd.f32 %v1053_v56, %v342_v19 }
  0x6f   :  { %v183_v33 = vadd.f32 %v1393_v2, %v181_v55 }
  0x70   :  { %v346_v49 = vadd.f32 %v1057_v12, %v344_v48 }
  0x71   :  { %v185_v29 = vadd.f32 %v1394_v34, %v183_v33 }
  0x72   :  { %v348_v30 = vadd.f32 %v1060_v17, %v346_v49 }
  0x73   :  { %v187_v8 = vadd.f32 %v1395_v61, %v185_v29 }
  0x74   :  { %v350_v25 = vadd.f32 %v1063_v18, %v348_v30 }
  0x75   :  { %v189_v13 = vadd.f32 %v1396_v11, %v187_v8 }
  0x76   :  { %v352_v43 = vadd.f32 %v1066_v20, %v350_v25 }
  0x77   :  { %v191_v15 = vadd.f32 %v1397_v10, %v189_v13 }
  0x78   :  { %v354_v56 = vadd.f32 %v1069_v21, %v352_v43 }
  0x79   :  { %v193_v62 = vadd.f32 %v1398_v40, %v191_v15 }
  0x7a   :  { %v356_v12 = vadd.f32 %v1072_v22, %v354_v56 }
  0x7b   :  { %v195_v31 = vadd.f32 %v1399_v23, %v193_v62 }
  0x7c   :  { %v358_v17 = vadd.f32 %v1076_v44, %v356_v12 }
  0x7d   :  { %v197_v9 = vadd.f32 %v1400_v6, %v195_v31 }
  0x7e   :  { %v360_v18 = vadd.f32 %v1079_v3, %v358_v17 }
  0x7f   :  { %v199_v54 = vadd.f32 %v1401_v0, %v197_v9 }
  0x80   :  { %v362_v24 = vadd.f32 %v1082_v26, %v360_v18 }
  0x81   :  { %v200_v1 = vrot.slane %v199_v54, 4 }
  0x82   :  { %v364_v20 = vadd.f32 %v1085_v27, %v362_v24 }
  0x84   :  { %v366_v59 = vadd.f32 %v1088_v28, %v364_v20 }
  0x86   :  { %v368_v21 = vadd.f32 %v1091_v32, %v366_v59 }
  0x88   :  { %v370_v5 = vadd.f32 %v1095_v39, %v368_v21  ;;  %v201_v39 = vadd.f32 %v200_v1, %v199_v54 }
  0x8a   :  { %v372_v22 = vadd.f32 %v1098_v41, %v370_v5  ;;  %v202_v14 = vrot.slane %v201_v39, 2 }
  0x8c   :  { %v374_v42 = vadd.f32 %v1101_v45, %v372_v22 }
  0x8e   :  { %v376_v44 = vadd.f32 %v1104_v46, %v374_v42 }
  0x90   :  { %v378_v50 = vadd.f32 %v1107_v38, %v376_v44 }
  0x92   :  { %v380_v3 = vadd.f32 %v1110_v47, %v378_v50  ;;  %v203_v47 = vadd.f32 %v202_v14, %v201_v39 }
  0x94   :  { %v382_v26 = vadd.f32 %v1114_v36, %v380_v3  ;;  %v204_v63 = vrot.slane %v203_v47, 1 }
  0x96   :  { %v384_v27 = vadd.f32 %v1117_v52, %v382_v26  ;;  %v205_v4 = vadd.f32 %v204_v63, %v203_v47 }
  0x98   :  { %v386_v28 = vadd.f32 %v1120_v53, %v384_v27 }
  0x9a   :  { %v388_v32 = vadd.f32 %v1123_v37, %v386_v28 }
  0x9c   :  { %v390_v41 = vadd.f32 %v1126_v58, %v388_v32 }
  0x9e   :  { %v392_v45 = vadd.f32 %v1129_v35, %v390_v41 }
  0xa0   :  { %v394_v46 = vadd.f32 %v1138_v51, %v392_v45 }
  0xa2   :  { %v396_v38 = vadd.f32 %v1141_v7, %v394_v46 }
  0xa4   :  { %v397_v57 = vrot.slane %v396_v38, 4 }
  0xa6   :  { %v398_v36 = vadd.f32 %v397_v57, %v396_v38 }
  0xa8   :  { %v399_v52 = vrot.slane %v398_v36, 2 }
  0xaa   :  { %v400_v60 = vadd.f32 %v399_v52, %v398_v36 }
  0xac   :  { %v401_v53 = vrot.slane %v400_v60, 1 }
  0xae   :  { %v402_v37 = vadd.f32 %v401_v53, %v400_v60 }
  0xb0   :  { %v404_v16 = vsel %vm403_vm1, %v205_v4, %v402_v37 }
  0xb1   :  { %406 = vst.msk [vmem:[%s1277_s1] sm:$0x3] %vm405_vm2, %v404_v16 }

// kernel: preact_bottleneck_forward.7
= control target key start
LH: loop header
LB: loop body
LE: loop exit
PB: predicated region body
PF: predicated region fallthrough
CT: control target
= control target key end

     0   :  { %vm507_vm0 = vcmask 1041408   ;;  %v111_v8 = vlaneseq  ;;  %vm410_vm1 = vcmask 31744   ;;  %vm800_vm2 = vcmask 130048   ;;  %s1858_s4 = inlined_call_operand.vmem [shape: bf16[4,16], index: 4, kind: input, shape index: {}]   ;;  %s1859_s1 = inlined_call_operand.vmem [shape: f32[2,4], index: 1, kind: input, shape index: {}]   ;;  %s1860_s2 = inlined_call_operand.vmem [shape: f32[1,4], index: 2, kind: input, shape index: {}]   ;;  %s1861_s0 = inlined_call_operand.vmem [shape: f32[512,4], index: 0, kind: input, shape index: {}]   ;;  %s1862_s3 = inlined_call_operand.vmem [shape: f32[1,4], index: 3, kind: input, shape index: {}]   ;;  %s1863_s5 = inlined_call_operand.vmem [shape: f32[512,16], index: 5, kind: input, shape index: {}]   ;;  %s1864_s6 = inlined_call_operand.vmem [shape: f32[512,16], index: 6, kind: output, shape index: {}]  }
   0x1   :  { %v345_v0 = vld [vmem:[%s1858_s4] sm:$0x3]  ;;  %v25_v14 = vld [vmem:[%s1861_s0 + $0x8] sm:$0xff]  ;;  %v26_v19 = vld [vmem:[%s1861_s0 + $0x10] sm:$0xff] }
   0x2   :  { %1003 = vmatprep.subr.msk.bf16.mxu0 %vm507_vm0, %v345_v0  ;;  %1004 = vmatprep.subr.msk.bf16.mxu1 %vm507_vm0, %v345_v0  ;;  %v509_v1 = vsel %vm507_vm0, %v345_v0, 0  ;;  %v88_v2 = vld [vmem:[%s1859_s1] sm:$0x3]  ;;  %v112_v9 = vshrl.u32 %v111_v8, 7  ;;  %v57_v18 = vld [vmem:[%s1861_s0 + $0x108] sm:$0xff]  ;;  %v27_v20 = vld [vmem:[%s1861_s0 + $0x18] sm:$0xff] }
   0x3   :  { %936 = vmatpush3.bf16.msra.mxu0 %v509_v1  ;;  %1002 = vmatpush3.bf16.msra.mxu1 %v509_v1  ;;  %v91_v3 = vmul.f32 0.001953125, %v88_v2  ;;  %v869_v10 = vld [vmem:[%s1860_s2] ss:$0 sm:$0xff]  ;;  %v58_v23 = vld [vmem:[%s1861_s0 + $0x110] sm:$0xff]  ;;  %v59_v24 = vld [vmem:[%s1861_s0 + $0x118] sm:$0xff] }
   0x4   :  { %v113_v11 = vsub.s32 1, %v112_v9  ;;  %v24_v13 = vld [vmem:[%s1861_s0] sm:$0xff]  ;;  %v182_v26 = vsub.s32 0, %v112_v9  ;;  %v29_v27 = vld [vmem:[%s1861_s0 + $0x28] sm:$0xff]  ;;  %v30_v34 = vld [vmem:[%s1861_s0 + $0x30] sm:$0xff] }
   0x5   :  { %v92_v4 = vmul.f32 %v91_v3, %v91_v3  ;;  %v56_v16 = vld [vmem:[%s1861_s0 + $0x100] sm:$0xff]  ;;  %v61_v29 = vld [vmem:[%s1861_s0 + $0x128] sm:$0xff]  ;;  %v31_v35 = vld [vmem:[%s1861_s0 + $0x38] sm:$0xff] }
   0x6   :  { %v90_v17 = vld [vmem:[%s1862_s3] sm:$0x1]  ;;  %v62_v36 = vld [vmem:[%s1861_s0 + $0x130] sm:$0xff]  ;;  %v63_v41 = vld [vmem:[%s1861_s0 + $0x138] sm:$0xff] }
   0x7   :  { %v94_v5 = vrot.slane %v92_v4, 7  ;;  %v28_v25 = vld [vmem:[%s1861_s0 + $0x20] sm:$0xff]  ;;  %v33_v43 = vld [vmem:[%s1861_s0 + $0x48] sm:$0xff]  ;;  %v34_v50 = vld [vmem:[%s1861_s0 + $0x50] sm:$0xff] }
   0x8   :  { %v60_v28 = vld [vmem:[%s1861_s0 + $0x120] sm:$0xff]  ;;  %v65_v49 = vld [vmem:[%s1861_s0 + $0x148] sm:$0xff] }
   0x9   :  { %v96_v6 = vsub.f32 %v91_v3, %v94_v5  ;;  %v32_v42 = vld [vmem:[%s1861_s0 + $0x40] sm:$0xff] }
   0xa   :  { %v64_v48 = vld [vmem:[%s1861_s0 + $0x140] sm:$0xff] }
   0xb   :  { %v97_v7 = vadd.f32 1e-05, %v96_v6 }
   0xd   :  { %1005 = vrsqrt.f32 %v97_v7 }
  0x17   :  { %v1006_v12 = vpop.eup %1005 }
  0x18   :  { %v105_v15 = vmul.f32 %v1006_v12, %v869_v10 }
  0x1a   :  { %v107_v21 = vrot.slane %v105_v15, 1  ;;  %v1072_v22 = vrot.slane %v105_v15, %v113_v11 }
  0x1c   :  { %v109_v30 = vmul.f32 %v107_v21, %v91_v3  ;;  %v115_v31 = vmul.f32 %v1072_v22, %v24_v13  ;;  %v116_v32 = vmul.f32 %v1072_v22, %v25_v14  ;;  %v147_v33 = vmul.f32 %v1072_v22, %v56_v16 }
  0x1d   :  { %v148_v37 = vmul.f32 %v1072_v22, %v57_v18  ;;  %v117_v38 = vmul.f32 %v1072_v22, %v26_v19  ;;  %v118_v39 = vmul.f32 %v1072_v22, %v27_v20  ;;  %v149_v40 = vmul.f32 %v1072_v22, %v58_v23 }
  0x1e   :  { %v110_v44 = vsub.f32 %v90_v17, %v109_v30  ;;  %v150_v45 = vmul.f32 %v1072_v22, %v59_v24  ;;  %v119_v46 = vmul.f32 %v1072_v22, %v28_v25  ;;  %v120_v47 = vmul.f32 %v1072_v22, %v29_v27 }
  0x1f   :  { %v151_v51 = vmul.f32 %v1072_v22, %v60_v28  ;;  %v152_v52 = vmul.f32 %v1072_v22, %v61_v29  ;;  %v121_v53 = vmul.f32 %v1072_v22, %v30_v34  ;;  %v122_v54 = vmul.f32 %v1072_v22, %v31_v35 }
  0x20   :  { %v1133_v55 = vrot.slane %v110_v44, %v182_v26  ;;  %v153_v56 = vmul.f32 %v1072_v22, %v62_v36  ;;  %v154_v57 = vmul.f32 %v1072_v22, %v63_v41  ;;  %v123_v58 = vmul.f32 %v1072_v22, %v32_v42  ;;  %v35_v36 = vld [vmem:[%s1861_s0 + $0x58] sm:$0xff]  ;;  %v66_v41 = vld [vmem:[%s1861_s0 + $0x150] sm:$0xff] }
  0x21   :  { %v124_v59 = vmul.f32 %v1072_v22, %v33_v43  ;;  %v155_v60 = vmul.f32 %v1072_v22, %v64_v48  ;;  %v156_v61 = vmul.f32 %v1072_v22, %v65_v49  ;;  %v125_v62 = vmul.f32 %v1072_v22, %v34_v50  ;;  %v67_v42 = vld [vmem:[%s1861_s0 + $0x158] sm:$0xff] }
  0x22   :  { %v185_v63 = vadd.f32 %v1133_v55, %v115_v31  ;;  %v186_v0 = vadd.f32 %v1133_v55, %v116_v32  ;;  %v217_v1 = vadd.f32 %v1133_v55, %v147_v33  ;;  %v218_v2 = vadd.f32 %v1133_v55, %v148_v37 }
  0x23   :  { %v187_v3 = vadd.f32 %v1133_v55, %v117_v38  ;;  %v188_v4 = vadd.f32 %v1133_v55, %v118_v39  ;;  %v219_v5 = vadd.f32 %v1133_v55, %v149_v40  ;;  %v220_v6 = vadd.f32 %v1133_v55, %v150_v45 }
  0x24   :  { %v249_v7 = vmax.f32 %v185_v63, 0.0  ;;  %v250_v8 = vmax.f32 %v186_v0, 0.0  ;;  %v281_v9 = vmax.f32 %v217_v1, 0.0  ;;  %v282_v10 = vmax.f32 %v218_v2, 0.0  ;;  %v38_v0 = vld [vmem:[%s1861_s0 + $0x70] sm:$0xff] }
  0x25   :  { %v251_v11 = vmax.f32 %v187_v3, 0.0  ;;  %v252_v12 = vmax.f32 %v188_v4, 0.0  ;;  %v283_v13 = vmax.f32 %v219_v5, 0.0  ;;  %v284_v14 = vmax.f32 %v220_v6, 0.0 }
  0x26   :  { %v313_v15 = vpack.c.bf16 %v250_v8, %v249_v7  ;;  %v329_v16 = vpack.c.bf16 %v282_v10, %v281_v9  ;;  %v189_v17 = vadd.f32 %v1133_v55, %v119_v46  ;;  %v190_v18 = vadd.f32 %v1133_v55, %v120_v47  ;;  %v36_v47 = vld [vmem:[%s1861_s0 + $0x60] sm:$0xff]  ;;  %v39_v9 = vld [vmem:[%s1861_s0 + $0x78] sm:$0xff] }
  0x27   :  { %v314_v19 = vpack.c.bf16 %v252_v12, %v251_v11  ;;  %v330_v20 = vpack.c.bf16 %v284_v14, %v283_v13  ;;  %v221_v21 = vadd.f32 %v1133_v55, %v151_v51  ;;  %v222_v23 = vadd.f32 %v1133_v55, %v152_v52  ;;  %v37_v52 = vld [vmem:[%s1861_s0 + $0x68] sm:$0xff]  ;;  %v70_v14 = vld [vmem:[%s1861_s0 + $0x170] sm:$0xff] }
  0x28   :  { %937 = vmatprep.mubr.msk.bf16.mxu0 %vm410_vm1, %v313_v15  ;;  %969 = vmatprep.mubr.msk.bf16.mxu1 %vm410_vm1, %v329_v16  ;;  %v253_v24 = vmax.f32 %v189_v17, 0.0  ;;  %v254_v25 = vmax.f32 %v190_v18, 0.0  ;;  %v191_v26 = vadd.f32 %v1133_v55, %v121_v53  ;;  %v192_v27 = vadd.f32 %v1133_v55, %v122_v54  ;;  %v71_v15 = vld [vmem:[%s1861_s0 + $0x178] sm:$0xff] }
  0x29   :  { %938 = vmatmul.mubr.msk.bf16.vlgmr.msra.gmra.mrb[0].mxu0 %vm410_vm1, %v314_v19  ;;  %970 = vmatmul.mubr.msk.bf16.vlgmr.msra.gmra.mrb[0].mxu1 %vm410_vm1, %v330_v20  ;;  %v285_v28 = vmax.f32 %v221_v21, 0.0  ;;  %v286_v29 = vmax.f32 %v222_v23, 0.0  ;;  %v223_v30 = vadd.f32 %v1133_v55, %v153_v56  ;;  %v224_v31 = vadd.f32 %v1133_v55, %v154_v57  ;;  %v40_v20 = vld [vmem:[%s1861_s0 + $0x80] sm:$0xff] }
  0x2a   :  { %v315_v32 = vpack.c.bf16 %v254_v25, %v253_v24  ;;  %v255_v33 = vmax.f32 %v191_v26, 0.0  ;;  %v256_v34 = vmax.f32 %v192_v27, 0.0  ;;  %v193_v35 = vadd.f32 %v1133_v55, %v123_v58  ;;  %v68_v58 = vld [vmem:[%s1861_s0 + $0x160] sm:$0xff]  ;;  %v41_v26 = vld [vmem:[%s1861_s0 + $0x88] sm:$0xff] }
  0x2b   :  { %v331_v37 = vpack.c.bf16 %v286_v29, %v285_v28  ;;  %v287_v38 = vmax.f32 %v223_v30, 0.0  ;;  %v288_v39 = vmax.f32 %v224_v31, 0.0  ;;  %v194_v40 = vadd.f32 %v1133_v55, %v124_v59  ;;  %v69_v59 = vld [vmem:[%s1861_s0 + $0x168] sm:$0xff]  ;;  %v72_v31 = vld [vmem:[%s1861_s0 + $0x180] sm:$0xff] }
  0x2c   :  { %941 = vmatprep.mubr.msk.bf16.mxu0 %vm410_vm1, %v315_v32  ;;  %v316_v43 = vpack.c.bf16 %v256_v34, %v255_v33  ;;  %v257_v44 = vmax.f32 %v193_v35, 0.0  ;;  %v225_v45 = vadd.f32 %v1133_v55, %v155_v60  ;;  %v226_v46 = vadd.f32 %v1133_v55, %v156_v61  ;;  %v73_v32 = vld [vmem:[%s1861_s0 + $0x188] sm:$0xff] }
  0x2d   :  { %973 = vmatprep.mubr.msk.bf16.mxu1 %vm410_vm1, %v331_v37  ;;  %v332_v48 = vpack.c.bf16 %v288_v39, %v287_v38  ;;  %v258_v49 = vmax.f32 %v194_v40, 0.0  ;;  %v126_v50 = vmul.f32 %v1072_v22, %v35_v36  ;;  %v195_v51 = vadd.f32 %v1133_v55, %v125_v62  ;;  %v42_v37 = vld [vmem:[%s1861_s0 + $0x90] sm:$0xff] }
  0x2e   :  { %v289_v53 = vmax.f32 %v225_v45, 0.0  ;;  %v290_v54 = vmax.f32 %v226_v46, 0.0  ;;  %v157_v56 = vmul.f32 %v1072_v22, %v66_v41  ;;  %v158_v57 = vmul.f32 %v1072_v22, %v67_v42  ;;  %v43_v46 = vld [vmem:[%s1861_s0 + $0x98] sm:$0xff] }
  0x2f   :  { %v317_v60 = vpack.c.bf16 %v258_v49, %v257_v44  ;;  %v196_v61 = vadd.f32 %v1133_v55, %v126_v50  ;;  %v259_v62 = vmax.f32 %v195_v51, 0.0  ;;  %v127_v63 = vmul.f32 %v1072_v22, %v36_v47  ;;  %v74_v51 = vld [vmem:[%s1861_s0 + $0x190] sm:$0xff] }
  0x30   :  { %v333_v1 = vpack.c.bf16 %v290_v54, %v289_v53  ;;  %v227_v2 = vadd.f32 %v1133_v55, %v157_v56  ;;  %v228_v3 = vadd.f32 %v1133_v55, %v158_v57  ;;  %v128_v4 = vmul.f32 %v1072_v22, %v37_v52  ;;  %v75_v52 = vld [vmem:[%s1861_s0 + $0x198] sm:$0xff] }
  0x31   :  { %942 = vmatmul.mubr.msk.bf16.gmra.mrb[4].mxu0 %vm410_vm1, %v316_v43  ;;  %974 = vmatmul.mubr.msk.bf16.gmra.mrb[4].mxu1 %vm410_vm1, %v332_v48  ;;  %v260_v5 = vmax.f32 %v196_v61, 0.0  ;;  %v197_v6 = vadd.f32 %v1133_v55, %v127_v63  ;;  %v159_v7 = vmul.f32 %v1072_v22, %v68_v58  ;;  %v160_v8 = vmul.f32 %v1072_v22, %v69_v59  ;;  %v44_v58 = vld [vmem:[%s1861_s0 + $0xa0] sm:$0xff]  ;;  %v45_v63 = vld [vmem:[%s1861_s0 + $0xa8] sm:$0xff] }
  0x32   :  { %945 = vmatprep.mubr.msk.bf16.mxu0 %vm410_vm1, %v317_v60  ;;  %977 = vmatprep.mubr.msk.bf16.mxu1 %vm410_vm1, %v333_v1  ;;  %v291_v10 = vmax.f32 %v227_v2, 0.0  ;;  %v292_v11 = vmax.f32 %v228_v3, 0.0  ;;  %v198_v12 = vadd.f32 %v1133_v55, %v128_v4  ;;  %v129_v13 = vmul.f32 %v1072_v22, %v38_v0  ;;  %v76_v4 = vld [vmem:[%s1861_s0 + $0x1a0] sm:$0xff] }
  0x33   :  { %v318_v16 = vpack.c.bf16 %v260_v5, %v259_v62  ;;  %v261_v17 = vmax.f32 %v197_v6, 0.0  ;;  %v229_v18 = vadd.f32 %v1133_v55, %v159_v7  ;;  %v230_v19 = vadd.f32 %v1133_v55, %v160_v8  ;;  %v77_v5 = vld [vmem:[%s1861_s0 + $0x1a8] sm:$0xff] }
  0x34   :  { %v334_v21 = vpack.c.bf16 %v292_v11, %v291_v10  ;;  %v262_v23 = vmax.f32 %v198_v12, 0.0  ;;  %v130_v24 = vmul.f32 %v1072_v22, %v39_v9  ;;  %v199_v25 = vadd.f32 %v1133_v55, %v129_v13  ;;  %v46_v10 = vld [vmem:[%s1861_s0 + $0xb0] sm:$0xff] }
  0x35   :  { %v293_v27 = vmax.f32 %v229_v18, 0.0  ;;  %v294_v28 = vmax.f32 %v230_v19, 0.0  ;;  %v161_v29 = vmul.f32 %v1072_v22, %v70_v14  ;;  %v162_v30 = vmul.f32 %v1072_v22, %v71_v15  ;;  %v47_v19 = vld [vmem:[%s1861_s0 + $0xb8] sm:$0xff] }
  0x36   :  { %v319_v33 = vpack.c.bf16 %v262_v23, %v261_v17  ;;  %v200_v34 = vadd.f32 %v1133_v55, %v130_v24  ;;  %v263_v35 = vmax.f32 %v199_v25, 0.0  ;;  %v131_v36 = vmul.f32 %v1072_v22, %v40_v20  ;;  %v78_v25 = vld [vmem:[%s1861_s0 + $0x1b0] sm:$0xff] }
  0x37   :  { %v335_v38 = vpack.c.bf16 %v294_v28, %v293_v27  ;;  %v231_v39 = vadd.f32 %v1133_v55, %v161_v29  ;;  %v232_v40 = vadd.f32 %v1133_v55, %v162_v30  ;;  %v132_v41 = vmul.f32 %v1072_v22, %v41_v26  ;;  %v79_v26 = vld [vmem:[%s1861_s0 + $0x1b8] sm:$0xff]  ;;  %v48_v30 = vld [vmem:[%s1861_s0 + $0xc0] sm:$0xff] }
  0x38   :  { %v264_v42 = vmax.f32 %v200_v34, 0.0  ;;  %v201_v43 = vadd.f32 %v1133_v55, %v131_v36  ;;  %v163_v44 = vmul.f32 %v1072_v22, %v72_v31  ;;  %v164_v45 = vmul.f32 %v1072_v22, %v73_v32  ;;  %v49_v34 = vld [vmem:[%s1861_s0 + $0xc8] sm:$0xff] }
  0x39   :  { %946 = vmatmul.mubr.msk.bf16.gmra.mrb[8].mxu0 %vm410_vm1, %v318_v16  ;;  %978 = vmatmul.mubr.msk.bf16.gmra.mrb[8].mxu1 %vm410_vm1, %v334_v21  ;;  %v295_v47 = vmax.f32 %v231_v39, 0.0  ;;  %v296_v48 = vmax.f32 %v232_v40, 0.0  ;;  %v202_v49 = vadd.f32 %v1133_v55, %v132_v41  ;;  %v133_v50 = vmul.f32 %v1072_v22, %v42_v37  ;;  %v80_v39 = vld [vmem:[%s1861_s0 + $0x1c0] sm:$0xff]  ;;  %v81_v40 = vld [vmem:[%s1861_s0 + $0x1c8] sm:$0xff] }
  0x3a   :  { %949 = vmatprep.mubr.msk.bf16.mxu0 %vm410_vm1, %v319_v33  ;;  %981 = vmatprep.mubr.msk.bf16.mxu1 %vm410_vm1, %v335_v38  ;;  %v320_v53 = vpack.c.bf16 %v264_v42, %v263_v35  ;;  %v265_v54 = vmax.f32 %v201_v43, 0.0  ;;  %v233_v56 = vadd.f32 %v1133_v55, %v163_v44  ;;  %v234_v57 = vadd.f32 %v1133_v55, %v164_v45  ;;  %v50_v45 = vld [vmem:[%s1861_s0 + $0xd0] sm:$0xff] }
  0x3b   :  { %v336_v59 = vpack.c.bf16 %v296_v48, %v295_v47  ;;  %v266_v60 = vmax.f32 %v202_v49, 0.0  ;;  %v134_v61 = vmul.f32 %v1072_v22, %v43_v46  ;;  %v203_v62 = vadd.f32 %v1133_v55, %v133_v50 }
  0x3c   :  { %v297_v0 = vmax.f32 %v233_v56, 0.0  ;;  %v298_v1 = vmax.f32 %v234_v57, 0.0  ;;  %v165_v2 = vmul.f32 %v1072_v22, %v74_v51  ;;  %v166_v3 = vmul.f32 %v1072_v22, %v75_v52 }
  0x3d   :  { %v321_v6 = vpack.c.bf16 %v266_v60, %v265_v54  ;;  %v204_v7 = vadd.f32 %v1133_v55, %v134_v61  ;;  %v267_v8 = vmax.f32 %v203_v62, 0.0  ;;  %v135_v9 = vmul.f32 %v1072_v22, %v44_v58  ;;  %v51_v54 = vld [vmem:[%s1861_s0 + $0xd8] sm:$0xff] }
  0x3e   :  { %v337_v11 = vpack.c.bf16 %v298_v1, %v297_v0  ;;  %v235_v12 = vadd.f32 %v1133_v55, %v165_v2  ;;  %v236_v13 = vadd.f32 %v1133_v55, %v166_v3  ;;  %v136_v14 = vmul.f32 %v1072_v22, %v45_v63  ;;  %v83_v60 = vld [vmem:[%s1861_s0 + $0x1d8] sm:$0xff]  ;;  %v52_v1 = vld [vmem:[%s1861_s0 + $0xe0] sm:$0xff] }
  0x3f   :  { %v268_v15 = vmax.f32 %v204_v7, 0.0  ;;  %v205_v16 = vadd.f32 %v1133_v55, %v135_v9  ;;  %v167_v17 = vmul.f32 %v1072_v22, %v76_v4  ;;  %v168_v18 = vmul.f32 %v1072_v22, %v77_v5 }
  0x40   :  { %v299_v20 = vmax.f32 %v235_v12, 0.0  ;;  %v300_v21 = vmax.f32 %v236_v13, 0.0  ;;  %v206_v23 = vadd.f32 %v1133_v55, %v136_v14  ;;  %v137_v24 = vmul.f32 %v1072_v22, %v46_v10  ;;  %v85_v12 = vld [vmem:[%s1861_s0 + $0x1e8] sm:$0xff] }
  0x41   :  { %950 = vmatmul.mubr.msk.bf16.gmra.mrb[12].mxu0 %vm410_vm1, %v320_v53  ;;  %982 = vmatmul.mubr.msk.bf16.gmra.mrb[12].mxu1 %vm410_vm1, %v336_v59  ;;  %v269_v27 = vmax.f32 %v205_v16, 0.0  ;;  %v237_v28 = vadd.f32 %v1133_v55, %v167_v17  ;;  %v238_v29 = vadd.f32 %v1133_v55, %v168_v18  ;;  %v138_v32 = vmul.f32 %v1072_v22, %v47_v19  ;;  %v82_v59 = vld [vmem:[%s1861_s0 + $0x1d0] sm:$0xff] }
  0x42   :  { %953 = vmatprep.mubr.msk.bf16.mxu0 %vm410_vm1, %v321_v6  ;;  %985 = vmatprep.mubr.msk.bf16.mxu1 %vm410_vm1, %v337_v11  ;;  %v270_v31 = vmax.f32 %v206_v23, 0.0  ;;  %v207_v33 = vadd.f32 %v1133_v55, %v137_v24  ;;  %v169_v37 = vmul.f32 %v1072_v22, %v78_v25  ;;  %v170_v38 = vmul.f32 %v1072_v22, %v79_v26  ;;  %v53_v6 = vld [vmem:[%s1861_s0 + $0xe8] sm:$0xff]  ;;  %v84_v11 = vld [vmem:[%s1861_s0 + $0x1e0] sm:$0xff]  ;;  %v54_v24 = vld [vmem:[%s1861_s0 + $0xf0] sm:$0xff] }
  0x43   :  { %v301_v35 = vmax.f32 %v237_v28, 0.0  ;;  %v302_v36 = vmax.f32 %v238_v29, 0.0  ;;  %v322_v41 = vpack.c.bf16 %v268_v15, %v267_v8  ;;  %v338_v42 = vpack.c.bf16 %v300_v21, %v299_v20  ;;  %v55_v29 = vld [vmem:[%s1861_s0 + $0xf8] sm:$0xff] }
  0x44   :  { %v208_v43 = vadd.f32 %v1133_v55, %v138_v32  ;;  %v139_v44 = vmul.f32 %v1072_v22, %v48_v30  ;;  %v323_v46 = vpack.c.bf16 %v270_v31, %v269_v27  ;;  %v239_v47 = vadd.f32 %v1133_v55, %v169_v37  ;;  %v86_v30 = vld [vmem:[%s1861_s0 + $0x1f0] sm:$0xff]  ;;  %v87_v31 = vld [vmem:[%s1861_s0 + $0x1f8] sm:$0xff] }
  0x45   :  { %v240_v48 = vadd.f32 %v1133_v55, %v170_v38  ;;  %v140_v49 = vmul.f32 %v1072_v22, %v49_v34  ;;  %v339_v50 = vpack.c.bf16 %v302_v36, %v301_v35  ;;  %v171_v52 = vmul.f32 %v1072_v22, %v80_v39 }
  0x46   :  { %v209_v51 = vadd.f32 %v1133_v55, %v139_v44  ;;  %v172_v53 = vmul.f32 %v1072_v22, %v81_v40  ;;  %v271_v56 = vmax.f32 %v207_v33, 0.0  ;;  %v141_v58 = vmul.f32 %v1072_v22, %v50_v45 }
  0x47   :  { %v210_v57 = vadd.f32 %v1133_v55, %v140_v49  ;;  %v272_v61 = vmax.f32 %v208_v43, 0.0  ;;  %v303_v62 = vmax.f32 %v239_v47, 0.0  ;;  %v241_v63 = vadd.f32 %v1133_v55, %v171_v52 }
  0x48   :  { %v242_v0 = vadd.f32 %v1133_v55, %v172_v53  ;;  %v304_v2 = vmax.f32 %v240_v48, 0.0  ;;  %v273_v3 = vmax.f32 %v209_v51, 0.0  ;;  %v142_v5 = vmul.f32 %v1072_v22, %v51_v54 }
  0x49   :  { %954 = vmatmul.mubr.msk.bf16.gmra.mrb[16].mxu0 %vm410_vm1, %v322_v41  ;;  %986 = vmatmul.mubr.msk.bf16.gmra.mrb[16].mxu1 %vm410_vm1, %v338_v42  ;;  %v274_v4 = vmax.f32 %v210_v57, 0.0  ;;  %v305_v7 = vmax.f32 %v241_v63, 0.0  ;;  %v173_v9 = vmul.f32 %v1072_v22, %v82_v59  ;;  %v174_v10 = vmul.f32 %v1072_v22, %v83_v60  ;;  %v380_v60 = vld [vmem:[%s1863_s5 + $0x110] sm:$0xff] }
  0x4a   :  { %957 = vmatprep.mubr.msk.bf16.mxu0 %vm410_vm1, %v323_v46  ;;  %989 = vmatprep.mubr.msk.bf16.mxu1 %vm410_vm1, %v339_v50  ;;  %v306_v8 = vmax.f32 %v242_v0, 0.0  ;;  %v211_v13 = vadd.f32 %v1133_v55, %v141_v58  ;;  %v143_v14 = vmul.f32 %v1072_v22, %v52_v1  ;;  %v212_v15 = vadd.f32 %v1133_v55, %v142_v5  ;;  %v349_v1 = vld [vmem:[%s1863_s5 + $0x18] sm:$0xff] }
  0x4b   :  { %v243_v16 = vadd.f32 %v1133_v55, %v173_v9  ;;  %v244_v17 = vadd.f32 %v1133_v55, %v174_v10  ;;  %v144_v18 = vmul.f32 %v1072_v22, %v53_v6  ;;  %v324_v19 = vpack.c.bf16 %v272_v61, %v271_v56  ;;  %v346_v61 = vld [vmem:[%s1863_s5] sm:$0xff] }
  0x4c   :  { %v340_v20 = vpack.c.bf16 %v304_v2, %v303_v62  ;;  %v175_v21 = vmul.f32 %v1072_v22, %v84_v11  ;;  %v176_v23 = vmul.f32 %v1072_v22, %v85_v12  ;;  %v325_v25 = vpack.c.bf16 %v274_v4, %v273_v3  ;;  %v378_v62 = vld [vmem:[%s1863_s5 + $0x100] sm:$0xff]  ;;  %v381_v2 = vld [vmem:[%s1863_s5 + $0x118] sm:$0xff] }
  0x4d   :  { %v341_v26 = vpack.c.bf16 %v306_v8, %v305_v7  ;;  %v213_v27 = vadd.f32 %v1133_v55, %v143_v14  ;;  %v214_v28 = vadd.f32 %v1133_v55, %v144_v18  ;;  %v275_v32 = vmax.f32 %v211_v13, 0.0  ;;  %v347_v7 = vld [vmem:[%s1863_s5 + $0x8] sm:$0xff] }
  0x4e   :  { %v245_v33 = vadd.f32 %v1133_v55, %v175_v21  ;;  %v246_v34 = vadd.f32 %v1133_v55, %v176_v23  ;;  %v276_v35 = vmax.f32 %v212_v15, 0.0  ;;  %v307_v36 = vmax.f32 %v243_v16, 0.0  ;;  %v379_v8 = vld [vmem:[%s1863_s5 + $0x108] sm:$0xff]  ;;  %v350_v21 = vld [vmem:[%s1863_s5 + $0x20] sm:$0xff] }
  0x4f   :  { %v308_v37 = vmax.f32 %v244_v17, 0.0  ;;  %v145_v38 = vmul.f32 %v1072_v22, %v54_v24  ;;  %v146_v39 = vmul.f32 %v1072_v22, %v55_v29  ;;  %v177_v40 = vmul.f32 %v1072_v22, %v86_v30  ;;  %v382_v23 = vld [vmem:[%s1863_s5 + $0x120] sm:$0xff] }
  0x50   :  { %v178_v41 = vmul.f32 %v1072_v22, %v87_v31  ;;  %v277_v42 = vmax.f32 %v213_v27, 0.0  ;;  %v278_v43 = vmax.f32 %v214_v28, 0.0  ;;  %v309_v44 = vmax.f32 %v245_v33, 0.0  ;;  %v385_v27 = vld [vmem:[%s1863_s5 + $0x138] sm:$0xff]  ;;  %v383_v33 = vld [vmem:[%s1863_s5 + $0x128] sm:$0xff] }
  0x51   :  { %958 = vmatmul.mubr.msk.bf16.gmra.mrb[20].mxu0 %vm410_vm1, %v324_v19  ;;  %990 = vmatmul.mubr.msk.bf16.gmra.mrb[20].mxu1 %vm410_vm1, %v340_v20  ;;  %v310_v45 = vmax.f32 %v246_v34, 0.0  ;;  %v326_v46 = vpack.c.bf16 %v276_v35, %v275_v32  ;;  %v342_v47 = vpack.c.bf16 %v308_v37, %v307_v36  ;;  %v215_v48 = vadd.f32 %v1133_v55, %v145_v38  ;;  %v352_v19 = vld [vmem:[%s1863_s5 + $0x30] sm:$0xff]  ;;  %v351_v32 = vld [vmem:[%s1863_s5 + $0x28] sm:$0xff] }
  0x52   :  { %961 = vmatprep.mubr.msk.bf16.mxu0 %vm410_vm1, %v325_v25  ;;  %993 = vmatprep.mubr.msk.bf16.mxu1 %vm410_vm1, %v341_v26  ;;  %v216_v49 = vadd.f32 %v1133_v55, %v146_v39  ;;  %v247_v50 = vadd.f32 %v1133_v55, %v177_v40  ;;  %v248_v51 = vadd.f32 %v1133_v55, %v178_v41  ;;  %v348_v55 = vld [vmem:[%s1863_s5 + $0x10] sm:$0xff]  ;;  %v353_v26 = vld [vmem:[%s1863_s5 + $0x38] sm:$0xff] }
  0x53   :  { %v327_v52 = vpack.c.bf16 %v278_v43, %v277_v42  ;;  %v343_v22 = vpack.c.bf16 %v310_v45, %v309_v44  ;;  %v279_v53 = vmax.f32 %v215_v48, 0.0  ;;  %v384_v20 = vld [vmem:[%s1863_s5 + $0x130] sm:$0xff] }
  0x54   :  { %v280_v54 = vmax.f32 %v216_v49, 0.0  ;;  %v311_v56 = vmax.f32 %v247_v50, 0.0  ;;  %v312_v57 = vmax.f32 %v248_v51, 0.0  ;;  %v356_v44 = vld [vmem:[%s1863_s5 + $0x50] sm:$0xff]  ;;  %v357_v50 = vld [vmem:[%s1863_s5 + $0x58] sm:$0xff] }
  0x55   :  { %v388_v45 = vld [vmem:[%s1863_s5 + $0x150] sm:$0xff]  ;;  %v389_v51 = vld [vmem:[%s1863_s5 + $0x158] sm:$0xff] }
  0x56   :  { %v328_v58 = vpack.c.bf16 %v280_v54, %v279_v53  ;;  %v344_v59 = vpack.c.bf16 %v312_v57, %v311_v56  ;;  %v355_v56 = vld [vmem:[%s1863_s5 + $0x48] sm:$0xff] }
  0x57   :  { %v387_v57 = vld [vmem:[%s1863_s5 + $0x148] sm:$0xff] }
  0x59   :  { %962 = vmatmul.mubr.msk.bf16.gmra.mrb[24].mxu0 %vm410_vm1, %v326_v46  ;;  %994 = vmatmul.mubr.msk.bf16.gmra.mrb[24].mxu1 %vm410_vm1, %v342_v47  ;;  %v354_v46 = vld [vmem:[%s1863_s5 + $0x40] sm:$0xff] }
  0x5a   :  { %965 = vmatprep.mubr.msk.bf16.mxu0 %vm410_vm1, %v327_v52  ;;  %997 = vmatprep.mubr.msk.bf16.mxu1 %vm410_vm1, %v343_v22  ;;  %v386_v47 = vld [vmem:[%s1863_s5 + $0x140] sm:$0xff] }
  0x61   :  { %966 = vmatmul.mubr.msk.bf16.gmra.mrb[28].mxu0 %vm410_vm1, %v328_v58  ;;  %998 = vmatmul.mubr.msk.bf16.gmra.mrb[28].mxu1 %vm410_vm1, %v344_v59 }
  0xfc   :  { %v939_v63 = vpop.f32.mrb[0].mxu0  ;;  %v971_v0 = vpop.f32.mrb[0].mxu1 }
  0xfd   :  { %v554_v3 = vadd.f32 %v939_v63, %v348_v55  ;;  %v682_v4 = vadd.f32 %v971_v0, %v380_v60  ;;  %v545_v5 = vpop.f32.mrb[1].mxu0  ;;  %v673_v6 = vpop.f32.mrb[1].mxu1 }
  0xfe   :  { %v546_v9 = vadd.f32 %v545_v5, %v346_v61  ;;  %v674_v10 = vadd.f32 %v673_v6, %v378_v62  ;;  %v940_v11 = vpop.f32.mrb[2].mxu0  ;;  %v972_v12 = vpop.f32.mrb[2].mxu1  ;;  %v358_v5 = vld [vmem:[%s1863_s5 + $0x60] sm:$0xff] }
  0xff   :  { %803 = vst.msk [vmem:[%s1864_s6 + $0x10] sm:$0xff] %vm800_vm2, %v554_v3  ;;  %835 = vst.msk [vmem:[%s1864_s6 + $0x110] sm:$0xff] %vm800_vm2, %v682_v4  ;;  %v557_v13 = vadd.f32 %v940_v11, %v349_v1  ;;  %v685_v14 = vadd.f32 %v972_v12, %v381_v2  ;;  %v548_v15 = vpop.f32.mrb[3].mxu0  ;;  %v676_v16 = vpop.f32.mrb[3].mxu1  ;;  %v360_v3 = vld [vmem:[%s1863_s5 + $0x70] sm:$0xff]  ;;  %v390_v6 = vld [vmem:[%s1863_s5 + $0x160] sm:$0xff] }
 0x100   :  { %801 = vst.msk [vmem:[%s1864_s6] sm:$0xff] %vm800_vm2, %v546_v9  ;;  %833 = vst.msk [vmem:[%s1864_s6 + $0x100] sm:$0xff] %vm800_vm2, %v674_v10  ;;  %v549_v17 = vadd.f32 %v548_v15, %v347_v7  ;;  %v677_v18 = vadd.f32 %v676_v16, %v379_v8  ;;  %v392_v4 = vld [vmem:[%s1863_s5 + $0x170] sm:$0xff]  ;;  %v361_v9 = vld [vmem:[%s1863_s5 + $0x78] sm:$0xff] }
 0x101   :  { %804 = vst.msk [vmem:[%s1864_s6 + $0x18] sm:$0xff] %vm800_vm2, %v557_v13  ;;  %836 = vst.msk [vmem:[%s1864_s6 + $0x118] sm:$0xff] %vm800_vm2, %v685_v14  ;;  %v393_v10 = vld [vmem:[%s1863_s5 + $0x178] sm:$0xff]  ;;  %v359_v15 = vld [vmem:[%s1863_s5 + $0x68] sm:$0xff] }
 0x102   :  { %802 = vst.msk [vmem:[%s1864_s6 + $0x8] sm:$0xff] %vm800_vm2, %v549_v17  ;;  %834 = vst.msk [vmem:[%s1864_s6 + $0x108] sm:$0xff] %vm800_vm2, %v677_v18  ;;  %v391_v16 = vld [vmem:[%s1863_s5 + $0x168] sm:$0xff] }
 0x104   :  { %v943_v24 = vpop.f32.mrb[4].mxu0  ;;  %v975_v25 = vpop.f32.mrb[4].mxu1 }
 0x105   :  { %v570_v28 = vadd.f32 %v943_v24, %v352_v19  ;;  %v698_v29 = vadd.f32 %v975_v25, %v384_v20  ;;  %v561_v30 = vpop.f32.mrb[5].mxu0  ;;  %v689_v31 = vpop.f32.mrb[5].mxu1 }
 0x106   :  { %v562_v34 = vadd.f32 %v561_v30, %v350_v21  ;;  %v690_v35 = vadd.f32 %v689_v31, %v382_v23  ;;  %v944_v36 = vpop.f32.mrb[6].mxu0  ;;  %v976_v37 = vpop.f32.mrb[6].mxu1  ;;  %v362_v30 = vld [vmem:[%s1863_s5 + $0x80] sm:$0xff] }
 0x107   :  { %807 = vst.msk [vmem:[%s1864_s6 + $0x30] sm:$0xff] %vm800_vm2, %v570_v28  ;;  %839 = vst.msk [vmem:[%s1864_s6 + $0x130] sm:$0xff] %vm800_vm2, %v698_v29  ;;  %v573_v38 = vadd.f32 %v944_v36, %v353_v26  ;;  %v701_v39 = vadd.f32 %v976_v37, %v385_v27  ;;  %v564_v40 = vpop.f32.mrb[7].mxu0  ;;  %v692_v41 = vpop.f32.mrb[7].mxu1  ;;  %v364_v28 = vld [vmem:[%s1863_s5 + $0x90] sm:$0xff]  ;;  %v394_v31 = vld [vmem:[%s1863_s5 + $0x180] sm:$0xff] }
 0x108   :  { %805 = vst.msk [vmem:[%s1864_s6 + $0x20] sm:$0xff] %vm800_vm2, %v562_v34  ;;  %837 = vst.msk [vmem:[%s1864_s6 + $0x120] sm:$0xff] %vm800_vm2, %v690_v35  ;;  %v565_v42 = vadd.f32 %v564_v40, %v351_v32  ;;  %v693_v43 = vadd.f32 %v692_v41, %v383_v33  ;;  %v396_v29 = vld [vmem:[%s1863_s5 + $0x190] sm:$0xff]  ;;  %v365_v34 = vld [vmem:[%s1863_s5 + $0x98] sm:$0xff] }
 0x109   :  { %808 = vst.msk [vmem:[%s1864_s6 + $0x38] sm:$0xff] %vm800_vm2, %v573_v38  ;;  %840 = vst.msk [vmem:[%s1864_s6 + $0x138] sm:$0xff] %vm800_vm2, %v701_v39  ;;  %v397_v35 = vld [vmem:[%s1863_s5 + $0x198] sm:$0xff]  ;;  %v363_v40 = vld [vmem:[%s1863_s5 + $0x88] sm:$0xff] }
 0x10a   :  { %806 = vst.msk [vmem:[%s1864_s6 + $0x28] sm:$0xff] %vm800_vm2, %v565_v42  ;;  %838 = vst.msk [vmem:[%s1864_s6 + $0x128] sm:$0xff] %vm800_vm2, %v693_v43  ;;  %v395_v41 = vld [vmem:[%s1863_s5 + $0x188] sm:$0xff] }
 0x10c   :  { %v947_v48 = vpop.f32.mrb[8].mxu0  ;;  %v979_v49 = vpop.f32.mrb[8].mxu1 }
 0x10d   :  { %v586_v52 = vadd.f32 %v947_v48, %v356_v44  ;;  %v714_v22 = vadd.f32 %v979_v49, %v388_v45  ;;  %v577_v53 = vpop.f32.mrb[9].mxu0  ;;  %v705_v54 = vpop.f32.mrb[9].mxu1 }
 0x10e   :  { %v578_v58 = vadd.f32 %v577_v53, %v354_v46  ;;  %v706_v59 = vadd.f32 %v705_v54, %v386_v47  ;;  %v948_v55 = vpop.f32.mrb[10].mxu0  ;;  %v980_v60 = vpop.f32.mrb[10].mxu1  ;;  %v366_v53 = vld [vmem:[%s1863_s5 + $0xa0] sm:$0xff] }
 0x10f   :  { %811 = vst.msk [vmem:[%s1864_s6 + $0x50] sm:$0xff] %vm800_vm2, %v586_v52  ;;  %843 = vst.msk [vmem:[%s1864_s6 + $0x150] sm:$0xff] %vm800_vm2, %v714_v22  ;;  %v589_v61 = vadd.f32 %v948_v55, %v357_v50  ;;  %v717_v62 = vadd.f32 %v980_v60, %v389_v51  ;;  %v580_v63 = vpop.f32.mrb[11].mxu0  ;;  %v708_v0 = vpop.f32.mrb[11].mxu1  ;;  %v368_v52 = vld [vmem:[%s1863_s5 + $0xb0] sm:$0xff]  ;;  %v398_v54 = vld [vmem:[%s1863_s5 + $0x1a0] sm:$0xff] }
 0x110   :  { %809 = vst.msk [vmem:[%s1864_s6 + $0x40] sm:$0xff] %vm800_vm2, %v578_v58  ;;  %841 = vst.msk [vmem:[%s1864_s6 + $0x140] sm:$0xff] %vm800_vm2, %v706_v59  ;;  %v581_v1 = vadd.f32 %v580_v63, %v355_v56  ;;  %v709_v2 = vadd.f32 %v708_v0, %v387_v57  ;;  %v400_v22 = vld [vmem:[%s1863_s5 + $0x1b0] sm:$0xff]  ;;  %v369_v58 = vld [vmem:[%s1863_s5 + $0xb8] sm:$0xff] }
 0x111   :  { %812 = vst.msk [vmem:[%s1864_s6 + $0x58] sm:$0xff] %vm800_vm2, %v589_v61  ;;  %844 = vst.msk [vmem:[%s1864_s6 + $0x158] sm:$0xff] %vm800_vm2, %v717_v62  ;;  %v401_v59 = vld [vmem:[%s1863_s5 + $0x1b8] sm:$0xff]  ;;  %v367_v63 = vld [vmem:[%s1863_s5 + $0xa8] sm:$0xff] }
 0x112   :  { %810 = vst.msk [vmem:[%s1864_s6 + $0x48] sm:$0xff] %vm800_vm2, %v581_v1  ;;  %842 = vst.msk [vmem:[%s1864_s6 + $0x148] sm:$0xff] %vm800_vm2, %v709_v2  ;;  %v399_v0 = vld [vmem:[%s1863_s5 + $0x1a8] sm:$0xff] }
 0x114   :  { %v951_v7 = vpop.f32.mrb[12].mxu0  ;;  %v983_v8 = vpop.f32.mrb[12].mxu1 }
 0x115   :  { %v602_v11 = vadd.f32 %v951_v7, %v360_v3  ;;  %v730_v12 = vadd.f32 %v983_v8, %v392_v4  ;;  %v593_v13 = vpop.f32.mrb[13].mxu0  ;;  %v721_v14 = vpop.f32.mrb[13].mxu1 }
 0x116   :  { %v594_v17 = vadd.f32 %v593_v13, %v358_v5  ;;  %v722_v18 = vadd.f32 %v721_v14, %v390_v6  ;;  %v952_v19 = vpop.f32.mrb[14].mxu0  ;;  %v984_v20 = vpop.f32.mrb[14].mxu1  ;;  %v370_v13 = vld [vmem:[%s1863_s5 + $0xc0] sm:$0xff] }
 0x117   :  { %815 = vst.msk [vmem:[%s1864_s6 + $0x70] sm:$0xff] %vm800_vm2, %v602_v11  ;;  %847 = vst.msk [vmem:[%s1864_s6 + $0x170] sm:$0xff] %vm800_vm2, %v730_v12  ;;  %v605_v21 = vadd.f32 %v952_v19, %v361_v9  ;;  %v733_v23 = vadd.f32 %v984_v20, %v393_v10  ;;  %v596_v24 = vpop.f32.mrb[15].mxu0  ;;  %v724_v25 = vpop.f32.mrb[15].mxu1  ;;  %v372_v11 = vld [vmem:[%s1863_s5 + $0xd0] sm:$0xff]  ;;  %v402_v14 = vld [vmem:[%s1863_s5 + $0x1c0] sm:$0xff] }
 0x118   :  { %813 = vst.msk [vmem:[%s1864_s6 + $0x60] sm:$0xff] %vm800_vm2, %v594_v17  ;;  %845 = vst.msk [vmem:[%s1864_s6 + $0x160] sm:$0xff] %vm800_vm2, %v722_v18  ;;  %v597_v26 = vadd.f32 %v596_v24, %v359_v15  ;;  %v725_v27 = vadd.f32 %v724_v25, %v391_v16  ;;  %v404_v12 = vld [vmem:[%s1863_s5 + $0x1d0] sm:$0xff]  ;;  %v373_v17 = vld [vmem:[%s1863_s5 + $0xd8] sm:$0xff] }
 0x119   :  { %816 = vst.msk [vmem:[%s1864_s6 + $0x78] sm:$0xff] %vm800_vm2, %v605_v21  ;;  %848 = vst.msk [vmem:[%s1864_s6 + $0x178] sm:$0xff] %vm800_vm2, %v733_v23  ;;  %v405_v18 = vld [vmem:[%s1863_s5 + $0x1d8] sm:$0xff]  ;;  %v371_v24 = vld [vmem:[%s1863_s5 + $0xc8] sm:$0xff] }
 0x11a   :  { %814 = vst.msk [vmem:[%s1864_s6 + $0x68] sm:$0xff] %vm800_vm2, %v597_v26  ;;  %846 = vst.msk [vmem:[%s1864_s6 + $0x168] sm:$0xff] %vm800_vm2, %v725_v27  ;;  %v403_v25 = vld [vmem:[%s1863_s5 + $0x1c8] sm:$0xff] }
 0x11c   :  { %v955_v32 = vpop.f32.mrb[16].mxu0  ;;  %v987_v33 = vpop.f32.mrb[16].mxu1 }
 0x11d   :  { %v618_v36 = vadd.f32 %v955_v32, %v364_v28  ;;  %v746_v37 = vadd.f32 %v987_v33, %v396_v29  ;;  %v609_v38 = vpop.f32.mrb[17].mxu0  ;;  %v737_v39 = vpop.f32.mrb[17].mxu1 }
 0x11e   :  { %v610_v42 = vadd.f32 %v609_v38, %v362_v30  ;;  %v738_v43 = vadd.f32 %v737_v39, %v394_v31  ;;  %v956_v44 = vpop.f32.mrb[18].mxu0  ;;  %v988_v45 = vpop.f32.mrb[18].mxu1  ;;  %v374_v38 = vld [vmem:[%s1863_s5 + $0xe0] sm:$0xff] }
 0x11f   :  { %819 = vst.msk [vmem:[%s1864_s6 + $0x90] sm:$0xff] %vm800_vm2, %v618_v36  ;;  %851 = vst.msk [vmem:[%s1864_s6 + $0x190] sm:$0xff] %vm800_vm2, %v746_v37  ;;  %v621_v46 = vadd.f32 %v956_v44, %v365_v34  ;;  %v749_v47 = vadd.f32 %v988_v45, %v397_v35  ;;  %v612_v48 = vpop.f32.mrb[19].mxu0  ;;  %v740_v49 = vpop.f32.mrb[19].mxu1  ;;  %v376_v36 = vld [vmem:[%s1863_s5 + $0xf0] sm:$0xff]  ;;  %v406_v39 = vld [vmem:[%s1863_s5 + $0x1e0] sm:$0xff] }
 0x120   :  { %817 = vst.msk [vmem:[%s1864_s6 + $0x80] sm:$0xff] %vm800_vm2, %v610_v42  ;;  %849 = vst.msk [vmem:[%s1864_s6 + $0x180] sm:$0xff] %vm800_vm2, %v738_v43  ;;  %v613_v50 = vadd.f32 %v612_v48, %v363_v40  ;;  %v741_v51 = vadd.f32 %v740_v49, %v395_v41  ;;  %v408_v37 = vld [vmem:[%s1863_s5 + $0x1f0] sm:$0xff]  ;;  %v377_v42 = vld [vmem:[%s1863_s5 + $0xf8] sm:$0xff] }
 0x121   :  { %820 = vst.msk [vmem:[%s1864_s6 + $0x98] sm:$0xff] %vm800_vm2, %v621_v46  ;;  %852 = vst.msk [vmem:[%s1864_s6 + $0x198] sm:$0xff] %vm800_vm2, %v749_v47  ;;  %v409_v43 = vld [vmem:[%s1863_s5 + $0x1f8] sm:$0xff]  ;;  %v375_v48 = vld [vmem:[%s1863_s5 + $0xe8] sm:$0xff] }
 0x122   :  { %818 = vst.msk [vmem:[%s1864_s6 + $0x88] sm:$0xff] %vm800_vm2, %v613_v50  ;;  %850 = vst.msk [vmem:[%s1864_s6 + $0x188] sm:$0xff] %vm800_vm2, %v741_v51  ;;  %v407_v49 = vld [vmem:[%s1863_s5 + $0x1e8] sm:$0xff] }
 0x124   :  { %v959_v56 = vpop.f32.mrb[20].mxu0  ;;  %v991_v57 = vpop.f32.mrb[20].mxu1 }
 0x125   :  { %v634_v55 = vadd.f32 %v959_v56, %v368_v52  ;;  %v762_v60 = vadd.f32 %v991_v57, %v400_v22  ;;  %v625_v61 = vpop.f32.mrb[21].mxu0  ;;  %v753_v62 = vpop.f32.mrb[21].mxu1 }
 0x126   :  { %v626_v1 = vadd.f32 %v625_v61, %v366_v53  ;;  %v754_v2 = vadd.f32 %v753_v62, %v398_v54  ;;  %v960_v3 = vpop.f32.mrb[22].mxu0  ;;  %v992_v4 = vpop.f32.mrb[22].mxu1 }
 0x127   :  { %823 = vst.msk [vmem:[%s1864_s6 + $0xb0] sm:$0xff] %vm800_vm2, %v634_v55  ;;  %855 = vst.msk [vmem:[%s1864_s6 + $0x1b0] sm:$0xff] %vm800_vm2, %v762_v60  ;;  %v637_v5 = vadd.f32 %v960_v3, %v369_v58  ;;  %v765_v6 = vadd.f32 %v992_v4, %v401_v59  ;;  %v628_v7 = vpop.f32.mrb[23].mxu0  ;;  %v756_v8 = vpop.f32.mrb[23].mxu1 }
 0x128   :  { %821 = vst.msk [vmem:[%s1864_s6 + $0xa0] sm:$0xff] %vm800_vm2, %v626_v1  ;;  %853 = vst.msk [vmem:[%s1864_s6 + $0x1a0] sm:$0xff] %vm800_vm2, %v754_v2  ;;  %v629_v9 = vadd.f32 %v628_v7, %v367_v63  ;;  %v757_v10 = vadd.f32 %v756_v8, %v399_v0 }
 0x129   :  { %824 = vst.msk [vmem:[%s1864_s6 + $0xb8] sm:$0xff] %vm800_vm2, %v637_v5  ;;  %856 = vst.msk [vmem:[%s1864_s6 + $0x1b8] sm:$0xff] %vm800_vm2, %v765_v6 }
 0x12a   :  { %822 = vst.msk [vmem:[%s1864_s6 + $0xa8] sm:$0xff] %vm800_vm2, %v629_v9  ;;  %854 = vst.msk [vmem:[%s1864_s6 + $0x1a8] sm:$0xff] %vm800_vm2, %v757_v10 }
 0x12c   :  { %v963_v15 = vpop.f32.mrb[24].mxu0  ;;  %v995_v16 = vpop.f32.mrb[24].mxu1 }
 0x12d   :  { %v650_v19 = vadd.f32 %v963_v15, %v372_v11  ;;  %v778_v20 = vadd.f32 %v995_v16, %v404_v12  ;;  %v641_v21 = vpop.f32.mrb[25].mxu0  ;;  %v769_v23 = vpop.f32.mrb[25].mxu1 }
 0x12e   :  { %v642_v26 = vadd.f32 %v641_v21, %v370_v13  ;;  %v770_v27 = vadd.f32 %v769_v23, %v402_v14  ;;  %v964_v28 = vpop.f32.mrb[26].mxu0  ;;  %v996_v29 = vpop.f32.mrb[26].mxu1 }
 0x12f   :  { %827 = vst.msk [vmem:[%s1864_s6 + $0xd0] sm:$0xff] %vm800_vm2, %v650_v19  ;;  %859 = vst.msk [vmem:[%s1864_s6 + $0x1d0] sm:$0xff] %vm800_vm2, %v778_v20  ;;  %v653_v30 = vadd.f32 %v964_v28, %v373_v17  ;;  %v781_v31 = vadd.f32 %v996_v29, %v405_v18  ;;  %v644_v32 = vpop.f32.mrb[27].mxu0  ;;  %v772_v33 = vpop.f32.mrb[27].mxu1 }
 0x130   :  { %825 = vst.msk [vmem:[%s1864_s6 + $0xc0] sm:$0xff] %vm800_vm2, %v642_v26  ;;  %857 = vst.msk [vmem:[%s1864_s6 + $0x1c0] sm:$0xff] %vm800_vm2, %v770_v27  ;;  %v645_v34 = vadd.f32 %v644_v32, %v371_v24  ;;  %v773_v35 = vadd.f32 %v772_v33, %v403_v25 }
 0x131   :  { %828 = vst.msk [vmem:[%s1864_s6 + $0xd8] sm:$0xff] %vm800_vm2, %v653_v30  ;;  %860 = vst.msk [vmem:[%s1864_s6 + $0x1d8] sm:$0xff] %vm800_vm2, %v781_v31 }
 0x132   :  { %826 = vst.msk [vmem:[%s1864_s6 + $0xc8] sm:$0xff] %vm800_vm2, %v645_v34  ;;  %858 = vst.msk [vmem:[%s1864_s6 + $0x1c8] sm:$0xff] %vm800_vm2, %v773_v35 }
 0x134   :  { %v967_v40 = vpop.f32.mrb[28].mxu0  ;;  %v999_v41 = vpop.f32.mrb[28].mxu1 }
 0x135   :  { %v666_v44 = vadd.f32 %v967_v40, %v376_v36  ;;  %v794_v45 = vadd.f32 %v999_v41, %v408_v37  ;;  %v657_v46 = vpop.f32.mrb[29].mxu0  ;;  %v785_v47 = vpop.f32.mrb[29].mxu1 }
 0x136   :  { %v658_v50 = vadd.f32 %v657_v46, %v374_v38  ;;  %v786_v51 = vadd.f32 %v785_v47, %v406_v39  ;;  %v968_v52 = vpop.f32.mrb[30].mxu0  ;;  %v1000_v22 = vpop.f32.mrb[30].mxu1 }
 0x137   :  { %831 = vst.msk [vmem:[%s1864_s6 + $0xf0] sm:$0xff] %vm800_vm2, %v666_v44  ;;  %863 = vst.msk [vmem:[%s1864_s6 + $0x1f0] sm:$0xff] %vm800_vm2, %v794_v45  ;;  %v669_v53 = vadd.f32 %v968_v52, %v377_v42  ;;  %v797_v54 = vadd.f32 %v1000_v22, %v409_v43  ;;  %v660_v56 = vpop.f32.mrb[31].mxu0  ;;  %v788_v57 = vpop.f32.mrb[31].mxu1 }
 0x138   :  { %829 = vst.msk [vmem:[%s1864_s6 + $0xe0] sm:$0xff] %vm800_vm2, %v658_v50  ;;  %861 = vst.msk [vmem:[%s1864_s6 + $0x1e0] sm:$0xff] %vm800_vm2, %v786_v51  ;;  %v661_v58 = vadd.f32 %v660_v56, %v375_v48  ;;  %v789_v59 = vadd.f32 %v788_v57, %v407_v49 }
 0x139   :  { %832 = vst.msk [vmem:[%s1864_s6 + $0xf8] sm:$0xff] %vm800_vm2, %v669_v53  ;;  %864 = vst.msk [vmem:[%s1864_s6 + $0x1f8] sm:$0xff] %vm800_vm2, %v797_v54 }
 0x13a   :  { %830 = vst.msk [vmem:[%s1864_s6 + $0xe8] sm:$0xff] %vm800_vm2, %v661_v58  ;;  %862 = vst.msk [vmem:[%s1864_s6 + $0x1e8] sm:$0xff] %vm800_vm2, %v789_v59 }

// kernel: preact_bottleneck_forward.5
= control target key start
LH: loop header
LB: loop body
LE: loop exit
PB: predicated region body
PF: predicated region fallthrough
CT: control target
= control target key end

     0   :  { %vm446_vm0 = vcmask 1041408   ;;  %v114_v10 = vlaneseq  ;;  %vm349_vm1 = vcmask 31744   ;;  %vm1096_vm2 = vcmask 130048   ;;  %s2975_s4 = inlined_call_operand.vmem [shape: bf16[4,4], index: 4, kind: input, shape index: {}]   ;;  %s2976_s1 = inlined_call_operand.vmem [shape: f32[2,4], index: 1, kind: input, shape index: {}]   ;;  %s2977_s5 = inlined_call_operand.vmem [shape: bf16[4,16], index: 5, kind: input, shape index: {}]   ;;  %s2978_s2 = inlined_call_operand.vmem [shape: f32[1,4], index: 2, kind: input, shape index: {}]   ;;  %s2979_s0 = inlined_call_operand.vmem [shape: f32[512,4], index: 0, kind: input, shape index: {}]   ;;  %s2980_s3 = inlined_call_operand.vmem [shape: f32[1,4], index: 3, kind: input, shape index: {}]   ;;  %s2981_s6 = inlined_call_operand.vmem [shape: f32[512,4], index: 6, kind: output, shape index: {0}]   ;;  %s2982_s7 = inlined_call_operand.vmem [shape: f32[512,16], index: 7, kind: output, shape index: {1}]   ;;  %s2983_s8 = inlined_call_operand.vmem [shape: f32[1,2,4], index: 8, kind: output, shape index: {2}]  }
   0x1   :  { %v348_v0 = vld [vmem:[%s2975_s4] sm:$0x3]  ;;  %v28_v17 = vld [vmem:[%s2979_s0 + $0x8] sm:$0xff]  ;;  %v29_v21 = vld [vmem:[%s2979_s0 + $0x10] sm:$0xff]  ;;  %vm1491_vm3 = vcmask 1040384   ;;  %vm1493_vm4 = vcmask 25600  }
   0x2   :  { %1770 = vmatprep.subr.msk.bf16.mxu0 %vm446_vm0, %v348_v0  ;;  %v448_v1 = vsel %vm446_vm0, %v348_v0, 0  ;;  %v91_v2 = vld [vmem:[%s2976_s1] sm:$0x3]  ;;  %v115_v11 = vshrl.u32 %v114_v10, 7  ;;  %v30_v22 = vld [vmem:[%s2979_s0 + $0x18] sm:$0xff]  ;;  %v32_v26 = vld [vmem:[%s2979_s0 + $0x28] sm:$0xff] }
   0x3   :  { %1639 = vmatpush3.bf16.msra.mxu0 %v448_v1  ;;  %v94_v3 = vmul.f32 0.001953125, %v91_v2  ;;  %v803_v5 = vld [vmem:[%s2977_s5] sm:$0x3]  ;;  %v33_v27 = vld [vmem:[%s2979_s0 + $0x30] sm:$0xff]  ;;  %v34_v28 = vld [vmem:[%s2979_s0 + $0x38] sm:$0xff] }
   0x4   :  { %1771 = vmatprep.subr.msk.bf16.mxu1 %vm446_vm0, %v803_v5  ;;  %v805_v7 = vsel %vm446_vm0, %v803_v5, 0  ;;  %v1507_v12 = vld [vmem:[%s2978_s2] ss:$0 sm:$0xff]  ;;  %v116_v13 = vsub.s32 1, %v115_v11  ;;  %v185_v25 = vsub.s32 0, %v115_v11  ;;  %v36_v31 = vld [vmem:[%s2979_s0 + $0x48] sm:$0xff] }
   0x5   :  { %v95_v4 = vmul.f32 %v94_v3, %v94_v3  ;;  %1705 = vmatpush3.bf16.msra.mxu1 %v805_v7  ;;  %v27_v16 = vld [vmem:[%s2979_s0] sm:$0xff]  ;;  %v37_v36 = vld [vmem:[%s2979_s0 + $0x50] sm:$0xff]  ;;  %v38_v37 = vld [vmem:[%s2979_s0 + $0x58] sm:$0xff] }
   0x6   :  { %v93_v18 = vld [vmem:[%s2980_s3] sm:$0x1]  ;;  %v40_v53 = vld [vmem:[%s2979_s0 + $0x68] sm:$0xff]  ;;  %v41_v54 = vld [vmem:[%s2979_s0 + $0x70] sm:$0xff] }
   0x7   :  { %v97_v6 = vrot.slane %v95_v4, 7  ;;  %v31_v23 = vld [vmem:[%s2979_s0 + $0x20] sm:$0xff]  ;;  %v42_v2 = vld [vmem:[%s2979_s0 + $0x78] sm:$0xff] }
   0x8   :  { %v35_v30 = vld [vmem:[%s2979_s0 + $0x40] sm:$0xff] }
   0x9   :  { %v99_v8 = vsub.f32 %v94_v3, %v97_v6  ;;  %v39_v38 = vld [vmem:[%s2979_s0 + $0x60] sm:$0xff] }
   0xb   :  { %v100_v9 = vadd.f32 1e-05, %v99_v8  ;;  %v43_v8 = vld [vmem:[%s2979_s0 + $0x80] sm:$0xff] }
   0xd   :  { %1772 = vrsqrt.f32 %v100_v9 }
  0x17   :  { %v1773_v14 = vpop.eup %1772 }
  0x18   :  { %v108_v15 = vmul.f32 %v1773_v14, %v1507_v12  ;;  %v45_v14 = vld [vmem:[%s2979_s0 + $0x90] sm:$0xff] }
  0x1a   :  { %v110_v19 = vrot.slane %v108_v15, 1  ;;  %v1840_v20 = vrot.slane %v108_v15, %v116_v13  ;;  %v44_v13 = vld [vmem:[%s2979_s0 + $0x88] sm:$0xff] }
  0x1c   :  { %v112_v24 = vmul.f32 %v110_v19, %v94_v3  ;;  %v118_v29 = vmul.f32 %v1840_v20, %v27_v16  ;;  %v119_v33 = vmul.f32 %v1840_v20, %v28_v17  ;;  %v120_v34 = vmul.f32 %v1840_v20, %v29_v21  ;;  %v46_v19 = vld [vmem:[%s2979_s0 + $0x98] sm:$0xff]  ;;  %v47_v21 = vld [vmem:[%s2979_s0 + $0xa0] sm:$0xff] }
  0x1d   :  { %v121_v35 = vmul.f32 %v1840_v20, %v30_v22  ;;  %v122_v39 = vmul.f32 %v1840_v20, %v31_v23  ;;  %v123_v40 = vmul.f32 %v1840_v20, %v32_v26  ;;  %v124_v41 = vmul.f32 %v1840_v20, %v33_v27  ;;  %v48_v27 = vld [vmem:[%s2979_s0 + $0xa8] sm:$0xff] }
  0x1e   :  { %v113_v32 = vsub.f32 %v93_v18, %v112_v24  ;;  %v125_v42 = vmul.f32 %v1840_v20, %v34_v28  ;;  %v126_v44 = vmul.f32 %v1840_v20, %v35_v30  ;;  %v127_v45 = vmul.f32 %v1840_v20, %v36_v31 }
  0x1f   :  { %v128_v46 = vmul.f32 %v1840_v20, %v37_v36  ;;  %v129_v47 = vmul.f32 %v1840_v20, %v38_v37  ;;  %v130_v48 = vmul.f32 %v1840_v20, %v39_v38  ;;  %v131_v1 = vmul.f32 %v1840_v20, %v40_v53  ;;  %v51_v38 = vld [vmem:[%s2979_s0 + $0xc0] sm:$0xff] }
  0x20   :  { %v1883_v43 = vrot.slane %v113_v32, %v185_v25  ;;  %v132_v3 = vmul.f32 %v1840_v20, %v41_v54  ;;  %v133_v18 = vmul.f32 %v1840_v20, %v42_v2  ;;  %v134_v24 = vmul.f32 %v1840_v20, %v43_v8  ;;  %v49_v32 = vld [vmem:[%s2979_s0 + $0xb0] sm:$0xff]  ;;  %v54_v54 = vld [vmem:[%s2979_s0 + $0xd8] sm:$0xff] }
  0x21   :  { %v135_v25 = vmul.f32 %v1840_v20, %v44_v13  ;;  %v136_v26 = vmul.f32 %v1840_v20, %v45_v14  ;;  %v137_v30 = vmul.f32 %v1840_v20, %v46_v19  ;;  %v138_v31 = vmul.f32 %v1840_v20, %v47_v21 }
  0x22   :  { %v188_v49 = vadd.f32 %v1883_v43, %v118_v29  ;;  %v189_v50 = vadd.f32 %v1883_v43, %v119_v33  ;;  %v190_v51 = vadd.f32 %v1883_v43, %v120_v34  ;;  %v191_v52 = vadd.f32 %v1883_v43, %v121_v35  ;;  %v50_v33 = vld [vmem:[%s2979_s0 + $0xb8] sm:$0xff] }
  0x23   :  { %v192_v55 = vadd.f32 %v1883_v43, %v122_v39  ;;  %v193_v56 = vadd.f32 %v1883_v43, %v123_v40  ;;  %v194_v57 = vadd.f32 %v1883_v43, %v124_v41  ;;  %v195_v58 = vadd.f32 %v1883_v43, %v125_v42 }
  0x24   :  { %v252_v59 = vmax.f32 %v188_v49, 0.0  ;;  %v253_v60 = vmax.f32 %v189_v50, 0.0  ;;  %v254_v61 = vmax.f32 %v190_v51, 0.0  ;;  %v255_v62 = vmax.f32 %v191_v52, 0.0  ;;  %v53_v49 = vld [vmem:[%s2979_s0 + $0xd0] sm:$0xff] }
  0x25   :  { %v256_v63 = vmax.f32 %v192_v55, 0.0  ;;  %v257_v0 = vmax.f32 %v193_v56, 0.0  ;;  %v196_v6 = vadd.f32 %v1883_v43, %v126_v44  ;;  %v197_v7 = vadd.f32 %v1883_v43, %v127_v45  ;;  %v52_v44 = vld [vmem:[%s2979_s0 + $0xc8] sm:$0xff] }
  0x26   :  { %v316_v4 = vpack.c.bf16 %v253_v60, %v252_v59  ;;  %v317_v5 = vpack.c.bf16 %v255_v62, %v254_v61  ;;  %v258_v10 = vmax.f32 %v194_v57, 0.0  ;;  %v259_v11 = vmax.f32 %v195_v58, 0.0  ;;  %v55_v59 = vld [vmem:[%s2979_s0 + $0xe0] sm:$0xff] }
  0x27   :  { %v318_v9 = vpack.c.bf16 %v257_v0, %v256_v63  ;;  %v1915_v12 = vadd.f32 %v1883_v43, %v128_v46  ;;  %v260_v15 = vmax.f32 %v196_v6, 0.0  ;;  %v261_v16 = vmax.f32 %v197_v7, 0.0  ;;  %v56_v7 = vld [vmem:[%s2979_s0 + $0xe8] sm:$0xff] }
  0x28   :  { %1640 = vmatprep.mubr.msk.bf16.mxu0 %vm349_vm1, %v316_v4  ;;  %v1925_v17 = vadd.f32 %v1883_v43, %v129_v47  ;;  %1706 = vmatprep.mubr.msk.bf16.mxu1 %vm349_vm1, %v316_v4  ;;  %v1938_v22 = vadd.f32 %v1883_v43, %v130_v48  ;;  %v1941_v23 = vadd.f32 %v1883_v43, %v131_v1 }
  0x29   :  { %1641 = vmatmul.mubr.msk.bf16.vlgmr.msra.gmra.mrb[0].mxu0 %vm349_vm1, %v317_v5  ;;  %1707 = vmatmul.mubr.msk.bf16.vlgmr.msra.gmra.mrb[0].mxu1 %vm349_vm1, %v317_v5  ;;  %v319_v28 = vpack.c.bf16 %v259_v11, %v258_v10  ;;  %v262_v29 = vmax.f32 %v1915_v12, 0.0  ;;  %v320_v34 = vpack.c.bf16 %v261_v16, %v260_v15  ;;  %v202_v36 = vadd.f32 %v1883_v43, %v132_v3  ;;  %v57_v15 = vld [vmem:[%s2979_s0 + $0xf0] sm:$0xff] }
  0x2a   :  { %1644 = vmatprep.mubr.msk.bf16.mxu0 %vm349_vm1, %v318_v9  ;;  %1710 = vmatprep.mubr.msk.bf16.mxu1 %vm349_vm1, %v318_v9  ;;  %v263_v35 = vmax.f32 %v1925_v17, 0.0  ;;  %v203_v37 = vadd.f32 %v1883_v43, %v133_v18  ;;  %v264_v39 = vmax.f32 %v1938_v22, 0.0  ;;  %v265_v40 = vmax.f32 %v1941_v23, 0.0  ;;  %v61_v16 = vld [vmem:[%s2979_s0 + $0x110] sm:$0xff]  ;;  %v62_v17 = vld [vmem:[%s2979_s0 + $0x118] sm:$0xff] }
  0x2b   :  { %v204_v41 = vadd.f32 %v1883_v43, %v134_v24  ;;  %v139_v42 = vmul.f32 %v1840_v20, %v48_v27  ;;  %v205_v45 = vadd.f32 %v1883_v43, %v135_v25  ;;  %v206_v46 = vadd.f32 %v1883_v43, %v136_v26  ;;  %v58_v23 = vld [vmem:[%s2979_s0 + $0xf8] sm:$0xff]  ;;  %v63_v24 = vld [vmem:[%s2979_s0 + $0x120] sm:$0xff] }
  0x2c   :  { %v140_v47 = vmul.f32 %v1840_v20, %v49_v32  ;;  %v141_v48 = vmul.f32 %v1840_v20, %v50_v33  ;;  %v207_v50 = vadd.f32 %v1883_v43, %v137_v30  ;;  %v208_v51 = vadd.f32 %v1883_v43, %v138_v31  ;;  %v59_v31 = vld [vmem:[%s2979_s0 + $0x100] sm:$0xff] }
  0x2d   :  { %v209_v52 = vadd.f32 %v1883_v43, %v139_v42  ;;  %v142_v53 = vmul.f32 %v1840_v20, %v51_v38  ;;  %v266_v55 = vmax.f32 %v202_v36, 0.0  ;;  %v143_v58 = vmul.f32 %v1840_v20, %v52_v44  ;;  %v60_v44 = vld [vmem:[%s2979_s0 + $0x108] sm:$0xff] }
  0x2e   :  { %v210_v56 = vadd.f32 %v1883_v43, %v140_v47  ;;  %v211_v57 = vadd.f32 %v1883_v43, %v141_v48  ;;  %v267_v60 = vmax.f32 %v203_v37, 0.0  ;;  %v268_v61 = vmax.f32 %v204_v41, 0.0  ;;  %v67_v47 = vld [vmem:[%s2979_s0 + $0x140] sm:$0xff] }
  0x2f   :  { %v212_v62 = vadd.f32 %v1883_v43, %v142_v53  ;;  %v144_v63 = vmul.f32 %v1840_v20, %v53_v49  ;;  %v269_v0 = vmax.f32 %v205_v45, 0.0  ;;  %v270_v1 = vmax.f32 %v206_v46, 0.0 }
  0x30   :  { %v213_v2 = vadd.f32 %v1883_v43, %v143_v58  ;;  %v145_v3 = vmul.f32 %v1840_v20, %v54_v54  ;;  %v271_v4 = vmax.f32 %v207_v50, 0.0  ;;  %v272_v5 = vmax.f32 %v208_v51, 0.0  ;;  %v70_v58 = vld [vmem:[%s2979_s0 + $0x158] sm:$0xff] }
  0x31   :  { %1645 = vmatmul.mubr.msk.bf16.gmra.mrb[4].mxu0 %vm349_vm1, %v319_v28  ;;  %1711 = vmatmul.mubr.msk.bf16.gmra.mrb[4].mxu1 %vm349_vm1, %v319_v28  ;;  %v273_v6 = vmax.f32 %v209_v52, 0.0  ;;  %v146_v8 = vmul.f32 %v1840_v20, %v55_v59  ;;  %v274_v9 = vmax.f32 %v210_v56, 0.0  ;;  %v275_v10 = vmax.f32 %v211_v57, 0.0  ;;  %v68_v52 = vld [vmem:[%s2979_s0 + $0x148] sm:$0xff]  ;;  %v69_v57 = vld [vmem:[%s2979_s0 + $0x150] sm:$0xff] }
  0x32   :  { %1648 = vmatprep.mubr.msk.bf16.mxu0 %vm349_vm1, %v320_v34  ;;  %1714 = vmatprep.mubr.msk.bf16.mxu1 %vm349_vm1, %v320_v34  ;;  %v321_v11 = vpack.c.bf16 %v263_v35, %v262_v29  ;;  %v276_v12 = vmax.f32 %v212_v62, 0.0  ;;  %v277_v13 = vmax.f32 %v213_v2, 0.0  ;;  %v2006_v14 = vadd.f32 %v1883_v43, %v144_v63  ;;  %v64_v34 = vld [vmem:[%s2979_s0 + $0x128] sm:$0xff]  ;;  %v71_v63 = vld [vmem:[%s2979_s0 + $0x160] sm:$0xff] }
  0x33   :  { %v322_v18 = vpack.c.bf16 %v265_v40, %v264_v39  ;;  %v2017_v19 = vpack.c.bf16 %v267_v60, %v266_v55  ;;  %v2020_v21 = vadd.f32 %v1883_v43, %v145_v3  ;;  %v147_v22 = vmul.f32 %v1840_v20, %v56_v7  ;;  %v65_v39 = vld [vmem:[%s2979_s0 + $0x130] sm:$0xff]  ;;  %v66_v40 = vld [vmem:[%s2979_s0 + $0x138] sm:$0xff] }
  0x34   :  { %v2029_v25 = vpack.c.bf16 %v269_v0, %v268_v61  ;;  %v2031_v26 = vpack.c.bf16 %v271_v4, %v270_v1  ;;  %v2033_v27 = vpack.c.bf16 %v273_v6, %v272_v5  ;;  %v2036_v28 = vadd.f32 %v1883_v43, %v146_v8  ;;  %v72_v8 = vld [vmem:[%s2979_s0 + $0x168] sm:$0xff] }
  0x35   :  { %v2038_v29 = vpack.c.bf16 %v275_v10, %v274_v9  ;;  %v2041_v30 = vmul.f32 %v1840_v20, %v57_v15  ;;  %v152_v32 = vmul.f32 %v1840_v20, %v61_v16  ;;  %v153_v33 = vmul.f32 %v1840_v20, %v62_v17  ;;  %v74_v15 = vld [vmem:[%s2979_s0 + $0x178] sm:$0xff] }
  0x36   :  { %v2053_v35 = vpack.c.bf16 %v277_v13, %v276_v12  ;;  %v278_v36 = vmax.f32 %v2006_v14, 0.0  ;;  %v2057_v37 = vmul.f32 %v1840_v20, %v58_v23  ;;  %v154_v38 = vmul.f32 %v1840_v20, %v63_v24  ;;  %v73_v13 = vld [vmem:[%s2979_s0 + $0x170] sm:$0xff]  ;;  %v75_v23 = vld [vmem:[%s2979_s0 + $0x180] sm:$0xff] }
  0x37   :  { %v279_v41 = vmax.f32 %v2020_v21, 0.0  ;;  %v2070_v42 = vadd.f32 %v1883_v43, %v147_v22  ;;  %v222_v45 = vadd.f32 %v1883_v43, %v152_v32  ;;  %v223_v46 = vadd.f32 %v1883_v43, %v153_v33  ;;  %v76_v33 = vld [vmem:[%s2979_s0 + $0x188] sm:$0xff] }
  0x38   :  { %v280_v48 = vmax.f32 %v2036_v28, 0.0  ;;  %v2082_v49 = vmul.f32 %v1840_v20, %v59_v31  ;;  %v155_v50 = vmul.f32 %v1840_v20, %v64_v34  ;;  %v224_v51 = vadd.f32 %v1883_v43, %v154_v38 }
  0x39   :  { %1649 = vmatmul.mubr.msk.bf16.gmra.mrb[8].mxu0 %vm349_vm1, %v321_v11  ;;  %1715 = vmatmul.mubr.msk.bf16.gmra.mrb[8].mxu1 %vm349_vm1, %v321_v11  ;;  %v286_v53 = vmax.f32 %v222_v45, 0.0  ;;  %v287_v54 = vmax.f32 %v223_v46, 0.0  ;;  %v156_v55 = vmul.f32 %v1840_v20, %v65_v39  ;;  %v157_v56 = vmul.f32 %v1840_v20, %v66_v40 }
  0x3a   :  { %1652 = vmatprep.mubr.msk.bf16.mxu0 %vm349_vm1, %v322_v18  ;;  %1718 = vmatprep.mubr.msk.bf16.mxu1 %vm349_vm1, %v322_v18  ;;  %v2098_v59 = vmul.f32 %v1840_v20, %v60_v44  ;;  %v225_v60 = vadd.f32 %v1883_v43, %v155_v50  ;;  %v288_v61 = vmax.f32 %v224_v51, 0.0  ;;  %v158_v62 = vmul.f32 %v1840_v20, %v67_v47  ;;  %v78_v44 = vld [vmem:[%s2979_s0 + $0x198] sm:$0xff]  ;;  %v79_v51 = vld [vmem:[%s2979_s0 + $0x1a0] sm:$0xff] }
  0x3b   :  { %v2105_v0 = vpack.c.bf16 %v287_v54, %v286_v53  ;;  %v226_v1 = vadd.f32 %v1883_v43, %v156_v55  ;;  %v227_v2 = vadd.f32 %v1883_v43, %v157_v56  ;;  %v159_v3 = vmul.f32 %v1840_v20, %v68_v52 }
  0x3c   :  { %v289_v4 = vmax.f32 %v225_v60, 0.0  ;;  %v228_v5 = vadd.f32 %v1883_v43, %v158_v62  ;;  %v160_v6 = vmul.f32 %v1840_v20, %v69_v57  ;;  %v161_v7 = vmul.f32 %v1840_v20, %v70_v58 }
  0x3d   :  { %v290_v9 = vmax.f32 %v226_v1, 0.0  ;;  %v291_v10 = vmax.f32 %v227_v2, 0.0  ;;  %v229_v11 = vadd.f32 %v1883_v43, %v159_v3  ;;  %v162_v12 = vmul.f32 %v1840_v20, %v71_v63  ;;  %v81_v3 = vld [vmem:[%s2979_s0 + $0x1b0] sm:$0xff] }
  0x3e   :  { %v2128_v16 = vpack.c.bf16 %v289_v4, %v288_v61  ;;  %v292_v17 = vmax.f32 %v228_v5, 0.0  ;;  %v230_v18 = vadd.f32 %v1883_v43, %v160_v6  ;;  %v231_v22 = vadd.f32 %v1883_v43, %v161_v7  ;;  %v80_v61 = vld [vmem:[%s2979_s0 + $0x1a8] sm:$0xff]  ;;  %v82_v4 = vld [vmem:[%s2979_s0 + $0x1b8] sm:$0xff] }
  0x3f   :  { %v2139_v24 = vpack.c.bf16 %v291_v10, %v290_v9  ;;  %v163_v31 = vmul.f32 %v1840_v20, %v72_v8  ;;  %v232_v32 = vadd.f32 %v1883_v43, %v162_v12  ;;  %v164_v39 = vmul.f32 %v1840_v20, %v73_v13  ;;  %v83_v9 = vld [vmem:[%s2979_s0 + $0x1c0] sm:$0xff] }
  0x40   :  { %v294_v34 = vmax.f32 %v230_v18, 0.0  ;;  %v295_v38 = vmax.f32 %v231_v22, 0.0  ;;  %v165_v40 = vmul.f32 %v1840_v20, %v74_v15  ;;  %v166_v50 = vmul.f32 %v1840_v20, %v75_v23  ;;  %v84_v15 = vld [vmem:[%s2979_s0 + $0x1c8] sm:$0xff]  ;;  %v85_v23 = vld [vmem:[%s2979_s0 + $0x1d0] sm:$0xff] }
  0x41   :  { %1653 = vmatmul.mubr.msk.bf16.gmra.mrb[12].mxu0 %vm349_vm1, %v2017_v19  ;;  %1719 = vmatmul.mubr.msk.bf16.gmra.mrb[12].mxu1 %vm349_vm1, %v2017_v19  ;;  %v293_v19 = vmax.f32 %v229_v11, 0.0  ;;  %v233_v46 = vadd.f32 %v1883_v43, %v163_v31  ;;  %v296_v47 = vmax.f32 %v232_v32, 0.0  ;;  %v234_v53 = vadd.f32 %v1883_v43, %v164_v39 }
  0x42   :  { %1656 = vmatprep.mubr.msk.bf16.mxu0 %vm349_vm1, %v2029_v25  ;;  %1722 = vmatprep.mubr.msk.bf16.mxu1 %vm349_vm1, %v2029_v25  ;;  %v77_v25 = vld [vmem:[%s2979_s0 + $0x190] sm:$0xff]  ;;  %v2161_v52 = vpack.c.bf16 %v295_v38, %v294_v34  ;;  %v235_v54 = vadd.f32 %v1883_v43, %v165_v40  ;;  %v167_v55 = vmul.f32 %v1840_v20, %v76_v33  ;;  %v87_v34 = vld [vmem:[%s2979_s0 + $0x1e0] sm:$0xff] }
  0x43   :  { %v2154_v45 = vpack.c.bf16 %v293_v19, %v292_v17  ;;  %v297_v56 = vmax.f32 %v233_v46, 0.0  ;;  %v236_v57 = vadd.f32 %v1883_v43, %v166_v50  ;;  %v168_v58 = vmul.f32 %v1840_v20, %v77_v25  ;;  %v86_v19 = vld [vmem:[%s2979_s0 + $0x1d8] sm:$0xff] }
  0x44   :  { %v169_v60 = vmul.f32 %v1840_v20, %v78_v44  ;;  %v298_v62 = vmax.f32 %v234_v53, 0.0  ;;  %v299_v63 = vmax.f32 %v235_v54, 0.0  ;;  %v237_v1 = vadd.f32 %v1883_v43, %v167_v55 }
  0x45   :  { %v170_v2 = vmul.f32 %v1840_v20, %v79_v51  ;;  %v2180_v5 = vpack.c.bf16 %v297_v56, %v296_v47  ;;  %v300_v6 = vmax.f32 %v236_v57, 0.0  ;;  %v238_v7 = vadd.f32 %v1883_v43, %v168_v58  ;;  %v88_v51 = vld [vmem:[%s2979_s0 + $0x1e8] sm:$0xff]  ;;  %v89_v57 = vld [vmem:[%s2979_s0 + $0x1f0] sm:$0xff]  ;;  %v90_v58 = vld [vmem:[%s2979_s0 + $0x1f8] sm:$0xff] }
  0x46   :  { %v239_v8 = vadd.f32 %v1883_v43, %v169_v60  ;;  %v2191_v10 = vpack.c.bf16 %v299_v63, %v298_v62  ;;  %v301_v11 = vmax.f32 %v237_v1, 0.0  ;;  %v171_v12 = vmul.f32 %v1840_v20, %v80_v61 }
  0x47   :  { %v240_v13 = vadd.f32 %v1883_v43, %v170_v2  ;;  %v302_v17 = vmax.f32 %v238_v7, 0.0  ;;  %v173_v22 = vmul.f32 %v1840_v20, %v82_v4  ;;  %v175_v25 = vmul.f32 %v1840_v20, %v84_v15 }
  0x48   :  { %v303_v18 = vmax.f32 %v239_v8, 0.0  ;;  %v2210_v31 = vpack.c.bf16 %v301_v11, %v300_v6  ;;  %v241_v32 = vadd.f32 %v1883_v43, %v171_v12  ;;  %v176_v47 = vmul.f32 %v1840_v20, %v85_v23 }
  0x49   :  { %1657 = vmatmul.mubr.msk.bf16.gmra.mrb[16].mxu0 %vm349_vm1, %v2031_v26  ;;  %1723 = vmatmul.mubr.msk.bf16.gmra.mrb[16].mxu1 %vm349_vm1, %v2031_v26  ;;  %v172_v26 = vmul.f32 %v1840_v20, %v81_v3  ;;  %v304_v33 = vmax.f32 %v240_v13, 0.0  ;;  %v243_v40 = vadd.f32 %v1883_v43, %v173_v22  ;;  %v177_v50 = vmul.f32 %v1840_v20, %v86_v19 }
  0x4a   :  { %1660 = vmatprep.mubr.msk.bf16.mxu0 %vm349_vm1, %v2033_v27  ;;  %1726 = vmatprep.mubr.msk.bf16.mxu1 %vm349_vm1, %v2033_v27  ;;  %v174_v27 = vmul.f32 %v1840_v20, %v83_v9  ;;  %v2217_v38 = vpack.c.bf16 %v303_v18, %v302_v17  ;;  %v305_v44 = vmax.f32 %v241_v32, 0.0  ;;  %v245_v55 = vadd.f32 %v1883_v43, %v175_v25 }
  0x4b   :  { %v242_v39 = vadd.f32 %v1883_v43, %v172_v26  ;;  %v307_v54 = vmax.f32 %v243_v40, 0.0  ;;  %v178_v56 = vmul.f32 %v1840_v20, %v87_v34  ;;  %v246_v62 = vadd.f32 %v1883_v43, %v176_v47 }
  0x4c   :  { %v244_v46 = vadd.f32 %v1883_v43, %v174_v27  ;;  %v2236_v60 = vpack.c.bf16 %v305_v44, %v304_v33  ;;  %v247_v63 = vadd.f32 %v1883_v43, %v177_v50  ;;  %v309_v2 = vmax.f32 %v245_v55, 0.0 }
  0x4d   :  { %v306_v53 = vmax.f32 %v242_v39, 0.0  ;;  %v179_v3 = vmul.f32 %v1840_v20, %v88_v51  ;;  %v248_v4 = vadd.f32 %v1883_v43, %v178_v56  ;;  %v310_v6 = vmax.f32 %v246_v62, 0.0 }
  0x4e   :  { %v308_v61 = vmax.f32 %v244_v46, 0.0  ;;  %v311_v7 = vmax.f32 %v247_v63, 0.0  ;;  %v180_v8 = vmul.f32 %v1840_v20, %v89_v57  ;;  %v181_v9 = vmul.f32 %v1840_v20, %v90_v58 }
  0x4f   :  { %v2240_v1 = vpack.c.bf16 %v307_v54, %v306_v53  ;;  %v281_v11 = vmax.f32 %v2070_v42, 0.0  ;;  %v249_v13 = vadd.f32 %v1883_v43, %v179_v3  ;;  %v312_v15 = vmax.f32 %v248_v4, 0.0 }
  0x50   :  { %v344_v12 = vpack.c.bf16 %v309_v2, %v308_v61  ;;  %v345_v17 = vpack.c.bf16 %v311_v7, %v310_v6  ;;  %v251_v18 = vadd.f32 %v1883_v43, %v181_v9  ;;  %v329_v20 = vpack.c.bf16 %v279_v41, %v278_v36 }
  0x51   :  { %1661 = vmatmul.mubr.msk.bf16.gmra.mrb[20].mxu0 %vm349_vm1, %v2038_v29  ;;  %1727 = vmatmul.mubr.msk.bf16.gmra.mrb[20].mxu1 %vm349_vm1, %v2038_v29  ;;  %v250_v29 = vadd.f32 %v1883_v43, %v180_v8  ;;  %v313_v26 = vmax.f32 %v249_v13, 0.0  ;;  %v218_v42 = vadd.f32 %v1883_v43, %v2041_v30  ;;  %v330_v19 = vpack.c.bf16 %v281_v11, %v280_v48 }
  0x52   :  { %1664 = vmatprep.mubr.msk.bf16.mxu0 %vm349_vm1, %v2053_v35  ;;  %1730 = vmatprep.mubr.msk.bf16.mxu1 %vm349_vm1, %v2053_v35  ;;  %v219_v35 = vadd.f32 %v1883_v43, %v2057_v37  ;;  %v315_v23 = vmax.f32 %v251_v18, 0.0  ;;  %v220_v32 = vadd.f32 %v1883_v43, %v2082_v49  ;;  %v221_v14 = vadd.f32 %v1883_v43, %v2098_v59 }
  0x53   :  { %v314_v22 = vmax.f32 %v250_v29, 0.0  ;;  %v346_v21 = vpack.c.bf16 %v313_v26, %v312_v15  ;;  %v282_v41 = vmax.f32 %v218_v42, 0.0 }
  0x54   :  { %v283_v30 = vmax.f32 %v219_v35, 0.0  ;;  %v284_v37 = vmax.f32 %v220_v32, 0.0  ;;  %v285_v33 = vmax.f32 %v221_v14, 0.0 }
  0x55   :  { %v347_v36 = vpack.c.bf16 %v315_v23, %v314_v22 }
  0x56   :  { %v331_v28 = vpack.c.bf16 %v283_v30, %v282_v41  ;;  %v332_v48 = vpack.c.bf16 %v285_v33, %v284_v37 }
  0x59   :  { %1665 = vmatmul.mubr.msk.bf16.gmra.mrb[24].mxu0 %vm349_vm1, %v329_v20  ;;  %1731 = vmatmul.mubr.msk.bf16.gmra.mrb[24].mxu1 %vm349_vm1, %v329_v20 }
  0x5a   :  { %1668 = vmatprep.mubr.msk.bf16.mxu0 %vm349_vm1, %v330_v19  ;;  %1734 = vmatprep.mubr.msk.bf16.mxu1 %vm349_vm1, %v330_v19 }
  0x61   :  { %1669 = vmatmul.mubr.msk.bf16.gmra.mrb[28].mxu0 %vm349_vm1, %v331_v28  ;;  %1735 = vmatmul.mubr.msk.bf16.gmra.mrb[28].mxu1 %vm349_vm1, %v331_v28 }
  0x62   :  { %1672 = vmatprep.mubr.msk.bf16.mxu0 %vm349_vm1, %v332_v48  ;;  %1738 = vmatprep.mubr.msk.bf16.mxu1 %vm349_vm1, %v332_v48 }
  0x69   :  { %1673 = vmatmul.mubr.msk.bf16.gmra.mrb[32].mxu0 %vm349_vm1, %v2105_v0  ;;  %1739 = vmatmul.mubr.msk.bf16.gmra.mrb[32].mxu1 %vm349_vm1, %v2105_v0 }
  0x6a   :  { %1676 = vmatprep.mubr.msk.bf16.mxu0 %vm349_vm1, %v2128_v16  ;;  %1742 = vmatprep.mubr.msk.bf16.mxu1 %vm349_vm1, %v2128_v16 }
  0x71   :  { %1677 = vmatmul.mubr.msk.bf16.gmra.mrb[36].mxu0 %vm349_vm1, %v2139_v24  ;;  %1743 = vmatmul.mubr.msk.bf16.gmra.mrb[36].mxu1 %vm349_vm1, %v2139_v24 }
  0x72   :  { %1680 = vmatprep.mubr.msk.bf16.mxu0 %vm349_vm1, %v2154_v45  ;;  %1746 = vmatprep.mubr.msk.bf16.mxu1 %vm349_vm1, %v2154_v45 }
  0x79   :  { %1681 = vmatmul.mubr.msk.bf16.gmra.mrb[40].mxu0 %vm349_vm1, %v2161_v52  ;;  %1747 = vmatmul.mubr.msk.bf16.gmra.mrb[40].mxu1 %vm349_vm1, %v2161_v52 }
  0x7a   :  { %1684 = vmatprep.mubr.msk.bf16.mxu0 %vm349_vm1, %v2180_v5  ;;  %1750 = vmatprep.mubr.msk.bf16.mxu1 %vm349_vm1, %v2180_v5 }
  0x81   :  { %1685 = vmatmul.mubr.msk.bf16.gmra.mrb[44].mxu0 %vm349_vm1, %v2191_v10  ;;  %1751 = vmatmul.mubr.msk.bf16.gmra.mrb[44].mxu1 %vm349_vm1, %v2191_v10 }
  0x82   :  { %1688 = vmatprep.mubr.msk.bf16.mxu0 %vm349_vm1, %v2210_v31  ;;  %1754 = vmatprep.mubr.msk.bf16.mxu1 %vm349_vm1, %v2210_v31 }
  0x89   :  { %1689 = vmatmul.mubr.msk.bf16.gmra.mrb[48].mxu0 %vm349_vm1, %v2217_v38  ;;  %1755 = vmatmul.mubr.msk.bf16.gmra.mrb[48].mxu1 %vm349_vm1, %v2217_v38 }
  0x8a   :  { %1692 = vmatprep.mubr.msk.bf16.mxu0 %vm349_vm1, %v2236_v60  ;;  %1758 = vmatprep.mubr.msk.bf16.mxu1 %vm349_vm1, %v2236_v60 }
  0x91   :  { %1693 = vmatmul.mubr.msk.bf16.gmra.mrb[52].mxu0 %vm349_vm1, %v2240_v1  ;;  %1759 = vmatmul.mubr.msk.bf16.gmra.mrb[52].mxu1 %vm349_vm1, %v2240_v1 }
  0x92   :  { %1696 = vmatprep.mubr.msk.bf16.mxu0 %vm349_vm1, %v344_v12  ;;  %1762 = vmatprep.mubr.msk.bf16.mxu1 %vm349_vm1, %v344_v12 }
  0x99   :  { %1697 = vmatmul.mubr.msk.bf16.gmra.mrb[56].mxu0 %vm349_vm1, %v345_v17  ;;  %1763 = vmatmul.mubr.msk.bf16.gmra.mrb[56].mxu1 %vm349_vm1, %v345_v17 }
  0x9a   :  { %1700 = vmatprep.mubr.msk.bf16.mxu0 %vm349_vm1, %v346_v21  ;;  %1766 = vmatprep.mubr.msk.bf16.mxu1 %vm349_vm1, %v346_v21 }
  0xa1   :  { %1701 = vmatmul.mubr.msk.bf16.gmra.mrb[60].mxu0 %vm349_vm1, %v347_v36  ;;  %1767 = vmatmul.mubr.msk.bf16.gmra.mrb[60].mxu1 %vm349_vm1, %v347_v36 }
  0xfc   :  { %v1642_v43 = vpop.f32.mrb[0].mxu0  ;;  %v1708_v49 = vpop.f32.mrb[0].mxu1 }
  0xfd   :  { %741 = vst.msk [vmem:[%s2981_s6 + $0x10] sm:$0xff] %vm349_vm1, %v1642_v43  ;;  %v484_v59 = vpop.f32.mrb[1].mxu0  ;;  %v841_v0 = vpop.f32.mrb[1].mxu1  ;;  %v1296_v10 = vmul.f32 %v1642_v43, %v1642_v43  ;;  %v1164_v39 = vsel %vm349_vm1, %v1642_v43, 0.0 }
  0xfe   :  { %1099 = vst.msk [vmem:[%s2982_s7 + $0x10] sm:$0xff] %vm1096_vm2, %v1708_v49  ;;  %v1294_v16 = vmul.f32 %v484_v59, %v484_v59  ;;  %v1643_v24 = vpop.f32.mrb[2].mxu0  ;;  %1097 = vst.msk [vmem:[%s2982_s7] sm:$0xff] %vm1096_vm2, %v841_v0  ;;  %v1709_v45 = vpop.f32.mrb[2].mxu1  ;;  %v1161_v31 = vsel %vm349_vm1, %v484_v59, 0.0 }
  0xff   :  { %739 = vst.msk [vmem:[%s2981_s6] sm:$0xff] %vm349_vm1, %v484_v59  ;;  %742 = vst.msk [vmem:[%s2981_s6 + $0x18] sm:$0xff] %vm349_vm1, %v1643_v24  ;;  %v487_v52 = vpop.f32.mrb[3].mxu0  ;;  %v844_v5 = vpop.f32.mrb[3].mxu1  ;;  %v1297_v25 = vmul.f32 %v1643_v24, %v1643_v24  ;;  %v1361_v50 = vsel %vm349_vm1, %v1296_v10, 0.0  ;;  %v1166_v51 = vsel %vm349_vm1, %v1643_v24, 0.0 }
 0x100   :  { %1100 = vst.msk [vmem:[%s2982_s7 + $0x18] sm:$0xff] %vm1096_vm2, %v1709_v45  ;;  %v1162_v27 = vsel %vm349_vm1, %v487_v52, 0.0  ;;  %v1295_v34 = vmul.f32 %v487_v52, %v487_v52  ;;  %1098 = vst.msk [vmem:[%s2982_s7 + $0x8] sm:$0xff] %vm1096_vm2, %v844_v5  ;;  %v1358_v40 = vsel %vm349_vm1, %v1294_v16, 0.0 }
 0x101   :  { %740 = vst.msk [vmem:[%s2981_s6 + $0x8] sm:$0xff] %vm349_vm1, %v487_v52  ;;  %v1163_v38 = vadd.f32 %v1162_v27, %v1161_v31  ;;  %v1363_v60 = vsel %vm349_vm1, %v1297_v25, 0.0 }
 0x102   :  { %v1359_v44 = vsel %vm349_vm1, %v1295_v34, 0.0 }
 0x103   :  { %v1165_v46 = vadd.f32 %v1164_v39, %v1163_v38  ;;  %v1360_v47 = vadd.f32 %v1359_v44, %v1358_v40 }
 0x104   :  { %v1646_v53 = vpop.f32.mrb[4].mxu0  ;;  %v1712_v54 = vpop.f32.mrb[4].mxu1 }
 0x105   :  { %v1362_v55 = vadd.f32 %v1361_v50, %v1360_v47  ;;  %745 = vst.msk [vmem:[%s2981_s6 + $0x30] sm:$0xff] %vm349_vm1, %v1646_v53  ;;  %v500_v56 = vpop.f32.mrb[5].mxu0  ;;  %v1167_v57 = vadd.f32 %v1166_v51, %v1165_v46  ;;  %v857_v58 = vpop.f32.mrb[5].mxu1  ;;  %v1300_v7 = vmul.f32 %v1646_v53, %v1646_v53  ;;  %v1172_v15 = vsel %vm349_vm1, %v1646_v53, 0.0 }
 0x106   :  { %1103 = vst.msk [vmem:[%s2982_s7 + $0x30] sm:$0xff] %vm1096_vm2, %v1712_v54  ;;  %v1168_v61 = vsel %vm349_vm1, %v500_v56, 0.0  ;;  %v1298_v62 = vmul.f32 %v500_v56, %v500_v56  ;;  %v1647_v63 = vpop.f32.mrb[6].mxu0  ;;  %1101 = vst.msk [vmem:[%s2982_s7 + $0x20] sm:$0xff] %vm1096_vm2, %v857_v58  ;;  %v1713_v1 = vpop.f32.mrb[6].mxu1 }
 0x107   :  { %743 = vst.msk [vmem:[%s2981_s6 + $0x20] sm:$0xff] %vm349_vm1, %v500_v56  ;;  %v1169_v2 = vadd.f32 %v1168_v61, %v1167_v57  ;;  %v1364_v3 = vadd.f32 %v1363_v60, %v1362_v55  ;;  %746 = vst.msk [vmem:[%s2981_s6 + $0x38] sm:$0xff] %vm349_vm1, %v1647_v63  ;;  %v503_v4 = vpop.f32.mrb[7].mxu0  ;;  %v860_v6 = vpop.f32.mrb[7].mxu1  ;;  %v1301_v17 = vmul.f32 %v1647_v63, %v1647_v63  ;;  %v1369_v26 = vsel %vm349_vm1, %v1300_v7, 0.0 }
 0x108   :  { %1104 = vst.msk [vmem:[%s2982_s7 + $0x38] sm:$0xff] %vm1096_vm2, %v1713_v1  ;;  %v1365_v8 = vsel %vm349_vm1, %v1298_v62, 0.0  ;;  %v1170_v9 = vsel %vm349_vm1, %v503_v4, 0.0  ;;  %v1299_v11 = vmul.f32 %v503_v4, %v503_v4  ;;  %1102 = vst.msk [vmem:[%s2982_s7 + $0x28] sm:$0xff] %vm1096_vm2, %v860_v6  ;;  %v1174_v42 = vsel %vm349_vm1, %v1647_v63, 0.0 }
 0x109   :  { %744 = vst.msk [vmem:[%s2981_s6 + $0x28] sm:$0xff] %vm349_vm1, %v503_v4  ;;  %v1366_v12 = vadd.f32 %v1365_v8, %v1364_v3  ;;  %v1171_v13 = vadd.f32 %v1170_v9, %v1169_v2  ;;  %v1371_v21 = vsel %vm349_vm1, %v1301_v17, 0.0 }
 0x10a   :  { %v1367_v29 = vsel %vm349_vm1, %v1299_v11, 0.0 }
 0x10b   :  { %v1173_v18 = vadd.f32 %v1172_v15, %v1171_v13  ;;  %v1368_v20 = vadd.f32 %v1367_v29, %v1366_v12 }
 0x10c   :  { %v1650_v35 = vpop.f32.mrb[8].mxu0  ;;  %v1716_v22 = vpop.f32.mrb[8].mxu1 }
 0x10d   :  { %v1370_v23 = vadd.f32 %v1369_v26, %v1368_v20  ;;  %749 = vst.msk [vmem:[%s2981_s6 + $0x50] sm:$0xff] %vm349_vm1, %v1650_v35  ;;  %v516_v19 = vpop.f32.mrb[9].mxu0  ;;  %v1175_v32 = vadd.f32 %v1174_v42, %v1173_v18  ;;  %v873_v14 = vpop.f32.mrb[9].mxu1  ;;  %v1304_v49 = vmul.f32 %v1650_v35, %v1650_v35  ;;  %v1180_v52 = vsel %vm349_vm1, %v1650_v35, 0.0 }
 0x10e   :  { %1107 = vst.msk [vmem:[%s2982_s7 + $0x50] sm:$0xff] %vm1096_vm2, %v1716_v22  ;;  %v1176_v36 = vsel %vm349_vm1, %v516_v19, 0.0  ;;  %v1302_v41 = vmul.f32 %v516_v19, %v516_v19  ;;  %v1651_v30 = vpop.f32.mrb[10].mxu0  ;;  %1105 = vst.msk [vmem:[%s2982_s7 + $0x40] sm:$0xff] %vm1096_vm2, %v873_v14  ;;  %v1717_v37 = vpop.f32.mrb[10].mxu1 }
 0x10f   :  { %747 = vst.msk [vmem:[%s2981_s6 + $0x40] sm:$0xff] %vm349_vm1, %v516_v19  ;;  %v1177_v33 = vadd.f32 %v1176_v36, %v1175_v32  ;;  %v1372_v28 = vadd.f32 %v1371_v21, %v1370_v23  ;;  %750 = vst.msk [vmem:[%s2981_s6 + $0x58] sm:$0xff] %vm349_vm1, %v1651_v30  ;;  %v519_v48 = vpop.f32.mrb[11].mxu0  ;;  %v876_v43 = vpop.f32.mrb[11].mxu1  ;;  %v1305_v5 = vmul.f32 %v1651_v30, %v1651_v30  ;;  %v1377_v34 = vsel %vm349_vm1, %v1304_v49, 0.0 }
 0x110   :  { %1108 = vst.msk [vmem:[%s2982_s7 + $0x58] sm:$0xff] %vm1096_vm2, %v1717_v37  ;;  %v1373_v59 = vsel %vm349_vm1, %v1302_v41, 0.0  ;;  %v1178_v0 = vsel %vm349_vm1, %v519_v48, 0.0  ;;  %v1303_v16 = vmul.f32 %v519_v48, %v519_v48  ;;  %1106 = vst.msk [vmem:[%s2982_s7 + $0x48] sm:$0xff] %vm1096_vm2, %v876_v43  ;;  %v1182_v38 = vsel %vm349_vm1, %v1651_v30, 0.0 }
 0x111   :  { %748 = vst.msk [vmem:[%s2981_s6 + $0x48] sm:$0xff] %vm349_vm1, %v519_v48  ;;  %v1374_v24 = vadd.f32 %v1373_v59, %v1372_v28  ;;  %v1179_v45 = vadd.f32 %v1178_v0, %v1177_v33  ;;  %v1379_v50 = vsel %vm349_vm1, %v1305_v5, 0.0 }
 0x112   :  { %v1375_v10 = vsel %vm349_vm1, %v1303_v16, 0.0 }
 0x113   :  { %v1181_v31 = vadd.f32 %v1180_v52, %v1179_v45  ;;  %v1376_v27 = vadd.f32 %v1375_v10, %v1374_v24 }
 0x114   :  { %v1654_v39 = vpop.f32.mrb[12].mxu0  ;;  %v1720_v40 = vpop.f32.mrb[12].mxu1 }
 0x115   :  { %v1378_v25 = vadd.f32 %v1377_v34, %v1376_v27  ;;  %753 = vst.msk [vmem:[%s2981_s6 + $0x70] sm:$0xff] %vm349_vm1, %v1654_v39  ;;  %v532_v44 = vpop.f32.mrb[13].mxu0  ;;  %v1183_v46 = vadd.f32 %v1182_v38, %v1181_v31  ;;  %v889_v47 = vpop.f32.mrb[13].mxu1  ;;  %v1308_v61 = vmul.f32 %v1654_v39, %v1654_v39  ;;  %v1188_v4 = vsel %vm349_vm1, %v1654_v39, 0.0 }
 0x116   :  { %1111 = vst.msk [vmem:[%s2982_s7 + $0x70] sm:$0xff] %vm1096_vm2, %v1720_v40  ;;  %v1184_v51 = vsel %vm349_vm1, %v532_v44, 0.0  ;;  %v1306_v53 = vmul.f32 %v532_v44, %v532_v44  ;;  %v1655_v54 = vpop.f32.mrb[14].mxu0  ;;  %1109 = vst.msk [vmem:[%s2982_s7 + $0x60] sm:$0xff] %vm1096_vm2, %v889_v47  ;;  %v1721_v55 = vpop.f32.mrb[14].mxu1 }
 0x117   :  { %751 = vst.msk [vmem:[%s2981_s6 + $0x60] sm:$0xff] %vm349_vm1, %v532_v44  ;;  %v1185_v56 = vadd.f32 %v1184_v51, %v1183_v46  ;;  %v1380_v57 = vadd.f32 %v1379_v50, %v1378_v25  ;;  %754 = vst.msk [vmem:[%s2981_s6 + $0x78] sm:$0xff] %vm349_vm1, %v1655_v54  ;;  %v535_v58 = vpop.f32.mrb[15].mxu0  ;;  %v892_v60 = vpop.f32.mrb[15].mxu1  ;;  %v1309_v6 = vmul.f32 %v1655_v54, %v1655_v54  ;;  %v1385_v11 = vsel %vm349_vm1, %v1308_v61, 0.0 }
 0x118   :  { %1112 = vst.msk [vmem:[%s2982_s7 + $0x78] sm:$0xff] %vm1096_vm2, %v1721_v55  ;;  %v1381_v62 = vsel %vm349_vm1, %v1306_v53, 0.0  ;;  %v1186_v63 = vsel %vm349_vm1, %v535_v58, 0.0  ;;  %v1307_v1 = vmul.f32 %v535_v58, %v535_v58  ;;  %1110 = vst.msk [vmem:[%s2982_s7 + $0x68] sm:$0xff] %vm1096_vm2, %v892_v60  ;;  %v1190_v12 = vsel %vm349_vm1, %v1655_v54, 0.0 }
 0x119   :  { %752 = vst.msk [vmem:[%s2981_s6 + $0x68] sm:$0xff] %vm349_vm1, %v535_v58  ;;  %v1382_v2 = vadd.f32 %v1381_v62, %v1380_v57  ;;  %v1187_v3 = vadd.f32 %v1186_v63, %v1185_v56  ;;  %v1387_v26 = vsel %vm349_vm1, %v1309_v6, 0.0 }
 0x11a   :  { %v1383_v7 = vsel %vm349_vm1, %v1307_v1, 0.0 }
 0x11b   :  { %v1189_v8 = vadd.f32 %v1188_v4, %v1187_v3  ;;  %v1384_v9 = vadd.f32 %v1383_v7, %v1382_v2 }
 0x11c   :  { %v1658_v13 = vpop.f32.mrb[16].mxu0  ;;  %v1724_v15 = vpop.f32.mrb[16].mxu1 }
 0x11d   :  { %v1386_v17 = vadd.f32 %v1385_v11, %v1384_v9  ;;  %757 = vst.msk [vmem:[%s2981_s6 + $0x90] sm:$0xff] %vm349_vm1, %v1658_v13  ;;  %v548_v29 = vpop.f32.mrb[17].mxu0  ;;  %v1191_v18 = vadd.f32 %v1190_v12, %v1189_v8  ;;  %v905_v20 = vpop.f32.mrb[17].mxu1  ;;  %v1312_v36 = vmul.f32 %v1658_v13, %v1658_v13  ;;  %v1196_v48 = vsel %vm349_vm1, %v1658_v13, 0.0 }
 0x11e   :  { %1115 = vst.msk [vmem:[%s2982_s7 + $0x90] sm:$0xff] %vm1096_vm2, %v1724_v15  ;;  %v1192_v42 = vsel %vm349_vm1, %v548_v29, 0.0  ;;  %v1310_v35 = vmul.f32 %v548_v29, %v548_v29  ;;  %v1659_v22 = vpop.f32.mrb[18].mxu0  ;;  %1113 = vst.msk [vmem:[%s2982_s7 + $0x80] sm:$0xff] %vm1096_vm2, %v905_v20  ;;  %v1725_v23 = vpop.f32.mrb[18].mxu1 }
 0x11f   :  { %755 = vst.msk [vmem:[%s2981_s6 + $0x80] sm:$0xff] %vm349_vm1, %v548_v29  ;;  %v1193_v19 = vadd.f32 %v1192_v42, %v1191_v18  ;;  %v1388_v32 = vadd.f32 %v1387_v26, %v1386_v17  ;;  %758 = vst.msk [vmem:[%s2981_s6 + $0x98] sm:$0xff] %vm349_vm1, %v1659_v22  ;;  %v551_v14 = vpop.f32.mrb[19].mxu0  ;;  %v908_v21 = vpop.f32.mrb[19].mxu1  ;;  %v1313_v43 = vmul.f32 %v1659_v22, %v1659_v22  ;;  %v1393_v16 = vsel %vm349_vm1, %v1312_v36, 0.0 }
 0x120   :  { %1116 = vst.msk [vmem:[%s2982_s7 + $0x98] sm:$0xff] %vm1096_vm2, %v1725_v23  ;;  %v1389_v41 = vsel %vm349_vm1, %v1310_v35, 0.0  ;;  %v1194_v30 = vsel %vm349_vm1, %v551_v14, 0.0  ;;  %v1311_v37 = vmul.f32 %v551_v14, %v551_v14  ;;  %1114 = vst.msk [vmem:[%s2982_s7 + $0x88] sm:$0xff] %vm1096_vm2, %v908_v21  ;;  %v1198_v24 = vsel %vm349_vm1, %v1659_v22, 0.0 }
 0x121   :  { %756 = vst.msk [vmem:[%s2981_s6 + $0x88] sm:$0xff] %vm349_vm1, %v551_v14  ;;  %v1390_v33 = vadd.f32 %v1389_v41, %v1388_v32  ;;  %v1195_v28 = vadd.f32 %v1194_v30, %v1193_v19  ;;  %v1395_v34 = vsel %vm349_vm1, %v1313_v43, 0.0 }
 0x122   :  { %v1391_v49 = vsel %vm349_vm1, %v1311_v37, 0.0 }
 0x123   :  { %v1197_v59 = vadd.f32 %v1196_v48, %v1195_v28  ;;  %v1392_v0 = vadd.f32 %v1391_v49, %v1390_v33 }
 0x124   :  { %v1662_v45 = vpop.f32.mrb[20].mxu0  ;;  %v1728_v52 = vpop.f32.mrb[20].mxu1 }
 0x125   :  { %v1394_v5 = vadd.f32 %v1393_v16, %v1392_v0  ;;  %761 = vst.msk [vmem:[%s2981_s6 + $0xb0] sm:$0xff] %vm349_vm1, %v1662_v45  ;;  %v564_v10 = vpop.f32.mrb[21].mxu0  ;;  %v1199_v31 = vadd.f32 %v1198_v24, %v1197_v59  ;;  %v921_v27 = vpop.f32.mrb[21].mxu1  ;;  %v1316_v51 = vmul.f32 %v1662_v45, %v1662_v45  ;;  %v1204_v58 = vsel %vm349_vm1, %v1662_v45, 0.0 }
 0x126   :  { %1119 = vst.msk [vmem:[%s2982_s7 + $0xb0] sm:$0xff] %vm1096_vm2, %v1728_v52  ;;  %v1200_v38 = vsel %vm349_vm1, %v564_v10, 0.0  ;;  %v1314_v39 = vmul.f32 %v564_v10, %v564_v10  ;;  %v1663_v40 = vpop.f32.mrb[22].mxu0  ;;  %1117 = vst.msk [vmem:[%s2982_s7 + $0xa0] sm:$0xff] %vm1096_vm2, %v921_v27  ;;  %v1729_v25 = vpop.f32.mrb[22].mxu1 }
 0x127   :  { %759 = vst.msk [vmem:[%s2981_s6 + $0xa0] sm:$0xff] %vm349_vm1, %v564_v10  ;;  %v1201_v44 = vadd.f32 %v1200_v38, %v1199_v31  ;;  %v1396_v46 = vadd.f32 %v1395_v34, %v1394_v5  ;;  %762 = vst.msk [vmem:[%s2981_s6 + $0xb8] sm:$0xff] %vm349_vm1, %v1663_v40  ;;  %v567_v47 = vpop.f32.mrb[23].mxu0  ;;  %v924_v50 = vpop.f32.mrb[23].mxu1  ;;  %v1317_v60 = vmul.f32 %v1663_v40, %v1663_v40  ;;  %v1401_v1 = vsel %vm349_vm1, %v1316_v51, 0.0 }
 0x128   :  { %1120 = vst.msk [vmem:[%s2982_s7 + $0xb8] sm:$0xff] %vm1096_vm2, %v1729_v25  ;;  %v1397_v53 = vsel %vm349_vm1, %v1314_v39, 0.0  ;;  %v1202_v54 = vsel %vm349_vm1, %v567_v47, 0.0  ;;  %v1315_v55 = vmul.f32 %v567_v47, %v567_v47  ;;  %1118 = vst.msk [vmem:[%s2982_s7 + $0xa8] sm:$0xff] %vm1096_vm2, %v924_v50  ;;  %v1206_v2 = vsel %vm349_vm1, %v1663_v40, 0.0 }
 0x129   :  { %760 = vst.msk [vmem:[%s2981_s6 + $0xa8] sm:$0xff] %vm349_vm1, %v567_v47  ;;  %v1398_v56 = vadd.f32 %v1397_v53, %v1396_v46  ;;  %v1203_v57 = vadd.f32 %v1202_v54, %v1201_v44  ;;  %v1403_v11 = vsel %vm349_vm1, %v1317_v60, 0.0 }
 0x12a   :  { %v1399_v61 = vsel %vm349_vm1, %v1315_v55, 0.0 }
 0x12b   :  { %v1205_v62 = vadd.f32 %v1204_v58, %v1203_v57  ;;  %v1400_v63 = vadd.f32 %v1399_v61, %v1398_v56 }
 0x12c   :  { %v1666_v3 = vpop.f32.mrb[24].mxu0  ;;  %v1732_v4 = vpop.f32.mrb[24].mxu1 }
 0x12d   :  { %v1402_v6 = vadd.f32 %v1401_v1, %v1400_v63  ;;  %765 = vst.msk [vmem:[%s2981_s6 + $0xd0] sm:$0xff] %vm349_vm1, %v1666_v3  ;;  %v580_v7 = vpop.f32.mrb[25].mxu0  ;;  %v1207_v8 = vadd.f32 %v1206_v2, %v1205_v62  ;;  %v937_v9 = vpop.f32.mrb[25].mxu1  ;;  %v1320_v42 = vmul.f32 %v1666_v3, %v1666_v3  ;;  %v1212_v14 = vsel %vm349_vm1, %v1666_v3, 0.0 }
 0x12e   :  { %1123 = vst.msk [vmem:[%s2982_s7 + $0xd0] sm:$0xff] %vm1096_vm2, %v1732_v4  ;;  %v1208_v12 = vsel %vm349_vm1, %v580_v7, 0.0  ;;  %v1318_v13 = vmul.f32 %v580_v7, %v580_v7  ;;  %v1667_v15 = vpop.f32.mrb[26].mxu0  ;;  %1121 = vst.msk [vmem:[%s2982_s7 + $0xc0] sm:$0xff] %vm1096_vm2, %v937_v9  ;;  %v1733_v17 = vpop.f32.mrb[26].mxu1 }
 0x12f   :  { %763 = vst.msk [vmem:[%s2981_s6 + $0xc0] sm:$0xff] %vm349_vm1, %v580_v7  ;;  %v1209_v29 = vadd.f32 %v1208_v12, %v1207_v8  ;;  %v1404_v18 = vadd.f32 %v1403_v11, %v1402_v6  ;;  %766 = vst.msk [vmem:[%s2981_s6 + $0xd8] sm:$0xff] %vm349_vm1, %v1667_v15  ;;  %v583_v20 = vpop.f32.mrb[27].mxu0  ;;  %v940_v26 = vpop.f32.mrb[27].mxu1  ;;  %v1321_v21 = vmul.f32 %v1667_v15, %v1667_v15  ;;  %v1409_v37 = vsel %vm349_vm1, %v1320_v42, 0.0 }
 0x130   :  { %1124 = vst.msk [vmem:[%s2982_s7 + $0xd8] sm:$0xff] %vm1096_vm2, %v1733_v17  ;;  %v1405_v35 = vsel %vm349_vm1, %v1318_v13, 0.0  ;;  %v1210_v22 = vsel %vm349_vm1, %v583_v20, 0.0  ;;  %v1319_v23 = vmul.f32 %v583_v20, %v583_v20  ;;  %1122 = vst.msk [vmem:[%s2982_s7 + $0xc8] sm:$0xff] %vm1096_vm2, %v940_v26  ;;  %v1214_v33 = vsel %vm349_vm1, %v1667_v15, 0.0 }
 0x131   :  { %764 = vst.msk [vmem:[%s2981_s6 + $0xc8] sm:$0xff] %vm349_vm1, %v583_v20  ;;  %v1406_v19 = vadd.f32 %v1405_v35, %v1404_v18  ;;  %v1211_v32 = vadd.f32 %v1210_v22, %v1209_v29  ;;  %v1411_v16 = vsel %vm349_vm1, %v1321_v21, 0.0 }
 0x132   :  { %v1407_v36 = vsel %vm349_vm1, %v1319_v23, 0.0 }
 0x133   :  { %v1213_v41 = vadd.f32 %v1212_v14, %v1211_v32  ;;  %v1408_v30 = vadd.f32 %v1407_v36, %v1406_v19 }
 0x134   :  { %v1670_v28 = vpop.f32.mrb[28].mxu0  ;;  %v1736_v48 = vpop.f32.mrb[28].mxu1 }
 0x135   :  { %v1410_v43 = vadd.f32 %v1409_v37, %v1408_v30  ;;  %769 = vst.msk [vmem:[%s2981_s6 + $0xf0] sm:$0xff] %vm349_vm1, %v1670_v28  ;;  %v596_v49 = vpop.f32.mrb[29].mxu0  ;;  %v1215_v59 = vadd.f32 %v1214_v33, %v1213_v41  ;;  %v953_v0 = vpop.f32.mrb[29].mxu1  ;;  %v1324_v38 = vmul.f32 %v1670_v28, %v1670_v28  ;;  %v1220_v47 = vsel %vm349_vm1, %v1670_v28, 0.0 }
 0x136   :  { %1127 = vst.msk [vmem:[%s2982_s7 + $0xf0] sm:$0xff] %vm1096_vm2, %v1736_v48  ;;  %v1216_v24 = vsel %vm349_vm1, %v596_v49, 0.0  ;;  %v1322_v45 = vmul.f32 %v596_v49, %v596_v49  ;;  %v1671_v52 = vpop.f32.mrb[30].mxu0  ;;  %1125 = vst.msk [vmem:[%s2982_s7 + $0xe0] sm:$0xff] %vm1096_vm2, %v953_v0  ;;  %v1737_v5 = vpop.f32.mrb[30].mxu1 }
 0x137   :  { %767 = vst.msk [vmem:[%s2981_s6 + $0xe0] sm:$0xff] %vm349_vm1, %v596_v49  ;;  %v1217_v10 = vadd.f32 %v1216_v24, %v1215_v59  ;;  %v1412_v31 = vadd.f32 %v1411_v16, %v1410_v43  ;;  %770 = vst.msk [vmem:[%s2981_s6 + $0xf8] sm:$0xff] %vm349_vm1, %v1671_v52  ;;  %v599_v27 = vpop.f32.mrb[31].mxu0  ;;  %v956_v34 = vpop.f32.mrb[31].mxu1  ;;  %v1325_v50 = vmul.f32 %v1671_v52, %v1671_v52  ;;  %v1417_v55 = vsel %vm349_vm1, %v1324_v38, 0.0 }
 0x138   :  { %1128 = vst.msk [vmem:[%s2982_s7 + $0xf8] sm:$0xff] %vm1096_vm2, %v1737_v5  ;;  %v1413_v39 = vsel %vm349_vm1, %v1322_v45, 0.0  ;;  %v1218_v40 = vsel %vm349_vm1, %v599_v27, 0.0  ;;  %v1323_v25 = vmul.f32 %v599_v27, %v599_v27  ;;  %1126 = vst.msk [vmem:[%s2982_s7 + $0xe8] sm:$0xff] %vm1096_vm2, %v956_v34  ;;  %v1222_v56 = vsel %vm349_vm1, %v1671_v52, 0.0 }
 0x139   :  { %768 = vst.msk [vmem:[%s2981_s6 + $0xe8] sm:$0xff] %vm349_vm1, %v599_v27  ;;  %v1414_v44 = vadd.f32 %v1413_v39, %v1412_v31  ;;  %v1219_v46 = vadd.f32 %v1218_v40, %v1217_v10  ;;  %v1419_v1 = vsel %vm349_vm1, %v1325_v50, 0.0 }
 0x13a   :  { %v1415_v51 = vsel %vm349_vm1, %v1323_v25, 0.0 }
 0x13b   :  { %v1221_v53 = vadd.f32 %v1220_v47, %v1219_v46  ;;  %v1416_v54 = vadd.f32 %v1415_v51, %v1414_v44 }
 0x13c   :  { %v1674_v57 = vpop.f32.mrb[32].mxu0  ;;  %v1740_v58 = vpop.f32.mrb[32].mxu1 }
 0x13d   :  { %v1418_v60 = vadd.f32 %v1417_v55, %v1416_v54  ;;  %773 = vst.msk [vmem:[%s2981_s6 + $0x110] sm:$0xff] %vm349_vm1, %v1674_v57  ;;  %v612_v61 = vpop.f32.mrb[33].mxu0  ;;  %v1223_v62 = vadd.f32 %v1222_v56, %v1221_v53  ;;  %v969_v63 = vpop.f32.mrb[33].mxu1  ;;  %v1328_v12 = vmul.f32 %v1674_v57, %v1674_v57  ;;  %v1228_v20 = vsel %vm349_vm1, %v1674_v57, 0.0 }
 0x13e   :  { %1131 = vst.msk [vmem:[%s2982_s7 + $0x110] sm:$0xff] %vm1096_vm2, %v1740_v58  ;;  %v1224_v2 = vsel %vm349_vm1, %v612_v61, 0.0  ;;  %v1326_v3 = vmul.f32 %v612_v61, %v612_v61  ;;  %v1675_v4 = vpop.f32.mrb[34].mxu0  ;;  %1129 = vst.msk [vmem:[%s2982_s7 + $0x100] sm:$0xff] %vm1096_vm2, %v969_v63  ;;  %v1741_v6 = vpop.f32.mrb[34].mxu1 }
 0x13f   :  { %771 = vst.msk [vmem:[%s2981_s6 + $0x100] sm:$0xff] %vm349_vm1, %v612_v61  ;;  %v1225_v7 = vadd.f32 %v1224_v2, %v1223_v62  ;;  %v1420_v8 = vadd.f32 %v1419_v1, %v1418_v60  ;;  %774 = vst.msk [vmem:[%s2981_s6 + $0x118] sm:$0xff] %vm349_vm1, %v1675_v4  ;;  %v615_v9 = vpop.f32.mrb[35].mxu0  ;;  %v972_v11 = vpop.f32.mrb[35].mxu1  ;;  %v1329_v26 = vmul.f32 %v1675_v4, %v1675_v4  ;;  %v1425_v23 = vsel %vm349_vm1, %v1328_v12, 0.0 }
 0x140   :  { %1132 = vst.msk [vmem:[%s2982_s7 + $0x118] sm:$0xff] %vm1096_vm2, %v1741_v6  ;;  %v1421_v13 = vsel %vm349_vm1, %v1326_v3, 0.0  ;;  %v1226_v15 = vsel %vm349_vm1, %v615_v9, 0.0  ;;  %v1327_v17 = vmul.f32 %v615_v9, %v615_v9  ;;  %1130 = vst.msk [vmem:[%s2982_s7 + $0x108] sm:$0xff] %vm1096_vm2, %v972_v11  ;;  %v1230_v19 = vsel %vm349_vm1, %v1675_v4, 0.0 }
 0x141   :  { %772 = vst.msk [vmem:[%s2981_s6 + $0x108] sm:$0xff] %vm349_vm1, %v615_v9  ;;  %v1422_v29 = vadd.f32 %v1421_v13, %v1420_v8  ;;  %v1227_v18 = vadd.f32 %v1226_v15, %v1225_v7  ;;  %v1427_v37 = vsel %vm349_vm1, %v1329_v26, 0.0 }
 0x142   :  { %v1423_v42 = vsel %vm349_vm1, %v1327_v17, 0.0 }
 0x143   :  { %v1229_v35 = vadd.f32 %v1228_v20, %v1227_v18  ;;  %v1424_v22 = vadd.f32 %v1423_v42, %v1422_v29 }
 0x144   :  { %v1678_v32 = vpop.f32.mrb[36].mxu0  ;;  %v1744_v14 = vpop.f32.mrb[36].mxu1 }
 0x145   :  { %v1426_v21 = vadd.f32 %v1425_v23, %v1424_v22  ;;  %777 = vst.msk [vmem:[%s2981_s6 + $0x130] sm:$0xff] %vm349_vm1, %v1678_v32  ;;  %v628_v36 = vpop.f32.mrb[37].mxu0  ;;  %v1231_v41 = vadd.f32 %v1230_v19, %v1229_v35  ;;  %v985_v30 = vpop.f32.mrb[37].mxu1  ;;  %v1332_v24 = vmul.f32 %v1678_v32, %v1678_v32  ;;  %v1236_v27 = vsel %vm349_vm1, %v1678_v32, 0.0 }
 0x146   :  { %1135 = vst.msk [vmem:[%s2982_s7 + $0x130] sm:$0xff] %vm1096_vm2, %v1744_v14  ;;  %v1232_v33 = vsel %vm349_vm1, %v628_v36, 0.0  ;;  %v1330_v28 = vmul.f32 %v628_v36, %v628_v36  ;;  %v1679_v48 = vpop.f32.mrb[38].mxu0  ;;  %1133 = vst.msk [vmem:[%s2982_s7 + $0x120] sm:$0xff] %vm1096_vm2, %v985_v30  ;;  %v1745_v43 = vpop.f32.mrb[38].mxu1 }
 0x147   :  { %775 = vst.msk [vmem:[%s2981_s6 + $0x120] sm:$0xff] %vm349_vm1, %v628_v36  ;;  %v1233_v49 = vadd.f32 %v1232_v33, %v1231_v41  ;;  %v1428_v59 = vadd.f32 %v1427_v37, %v1426_v21  ;;  %778 = vst.msk [vmem:[%s2981_s6 + $0x138] sm:$0xff] %vm349_vm1, %v1679_v48  ;;  %v631_v0 = vpop.f32.mrb[39].mxu0  ;;  %v988_v16 = vpop.f32.mrb[39].mxu1  ;;  %v1333_v34 = vmul.f32 %v1679_v48, %v1679_v48  ;;  %v1433_v25 = vsel %vm349_vm1, %v1332_v24, 0.0 }
 0x148   :  { %1136 = vst.msk [vmem:[%s2982_s7 + $0x138] sm:$0xff] %vm1096_vm2, %v1745_v43  ;;  %v1429_v45 = vsel %vm349_vm1, %v1330_v28, 0.0  ;;  %v1234_v52 = vsel %vm349_vm1, %v631_v0, 0.0  ;;  %v1331_v5 = vmul.f32 %v631_v0, %v631_v0  ;;  %1134 = vst.msk [vmem:[%s2982_s7 + $0x128] sm:$0xff] %vm1096_vm2, %v988_v16  ;;  %v1238_v44 = vsel %vm349_vm1, %v1679_v48, 0.0 }
 0x149   :  { %776 = vst.msk [vmem:[%s2981_s6 + $0x128] sm:$0xff] %vm349_vm1, %v631_v0  ;;  %v1430_v10 = vadd.f32 %v1429_v45, %v1428_v59  ;;  %v1235_v31 = vadd.f32 %v1234_v52, %v1233_v49  ;;  %v1435_v55 = vsel %vm349_vm1, %v1333_v34, 0.0 }
 0x14a   :  { %v1431_v38 = vsel %vm349_vm1, %v1331_v5, 0.0 }
 0x14b   :  { %v1237_v39 = vadd.f32 %v1236_v27, %v1235_v31  ;;  %v1432_v40 = vadd.f32 %v1431_v38, %v1430_v10 }
 0x14c   :  { %v1682_v46 = vpop.f32.mrb[40].mxu0  ;;  %v1748_v47 = vpop.f32.mrb[40].mxu1 }
 0x14d   :  { %v1434_v50 = vadd.f32 %v1433_v25, %v1432_v40  ;;  %781 = vst.msk [vmem:[%s2981_s6 + $0x150] sm:$0xff] %vm349_vm1, %v1682_v46  ;;  %v644_v51 = vpop.f32.mrb[41].mxu0  ;;  %v1239_v53 = vadd.f32 %v1238_v44, %v1237_v39  ;;  %v1001_v54 = vpop.f32.mrb[41].mxu1  ;;  %v1336_v2 = vmul.f32 %v1682_v46, %v1682_v46  ;;  %v1244_v9 = vsel %vm349_vm1, %v1682_v46, 0.0 }
 0x14e   :  { %1139 = vst.msk [vmem:[%s2982_s7 + $0x150] sm:$0xff] %vm1096_vm2, %v1748_v47  ;;  %v1240_v56 = vsel %vm349_vm1, %v644_v51, 0.0  ;;  %v1334_v57 = vmul.f32 %v644_v51, %v644_v51  ;;  %v1683_v58 = vpop.f32.mrb[42].mxu0  ;;  %1137 = vst.msk [vmem:[%s2982_s7 + $0x140] sm:$0xff] %vm1096_vm2, %v1001_v54  ;;  %v1749_v60 = vpop.f32.mrb[42].mxu1 }
 0x14f   :  { %779 = vst.msk [vmem:[%s2981_s6 + $0x140] sm:$0xff] %vm349_vm1, %v644_v51  ;;  %v1241_v61 = vadd.f32 %v1240_v56, %v1239_v53  ;;  %v1436_v62 = vadd.f32 %v1435_v55, %v1434_v50  ;;  %782 = vst.msk [vmem:[%s2981_s6 + $0x158] sm:$0xff] %vm349_vm1, %v1683_v58  ;;  %v647_v63 = vpop.f32.mrb[43].mxu0  ;;  %v1004_v1 = vpop.f32.mrb[43].mxu1  ;;  %v1337_v11 = vmul.f32 %v1683_v58, %v1683_v58  ;;  %v1441_v17 = vsel %vm349_vm1, %v1336_v2, 0.0 }
 0x150   :  { %1140 = vst.msk [vmem:[%s2982_s7 + $0x158] sm:$0xff] %vm1096_vm2, %v1749_v60  ;;  %v1437_v3 = vsel %vm349_vm1, %v1334_v57, 0.0  ;;  %v1242_v4 = vsel %vm349_vm1, %v647_v63, 0.0  ;;  %v1335_v6 = vmul.f32 %v647_v63, %v647_v63  ;;  %1138 = vst.msk [vmem:[%s2982_s7 + $0x148] sm:$0xff] %vm1096_vm2, %v1004_v1  ;;  %v1246_v29 = vsel %vm349_vm1, %v1683_v58, 0.0 }
 0x151   :  { %780 = vst.msk [vmem:[%s2981_s6 + $0x148] sm:$0xff] %vm349_vm1, %v647_v63  ;;  %v1438_v7 = vadd.f32 %v1437_v3, %v1436_v62  ;;  %v1243_v8 = vadd.f32 %v1242_v4, %v1241_v61  ;;  %v1443_v23 = vsel %vm349_vm1, %v1337_v11, 0.0 }
 0x152   :  { %v1439_v12 = vsel %vm349_vm1, %v1335_v6, 0.0 }
 0x153   :  { %v1245_v13 = vadd.f32 %v1244_v9, %v1243_v8  ;;  %v1440_v15 = vadd.f32 %v1439_v12, %v1438_v7 }
 0x154   :  { %v1686_v18 = vpop.f32.mrb[44].mxu0  ;;  %v1752_v20 = vpop.f32.mrb[44].mxu1 }
 0x155   :  { %v1442_v26 = vadd.f32 %v1441_v17, %v1440_v15  ;;  %785 = vst.msk [vmem:[%s2981_s6 + $0x170] sm:$0xff] %vm349_vm1, %v1686_v18  ;;  %v660_v42 = vpop.f32.mrb[45].mxu0  ;;  %v1247_v35 = vadd.f32 %v1246_v29, %v1245_v13  ;;  %v1017_v22 = vpop.f32.mrb[45].mxu1  ;;  %v1340_v33 = vmul.f32 %v1686_v18, %v1686_v18  ;;  %v1252_v0 = vsel %vm349_vm1, %v1686_v18, 0.0 }
 0x156   :  { %1143 = vst.msk [vmem:[%s2982_s7 + $0x170] sm:$0xff] %vm1096_vm2, %v1752_v20  ;;  %v1248_v19 = vsel %vm349_vm1, %v660_v42, 0.0  ;;  %v1338_v32 = vmul.f32 %v660_v42, %v660_v42  ;;  %v1687_v14 = vpop.f32.mrb[46].mxu0  ;;  %1141 = vst.msk [vmem:[%s2982_s7 + $0x160] sm:$0xff] %vm1096_vm2, %v1017_v22  ;;  %v1753_v21 = vpop.f32.mrb[46].mxu1 }
 0x157   :  { %783 = vst.msk [vmem:[%s2981_s6 + $0x160] sm:$0xff] %vm349_vm1, %v660_v42  ;;  %v1249_v36 = vadd.f32 %v1248_v19, %v1247_v35  ;;  %v1444_v41 = vadd.f32 %v1443_v23, %v1442_v26  ;;  %786 = vst.msk [vmem:[%s2981_s6 + $0x178] sm:$0xff] %vm349_vm1, %v1687_v14  ;;  %v663_v30 = vpop.f32.mrb[47].mxu0  ;;  %v1020_v37 = vpop.f32.mrb[47].mxu1  ;;  %v1341_v16 = vmul.f32 %v1687_v14, %v1687_v14  ;;  %v1449_v5 = vsel %vm349_vm1, %v1340_v33, 0.0 }
 0x158   :  { %1144 = vst.msk [vmem:[%s2982_s7 + $0x178] sm:$0xff] %vm1096_vm2, %v1753_v21  ;;  %v1445_v28 = vsel %vm349_vm1, %v1338_v32, 0.0  ;;  %v1250_v48 = vsel %vm349_vm1, %v663_v30, 0.0  ;;  %v1339_v43 = vmul.f32 %v663_v30, %v663_v30  ;;  %1142 = vst.msk [vmem:[%s2982_s7 + $0x168] sm:$0xff] %vm1096_vm2, %v1020_v37  ;;  %v1254_v10 = vsel %vm349_vm1, %v1687_v14, 0.0 }
 0x159   :  { %784 = vst.msk [vmem:[%s2981_s6 + $0x168] sm:$0xff] %vm349_vm1, %v663_v30  ;;  %v1446_v49 = vadd.f32 %v1445_v28, %v1444_v41  ;;  %v1251_v59 = vadd.f32 %v1250_v48, %v1249_v36  ;;  %v1451_v25 = vsel %vm349_vm1, %v1341_v16, 0.0 }
 0x15a   :  { %v1447_v24 = vsel %vm349_vm1, %v1339_v43, 0.0 }
 0x15b   :  { %v1253_v45 = vadd.f32 %v1252_v0, %v1251_v59  ;;  %v1448_v52 = vadd.f32 %v1447_v24, %v1446_v49 }
 0x15c   :  { %v1690_v31 = vpop.f32.mrb[48].mxu0  ;;  %v1756_v27 = vpop.f32.mrb[48].mxu1 }
 0x15d   :  { %v1450_v34 = vadd.f32 %v1449_v5, %v1448_v52  ;;  %789 = vst.msk [vmem:[%s2981_s6 + $0x190] sm:$0xff] %vm349_vm1, %v1690_v31  ;;  %v676_v38 = vpop.f32.mrb[49].mxu0  ;;  %v1255_v39 = vadd.f32 %v1254_v10, %v1253_v45  ;;  %v1033_v40 = vpop.f32.mrb[49].mxu1  ;;  %v1344_v56 = vmul.f32 %v1690_v31, %v1690_v31  ;;  %v1260_v63 = vsel %vm349_vm1, %v1690_v31, 0.0 }
 0x15e   :  { %1147 = vst.msk [vmem:[%s2982_s7 + $0x190] sm:$0xff] %vm1096_vm2, %v1756_v27  ;;  %v1256_v44 = vsel %vm349_vm1, %v676_v38, 0.0  ;;  %v1342_v46 = vmul.f32 %v676_v38, %v676_v38  ;;  %v1691_v47 = vpop.f32.mrb[50].mxu0  ;;  %1145 = vst.msk [vmem:[%s2982_s7 + $0x180] sm:$0xff] %vm1096_vm2, %v1033_v40  ;;  %v1757_v50 = vpop.f32.mrb[50].mxu1 }
 0x15f   :  { %787 = vst.msk [vmem:[%s2981_s6 + $0x180] sm:$0xff] %vm349_vm1, %v676_v38  ;;  %v1257_v51 = vadd.f32 %v1256_v44, %v1255_v39  ;;  %v1452_v53 = vadd.f32 %v1451_v25, %v1450_v34  ;;  %790 = vst.msk [vmem:[%s2981_s6 + $0x198] sm:$0xff] %vm349_vm1, %v1691_v47  ;;  %v679_v54 = vpop.f32.mrb[51].mxu0  ;;  %v1036_v55 = vpop.f32.mrb[51].mxu1  ;;  %v1345_v1 = vmul.f32 %v1691_v47, %v1691_v47  ;;  %v1457_v6 = vsel %vm349_vm1, %v1344_v56, 0.0 }
 0x160   :  { %1148 = vst.msk [vmem:[%s2982_s7 + $0x198] sm:$0xff] %vm1096_vm2, %v1757_v50  ;;  %v1453_v57 = vsel %vm349_vm1, %v1342_v46, 0.0  ;;  %v1258_v58 = vsel %vm349_vm1, %v679_v54, 0.0  ;;  %v1343_v60 = vmul.f32 %v679_v54, %v679_v54  ;;  %1146 = vst.msk [vmem:[%s2982_s7 + $0x188] sm:$0xff] %vm1096_vm2, %v1036_v55  ;;  %v1262_v7 = vsel %vm349_vm1, %v1691_v47, 0.0 }
 0x161   :  { %788 = vst.msk [vmem:[%s2981_s6 + $0x188] sm:$0xff] %vm349_vm1, %v679_v54  ;;  %v1454_v61 = vadd.f32 %v1453_v57, %v1452_v53  ;;  %v1259_v62 = vadd.f32 %v1258_v58, %v1257_v51  ;;  %v1459_v17 = vsel %vm349_vm1, %v1345_v1, 0.0 }
 0x162   :  { %v1455_v2 = vsel %vm349_vm1, %v1343_v60, 0.0 }
 0x163   :  { %v1261_v3 = vadd.f32 %v1260_v63, %v1259_v62  ;;  %v1456_v4 = vadd.f32 %v1455_v2, %v1454_v61 }
 0x164   :  { %v1694_v8 = vpop.f32.mrb[52].mxu0  ;;  %v1760_v9 = vpop.f32.mrb[52].mxu1 }
 0x165   :  { %v1458_v11 = vadd.f32 %v1457_v6, %v1456_v4  ;;  %793 = vst.msk [vmem:[%s2981_s6 + $0x1b0] sm:$0xff] %vm349_vm1, %v1694_v8  ;;  %v692_v12 = vpop.f32.mrb[53].mxu0  ;;  %v1263_v13 = vadd.f32 %v1262_v7, %v1261_v3  ;;  %v1049_v15 = vpop.f32.mrb[53].mxu1  ;;  %v1348_v19 = vmul.f32 %v1694_v8, %v1694_v8  ;;  %v1268_v30 = vsel %vm349_vm1, %v1694_v8, 0.0 }
 0x166   :  { %1151 = vst.msk [vmem:[%s2982_s7 + $0x1b0] sm:$0xff] %vm1096_vm2, %v1760_v9  ;;  %v1264_v29 = vsel %vm349_vm1, %v692_v12, 0.0  ;;  %v1346_v18 = vmul.f32 %v692_v12, %v692_v12  ;;  %v1695_v20 = vpop.f32.mrb[54].mxu0  ;;  %1149 = vst.msk [vmem:[%s2982_s7 + $0x1a0] sm:$0xff] %vm1096_vm2, %v1049_v15  ;;  %v1761_v26 = vpop.f32.mrb[54].mxu1 }
 0x167   :  { %791 = vst.msk [vmem:[%s2981_s6 + $0x1a0] sm:$0xff] %vm349_vm1, %v692_v12  ;;  %v1265_v42 = vadd.f32 %v1264_v29, %v1263_v13  ;;  %v1460_v35 = vadd.f32 %v1459_v17, %v1458_v11  ;;  %794 = vst.msk [vmem:[%s2981_s6 + $0x1b8] sm:$0xff] %vm349_vm1, %v1695_v20  ;;  %v695_v22 = vpop.f32.mrb[55].mxu0  ;;  %v1052_v23 = vpop.f32.mrb[55].mxu1  ;;  %v1349_v37 = vmul.f32 %v1695_v20, %v1695_v20  ;;  %v1465_v43 = vsel %vm349_vm1, %v1348_v19, 0.0 }
 0x168   :  { %1152 = vst.msk [vmem:[%s2982_s7 + $0x1b8] sm:$0xff] %vm1096_vm2, %v1761_v26  ;;  %v1461_v32 = vsel %vm349_vm1, %v1346_v18, 0.0  ;;  %v1266_v14 = vsel %vm349_vm1, %v695_v22, 0.0  ;;  %v1347_v21 = vmul.f32 %v695_v22, %v695_v22  ;;  %1150 = vst.msk [vmem:[%s2982_s7 + $0x1a8] sm:$0xff] %vm1096_vm2, %v1052_v23  ;;  %v1270_v49 = vsel %vm349_vm1, %v1695_v20, 0.0 }
 0x169   :  { %792 = vst.msk [vmem:[%s2981_s6 + $0x1a8] sm:$0xff] %vm349_vm1, %v695_v22  ;;  %v1462_v36 = vadd.f32 %v1461_v32, %v1460_v35  ;;  %v1267_v41 = vadd.f32 %v1266_v14, %v1265_v42  ;;  %v1467_v5 = vsel %vm349_vm1, %v1349_v37, 0.0 }
 0x16a   :  { %v1463_v33 = vsel %vm349_vm1, %v1347_v21, 0.0 }
 0x16b   :  { %v1269_v28 = vadd.f32 %v1268_v30, %v1267_v41  ;;  %v1464_v48 = vadd.f32 %v1463_v33, %v1462_v36 }
 0x16c   :  { %v1698_v59 = vpop.f32.mrb[56].mxu0  ;;  %v1764_v0 = vpop.f32.mrb[56].mxu1 }
 0x16d   :  { %v1466_v16 = vadd.f32 %v1465_v43, %v1464_v48  ;;  %797 = vst.msk [vmem:[%s2981_s6 + $0x1d0] sm:$0xff] %vm349_vm1, %v1698_v59  ;;  %v708_v24 = vpop.f32.mrb[57].mxu0  ;;  %v1271_v45 = vadd.f32 %v1270_v49, %v1269_v28  ;;  %v1065_v52 = vpop.f32.mrb[57].mxu1  ;;  %v1352_v44 = vmul.f32 %v1698_v59, %v1698_v59  ;;  %v1276_v54 = vsel %vm349_vm1, %v1698_v59, 0.0 }
 0x16e   :  { %1155 = vst.msk [vmem:[%s2982_s7 + $0x1d0] sm:$0xff] %vm1096_vm2, %v1764_v0  ;;  %v1272_v10 = vsel %vm349_vm1, %v708_v24, 0.0  ;;  %v1350_v31 = vmul.f32 %v708_v24, %v708_v24  ;;  %v1699_v27 = vpop.f32.mrb[58].mxu0  ;;  %1153 = vst.msk [vmem:[%s2982_s7 + $0x1c0] sm:$0xff] %vm1096_vm2, %v1065_v52  ;;  %v1765_v34 = vpop.f32.mrb[58].mxu1 }
 0x16f   :  { %795 = vst.msk [vmem:[%s2981_s6 + $0x1c0] sm:$0xff] %vm349_vm1, %v708_v24  ;;  %v1273_v38 = vadd.f32 %v1272_v10, %v1271_v45  ;;  %v1468_v39 = vadd.f32 %v1467_v5, %v1466_v16  ;;  %798 = vst.msk [vmem:[%s2981_s6 + $0x1d8] sm:$0xff] %vm349_vm1, %v1699_v27  ;;  %v711_v40 = vpop.f32.mrb[59].mxu0  ;;  %v1068_v25 = vpop.f32.mrb[59].mxu1  ;;  %v1353_v55 = vmul.f32 %v1699_v27, %v1699_v27  ;;  %v1473_v60 = vsel %vm349_vm1, %v1352_v44, 0.0 }
 0x170   :  { %1156 = vst.msk [vmem:[%s2982_s7 + $0x1d8] sm:$0xff] %vm1096_vm2, %v1765_v34  ;;  %v1469_v46 = vsel %vm349_vm1, %v1350_v31, 0.0  ;;  %v1274_v47 = vsel %vm349_vm1, %v711_v40, 0.0  ;;  %v1351_v50 = vmul.f32 %v711_v40, %v711_v40  ;;  %1154 = vst.msk [vmem:[%s2982_s7 + $0x1c8] sm:$0xff] %vm1096_vm2, %v1068_v25  ;;  %v1278_v61 = vsel %vm349_vm1, %v1699_v27, 0.0 }
 0x171   :  { %796 = vst.msk [vmem:[%s2981_s6 + $0x1c8] sm:$0xff] %vm349_vm1, %v711_v40  ;;  %v1470_v51 = vadd.f32 %v1469_v46, %v1468_v39  ;;  %v1275_v53 = vadd.f32 %v1274_v47, %v1273_v38  ;;  %v1475_v6 = vsel %vm349_vm1, %v1353_v55, 0.0 }
 0x172   :  { %v1471_v56 = vsel %vm349_vm1, %v1351_v50, 0.0 }
 0x173   :  { %v1277_v57 = vadd.f32 %v1276_v54, %v1275_v53  ;;  %v1472_v58 = vadd.f32 %v1471_v56, %v1470_v51 }
 0x174   :  { %v1702_v62 = vpop.f32.mrb[60].mxu0  ;;  %v1768_v63 = vpop.f32.mrb[60].mxu1 }
 0x175   :  { %v1474_v1 = vadd.f32 %v1473_v60, %v1472_v58  ;;  %801 = vst.msk [vmem:[%s2981_s6 + $0x1f0] sm:$0xff] %vm349_vm1, %v1702_v62  ;;  %v724_v2 = vpop.f32.mrb[61].mxu0  ;;  %v1279_v3 = vadd.f32 %v1278_v61, %v1277_v57  ;;  %v1081_v4 = vpop.f32.mrb[61].mxu1  ;;  %v1356_v29 = vmul.f32 %v1702_v62, %v1702_v62  ;;  %v1284_v22 = vsel %vm349_vm1, %v1702_v62, 0.0 }
 0x176   :  { %1159 = vst.msk [vmem:[%s2982_s7 + $0x1f0] sm:$0xff] %vm1096_vm2, %v1768_v63  ;;  %v1280_v7 = vsel %vm349_vm1, %v724_v2, 0.0  ;;  %v1354_v8 = vmul.f32 %v724_v2, %v724_v2  ;;  %v1703_v9 = vpop.f32.mrb[62].mxu0  ;;  %1157 = vst.msk [vmem:[%s2982_s7 + $0x1e0] sm:$0xff] %vm1096_vm2, %v1081_v4  ;;  %v1769_v11 = vpop.f32.mrb[62].mxu1 }
 0x177   :  { %799 = vst.msk [vmem:[%s2981_s6 + $0x1e0] sm:$0xff] %vm349_vm1, %v724_v2  ;;  %v1281_v12 = vadd.f32 %v1280_v7, %v1279_v3  ;;  %v1476_v13 = vadd.f32 %v1475_v6, %v1474_v1  ;;  %802 = vst.msk [vmem:[%s2981_s6 + $0x1f8] sm:$0xff] %vm349_vm1, %v1703_v9  ;;  %v727_v15 = vpop.f32.mrb[63].mxu0  ;;  %v1084_v17 = vpop.f32.mrb[63].mxu1  ;;  %v1357_v23 = vmul.f32 %v1703_v9, %v1703_v9  ;;  %v1481_v21 = vsel %vm349_vm1, %v1356_v29, 0.0 }
 0x178   :  { %1160 = vst.msk [vmem:[%s2982_s7 + $0x1f8] sm:$0xff] %vm1096_vm2, %v1769_v11  ;;  %v1477_v18 = vsel %vm349_vm1, %v1354_v8, 0.0  ;;  %v1282_v20 = vsel %vm349_vm1, %v727_v15, 0.0  ;;  %v1355_v26 = vmul.f32 %v727_v15, %v727_v15  ;;  %1158 = vst.msk [vmem:[%s2982_s7 + $0x1e8] sm:$0xff] %vm1096_vm2, %v1084_v17  ;;  %v1286_v36 = vsel %vm349_vm1, %v1703_v9, 0.0 }
 0x179   :  { %800 = vst.msk [vmem:[%s2981_s6 + $0x1e8] sm:$0xff] %vm349_vm1, %v727_v15  ;;  %v1478_v42 = vadd.f32 %v1477_v18, %v1476_v13  ;;  %v1283_v35 = vadd.f32 %v1282_v20, %v1281_v12  ;;  %v1483_v37 = vsel %vm349_vm1, %v1357_v23, 0.0 }
 0x17a   :  { %v1479_v19 = vsel %vm349_vm1, %v1355_v26, 0.0 }
 0x17b   :  { %v1285_v32 = vadd.f32 %v1284_v22, %v1283_v35  ;;  %v1480_v14 = vadd.f32 %v1479_v19, %v1478_v42 }
 0x17d   :  { %v1287_v41 = vadd.f32 %v1286_v36, %v1285_v32  ;;  %v1482_v30 = vadd.f32 %v1481_v21, %v1480_v14 }
 0x17f   :  { %v1288_v33 = vrot.slane %v1287_v41, 4  ;;  %v1484_v28 = vadd.f32 %v1483_v37, %v1482_v30 }
 0x181   :  { %v1289_v48 = vadd.f32 %v1288_v33, %v1287_v41  ;;  %v1485_v43 = vrot.slane %v1484_v28, 4 }
 0x183   :  { %v1290_v49 = vrot.slane %v1289_v48, 2  ;;  %v1486_v59 = vadd.f32 %v1485_v43, %v1484_v28 }
 0x185   :  { %v1291_v0 = vadd.f32 %v1290_v49, %v1289_v48  ;;  %v1487_v16 = vrot.slane %v1486_v59, 2 }
 0x187   :  { %v1292_v24 = vrot.slane %v1291_v0, 1  ;;  %v1488_v45 = vadd.f32 %v1487_v16, %v1486_v59 }
 0x189   :  { %v1489_v52 = vrot.slane %v1488_v45, 1  ;;  %v1293_v5 = vadd.f32 %v1292_v24, %v1291_v0 }
 0x18b   :  { %v1490_v10 = vadd.f32 %v1489_v52, %v1488_v45 }
 0x18d   :  { %v1492_v31 = vsel %vm1491_vm3, %v1293_v5, %v1490_v10 }
 0x18e   :  { %1494 = vst.msk [vmem:[%s2983_s8] sm:$0x3] %vm1493_vm4, %v1492_v31 }

// kernel: preact_bottleneck_forward.6
= control target key start
LH: loop header
LB: loop body
LE: loop exit
PB: predicated region body
PF: predicated region fallthrough
CT: control target
= control target key end

     0   :  { %s7163_s21 = smov 0   ;;  %s9182_s0 = inlined_call_operand.vmem [shape: f32[2,16,16,4], index: 0, kind: input, shape index: {}]   ;;  %s9183_s1 = inlined_call_operand.vmem [shape: f32[2,4], index: 1, kind: input, shape index: {}]   ;;  %s9184_s2 = inlined_call_operand.vmem [shape: f32[1,4], index: 2, kind: input, shape index: {}]   ;;  %s9185_s3 = inlined_call_operand.vmem [shape: f32[1,4], index: 3, kind: input, shape index: {}]   ;;  %s9186_s4 = inlined_call_operand.vmem [shape: bf16[9,4,4], index: 4, kind: input, shape index: {}]   ;;  %s9187_s5 = inlined_call_operand.vmem [shape: f32[2,256,4], index: 5, kind: output, shape index: {0}]   ;;  %s9188_s6 = inlined_call_operand.vmem [shape: f32[2,2,4], index: 6, kind: output, shape index: {1}]  }
   0x1 LB: > { %s5868_s22 = sadd.s32 4294967295, %s7125_s21   ;;  %p5872_p0 = scmp.ge.s32.totalorder %s7125_s21, 1  ;;  %s7125_s21 = sphi %s7163_s21, %s17_s21  }
   0x2   : > { %p215_p1 = scmp.lt.s32.totalorder %s7125_s21, 3 }
   0x4   : > { %p216_p2 = pnand %p5872_p0, %p215_p1 }
   0x6   : > { %219 = sbr.rel (%p216_p2) target bundleno = 717 (0x2cd), region = 40 }
   0xd   : > { %v5911_v0 = vld [vmem:[%s9186_s4 + $0x2] sm:$0x3]  ;;  %vm1553_vm0 = vcmask 1041408   ;;  %v6058_v1 = vld [vmem:[%s9186_s4 + $0x8] sm:$0x3]  ;;  %vm425_vm1 = vcmask 27648   ;;  %v319_v31 = vlaneseq }
   0xe   : > { %7008 = vmatprep.subr.msk.bf16.mxu1 %vm1553_vm0, %v5911_v0  ;;  %7012 = vmatprep.subr.msk.bf16.mxu0 %vm1553_vm0, %v6058_v1  ;;  %v1555_v2 = vsel %vm1553_vm0, %v5911_v0, 0  ;;  %v7181_v3 = vsel %vm1553_vm0, %v6058_v1, 0  ;;  %vm428_vm2 = vcmask 24576   ;;  %v7127_v4 = vmov 0   ;;  %v296_v5 = vld [vmem:[%s9183_s1] sm:$0x3] }
   0xf   : > { %9201 = vst [vmem:[#allocation3_spill] sm:$0xff] %v7181_v3  ;;  %6445 = vmatpush3.bf16.msra.mxu1 %v1555_v2  ;;  %6581 = vmatpush3.bf16.msra.mxu0 %v7181_v3  ;;  %426 = vst.msk [vmem:[#allocation2] sm:$0xf] %vm425_vm1, %v7127_v4  ;;  %v299_v6 = vmul.f32 0.001953125, %v296_v5  ;;  %v1050_v8 = vld [vmem:[%s9186_s4] sm:$0x3] }
  0x10   : > { %427 = vst.msk [vmem:[#allocation2 + $0x4] sm:$0xf] %vm425_vm1, %v7127_v4  ;;  %430 = vst.msk [vmem:[#allocation2 + $0xc] sm:$0xf] %vm425_vm1, %v7127_v4  ;;  %v6107_v9 = vld [vmem:[%s9186_s4 + $0xa] sm:$0x3]  ;;  %7009 = vmatprep.subr.msk.bf16.mxu1 %vm1553_vm0, %v1050_v8 }
  0x11   : > { %429 = vst.msk [vmem:[#allocation2 + $0x8] sm:$0x1] %vm428_vm2, %v7127_v4  ;;  %432 = vst.msk [vmem:[#allocation2 + $0x14] sm:$0x1] %vm428_vm2, %v7127_v4  ;;  %v300_v7 = vmul.f32 %v299_v6, %v299_v6  ;;  %7014 = vmatprep.subr.msk.bf16.mxu0 %vm1553_vm0, %v6107_v9  ;;  %vm1067_vm3 = vsmask.f32 3328 }
  0x12   : > { %431 = vst.msk [vmem:[#allocation2 + $0x10] sm:$0xf] %vm425_vm1, %v7127_v4  ;;  %433 = vst.msk [vmem:[#allocation2 + $0x18] sm:$0xf] %vm425_vm1, %v7127_v4  ;;  %vm1068_vm4 = vsmask.f32 7440 }
  0x13   : > { %434 = vst.msk [vmem:[#allocation2 + $0x1c] sm:$0xf] %vm425_vm1, %v7127_v4  ;;  %436 = vst.msk [vmem:[#allocation2 + $0x24] sm:$0xf] %vm425_vm1, %v7127_v4  ;;  %v302_v10 = vrot.slane %v300_v7, 7  ;;  %p249_p3 = scmp.lt.s32.totalorder %s5868_s22, 1 }
  0x14   : > { %435 = vst.msk [vmem:[#allocation2 + $0x20] sm:$0x1] %vm428_vm2, %v7127_v4  ;;  %438 = vst.msk [vmem:[#allocation2 + $0x2c] sm:$0x1] %vm428_vm2, %v7127_v4  ;;  %vm1504_vm6 = vcmask 31744   ;;  %v320_v35 = vshrl.u32 %v319_v31, 7 }
  0x15   : > { %437 = vst.msk [vmem:[#allocation2 + $0x28] sm:$0xf] %vm425_vm1, %v7127_v4  ;;  %439 = vst.msk [vmem:[#allocation2 + $0x30] sm:$0xf] %vm425_vm1, %v7127_v4  ;;  %v304_v19 = vsub.f32 %v299_v6, %v302_v10  ;;  %s9256_s22 = smov (!%p249_p3, %s5868_s22), 1  ;;  %v7289_v53 = vsel %vm1553_vm0, %v1050_v8, 0 }
  0x16   : > { %440 = vst.msk [vmem:[#allocation2 + $0x34] sm:$0xf] %vm425_vm1, %v7127_v4  ;;  %442 = vst.msk [vmem:[#allocation2 + $0x3c] sm:$0xf] %vm425_vm1, %v7127_v4  ;;  %v1018_v11 = vld [vmem:[#allocation2] sm:$0xf] }
  0x17   : > { %441 = vst.msk [vmem:[#allocation2 + $0x38] sm:$0x1] %vm428_vm2, %v7127_v4  ;;  %444 = vst.msk [vmem:[#allocation2 + $0x44] sm:$0x1] %vm428_vm2, %v7127_v4  ;;  %v1019_v12 = vld [vmem:[#allocation2 + $0x4] sm:$0xf] }
  0x18   : > { %443 = vst.msk [vmem:[#allocation2 + $0x40] sm:$0xf] %vm425_vm1, %v7127_v4  ;;  %445 = vst.msk [vmem:[#allocation2 + $0x48] sm:$0xf] %vm425_vm1, %v7127_v4  ;;  %v1051_v13 = vld [vmem:[#allocation2 + $0x8] sm:$0x1] }
  0x19   : > { %446 = vst.msk [vmem:[#allocation2 + $0x4c] sm:$0xf] %vm425_vm1, %v7127_v4  ;;  %448 = vst.msk [vmem:[#allocation2 + $0x54] sm:$0xf] %vm425_vm1, %v7127_v4  ;;  %v1071_v14 = vshrl.u32 %v1018_v11, 16  ;;  %v1074_v15 = vshll.u32 %v1018_v11, 16 }
  0x1a   : > { %447 = vst.msk [vmem:[#allocation2 + $0x50] sm:$0x1] %vm428_vm2, %v7127_v4  ;;  %450 = vst.msk [vmem:[#allocation2 + $0x5c] sm:$0x1] %vm428_vm2, %v7127_v4  ;;  %v1080_v16 = vshll.u32 %v1019_v12, 16  ;;  %v1084_v17 = vshrl.u32 %v1019_v12, 16 }
  0x1b   : > { %449 = vst.msk [vmem:[#allocation2 + $0x58] sm:$0xf] %vm425_vm1, %v7127_v4  ;;  %451 = vst.msk [vmem:[#allocation2 + $0x60] sm:$0xf] %vm425_vm1, %v7127_v4  ;;  %v1090_v18 = vshll.u32 %v1051_v13, 16  ;;  %v1073_v20 = vrot.slane %v1071_v14, 4 }
  0x1c   : > { %452 = vst.msk [vmem:[#allocation2 + $0x64] sm:$0xf] %vm425_vm1, %v7127_v4  ;;  %454 = vst.msk [vmem:[#allocation2 + $0x6c] sm:$0xf] %vm425_vm1, %v7127_v4  ;;  %v1076_v21 = vrot.slane %v1074_v15, 5  ;;  %v1082_v22 = vrot.slane %v1080_v16, 5 }
  0x1d   : > { %453 = vst.msk [vmem:[#allocation2 + $0x68] sm:$0x1] %vm428_vm2, %v7127_v4  ;;  %456 = vst.msk [vmem:[#allocation2 + $0x74] sm:$0x1] %vm428_vm2, %v7127_v4  ;;  %v1086_v23 = vrot.slane %v1084_v17, 4  ;;  %v1092_v27 = vrot.slane %v1090_v18, 5 }
  0x1e   : > { %455 = vst.msk [vmem:[#allocation2 + $0x70] sm:$0xf] %vm425_vm1, %v7127_v4  ;;  %457 = vst.msk [vmem:[#allocation2 + $0x78] sm:$0xf] %vm425_vm1, %v7127_v4  ;;  %v305_v24 = vadd.f32 1e-05, %v304_v19  ;;  %v1077_v25 = vor.u32 %v1076_v21, %v1073_v20 }
  0x1f   : > { %458 = vst.msk [vmem:[#allocation2 + $0x7c] sm:$0xf] %vm425_vm1, %v7127_v4  ;;  %460 = vst.msk [vmem:[#allocation2 + $0x84] sm:$0xf] %vm425_vm1, %v7127_v4  ;;  %v1087_v26 = vor.u32 %v1086_v23, %v1082_v22  ;;  %s6257_s9 = sshll.u32 %s9256_s22, 8  ;;  %v321_v37 = vsub.s32 1, %v320_v35 }
  0x20   : > { %459 = vst.msk [vmem:[#allocation2 + $0x80] sm:$0x1] %vm428_vm2, %v7127_v4  ;;  %462 = vst.msk [vmem:[#allocation2 + $0x8c] sm:$0x1] %vm428_vm2, %v7127_v4  ;;  %7059 = vrsqrt.f32 %v305_v24  ;;  %v1078_v29 = vrot.slane %v1077_v25, 4  ;;  %s7273_s14 = scalar_lea.vmem %s9182_s0, %s6257_s9  ;;  %v358_v52 = vsub.s32 0, %v320_v35  ;;  %s9037_s12 = scalar_lea.vmem %s9187_s5, %s6257_s9 }
  0x21   : > { %461 = vst.msk [vmem:[#allocation2 + $0x88] sm:$0xf] %vm425_vm1, %v7127_v4  ;;  %463 = vst.msk [vmem:[#allocation2 + $0x90] sm:$0xf] %vm425_vm1, %v7127_v4  ;;  %v1088_v30 = vrot.slane %v1087_v26, 4  ;;  %v264_v40 = vld [vmem:[%s7273_s14] sm:$0xff] }
  0x22   : > { %464 = vst.msk [vmem:[#allocation2 + $0x94] sm:$0xf] %vm425_vm1, %v7127_v4  ;;  %466 = vst.msk [vmem:[#allocation2 + $0x9c] sm:$0xf] %vm425_vm1, %v7127_v4  ;;  %v5878_v36 = vld [vmem:[%s9184_s2] ss:$0 sm:$0xff] }
  0x23   : > { %465 = vst.msk [vmem:[#allocation2 + $0x98] sm:$0x1] %vm428_vm2, %v7127_v4  ;;  %468 = vst.msk [vmem:[#allocation2 + $0xa4] sm:$0x1] %vm428_vm2, %v7127_v4  ;;  %v265_v41 = vld [vmem:[%s7273_s14 + $0x8] sm:$0xff]  ;;  %v266_v45 = vld [vmem:[%s7273_s14 + $0x10] sm:$0xff] }
  0x24   : > { %467 = vst.msk [vmem:[#allocation2 + $0xa0] sm:$0xf] %vm425_vm1, %v7127_v4  ;;  %469 = vst.msk [vmem:[#allocation2 + $0xa8] sm:$0xf] %vm425_vm1, %v7127_v4  ;;  %v298_v42 = vld [vmem:[%s9185_s3] sm:$0x1] }
  0x25   : > { %470 = vst.msk [vmem:[#allocation2 + $0xac] sm:$0xf] %vm425_vm1, %v7127_v4  ;;  %472 = vst.msk [vmem:[#allocation2 + $0xb4] sm:$0xf] %vm425_vm1, %v7127_v4  ;;  %v267_v46 = vld [vmem:[%s7273_s14 + $0x18] sm:$0xff]  ;;  %v268_v47 = vld [vmem:[%s7273_s14 + $0x20] sm:$0xff] }
  0x26   : > { %471 = vst.msk [vmem:[#allocation2 + $0xb0] sm:$0x1] %vm428_vm2, %v7127_v4  ;;  %474 = vst.msk [vmem:[#allocation2 + $0xbc] sm:$0x1] %vm428_vm2, %v7127_v4  ;;  %v269_v48 = vld [vmem:[%s7273_s14 + $0x28] sm:$0xff]  ;;  %v270_v49 = vld [vmem:[%s7273_s14 + $0x30] sm:$0xff] }
  0x27   : > { %473 = vst.msk [vmem:[#allocation2 + $0xb8] sm:$0xf] %vm425_vm1, %v7127_v4  ;;  %475 = vst.msk [vmem:[#allocation2 + $0xc0] sm:$0xf] %vm425_vm1, %v7127_v4  ;;  %v271_v50 = vld [vmem:[%s7273_s14 + $0x38] sm:$0xff]  ;;  %v272_v54 = vld [vmem:[%s7273_s14 + $0x40] sm:$0xff] }
  0x28   : > { %476 = vst.msk [vmem:[#allocation2 + $0xc4] sm:$0xf] %vm425_vm1, %v7127_v4  ;;  %478 = vst.msk [vmem:[#allocation2 + $0xcc] sm:$0xf] %vm425_vm1, %v7127_v4  ;;  %v273_v55 = vld [vmem:[%s7273_s14 + $0x48] sm:$0xff]  ;;  %v274_v56 = vld [vmem:[%s7273_s14 + $0x50] sm:$0xff] }
  0x29   : > { %477 = vst.msk [vmem:[#allocation2 + $0xc8] sm:$0x1] %vm428_vm2, %v7127_v4  ;;  %480 = vst.msk [vmem:[#allocation2 + $0xd4] sm:$0x1] %vm428_vm2, %v7127_v4  ;;  %v7298_v60 = vsel %vm1553_vm0, %v6107_v9, 0  ;;  %v275_v61 = vld [vmem:[%s7273_s14 + $0x58] sm:$0xff] }
  0x2a   : > { %479 = vst.msk [vmem:[#allocation2 + $0xd0] sm:$0xf] %vm425_vm1, %v7127_v4  ;;  %vm7251_vm5 = vmor %vm1067_vm3, %vm1068_vm4  ;;  %v7060_v38 = vpop.eup %7059  ;;  %v276_v62 = vld [vmem:[%s7273_s14 + $0x60] sm:$0xff]  ;;  %v277_v63 = vld [vmem:[%s7273_s14 + $0x68] sm:$0xff]  ;;  %vm577_vm7 = vsmask.f32 256 }
  0x2b   : > { %v1083_v32 = vsel %vm7251_vm5, %v1078_v29, %v1082_v22  ;;  %v1093_v33 = vsel %vm7251_vm5, %v1088_v30, %v1092_v27  ;;  %v313_v39 = vmul.f32 %v7060_v38, %v5878_v36  ;;  %vm578_vm8 = vsmask.f32 4368  ;;  %v278_v5 = vld [vmem:[%s7273_s14 + $0x70] sm:$0xff]  ;;  %v280_v7 = vld [vmem:[%s7273_s14 + $0x80] sm:$0xff]  ;;  %vm7366_vm12 = vmand %vm428_vm2, %vm577_vm7  ;;  %s5877_s9 = sshll.u32 %s9256_s22, 1 }
  0x2c   : > { %v5912_v34 = vcombine.low %v1083_v32, %v1093_v33  ;;  %vm902_vm9 = vsmask.f32 7938  ;;  %vm7354_vm10 = vmor %vm577_vm7, %vm578_vm8  ;;  %vm2058_vm13 = vcmask 1042432   ;;  %vm2059_vm14 = vcmask 1046532   ;;  %s262_s15 = scalar_lea.vmem %s9188_s6, %s5877_s9 }
  0x2d   : > { %v315_v43 = vrot.slane %v313_v39, 1  ;;  %v7280_v44 = vrot.slane %v313_v39, %v321_v37  ;;  %vm7360_vm11 = vmand %vm425_vm1, %vm902_vm9 }
  0x2e   : > { %6446 = vmatprep.mubr.msk.bf16.mxu1 %vm1504_vm6, %v5912_v34  ;;  %vm7638_vm15 = vmor %vm2058_vm13, %vm2059_vm14 }
  0x2f   : > { %v317_v51 = vmul.f32 %v315_v43, %v299_v6  ;;  %v323_v57 = vmul.f32 %v7280_v44, %v264_v40  ;;  %v324_v58 = vmul.f32 %v7280_v44, %v265_v41  ;;  %v325_v59 = vmul.f32 %v7280_v44, %v266_v45  ;;  %v279_v6 = vld [vmem:[%s7273_s14 + $0x78] sm:$0xff] }
  0x30   : > { %v326_v1 = vmul.f32 %v7280_v44, %v267_v46  ;;  %v327_v2 = vmul.f32 %v7280_v44, %v268_v47  ;;  %v328_v4 = vmul.f32 %v7280_v44, %v269_v48  ;;  %v329_v8 = vmul.f32 %v7280_v44, %v270_v49 }
  0x31   : > { %v318_v0 = vsub.f32 %v298_v42, %v317_v51  ;;  %v330_v9 = vmul.f32 %v7280_v44, %v271_v50  ;;  %v7312_v10 = vmul.f32 %v7280_v44, %v272_v54  ;;  %v7315_v11 = vmul.f32 %v7280_v44, %v273_v55 }
  0x32   : > { %v7320_v13 = vmul.f32 %v7280_v44, %v274_v56  ;;  %v7323_v14 = vmul.f32 %v7280_v44, %v275_v61  ;;  %v7326_v15 = vmul.f32 %v7280_v44, %v276_v62  ;;  %v7329_v16 = vmul.f32 %v7280_v44, %v277_v63 }
  0x33   : > { %v7317_v12 = vrot.slane %v318_v0, %v358_v52  ;;  %v7332_v17 = vmul.f32 %v7280_v44, %v278_v5  ;;  %v7335_v18 = vmul.f32 %v7280_v44, %v279_v6  ;;  %v7338_v19 = vmul.f32 %v7280_v44, %v280_v7  ;;  %v910_v0 = vld [vmem:[#allocation2 + $0x14] sm:$0x1] }
  0x35   : > { %v361_v20 = vadd.f32 %v7317_v12, %v323_v57  ;;  %v362_v21 = vadd.f32 %v7317_v12, %v324_v58  ;;  %v363_v22 = vadd.f32 %v7317_v12, %v325_v59  ;;  %v364_v23 = vadd.f32 %v7317_v12, %v326_v1  ;;  %v904_v59 = vld [vmem:[#allocation2 + $0xc] sm:$0xf] }
  0x36   : > { %v365_v24 = vadd.f32 %v7317_v12, %v327_v2  ;;  %v366_v25 = vadd.f32 %v7317_v12, %v328_v4  ;;  %v367_v26 = vadd.f32 %v7317_v12, %v329_v8  ;;  %v368_v27 = vadd.f32 %v7317_v12, %v330_v9 }
  0x37   : > { %v393_v29 = vmax.f32 %v361_v20, 0.0  ;;  %v394_v30 = vmax.f32 %v362_v21, 0.0  ;;  %v395_v31 = vmax.f32 %v363_v22, 0.0  ;;  %v396_v32 = vmax.f32 %v364_v23, 0.0  ;;  %v913_v20 = vld [vmem:[#allocation2 + $0x18] sm:$0xf] }
  0x38   : > { %v397_v33 = vmax.f32 %v365_v24, 0.0  ;;  %v398_v34 = vmax.f32 %v366_v25, 0.0  ;;  %v399_v35 = vmax.f32 %v367_v26, 0.0  ;;  %v400_v36 = vmax.f32 %v368_v27, 0.0  ;;  %v917_v21 = vld [vmem:[#allocation2 + $0x20] sm:$0x1] }
  0x39   : > { %v6259_v37 = vpack.c.bf16 %v393_v29, %v393_v29  ;;  %v6260_v38 = vpack.c.bf16 %v394_v30, %v394_v30  ;;  %v6261_v39 = vpack.c.bf16 %v395_v31, %v395_v31  ;;  %v6262_v40 = vpack.c.bf16 %v396_v32, %v396_v32 }
  0x3a   : > { %v6263_v41 = vpack.c.bf16 %v397_v33, %v397_v33  ;;  %v6264_v42 = vpack.c.bf16 %v398_v34, %v398_v34  ;;  %v7348_v43 = vpack.c.bf16 %v399_v35, %v399_v35  ;;  %v7350_v45 = vpack.c.bf16 %v400_v36, %v400_v36  ;;  %v920_v35 = vld [vmem:[#allocation2 + $0x24] sm:$0xf] }
  0x3b   : > { %v581_v46 = vshrl.u32 %v6259_v37, 16  ;;  %v584_v47 = vshll.u32 %v6259_v37, 16  ;;  %v589_v48 = vshrl.u32 %v6260_v38, 16  ;;  %v592_v49 = vshll.u32 %v6260_v38, 16  ;;  %v924_v38 = vld [vmem:[#allocation2 + $0x2c] sm:$0x1] }
  0x3c   : > { %v598_v51 = vshrl.u32 %v6261_v39, 16  ;;  %v601_v52 = vshll.u32 %v6261_v39, 16  ;;  %v606_v54 = vshrl.u32 %v6262_v40, 16  ;;  %v609_v55 = vshll.u32 %v6262_v40, 16 }
  0x3d   : > { %v583_v56 = vrot.slane %v581_v46, 7  ;;  %v591_v57 = vrot.slane %v589_v48, 7  ;;  %v615_v61 = vshrl.u32 %v6263_v41, 16  ;;  %v618_v62 = vshll.u32 %v6263_v41, 16  ;;  %v281_v48 = vld [vmem:[%s7273_s14 + $0x88] sm:$0xff] }
  0x3e   : > { %v600_v1 = vrot.slane %v598_v51, 7  ;;  %v608_v2 = vrot.slane %v606_v54, 7  ;;  %v623_v4 = vshrl.u32 %v6264_v42, 16  ;;  %v626_v5 = vshll.u32 %v6264_v42, 16 }
  0x3f   : > { %v586_v6 = vor.u32 %v584_v47, %v583_v56  ;;  %v587_v7 = vrot.slane %v583_v56, 4  ;;  %v594_v8 = vor.u32 %v592_v49, %v591_v57  ;;  %v596_v9 = vrot.slane %v591_v57, 4  ;;  %v927_v57 = vld [vmem:[#allocation2 + $0x30] sm:$0xf] }
  0x40   : > { %v603_v22 = vor.u32 %v601_v52, %v600_v1  ;;  %v604_v23 = vrot.slane %v600_v1, 4  ;;  %v611_v24 = vor.u32 %v609_v55, %v608_v2  ;;  %v613_v25 = vrot.slane %v608_v2, 4  ;;  %v282_v55 = vld [vmem:[%s7273_s14 + $0x90] sm:$0xff] }
  0x41   : > { %v595_v26 = vsel %vm7354_vm10, %v587_v7, %v594_v8  ;;  %v905_v27 = vsel %vm7360_vm11, %v586_v6, %v904_v59  ;;  %v911_v29 = vsel %vm7366_vm12, %v596_v9, %v910_v0  ;;  %v617_v30 = vrot.slane %v615_v61, 7 }
  0x42   : > { %906 = vst [vmem:[#allocation2 + $0xc] sm:$0xf] %v905_v27  ;;  %907 = vst.msk [vmem:[#allocation2 + $0x10] sm:$0xf] %vm425_vm1, %v595_v26  ;;  %v612_v31 = vsel %vm7354_vm10, %v604_v23, %v611_v24  ;;  %v914_v32 = vsel %vm7360_vm11, %v603_v22, %v913_v20  ;;  %v918_v33 = vsel %vm7366_vm12, %v613_v25, %v917_v21  ;;  %v625_v34 = vrot.slane %v623_v4, 7 }
  0x43   : > { %912 = vst [vmem:[#allocation2 + $0x14] sm:$0x1] %v911_v29  ;;  %915 = vst [vmem:[#allocation2 + $0x18] sm:$0xf] %v914_v32  ;;  %v620_v36 = vor.u32 %v618_v62, %v617_v30  ;;  %v621_v37 = vrot.slane %v617_v30, 4  ;;  %v632_v39 = vshrl.u32 %v7348_v43, 16  ;;  %v369_v52 = vadd.f32 %v7317_v12, %v7312_v10 }
  0x44   : > { %916 = vst.msk [vmem:[#allocation2 + $0x1c] sm:$0xf] %vm425_vm1, %v612_v31  ;;  %919 = vst [vmem:[#allocation2 + $0x20] sm:$0x1] %v918_v33  ;;  %v635_v40 = vshll.u32 %v7348_v43, 16  ;;  %v628_v41 = vor.u32 %v626_v5, %v625_v34  ;;  %v630_v42 = vrot.slane %v625_v34, 4  ;;  %v370_v54 = vadd.f32 %v7317_v12, %v7315_v11 }
  0x45   : > { %v640_v46 = vshrl.u32 %v7350_v45, 16  ;;  %v643_v47 = vshll.u32 %v7350_v45, 16  ;;  %v921_v49 = vsel %vm7360_vm11, %v620_v36, %v920_v35  ;;  %v7391_v51 = vrot.slane %v632_v39, 7 }
  0x46   : > { %v629_v43 = vsel %vm7354_vm10, %v621_v37, %v628_v41  ;;  %922 = vst [vmem:[#allocation2 + $0x24] sm:$0xf] %v921_v49  ;;  %v925_v45 = vsel %vm7366_vm12, %v630_v42, %v924_v38  ;;  %v7406_v59 = vadd.f32 %v7317_v12, %v7320_v13  ;;  %v401_v11 = vmax.f32 %v369_v52, 0.0 }
  0x47   : > { %v7402_v56 = vrot.slane %v640_v46, 7  ;;  %923 = vst.msk [vmem:[#allocation2 + $0x28] sm:$0xf] %vm425_vm1, %v629_v43  ;;  %926 = vst [vmem:[#allocation2 + $0x2c] sm:$0x1] %v925_v45  ;;  %v637_v10 = vor.u32 %v635_v40, %v7391_v51  ;;  %v402_v61 = vmax.f32 %v370_v54, 0.0  ;;  %v7411_v62 = vmul.f32 %v7280_v44, %v281_v48 }
  0x48   : > { %v638_v0 = vrot.slane %v7391_v51, 4  ;;  %v403_v2 = vmax.f32 %v7406_v59, 0.0  ;;  %v7417_v4 = vmul.f32 %v7280_v44, %v282_v55  ;;  %v7424_v9 = vpack.c.bf16 %v401_v11, %v401_v11 }
  0x49   : > { %v647_v1 = vrot.slane %v7402_v56, 4  ;;  %v1020_v13 = vld [vmem:[#allocation2 + $0xc] sm:$0xf]  ;;  %v1021_v5 = vld [vmem:[#allocation2 + $0x10] sm:$0xf]  ;;  %v7420_v7 = vor.u32 %v643_v47, %v7402_v56  ;;  %v928_v8 = vsel %vm7360_vm11, %v637_v10, %v927_v57  ;;  %v7428_v20 = vadd.f32 %v7317_v12, %v7323_v14 }
  0x4a   : > { %v1052_v6 = vld [vmem:[#allocation2 + $0x14] sm:$0x1]  ;;  %v1095_v21 = vshrl.u32 %v1020_v13, 16  ;;  %v1098_v22 = vshll.u32 %v1020_v13, 16  ;;  %v1104_v23 = vshll.u32 %v1021_v5, 16  ;;  %v1108_v24 = vshrl.u32 %v1021_v5, 16 }
  0x4b   : > { %v2825_v25 = vld [vmem:[#allocation2 + $0xc] sm:$0xf]  ;;  %929 = vst [vmem:[#allocation2 + $0x30] sm:$0xf] %v928_v8  ;;  %v1114_v26 = vshll.u32 %v1052_v6, 16  ;;  %v7432_v30 = vpack.c.bf16 %v402_v61, %v402_v61  ;;  %v7436_v31 = vadd.f32 %v7317_v12, %v7326_v15  ;;  %v649_v56 = vshrl.u32 %v7424_v9, 16 }
  0x4c   : > { %v7430_v27 = vld [vmem:[#allocation2 + $0x10] sm:$0xf]  ;;  %v2874_v29 = vshrl.u32 %v2825_v25, 16  ;;  %v1097_v32 = vrot.slane %v1095_v21, 4  ;;  %v1100_v33 = vrot.slane %v1098_v22, 5  ;;  %v1106_v14 = vrot.slane %v1104_v23, 5 }
  0x4d   : > { %v1110_v34 = vrot.slane %v1108_v24, 4  ;;  %v7438_v35 = vld [vmem:[#allocation2 + $0x14] sm:$0x1]  ;;  %v1116_v36 = vrot.slane %v1114_v26, 5  ;;  %v2877_v38 = vshll.u32 %v2825_v25, 16  ;;  %v2883_v39 = vshll.u32 %v7430_v27, 16 }
  0x4e   : > { %v2876_v37 = vrot.slane %v2874_v29, 4  ;;  %v1101_v40 = vor.u32 %v1100_v33, %v1097_v32  ;;  %v2887_v42 = vshrl.u32 %v7430_v27, 16  ;;  %v2893_v46 = vshll.u32 %v7438_v35, 16  ;;  %v2828_v47 = vld [vmem:[#allocation2 + $0x18] sm:$0xf] }
  0x4f   : > { %v1111_v41 = vor.u32 %v1110_v34, %v1106_v14  ;;  %v7443_v15 = vld [vmem:[#allocation2 + $0x1c] sm:$0xf]  ;;  %v2879_v48 = vrot.slane %v2877_v38, 5  ;;  %v2885_v49 = vrot.slane %v2883_v39, 5  ;;  %v3617_v52 = vrot.slane %v7430_v27, 5 }
  0x50   : > { %v3620_v54 = vrot.slane %v7438_v35, 5  ;;  %v1102_v55 = vrot.slane %v1101_v40, 4  ;;  %v2889_v45 = vrot.slane %v2887_v42, 4  ;;  %v2895_v57 = vrot.slane %v2893_v46, 5  ;;  %v7447_v11 = vld [vmem:[#allocation2 + $0x20] sm:$0x1] }
  0x51   : > { %v1112_v43 = vrot.slane %v1111_v41, 4  ;;  %v2880_v10 = vor.u32 %v2879_v48, %v2876_v37  ;;  %v2898_v61 = vshrl.u32 %v2828_v47, 16  ;;  %v2901_v13 = vshll.u32 %v2828_v47, 16  ;;  %v1022_v29 = vld [vmem:[#allocation2 + $0x18] sm:$0xf] }
  0x52   : > { %v2907_v5 = vshll.u32 %v7443_v15, 16  ;;  %v1107_v6 = vsel %vm7251_vm5, %v1102_v55, %v1106_v14  ;;  %v2890_v21 = vor.u32 %v2889_v45, %v2885_v49  ;;  %v2911_v22 = vshrl.u32 %v7443_v15, 16  ;;  %v1023_v40 = vld [vmem:[#allocation2 + $0x1c] sm:$0xf]  ;;  %v1053_v47 = vld [vmem:[#allocation2 + $0x20] sm:$0x1] }
  0x53   : > { %v1117_v8 = vsel %vm7251_vm5, %v1112_v43, %v1116_v36  ;;  %v2881_v24 = vrot.slane %v2880_v10, 4  ;;  %v2900_v25 = vrot.slane %v2898_v61, 4  ;;  %v2903_v26 = vrot.slane %v2901_v13, 5  ;;  %v1024_v55 = vld [vmem:[#allocation2 + $0x24] sm:$0xf] }
  0x54   : > { %v5913_v23 = vcombine.low %v1107_v6, %v1117_v8  ;;  %v2891_v32 = vrot.slane %v2890_v21, 4  ;;  %v2909_v33 = vrot.slane %v2907_v5, 5  ;;  %v2913_v34 = vrot.slane %v2911_v22, 4  ;;  %v1025_v8 = vld [vmem:[#allocation2 + $0x28] sm:$0xf] }
  0x55   : > { %v2917_v37 = vshll.u32 %v7447_v11, 16  ;;  %v2886_v14 = vsel %vm7251_vm5, %v2881_v24, %v2885_v49  ;;  %v2904_v38 = vor.u32 %v2903_v26, %v2900_v25  ;;  %v3624_v36 = vrot.slane %v7443_v15, 5  ;;  %v1054_v22 = vld [vmem:[#allocation2 + $0x2c] sm:$0x1]  ;;  %v959_v27 = vld [vmem:[#allocation2 + $0x68] sm:$0x1] }
  0x56   : > { %6447 = vmatmul.mubr.msk.bf16.vlgmr.msra.gmra.mrb[0].mxu1 %vm1504_vm6, %v5913_v23  ;;  %v3627_v39 = vrot.slane %v7447_v11, 5  ;;  %v2896_v41 = vsel %vm7251_vm5, %v2891_v32, %v2895_v57  ;;  %v2914_v42 = vor.u32 %v2913_v34, %v2909_v33  ;;  %v1119_v48 = vshrl.u32 %v1022_v29, 16  ;;  %v2831_v32 = vld [vmem:[#allocation2 + $0x24] sm:$0xf] }
  0x57   : > { %6479 = vmatpush3.bf16.msra.mxu1 %v7289_v53  ;;  %v2919_v46 = vrot.slane %v2917_v37, 5  ;;  %v6059_v43 = vcombine.low %v2886_v14, %v2896_v41  ;;  %v2905_v45 = vrot.slane %v2904_v38, 4  ;;  %v7466_v49 = vrot.slane %v3624_v36, 4 }
  0x58   : > { %v1122_v10 = vshll.u32 %v1022_v29, 16  ;;  %v2915_v61 = vrot.slane %v2914_v42, 4  ;;  %v1121_v13 = vrot.slane %v1119_v48, 4  ;;  %v1128_v5 = vshll.u32 %v1023_v40, 16 }
  0x59   : > { %v1132_v6 = vshrl.u32 %v1023_v40, 16  ;;  %6582 = vmatprep.mubr.msk.bf16.mxu0 %vm1504_vm6, %v6059_v43  ;;  %v2910_v53 = vsel %vm7251_vm5, %v2905_v45, %v2909_v33  ;;  %v1138_v21 = vshll.u32 %v1053_v47, 16  ;;  %v1143_v23 = vshrl.u32 %v1024_v55, 16  ;;  %v7476_v33 = vld [vmem:[%s9186_s4 + $0xc] sm:$0x3] }
  0x5a   : > { %v1124_v57 = vrot.slane %v1122_v10, 5  ;;  %v2920_v24 = vsel %vm7251_vm5, %v2915_v61, %v2919_v46  ;;  %v1130_v25 = vrot.slane %v1128_v5, 5  ;;  %v1146_v29 = vshll.u32 %v1024_v55, 16  ;;  %v7479_v43 = vld [vmem:[#allocation2 + $0x28] sm:$0xf] }
  0x5b   : > { %v1134_v26 = vrot.slane %v1132_v6, 4  ;;  %v6060_v34 = vcombine.low %v2910_v53, %v2920_v24  ;;  %v1140_v14 = vrot.slane %v1138_v21, 5  ;;  %v1145_v38 = vrot.slane %v1143_v23, 4  ;;  %v7482_v6 = vld [vmem:[#allocation2 + $0x2c] sm:$0x1] }
  0x5c   : > { %v1125_v37 = vor.u32 %v1124_v57, %v1121_v13  ;;  %v1148_v41 = vrot.slane %v1146_v29, 5  ;;  %v1152_v42 = vshll.u32 %v1025_v8, 16  ;;  %v1156_v48 = vshrl.u32 %v1025_v8, 16  ;;  %v931_v8 = vld [vmem:[#allocation2 + $0x38] sm:$0x1] }
  0x5d   : > { %v1135_v40 = vor.u32 %v1134_v26, %v1130_v25  ;;  %6583 = vmatmul.mubr.msk.bf16.vlgmr.msra.gmra.mrb[0].mxu0 %vm1504_vm6, %v6060_v34  ;;  %v1162_v47 = vshll.u32 %v1054_v22, 16  ;;  %v2922_v55 = vshrl.u32 %v2831_v32, 16  ;;  %v2925_v45 = vshll.u32 %v2831_v32, 16  ;;  %v2834_v22 = vld [vmem:[#allocation2 + $0x30] sm:$0xf] }
  0x5e   : > { %v1126_v46 = vrot.slane %v1125_v37, 4  ;;  %6615 = vmatpush3.bf16.msra.mxu0 %v7298_v60  ;;  %v1149_v61 = vor.u32 %v1148_v41, %v1145_v38  ;;  %v1154_v13 = vrot.slane %v1152_v42, 5  ;;  %v1158_v5 = vrot.slane %v1156_v48, 4  ;;  %v1026_v24 = vld [vmem:[#allocation2 + $0x30] sm:$0xf] }
  0x5f   : > { %v1136_v10 = vrot.slane %v1135_v40, 4  ;;  %v1164_v57 = vrot.slane %v1162_v47, 5  ;;  %v2924_v21 = vrot.slane %v2922_v55, 4  ;;  %v2927_v23 = vrot.slane %v2925_v45, 5  ;;  %7015 = vmatprep.subr.msk.bf16.mxu0 %vm1553_vm0, %v7476_v33 }
  0x60   : > { %v1131_v53 = vsel %vm7251_vm5, %v1126_v46, %v1130_v25  ;;  %v1150_v26 = vrot.slane %v1149_v61, 4  ;;  %v1159_v29 = vor.u32 %v1158_v5, %v1154_v13  ;;  %v2931_v32 = vshll.u32 %v7479_v43, 16 }
  0x61   : > { %v1141_v60 = vsel %vm7251_vm5, %v1136_v10, %v1140_v14  ;;  %v2928_v37 = vor.u32 %v2927_v23, %v2924_v21  ;;  %v2935_v38 = vshrl.u32 %v7479_v43, 16  ;;  %v2941_v25 = vshll.u32 %v7482_v6, 16 }
  0x62   : > { %v5914_v34 = vcombine.low %v1131_v53, %v1141_v60  ;;  %v1155_v40 = vsel %vm7251_vm5, %v1150_v26, %v1154_v13  ;;  %v1160_v41 = vrot.slane %v1159_v29, 4  ;;  %v2933_v42 = vrot.slane %v2931_v32, 5 }
  0x63   : > { %v646_v14 = vsel %vm7354_vm10, %v638_v0, %v7420_v7  ;;  %v2929_v48 = vrot.slane %v2928_v37, 4  ;;  %v2937_v46 = vrot.slane %v2935_v38, 4  ;;  %v2943_v47 = vrot.slane %v2941_v25, 5 }
  0x64   : > { %6450 = vmatprep.mubr.msk.bf16.mxu1 %vm1504_vm6, %v5914_v34  ;;  %930 = vst.msk [vmem:[#allocation2 + $0x34] sm:$0xf] %vm425_vm1, %v646_v14  ;;  %v932_v55 = vsel %vm7366_vm12, %v647_v1, %v931_v8  ;;  %v1165_v45 = vsel %vm7251_vm5, %v1160_v41, %v1164_v57  ;;  %v2946_v51 = vshrl.u32 %v2834_v22, 16  ;;  %v2949_v10 = vshll.u32 %v2834_v22, 16 }
  0x65   : > { %933 = vst [vmem:[#allocation2 + $0x38] sm:$0x1] %v932_v55  ;;  %v1167_v61 = vshrl.u32 %v1026_v24, 16  ;;  %v5915_v0 = vcombine.low %v1155_v40, %v1165_v45  ;;  %v2934_v7 = vsel %vm7251_vm5, %v2929_v48, %v2933_v42  ;;  %v2938_v13 = vor.u32 %v2937_v46, %v2933_v42  ;;  %v934_v48 = vld [vmem:[#allocation2 + $0x3c] sm:$0xf] }
  0x66   : > { %v1170_v5 = vshll.u32 %v1026_v24, 16  ;;  %v2948_v53 = vrot.slane %v2946_v51, 4  ;;  %v2951_v21 = vrot.slane %v2949_v10, 5  ;;  %v652_v57 = vshll.u32 %v7424_v9, 16  ;;  %v938_v45 = vld [vmem:[#allocation2 + $0x44] sm:$0x1] }
  0x67   : > { %v1169_v23 = vrot.slane %v1167_v61, 4  ;;  %6451 = vmatmul.mubr.msk.bf16.gmra.mrb[4].mxu1 %vm1504_vm6, %v5915_v0  ;;  %v2939_v1 = vrot.slane %v2938_v13, 4  ;;  %v657_v22 = vshrl.u32 %v7432_v30, 16  ;;  %v651_v26 = vrot.slane %v649_v56, 7 }
  0x68   : > { %v1172_v8 = vrot.slane %v1170_v5, 5  ;;  %v2952_v60 = vor.u32 %v2951_v21, %v2948_v53  ;;  %v660_v29 = vshll.u32 %v7432_v30, 16  ;;  %v404_v32 = vmax.f32 %v7428_v20, 0.0 }
  0x69   : > { %v2944_v24 = vsel %vm7251_vm5, %v2939_v1, %v2943_v47  ;;  %v659_v37 = vrot.slane %v657_v22, 7  ;;  %v6269_v38 = vpack.c.bf16 %v403_v2, %v403_v2  ;;  %v654_v42 = vor.u32 %v652_v57, %v651_v26 }
  0x6a   : > { %v1173_v34 = vor.u32 %v1172_v8, %v1169_v23  ;;  %v6061_v25 = vcombine.low %v2934_v7, %v2944_v24  ;;  %v2953_v9 = vrot.slane %v2952_v60, 4  ;;  %v655_v14 = vrot.slane %v651_v26, 4 }
  0x6b   : > { %v7521_v40 = vld [vmem:[#allocation2 + $0x34] sm:$0xf]  ;;  %v662_v55 = vor.u32 %v660_v29, %v659_v37  ;;  %v6270_v59 = vpack.c.bf16 %v404_v32, %v404_v32  ;;  %v664_v56 = vrot.slane %v659_v37, 4  ;;  %v935_v22 = vsel %vm7360_vm11, %v654_v42, %v934_v48 }
  0x6c   : > { %v1027_v41 = vld [vmem:[#allocation2 + $0x34] sm:$0xf]  ;;  %v7523_v30 = vld [vmem:[#allocation2 + $0x38] sm:$0x1]  ;;  %v2955_v20 = vshll.u32 %v7521_v40, 16  ;;  %v2959_v46 = vshrl.u32 %v7521_v40, 16  ;;  %6586 = vmatprep.mubr.msk.bf16.mxu0 %vm1504_vm6, %v6061_v25 }
  0x6d   : > { %v1055_v47 = vld [vmem:[#allocation2 + $0x38] sm:$0x1]  ;;  %v2965_v2 = vshll.u32 %v7523_v30, 16  ;;  %v1174_v51 = vrot.slane %v1173_v34, 4  ;;  %v1176_v10 = vshll.u32 %v1027_v41, 16  ;;  %v1180_v61 = vshrl.u32 %v1027_v41, 16 }
  0x6e   : > { %v2957_v0 = vrot.slane %v2955_v20, 5  ;;  %v2961_v7 = vrot.slane %v2959_v46, 4  ;;  %v1186_v13 = vshll.u32 %v1055_v47, 16  ;;  %v663_v5 = vsel %vm7354_vm10, %v655_v14, %v662_v55  ;;  %936 = vst [vmem:[#allocation2 + $0x3c] sm:$0xf] %v935_v22 }
  0x6f   : > { %v2967_v53 = vrot.slane %v2965_v2, 5  ;;  %v1178_v21 = vrot.slane %v1176_v10, 5  ;;  %v1182_v23 = vrot.slane %v1180_v61, 4  ;;  %937 = vst.msk [vmem:[#allocation2 + $0x40] sm:$0xf] %vm425_vm1, %v663_v5  ;;  %v939_v29 = vsel %vm7366_vm12, %v664_v56, %v938_v45 }
  0x70   : > { %v2958_v1 = vsel %vm7251_vm5, %v2953_v9, %v2957_v0  ;;  %v2962_v8 = vor.u32 %v2961_v7, %v2957_v0  ;;  %v1188_v57 = vrot.slane %v1186_v13, 5  ;;  %v666_v32 = vshrl.u32 %v6269_v38, 16  ;;  %940 = vst [vmem:[#allocation2 + $0x44] sm:$0x1] %v939_v29 }
  0x71   : > { %v1179_v60 = vsel %vm7251_vm5, %v1174_v51, %v1178_v21  ;;  %v1183_v26 = vor.u32 %v1182_v23, %v1178_v21  ;;  %v669_v34 = vshll.u32 %v6269_v38, 16  ;;  %v674_v37 = vshrl.u32 %v6270_v59, 16 }
  0x72   : > { %v2963_v24 = vrot.slane %v2962_v8, 4  ;;  %v677_v25 = vshll.u32 %v6270_v59, 16  ;;  %v668_v41 = vrot.slane %v666_v32, 7  ;;  %v374_v14 = vadd.f32 %v7317_v12, %v7329_v16  ;;  %v941_v59 = vld [vmem:[#allocation2 + $0x48] sm:$0xf] }
  0x73   : > { %v1184_v9 = vrot.slane %v1183_v26, 4  ;;  %v405_v42 = vmax.f32 %v7436_v31, 0.0  ;;  %v676_v20 = vrot.slane %v674_v37, 7  ;;  %v7547_v46 = vadd.f32 %v7317_v12, %v7332_v17  ;;  %v945_v31 = vld [vmem:[#allocation2 + $0x50] sm:$0x1] }
  0x74   : > { %v2968_v48 = vsel %vm7251_vm5, %v2963_v24, %v2967_v53  ;;  %v7551_v38 = vadd.f32 %v7317_v12, %v7335_v18  ;;  %v671_v45 = vor.u32 %v669_v34, %v668_v41  ;;  %v672_v16 = vrot.slane %v668_v41, 4 }
  0x75   : > { %v6062_v47 = vcombine.low %v2958_v1, %v2968_v48  ;;  %v1189_v55 = vsel %vm7251_vm5, %v1184_v9, %v1188_v57  ;;  %v679_v61 = vor.u32 %v677_v25, %v676_v20  ;;  %v681_v0 = vrot.slane %v676_v20, 4  ;;  %v1028_v53 = vld [vmem:[#allocation2 + $0x3c] sm:$0xf] }
  0x76   : > { %v5916_v2 = vcombine.low %v1179_v60, %v1189_v55  ;;  %v1029_v51 = vld [vmem:[#allocation2 + $0x40] sm:$0xf]  ;;  %v406_v17 = vmax.f32 %v374_v14, 0.0  ;;  %v2837_v21 = vld [vmem:[#allocation2 + $0x3c] sm:$0xf]  ;;  %v942_v56 = vsel %vm7360_vm11, %v671_v45, %v941_v59  ;;  %v7567_v8 = vpack.c.bf16 %v405_v42, %v405_v42 }
  0x77   : > { %v7555_v10 = vld [vmem:[#allocation2 + $0x40] sm:$0xf]  ;;  %6587 = vmatmul.mubr.msk.bf16.gmra.mrb[4].mxu0 %vm1504_vm6, %v6062_v47  ;;  %v1200_v7 = vshll.u32 %v1029_v51, 16  ;;  %v1204_v18 = vshrl.u32 %v1029_v51, 16  ;;  %v680_v23 = vsel %vm7354_vm10, %v672_v16, %v679_v61  ;;  %v946_v1 = vsel %vm7366_vm12, %v681_v0, %v945_v31  ;;  %v1056_v57 = vld [vmem:[#allocation2 + $0x44] sm:$0x1] }
  0x78   : > { %v2979_v13 = vshll.u32 %v7555_v10, 16  ;;  %v2983_v5 = vshrl.u32 %v7555_v10, 16  ;;  %6454 = vmatprep.mubr.msk.bf16.mxu1 %vm1504_vm6, %v5916_v2  ;;  %v1191_v22 = vshrl.u32 %v1028_v53, 16  ;;  %v1194_v60 = vshll.u32 %v1028_v53, 16  ;;  %943 = vst [vmem:[#allocation2 + $0x48] sm:$0xf] %v942_v56 }
  0x79   : > { %v1202_v26 = vrot.slane %v1200_v7, 5  ;;  %v1206_v29 = vrot.slane %v1204_v18, 4  ;;  %944 = vst.msk [vmem:[#allocation2 + $0x4c] sm:$0xf] %vm425_vm1, %v680_v23  ;;  %947 = vst [vmem:[#allocation2 + $0x50] sm:$0x1] %v946_v1  ;;  %v7573_v31 = vpack.c.bf16 %v406_v17, %v406_v17  ;;  %v7586_v17 = vadd.f32 %v7317_v12, %v7338_v19 }
  0x7a   : > { %v1210_v32 = vshll.u32 %v1056_v57, 16  ;;  %v7570_v24 = vld [vmem:[#allocation2 + $0x44] sm:$0x1]  ;;  %v2970_v34 = vshrl.u32 %v2837_v21, 16  ;;  %v2973_v37 = vshll.u32 %v2837_v21, 16  ;;  %v2981_v25 = vrot.slane %v2979_v13, 5 }
  0x7b   : > { %v1193_v9 = vrot.slane %v1191_v22, 4  ;;  %v1196_v41 = vrot.slane %v1194_v60, 5  ;;  %v1207_v14 = vor.u32 %v1206_v29, %v1202_v26  ;;  %v2985_v42 = vrot.slane %v2983_v5, 4 }
  0x7c   : > { %v1212_v48 = vrot.slane %v1210_v32, 5  ;;  %v2972_v20 = vrot.slane %v2970_v34, 4  ;;  %v2975_v47 = vrot.slane %v2973_v37, 5  ;;  %v2989_v55 = vshll.u32 %v7570_v24, 16 }
  0x7d   : > { %v1197_v45 = vor.u32 %v1196_v41, %v1193_v9  ;;  %v1208_v16 = vrot.slane %v1207_v14, 4  ;;  %v2986_v59 = vor.u32 %v2985_v42, %v2981_v25  ;;  %v683_v61 = vshrl.u32 %v7567_v8, 16 }
  0x7e   : > { %v2976_v2 = vor.u32 %v2975_v47, %v2972_v20  ;;  %v2991_v51 = vrot.slane %v2989_v55, 5  ;;  %v686_v0 = vshll.u32 %v7567_v8, 16  ;;  %v691_v5 = vshrl.u32 %v7573_v31, 16 }
  0x7f   : > { %v1198_v7 = vrot.slane %v1197_v45, 4  ;;  %v1213_v18 = vsel %vm7251_vm5, %v1208_v16, %v1212_v48  ;;  %v2987_v13 = vrot.slane %v2986_v59, 4  ;;  %v2840_v21 = vld [vmem:[#allocation2 + $0x48] sm:$0xf]  ;;  %v7582_v56 = vrot.slane %v683_v61, 7 }
  0x80   : > { %v2977_v53 = vrot.slane %v2976_v2, 4  ;;  %v7580_v23 = vld [vmem:[#allocation2 + $0x4c] sm:$0xf]  ;;  %v7590_v1 = vadd.f32 %v7317_v12, %v7411_v62  ;;  %v7596_v22 = vld [vmem:[#allocation2 + $0x50] sm:$0x1]  ;;  %v2994_v60 = vshrl.u32 %v2840_v21, 16 }
  0x81   : > { %v1203_v8 = vsel %vm7251_vm5, %v1198_v7, %v1202_v26  ;;  %v2992_v57 = vsel %vm7251_vm5, %v2987_v13, %v2991_v51  ;;  %v2997_v29 = vshll.u32 %v2840_v21, 16  ;;  %v1030_v32 = vld [vmem:[#allocation2 + $0x48] sm:$0xf]  ;;  %v3003_v37 = vshll.u32 %v7580_v23, 16  ;;  %v1031_v9 = vld [vmem:[#allocation2 + $0x4c] sm:$0xf] }
  0x82   : > { %v5917_v34 = vcombine.low %v1203_v8, %v1213_v18  ;;  %v2982_v19 = vsel %vm7251_vm5, %v2977_v53, %v2981_v25  ;;  %v3007_v62 = vshrl.u32 %v7580_v23, 16  ;;  %v2996_v14 = vrot.slane %v2994_v60, 4  ;;  %v1057_v48 = vld [vmem:[#allocation2 + $0x50] sm:$0x1]  ;;  %v5992_v25 = vld [vmem:[%s9186_s4 + $0x4] sm:$0x3] }
  0x83   : > { %v6063_v41 = vcombine.low %v2982_v19, %v2992_v57  ;;  %v2999_v26 = vrot.slane %v2997_v29, 5  ;;  %v3013_v42 = vshll.u32 %v7596_v22, 16  ;;  %v3005_v20 = vrot.slane %v3003_v37, 5  ;;  %v948_v61 = vld [vmem:[#allocation2 + $0x54] sm:$0xf]  ;;  %7010 = vmatprep.subr.msk.bf16.mxu1 %vm1553_vm0, %v5992_v25 }
  0x84   : > { %6455 = vmatmul.mubr.msk.bf16.gmra.mrb[8].mxu1 %vm1504_vm6, %v5917_v34  ;;  %v3009_v47 = vrot.slane %v3007_v62, 4  ;;  %v1215_v55 = vshrl.u32 %v1030_v32, 16  ;;  %v1218_v45 = vshll.u32 %v1030_v32, 16  ;;  %v1224_v2 = vshll.u32 %v1031_v9, 16 }
  0x85   : > { %6590 = vmatprep.mubr.msk.bf16.mxu0 %vm1504_vm6, %v6063_v41  ;;  %v3000_v16 = vor.u32 %v2999_v26, %v2996_v14  ;;  %v3015_v59 = vrot.slane %v3013_v42, 5  ;;  %v1228_v51 = vshrl.u32 %v1031_v9, 16  ;;  %v1234_v53 = vshll.u32 %v1057_v48, 16 }
  0x86   : > { %v3010_v7 = vor.u32 %v3009_v47, %v3005_v20  ;;  %v1217_v18 = vrot.slane %v1215_v55, 4  ;;  %v1220_v13 = vrot.slane %v1218_v45, 5  ;;  %v1226_v8 = vrot.slane %v1224_v2, 5 }
  0x87   : > { %v3001_v21 = vrot.slane %v3000_v16, 4  ;;  %v1230_v57 = vrot.slane %v1228_v51, 4  ;;  %v688_v60 = vor.u32 %v686_v0, %v7582_v56  ;;  %v1236_v34 = vrot.slane %v1234_v53, 5  ;;  %v952_v0 = vld [vmem:[#allocation2 + $0x5c] sm:$0x1] }
  0x88   : > { %v3011_v29 = vrot.slane %v3010_v7, 4  ;;  %v1221_v32 = vor.u32 %v1220_v13, %v1217_v18  ;;  %v689_v19 = vrot.slane %v7582_v56, 4  ;;  %v693_v9 = vrot.slane %v691_v5, 7  ;;  %v3551_v16 = vld [vmem:[#allocation2 + $0xc] sm:$0xe] }
  0x89   : > { %v3006_v37 = vsel %vm7251_vm5, %v3001_v21, %v3005_v20  ;;  %v1231_v62 = vor.u32 %v1230_v57, %v1226_v8  ;;  %v694_v41 = vshll.u32 %v7573_v31, 16  ;;  %v949_v42 = vsel %vm7360_vm11, %v688_v60, %v948_v61  ;;  %v3552_v61 = vld [vmem:[#allocation2 + $0x18] sm:$0xe] }
  0x8a   : > { %v3016_v14 = vsel %vm7251_vm5, %v3011_v29, %v3015_v59  ;;  %v1222_v26 = vrot.slane %v1221_v32, 4  ;;  %v407_v48 = vmax.f32 %v7547_v46, 0.0  ;;  %v698_v45 = vrot.slane %v693_v9, 4  ;;  %950 = vst [vmem:[#allocation2 + $0x54] sm:$0xf] %v949_v42 }
  0x8b   : > { %v6064_v47 = vcombine.low %v3006_v37, %v3016_v14  ;;  %v1232_v55 = vrot.slane %v1231_v62, 4  ;;  %v696_v56 = vor.u32 %v694_v41, %v693_v9  ;;  %v408_v31 = vmax.f32 %v7551_v38, 0.0 }
  0x8c   : > { %v1227_v5 = vsel %vm7251_vm5, %v1222_v26, %v1226_v8  ;;  %v6273_v20 = vpack.c.bf16 %v407_v48, %v407_v48  ;;  %v409_v25 = vmax.f32 %v7586_v17, 0.0  ;;  %v953_v2 = vsel %vm7366_vm12, %v698_v45, %v952_v0 }
  0x8d   : > { %6591 = vmatmul.mubr.msk.bf16.gmra.mrb[8].mxu0 %vm1504_vm6, %v6064_v47  ;;  %v1237_v59 = vsel %vm7251_vm5, %v1232_v55, %v1236_v34  ;;  %v697_v46 = vsel %vm7354_vm10, %v689_v19, %v696_v56  ;;  %v410_v51 = vmax.f32 %v7590_v1, 0.0  ;;  %954 = vst [vmem:[#allocation2 + $0x5c] sm:$0x1] %v953_v2  ;;  %v6274_v38 = vpack.c.bf16 %v408_v31, %v408_v31  ;;  %v955_v34 = vld [vmem:[#allocation2 + $0x60] sm:$0xf] }
  0x8e   : > { %v5918_v7 = vcombine.low %v1227_v5, %v1237_v59  ;;  %951 = vst.msk [vmem:[#allocation2 + $0x58] sm:$0xf] %vm425_vm1, %v697_v46  ;;  %v700_v17 = vshrl.u32 %v6273_v20, 16  ;;  %v703_v18 = vshll.u32 %v6273_v20, 16  ;;  %v7632_v13 = vpack.c.bf16 %v409_v25, %v409_v25 }
  0x8f   : > { %v7634_v53 = vpack.c.bf16 %v410_v51, %v410_v51  ;;  %v6091_v8 = vrot.slane %v3551_v16, 9  ;;  %v3619_v1 = vrot.slane %v3617_v52, 4  ;;  %v708_v60 = vshrl.u32 %v6274_v38, 16 }
  0x90   : > { %6458 = vmatprep.mubr.msk.bf16.mxu1 %vm1504_vm6, %v5918_v7  ;;  %v702_v57 = vrot.slane %v700_v17, 7  ;;  %v711_v29 = vshll.u32 %v6274_v38, 16  ;;  %v6092_v32 = vrot.slane %v3552_v61, 9  ;;  %v717_v19 = vshrl.u32 %v7632_v13, 16 }
  0x91   : > { %v720_v37 = vshll.u32 %v7632_v13, 16  ;;  %v725_v62 = vshrl.u32 %v7634_v53, 16  ;;  %v728_v9 = vshll.u32 %v7634_v53, 16  ;;  %v1032_v41 = vld [vmem:[#allocation2 + $0x54] sm:$0xf]  ;;  %v710_v0 = vrot.slane %v708_v60, 7 }
  0x92   : > { %v2843_v14 = vld [vmem:[#allocation2 + $0x54] sm:$0xf]  ;;  %v705_v26 = vor.u32 %v703_v18, %v702_v57  ;;  %v706_v42 = vrot.slane %v702_v57, 4  ;;  %v7653_v48 = vsel %vm7638_vm15, %v6091_v8, %v3617_v52  ;;  %v1239_v47 = vshrl.u32 %v1032_v41, 16 }
  0x93   : > { %v1242_v55 = vshll.u32 %v1032_v41, 16  ;;  %v3018_v56 = vshrl.u32 %v2843_v14, 16  ;;  %v3021_v45 = vshll.u32 %v2843_v14, 16  ;;  %v713_v5 = vor.u32 %v711_v29, %v710_v0 }
  0x94   : > { %v715_v31 = vrot.slane %v710_v0, 4  ;;  %v956_v20 = vsel %vm7360_vm11, %v705_v26, %v955_v34  ;;  %v7657_v25 = vrot.slane %v717_v19, 7  ;;  %v1058_v59 = vld [vmem:[#allocation2 + $0x5c] sm:$0x1]  ;;  %v1241_v46 = vrot.slane %v1239_v47, 4 }
  0x95   : > { %v1033_v16 = vld [vmem:[#allocation2 + $0x58] sm:$0xf]  ;;  %v1244_v2 = vrot.slane %v1242_v55, 5  ;;  %957 = vst [vmem:[#allocation2 + $0x60] sm:$0xf] %v956_v20  ;;  %v7663_v52 = vsel %vm7638_vm15, %v3619_v1, %v3620_v54  ;;  %v7669_v51 = vsel %vm7638_vm15, %v6092_v32, %v3624_v36  ;;  %v1258_v38 = vshll.u32 %v1058_v59, 16 }
  0x96   : > { %v1248_v61 = vshll.u32 %v1033_v16, 16  ;;  %v1252_v7 = vshrl.u32 %v1033_v16, 16  ;;  %v7671_v17 = vld [vmem:[#allocation2 + $0x58] sm:$0xf]  ;;  %v3020_v18 = vrot.slane %v3018_v56, 4  ;;  %v3023_v35 = vrot.slane %v3021_v45, 5 }
  0x97   : > { %v1245_v13 = vor.u32 %v1244_v2, %v1241_v46  ;;  %v7673_v8 = vld [vmem:[#allocation2 + $0x5c] sm:$0x1]  ;;  %v3027_v57 = vshll.u32 %v7671_v17, 16  ;;  %v3031_v54 = vshrl.u32 %v7671_v17, 16  ;;  %v1260_v60 = vrot.slane %v1258_v38, 5 }
  0x98   : > { %v1250_v1 = vrot.slane %v1248_v61, 5  ;;  %v1254_v15 = vrot.slane %v1252_v7, 4  ;;  %v3037_v36 = vshll.u32 %v7673_v8, 16  ;;  %v3024_v32 = vor.u32 %v3023_v35, %v3020_v18  ;;  %v962_v61 = vld [vmem:[#allocation2 + $0x6c] sm:$0xf]  ;;  %v283_v35 = vld [vmem:[%s7273_s14 + $0x98] sm:$0xff] }
  0x99   : > { %v1246_v29 = vrot.slane %v1245_v13, 4  ;;  %v3029_v34 = vrot.slane %v3027_v57, 5  ;;  %v3033_v19 = vrot.slane %v3031_v54, 4  ;;  %v714_v26 = vsel %vm7354_vm10, %v706_v42, %v713_v5 }
  0x9a   : > { %v1255_v41 = vor.u32 %v1254_v15, %v1250_v1  ;;  %v3039_v14 = vrot.slane %v3037_v36, 5  ;;  %v960_v0 = vsel %vm7366_vm12, %v715_v31, %v959_v27  ;;  %v3025_v55 = vrot.slane %v3024_v32, 4  ;;  %958 = vst.msk [vmem:[#allocation2 + $0x64] sm:$0xf] %vm425_vm1, %v714_v26 }
  0x9b   : > { %v1251_v47 = vsel %vm7251_vm5, %v1246_v29, %v1250_v1  ;;  %v3034_v56 = vor.u32 %v3033_v19, %v3029_v34  ;;  %961 = vst [vmem:[#allocation2 + $0x68] sm:$0x1] %v960_v0  ;;  %v722_v45 = vor.u32 %v720_v37, %v7657_v25  ;;  %v723_v46 = vrot.slane %v7657_v25, 4  ;;  %v966_v29 = vld [vmem:[#allocation2 + $0x74] sm:$0x1] }
  0x9c   : > { %v1256_v20 = vrot.slane %v1255_v41, 4  ;;  %v2846_v16 = vld [vmem:[#allocation2 + $0x60] sm:$0xf]  ;;  %v6108_v42 = vcombine.low %v7653_v48, %v7663_v52  ;;  %v7694_v5 = vsel %vm7638_vm15, %v7466_v49, %v3627_v39  ;;  %v3030_v31 = vsel %vm7251_vm5, %v3025_v55, %v3029_v34 }
  0x9d   : > { %v1034_v59 = vld [vmem:[#allocation2 + $0x60] sm:$0xf]  ;;  %v3035_v37 = vrot.slane %v3034_v56, 4  ;;  %v3042_v2 = vshrl.u32 %v2846_v16, 16  ;;  %v3045_v27 = vshll.u32 %v2846_v16, 16  ;;  %v727_v11 = vrot.slane %v725_v62, 7 }
  0x9e   : > { %v1261_v25 = vsel %vm7251_vm5, %v1256_v20, %v1260_v60  ;;  %v1263_v7 = vshrl.u32 %v1034_v59, 16  ;;  %v1266_v38 = vshll.u32 %v1034_v59, 16  ;;  %v963_v62 = vsel %vm7360_vm11, %v722_v45, %v962_v61  ;;  %v285_v61 = vld [vmem:[%s7273_s14 + $0xa8] sm:$0xff] }
  0x9f   : > { %v5919_v18 = vcombine.low %v1251_v47, %v1261_v25  ;;  %v3040_v39 = vsel %vm7251_vm5, %v3035_v37, %v3039_v14  ;;  %v3044_v49 = vrot.slane %v3042_v2, 4  ;;  %v3047_v13 = vrot.slane %v3045_v27, 5  ;;  %964 = vst [vmem:[#allocation2 + $0x6c] sm:$0xf] %v963_v62  ;;  %v7730_v25 = vld [vmem:[#allocation2 + $0x24] sm:$0xe] }
  0xa0   : > { %v6065_v57 = vcombine.low %v3030_v31, %v3040_v39  ;;  %v1265_v54 = vrot.slane %v1263_v7, 4  ;;  %v1268_v1 = vrot.slane %v1266_v38, 5  ;;  %v730_v15 = vor.u32 %v728_v9, %v727_v11  ;;  %v284_v31 = vld [vmem:[%s7273_s14 + $0xa0] sm:$0xff] }
  0xa1   : > { %6459 = vmatmul.mubr.msk.bf16.gmra.mrb[12].mxu1 %vm1504_vm6, %v5919_v18  ;;  %v3048_v60 = vor.u32 %v3047_v13, %v3044_v49  ;;  %v732_v36 = vrot.slane %v727_v11, 4  ;;  %v6109_v32 = vcombine.low %v7669_v51, %v7694_v5  ;;  %v7713_v34 = vld [vmem:[#allocation2 + $0x64] sm:$0xf]  ;;  %v342_v14 = vmul.f32 %v7280_v44, %v283_v35 }
  0xa2   : > { %6594 = vmatprep.mubr.msk.bf16.mxu0 %vm1504_vm6, %v6065_v57  ;;  %v7715_v19 = vld [vmem:[#allocation2 + $0x68] sm:$0x1]  ;;  %v1035_v41 = vld [vmem:[#allocation2 + $0x64] sm:$0xf]  ;;  %v1269_v53 = vor.u32 %v1268_v1, %v1265_v54  ;;  %v731_v9 = vsel %vm7354_vm10, %v723_v46, %v730_v15  ;;  %v379_v26 = vadd.f32 %v7317_v12, %v7417_v4  ;;  %v3051_v47 = vshll.u32 %v7713_v34, 16 }
  0xa3   : > { %v3049_v0 = vrot.slane %v3048_v60, 4  ;;  %v3055_v55 = vshrl.u32 %v7713_v34, 16  ;;  %v3061_v56 = vshll.u32 %v7715_v19, 16  ;;  %v1059_v45 = vld [vmem:[#allocation2 + $0x68] sm:$0x1]  ;;  %v1272_v16 = vshll.u32 %v1035_v41, 16 }
  0xa4   : > { %965 = vst.msk [vmem:[#allocation2 + $0x70] sm:$0xf] %vm425_vm1, %v731_v9  ;;  %v1270_v20 = vrot.slane %v1269_v53, 4  ;;  %v1276_v59 = vshrl.u32 %v1035_v41, 16  ;;  %v1282_v46 = vshll.u32 %v1059_v45, 16  ;;  %v3053_v37 = vrot.slane %v3051_v47, 5 }
  0xa5   : > { %v3057_v2 = vrot.slane %v3055_v55, 4  ;;  %v3063_v27 = vrot.slane %v3061_v56, 5  ;;  %v967_v4 = vsel %vm7366_vm12, %v732_v36, %v966_v29  ;;  %v1274_v7 = vrot.slane %v1272_v16, 5 }
  0xa6   : > { %v1278_v38 = vrot.slane %v1276_v59, 4  ;;  %v1284_v11 = vrot.slane %v1282_v46, 5  ;;  %968 = vst [vmem:[#allocation2 + $0x74] sm:$0x1] %v967_v4  ;;  %v7734_v18 = vsel %vm1553_vm0, %v7476_v33, 0  ;;  %v3054_v39 = vsel %vm7251_vm5, %v3049_v0, %v3053_v37 }
  0xa7   : > { %v3058_v49 = vor.u32 %v3057_v2, %v3053_v37  ;;  %v380_v13 = vadd.f32 %v7317_v12, %v342_v14  ;;  %v411_v35 = vmax.f32 %v379_v26, 0.0  ;;  %v1275_v57 = vsel %vm7251_vm5, %v1270_v20, %v1274_v7  ;;  %v1036_v36 = vld [vmem:[#allocation2 + $0x6c] sm:$0xf] }
  0xa8   : > { %v1279_v54 = vor.u32 %v1278_v38, %v1274_v7  ;;  %v343_v1 = vmul.f32 %v7280_v44, %v284_v31  ;;  %v344_v15 = vmul.f32 %v7280_v44, %v285_v61  ;;  %v6093_v29 = vrot.slane %v7730_v25, 9  ;;  %v969_v38 = vld [vmem:[#allocation2 + $0x78] sm:$0xf] }
  0xa9   : > { %v3059_v60 = vrot.slane %v3058_v49, 4  ;;  %v412_v62 = vmax.f32 %v380_v13, 0.0  ;;  %v6277_v33 = vpack.c.bf16 %v411_v35, %v411_v35  ;;  %v1287_v9 = vshrl.u32 %v1036_v36, 16 }
  0xaa   : > { %v1280_v41 = vrot.slane %v1279_v54, 4  ;;  %v1290_v0 = vshll.u32 %v1036_v36, 16  ;;  %v381_v14 = vadd.f32 %v7317_v12, %v343_v1  ;;  %v382_v13 = vadd.f32 %v7317_v12, %v344_v15 }
  0xab   : > { %v1037_v53 = vld [vmem:[#allocation2 + $0x70] sm:$0xf]  ;;  %v3064_v26 = vsel %vm7251_vm5, %v3059_v60, %v3063_v27  ;;  %v6278_v56 = vpack.c.bf16 %v412_v62, %v412_v62  ;;  %v1289_v16 = vrot.slane %v1287_v9, 4  ;;  %v734_v4 = vshrl.u32 %v6277_v33, 16 }
  0xac   : > { %v1296_v47 = vshll.u32 %v1037_v53, 16  ;;  %v1300_v55 = vshrl.u32 %v1037_v53, 16  ;;  %v6066_v45 = vcombine.low %v3054_v39, %v3064_v26  ;;  %v1285_v20 = vsel %vm7251_vm5, %v1280_v41, %v1284_v11  ;;  %v3554_v26 = vld [vmem:[#allocation2 + $0x30] sm:$0xe] }
  0xad   : > { %v1292_v59 = vrot.slane %v1290_v0, 5  ;;  %v5920_v46 = vcombine.low %v1275_v57, %v1285_v20  ;;  %v1060_v31 = vld [vmem:[#allocation2 + $0x74] sm:$0x1]  ;;  %v737_v7 = vshll.u32 %v6277_v33, 16  ;;  %v742_v27 = vshrl.u32 %v6278_v56, 16 }
  0xae   : > { %v1298_v37 = vrot.slane %v1296_v47, 5  ;;  %v1302_v2 = vrot.slane %v1300_v55, 4  ;;  %6595 = vmatmul.mubr.msk.bf16.gmra.mrb[12].mxu0 %vm1504_vm6, %v6066_v45  ;;  %v1306_v25 = vshll.u32 %v1060_v31, 16  ;;  %v736_v11 = vrot.slane %v734_v4, 7  ;;  %v973_v33 = vld [vmem:[#allocation2 + $0x80] sm:$0x1] }
  0xaf   : > { %v1293_v61 = vor.u32 %v1292_v59, %v1289_v16  ;;  %6462 = vmatprep.mubr.msk.bf16.mxu1 %vm1504_vm6, %v5920_v46  ;;  %6616 = vmatprep.mubr.msk.bf16.mxu0 %vm1504_vm6, %v6108_v42  ;;  %v745_v49 = vshll.u32 %v6278_v56, 16  ;;  %v744_v54 = vrot.slane %v742_v27, 7  ;;  %v413_v1 = vmax.f32 %v381_v14, 0.0  ;;  %v286_v20 = vld [vmem:[%s7273_s14 + $0xb0] sm:$0xff]  ;;  %v287_v31 = vld [vmem:[%s7273_s14 + $0xb8] sm:$0xff] }
  0xb0   : > { %v1303_v39 = vor.u32 %v1302_v2, %v1298_v37  ;;  %v1308_v57 = vrot.slane %v1306_v25, 5  ;;  %v739_v36 = vor.u32 %v737_v7, %v736_v11  ;;  %v740_v62 = vrot.slane %v736_v11, 4  ;;  %v976_v7 = vld [vmem:[#allocation2 + $0x84] sm:$0xf] }
  0xb1   : > { %v1294_v35 = vrot.slane %v1293_v61, 4  ;;  %v414_v41 = vmax.f32 %v382_v13, 0.0  ;;  %v747_v48 = vor.u32 %v745_v49, %v744_v54  ;;  %v749_v52 = vrot.slane %v744_v54, 4  ;;  %v288_v49 = vld [vmem:[%s7273_s14 + $0xc0] sm:$0xff]  ;;  %v289_v13 = vld [vmem:[%s7273_s14 + $0xc8] sm:$0xff] }
  0xb2   : > { %v1304_v60 = vrot.slane %v1303_v39, 4  ;;  %v6279_v42 = vpack.c.bf16 %v413_v1, %v413_v1  ;;  %v970_v15 = vsel %vm7360_vm11, %v739_v36, %v969_v38  ;;  %v3631_v14 = vrot.slane %v7479_v43, 5  ;;  %v980_v39 = vld [vmem:[#allocation2 + $0x8c] sm:$0x1] }
  0xb3   : > { %v1299_v53 = vsel %vm7251_vm5, %v1294_v35, %v1298_v37  ;;  %v6280_v0 = vpack.c.bf16 %v414_v41, %v414_v41  ;;  %v748_v55 = vsel %vm7354_vm10, %v740_v62, %v747_v48  ;;  %971 = vst [vmem:[#allocation2 + $0x78] sm:$0xf] %v970_v15  ;;  %v974_v56 = vsel %vm7366_vm12, %v749_v52, %v973_v33  ;;  %v7775_v37 = vld [vmem:[%s9186_s4 + $0xe] sm:$0x3] }
  0xb4   : > { %v1309_v9 = vsel %vm7251_vm5, %v1304_v60, %v1308_v57  ;;  %v751_v45 = vshrl.u32 %v6279_v42, 16  ;;  %972 = vst.msk [vmem:[#allocation2 + $0x7c] sm:$0xf] %vm425_vm1, %v748_v55  ;;  %975 = vst [vmem:[#allocation2 + $0x80] sm:$0x1] %v974_v56  ;;  %v754_v16 = vshll.u32 %v6279_v42, 16  ;;  %v3632_v43 = vsel %vm7638_vm15, %v6093_v29, %v3631_v14 }
  0xb5   : > { %v5921_v47 = vcombine.low %v1299_v53, %v1309_v9  ;;  %v759_v59 = vshrl.u32 %v6280_v0, 16  ;;  %v762_v46 = vshll.u32 %v6280_v0, 16  ;;  %v3633_v4 = vrot.slane %v3631_v14, 4  ;;  %v290_v57 = vld [vmem:[%s7273_s14 + $0xd0] sm:$0xff] }
  0xb6   : > { %6617 = vmatmul.mubr.msk.bf16.vlgmr.msra.gmra.mrb[0].mxu0 %vm1504_vm6, %v6109_v32  ;;  %v753_v2 = vrot.slane %v751_v45, 7  ;;  %v3634_v61 = vrot.slane %v7482_v6, 5  ;;  %v6094_v29 = vrot.slane %v3554_v26, 9  ;;  %v3638_v27 = vrot.slane %v7521_v40, 5 }
  0xb7   : > { %6463 = vmatmul.mubr.msk.bf16.gmra.mrb[16].mxu1 %vm1504_vm6, %v5921_v47  ;;  %6649 = vmatpush3.bf16.msra.mxu0 %v7734_v18  ;;  %v761_v25 = vrot.slane %v759_v59, 7  ;;  %v3641_v38 = vrot.slane %v7523_v30, 5  ;;  %v345_v51 = vmul.f32 %v7280_v44, %v286_v20  ;;  %v346_v6 = vmul.f32 %v7280_v44, %v287_v31 }
  0xb8   : > { %v756_v5 = vor.u32 %v754_v16, %v753_v2  ;;  %v757_v32 = vrot.slane %v753_v2, 4  ;;  %v3635_v11 = vsel %vm7638_vm15, %v3633_v4, %v3634_v61  ;;  %7016 = vmatprep.subr.msk.bf16.mxu0 %vm1553_vm0, %v7775_v37  ;;  %v3639_v30 = vsel %vm7638_vm15, %v6094_v29, %v3638_v27 }
  0xb9   : > { %v764_v18 = vor.u32 %v762_v46, %v761_v25  ;;  %v766_v35 = vrot.slane %v761_v25, 4  ;;  %v6110_v40 = vcombine.low %v3632_v43, %v3635_v11  ;;  %v3640_v1 = vrot.slane %v3638_v27, 4  ;;  %v3555_v46 = vld [vmem:[#allocation2 + $0x3c] sm:$0xe] }
  0xba   : > { %v977_v54 = vsel %vm7360_vm11, %v756_v5, %v976_v7  ;;  %v383_v60 = vadd.f32 %v7317_v12, %v345_v51  ;;  %v384_v36 = vadd.f32 %v7317_v12, %v346_v6  ;;  %v7801_v62 = vld [vmem:[#allocation2 + $0x78] sm:$0xf]  ;;  %v347_v53 = vmul.f32 %v7280_v44, %v288_v49 }
  0xbb   : > { %v765_v33 = vsel %vm7354_vm10, %v757_v32, %v764_v18  ;;  %978 = vst [vmem:[#allocation2 + $0x84] sm:$0xf] %v977_v54  ;;  %v981_v41 = vsel %vm7366_vm12, %v766_v35, %v980_v39  ;;  %6620 = vmatprep.mubr.msk.bf16.mxu0 %vm1504_vm6, %v6110_v40  ;;  %v348_v48 = vmul.f32 %v7280_v44, %v289_v13  ;;  %v7810_v52 = vld [vmem:[#allocation2 + $0x7c] sm:$0xf]  ;;  %v1061_v42 = vld [vmem:[#allocation2 + $0x80] sm:$0x1] }
  0xbc   : > { %v1311_v9 = vshrl.u32 %v7801_v62, 16  ;;  %v1314_v15 = vshll.u32 %v7801_v62, 16  ;;  %979 = vst.msk [vmem:[#allocation2 + $0x88] sm:$0xf] %vm425_vm1, %v765_v33  ;;  %982 = vst [vmem:[#allocation2 + $0x8c] sm:$0x1] %v981_v41  ;;  %v3642_v0 = vsel %vm7638_vm15, %v3640_v1, %v3641_v38  ;;  %v7818_v14 = vmul.f32 %v7280_v44, %v290_v57 }
  0xbd   : > { %v1320_v26 = vshll.u32 %v7810_v52, 16  ;;  %v1324_v47 = vshrl.u32 %v7810_v52, 16  ;;  %v1330_v55 = vshll.u32 %v1061_v42, 16  ;;  %v6111_v56 = vcombine.low %v3639_v30, %v3642_v0  ;;  %v983_v0 = vld [vmem:[#allocation2 + $0x90] sm:$0xf] }
  0xbe   : > { %v1313_v45 = vrot.slane %v1311_v9, 4  ;;  %v1316_v20 = vrot.slane %v1314_v15, 5  ;;  %v415_v16 = vmax.f32 %v383_v60, 0.0  ;;  %v416_v59 = vmax.f32 %v384_v36, 0.0 }
  0xbf   : > { %v1322_v43 = vrot.slane %v1320_v26, 5  ;;  %v1326_v31 = vrot.slane %v1324_v47, 4  ;;  %v1332_v2 = vrot.slane %v1330_v55, 5  ;;  %6621 = vmatmul.mubr.msk.bf16.gmra.mrb[4].mxu0 %vm1504_vm6, %v6111_v56  ;;  %v385_v4 = vadd.f32 %v7317_v12, %v347_v53 }
  0xc0   : > { %v1317_v61 = vor.u32 %v1316_v20, %v1313_v45  ;;  %v6281_v29 = vpack.c.bf16 %v415_v16, %v415_v16  ;;  %v6282_v25 = vpack.c.bf16 %v416_v59, %v416_v59  ;;  %v386_v7 = vadd.f32 %v7317_v12, %v348_v48  ;;  %v987_v45 = vld [vmem:[#allocation2 + $0x98] sm:$0x1] }
  0xc1   : > { %v1327_v27 = vor.u32 %v1326_v31, %v1322_v43  ;;  %v417_v38 = vmax.f32 %v385_v4, 0.0  ;;  %v6095_v51 = vrot.slane %v3555_v46, 9  ;;  %v3645_v5 = vrot.slane %v7555_v10, 5 }
  0xc2   : > { %v1318_v32 = vrot.slane %v1317_v61, 4  ;;  %v7826_v39 = vld [vmem:[#allocation2 + $0x84] sm:$0xf]  ;;  %v768_v11 = vshrl.u32 %v6281_v29, 16  ;;  %v771_v6 = vshll.u32 %v6281_v29, 16  ;;  %v776_v49 = vshrl.u32 %v6282_v25, 16 }
  0xc3   : > { %v1328_v13 = vrot.slane %v1327_v27, 4  ;;  %v7828_v18 = vld [vmem:[#allocation2 + $0x88] sm:$0xf]  ;;  %v1062_v35 = vld [vmem:[#allocation2 + $0x8c] sm:$0x1]  ;;  %v1335_v40 = vshrl.u32 %v7826_v39, 16  ;;  %v6283_v30 = vpack.c.bf16 %v417_v38, %v417_v38  ;;  %v7833_v57 = vsel %vm7638_vm15, %v6095_v51, %v3645_v5 }
  0xc4   : > { %v1323_v10 = vsel %vm7251_vm5, %v1318_v32, %v1322_v43  ;;  %v1338_v54 = vshll.u32 %v7826_v39, 16  ;;  %v1344_v1 = vshll.u32 %v7828_v18, 16  ;;  %v1348_v60 = vshrl.u32 %v7828_v18, 16  ;;  %v3556_v51 = vld [vmem:[#allocation2 + $0x48] sm:$0xe] }
  0xc5   : > { %v1333_v36 = vsel %vm7251_vm5, %v1328_v13, %v1332_v2  ;;  %v1337_v33 = vrot.slane %v1335_v40, 4  ;;  %v1354_v41 = vshll.u32 %v1062_v35, 16  ;;  %v770_v53 = vrot.slane %v768_v11, 7  ;;  %v990_v40 = vld [vmem:[#allocation2 + $0x9c] sm:$0xf] }
  0xc6   : > { %v5922_v48 = vcombine.low %v1323_v10, %v1333_v36  ;;  %v1340_v42 = vrot.slane %v1338_v54, 5  ;;  %v1346_v9 = vrot.slane %v1344_v1, 5  ;;  %v1350_v15 = vrot.slane %v1348_v60, 4 }
  0xc7   : > { %v1356_v26 = vrot.slane %v1354_v41, 5  ;;  %v773_v47 = vor.u32 %v771_v6, %v770_v53  ;;  %v774_v55 = vrot.slane %v770_v53, 4  ;;  %v778_v56 = vrot.slane %v776_v49, 7  ;;  %v292_v41 = vld [vmem:[%s7273_s14 + $0xe0] sm:$0xff]  ;;  %v293_v53 = vld [vmem:[%s7273_s14 + $0xe8] sm:$0xff] }
  0xc8   : > { %6466 = vmatprep.mubr.msk.bf16.mxu1 %vm1504_vm6, %v5922_v48  ;;  %v1341_v20 = vor.u32 %v1340_v42, %v1337_v33  ;;  %v1351_v16 = vor.u32 %v1350_v15, %v1346_v9  ;;  %v779_v59 = vshll.u32 %v6282_v25, 16  ;;  %v418_v46 = vmax.f32 %v386_v7, 0.0  ;;  %v994_v42 = vld [vmem:[#allocation2 + $0xa4] sm:$0x1] }
  0xc9   : > { %v783_v43 = vrot.slane %v778_v56, 4  ;;  %v984_v31 = vsel %vm7360_vm11, %v773_v47, %v983_v0  ;;  %v785_v2 = vshrl.u32 %v6283_v30, 16  ;;  %v788_v4 = vshll.u32 %v6283_v30, 16  ;;  %v291_v30 = vld [vmem:[%s7273_s14 + $0xd8] sm:$0xff] }
  0xca   : > { %v1342_v61 = vrot.slane %v1341_v20, 4  ;;  %v1352_v29 = vrot.slane %v1351_v16, 4  ;;  %v781_v27 = vor.u32 %v779_v59, %v778_v56  ;;  %985 = vst [vmem:[#allocation2 + $0x90] sm:$0xf] %v984_v31  ;;  %v6284_v38 = vpack.c.bf16 %v418_v46, %v418_v46 }
  0xcb   : > { %v988_v32 = vsel %vm7366_vm12, %v783_v43, %v987_v45  ;;  %v787_v11 = vrot.slane %v785_v2, 7  ;;  %v3647_v6 = vrot.slane %v3645_v5, 4  ;;  %v3648_v25 = vrot.slane %v7570_v24, 5 }
  0xcc   : > { %v1347_v7 = vsel %vm7251_vm5, %v1342_v61, %v1346_v9  ;;  %v1357_v49 = vsel %vm7251_vm5, %v1352_v29, %v1356_v26  ;;  %v782_v13 = vsel %vm7354_vm10, %v774_v55, %v781_v27  ;;  %989 = vst [vmem:[#allocation2 + $0x98] sm:$0x1] %v988_v32  ;;  %v793_v35 = vshrl.u32 %v6284_v38, 16 }
  0xcd   : > { %v5923_v10 = vcombine.low %v1347_v7, %v1357_v49  ;;  %986 = vst.msk [vmem:[#allocation2 + $0x94] sm:$0xf] %vm425_vm1, %v782_v13  ;;  %v790_v5 = vor.u32 %v788_v4, %v787_v11  ;;  %v791_v24 = vrot.slane %v787_v11, 4  ;;  %v796_v54 = vshll.u32 %v6284_v38, 16 }
  0xce   : > { %v795_v1 = vrot.slane %v793_v35, 7  ;;  %v3649_v60 = vsel %vm7638_vm15, %v3647_v6, %v3648_v25  ;;  %v6096_v36 = vrot.slane %v3556_v51, 9  ;;  %v3652_v33 = vrot.slane %v7580_v23, 5 }
  0xcf   : > { %6467 = vmatmul.mubr.msk.bf16.gmra.mrb[20].mxu1 %vm1504_vm6, %v5923_v10  ;;  %v991_v48 = vsel %vm7360_vm11, %v790_v5, %v990_v40  ;;  %v6112_v9 = vcombine.low %v7833_v57, %v3649_v60  ;;  %v3655_v15 = vrot.slane %v7596_v22, 5  ;;  %v350_v0 = vmul.f32 %v7280_v44, %v291_v30 }
  0xd0   : > { %v798_v26 = vor.u32 %v796_v54, %v795_v1  ;;  %v800_v47 = vrot.slane %v795_v1, 4  ;;  %992 = vst [vmem:[#allocation2 + $0x9c] sm:$0xf] %v991_v48  ;;  %v3653_v23 = vsel %vm7638_vm15, %v6096_v36, %v3652_v33  ;;  %v3654_v55 = vrot.slane %v3652_v33, 4 }
  0xd1   : > { %v7869_v56 = vld [vmem:[#allocation2 + $0x90] sm:$0xf]  ;;  %6624 = vmatprep.mubr.msk.bf16.mxu0 %vm1504_vm6, %v6112_v9  ;;  %v387_v45 = vadd.f32 %v7317_v12, %v7818_v14  ;;  %v388_v57 = vadd.f32 %v7317_v12, %v350_v0  ;;  %v351_v22 = vmul.f32 %v7280_v44, %v292_v41  ;;  %v352_v20 = vmul.f32 %v7280_v44, %v293_v53 }
  0xd2   : > { %v1359_v16 = vshrl.u32 %v7869_v56, 16  ;;  %v1362_v59 = vshll.u32 %v7869_v56, 16  ;;  %v799_v46 = vsel %vm7354_vm10, %v791_v24, %v798_v26  ;;  %v995_v43 = vsel %vm7366_vm12, %v800_v47, %v994_v42 }
  0xd3   : > { %v1063_v31 = vld [vmem:[#allocation2 + $0x98] sm:$0x1]  ;;  %993 = vst.msk [vmem:[#allocation2 + $0xa0] sm:$0xf] %vm425_vm1, %v799_v46  ;;  %996 = vst [vmem:[#allocation2 + $0xa4] sm:$0x1] %v995_v43  ;;  %v3656_v14 = vsel %vm7638_vm15, %v3654_v55, %v3655_v15  ;;  %v389_v61 = vadd.f32 %v7317_v12, %v351_v22  ;;  %v390_v35 = vadd.f32 %v7317_v12, %v352_v20 }
  0xd4   : > { %v419_v2 = vmax.f32 %v387_v45, 0.0  ;;  %v420_v4 = vmax.f32 %v388_v57, 0.0  ;;  %v7887_v29 = vld [vmem:[#allocation2 + $0x94] sm:$0xf]  ;;  %v1361_v27 = vrot.slane %v1359_v16, 4  ;;  %v1364_v38 = vrot.slane %v1362_v59, 5 }
  0xd5   : > { %v1378_v51 = vshll.u32 %v1063_v31, 16  ;;  %v6113_v32 = vcombine.low %v3653_v23, %v3656_v14  ;;  %v1368_v11 = vshll.u32 %v7887_v29, 16  ;;  %v1372_v6 = vshrl.u32 %v7887_v29, 16  ;;  %v997_v43 = vld [vmem:[#allocation2 + $0xa8] sm:$0xf] }
  0xd6   : > { %v6285_v25 = vpack.c.bf16 %v419_v2, %v419_v2  ;;  %v6286_v7 = vpack.c.bf16 %v420_v4, %v420_v4  ;;  %v1365_v49 = vor.u32 %v1364_v38, %v1361_v27  ;;  %v421_v40 = vmax.f32 %v389_v61, 0.0  ;;  %v1001_v61 = vld [vmem:[#allocation2 + $0xb0] sm:$0x1] }
  0xd7   : > { %v1380_v13 = vrot.slane %v1378_v51, 5  ;;  %6625 = vmatmul.mubr.msk.bf16.gmra.mrb[8].mxu0 %vm1504_vm6, %v6113_v32  ;;  %v1370_v30 = vrot.slane %v1368_v11, 5  ;;  %v1374_v10 = vrot.slane %v1372_v6, 4  ;;  %v7893_v5 = vld [vmem:[#allocation2 + $0x9c] sm:$0xf]  ;;  %v422_v42 = vmax.f32 %v390_v35, 0.0 }
  0xd8   : > { %v802_v24 = vshrl.u32 %v6285_v25, 16  ;;  %v805_v54 = vshll.u32 %v6285_v25, 16  ;;  %v1366_v1 = vrot.slane %v1365_v49, 4  ;;  %v1383_v60 = vshrl.u32 %v7893_v5, 16  ;;  %v3557_v49 = vld [vmem:[#allocation2 + $0x54] sm:$0xe] }
  0xd9   : > { %v1386_v36 = vshll.u32 %v7893_v5, 16  ;;  %v810_v33 = vshrl.u32 %v6286_v7, 16  ;;  %v1375_v41 = vor.u32 %v1374_v10, %v1370_v30  ;;  %v813_v48 = vshll.u32 %v6286_v7, 16  ;;  %v3558_v35 = vld [vmem:[#allocation2 + $0x60] sm:$0xe] }
  0xda   : > { %v804_v53 = vrot.slane %v802_v24, 7  ;;  %v1371_v9 = vsel %vm7251_vm5, %v1366_v1, %v1370_v30  ;;  %v7899_v15 = vld [vmem:[#allocation2 + $0xa0] sm:$0xf]  ;;  %v1064_v0 = vld [vmem:[#allocation2 + $0xa4] sm:$0x1]  ;;  %v1385_v26 = vrot.slane %v1383_v60, 4  ;;  %v6287_v23 = vpack.c.bf16 %v421_v40, %v421_v40 }
  0xdb   : > { %v1388_v47 = vrot.slane %v1386_v36, 5  ;;  %v1376_v55 = vrot.slane %v1375_v41, 4  ;;  %v1392_v45 = vshll.u32 %v7899_v15, 16  ;;  %v1396_v57 = vshrl.u32 %v7899_v15, 16  ;;  %v1004_v36 = vld [vmem:[#allocation2 + $0xb4] sm:$0xf] }
  0xdc   : > { %v1402_v22 = vshll.u32 %v1064_v0, 16  ;;  %v807_v16 = vor.u32 %v805_v54, %v804_v53  ;;  %v808_v59 = vrot.slane %v804_v53, 4  ;;  %v812_v46 = vrot.slane %v810_v33, 7 }
  0xdd   : > { %v1389_v20 = vor.u32 %v1388_v47, %v1385_v26  ;;  %v1381_v31 = vsel %vm7251_vm5, %v1376_v55, %v1380_v13  ;;  %v1394_v14 = vrot.slane %v1392_v45, 5  ;;  %v1398_v2 = vrot.slane %v1396_v57, 4 }
  0xde   : > { %v1404_v4 = vrot.slane %v1402_v22, 5  ;;  %v5924_v27 = vcombine.low %v1371_v9, %v1381_v31  ;;  %v815_v51 = vor.u32 %v813_v48, %v812_v46  ;;  %v817_v32 = vrot.slane %v812_v46, 4  ;;  %v3559_v31 = vld [vmem:[#allocation2 + $0x6c] sm:$0xe] }
  0xdf   : > { %v1390_v38 = vrot.slane %v1389_v20, 4  ;;  %v1399_v11 = vor.u32 %v1398_v2, %v1394_v14  ;;  %v998_v6 = vsel %vm7360_vm11, %v807_v16, %v997_v43  ;;  %v6288_v25 = vpack.c.bf16 %v422_v42, %v422_v42  ;;  %v2850_v43 = vld [vmem:[#allocation2 + $0x70] sm:$0xf] }
  0xe0   : > { %v819_v7 = vshrl.u32 %v6287_v23, 16  ;;  %6470 = vmatprep.mubr.msk.bf16.mxu1 %vm1504_vm6, %v5924_v27  ;;  %v816_v40 = vsel %vm7354_vm10, %v808_v59, %v815_v51  ;;  %999 = vst [vmem:[#allocation2 + $0xa8] sm:$0xf] %v998_v6  ;;  %v1002_v30 = vsel %vm7366_vm12, %v817_v32, %v1001_v61  ;;  %v822_v10 = vshll.u32 %v6287_v23, 16  ;;  %v1008_v23 = vld [vmem:[#allocation2 + $0xbc] sm:$0x1] }
  0xe1   : > { %v1395_v13 = vsel %vm7251_vm5, %v1390_v38, %v1394_v14  ;;  %v1400_v24 = vrot.slane %v1399_v11, 4  ;;  %1000 = vst.msk [vmem:[#allocation2 + $0xac] sm:$0xf] %vm425_vm1, %v816_v40  ;;  %1003 = vst [vmem:[#allocation2 + $0xb0] sm:$0x1] %v1002_v30  ;;  %v827_v1 = vshrl.u32 %v6288_v25, 16 }
  0xe2   : > { %v821_v54 = vrot.slane %v819_v7, 7  ;;  %v830_v60 = vshll.u32 %v6288_v25, 16  ;;  %v6097_v33 = vrot.slane %v3557_v49, 9  ;;  %v3659_v41 = vrot.slane %v7671_v17, 5 }
  0xe3   : > { %v3662_v53 = vrot.slane %v7673_v8, 5  ;;  %v6098_v48 = vrot.slane %v3558_v35, 9  ;;  %v1405_v42 = vsel %vm7251_vm5, %v1400_v24, %v1404_v4  ;;  %v829_v26 = vrot.slane %v827_v1, 7  ;;  %v2851_v4 = vld [vmem:[#allocation2 + $0x74] sm:$0x1] }
  0xe4   : > { %v824_v9 = vor.u32 %v822_v10, %v821_v54  ;;  %v825_v0 = vrot.slane %v821_v54, 4  ;;  %v5925_v47 = vcombine.low %v1395_v13, %v1405_v42  ;;  %v3660_v55 = vsel %vm7638_vm15, %v6097_v33, %v3659_v41 }
  0xe5   : > { %v3661_v45 = vrot.slane %v3659_v41, 4  ;;  %v3666_v57 = vrot.slane %v7713_v34, 5  ;;  %v832_v22 = vor.u32 %v830_v60, %v829_v26  ;;  %v834_v20 = vrot.slane %v829_v26, 4 }
  0xe6   : > { %v1005_v17 = vsel %vm7360_vm11, %v824_v9, %v1004_v36  ;;  %v3669_v8 = vrot.slane %v7715_v19, 5  ;;  %6471 = vmatmul.mubr.msk.bf16.gmra.mrb[24].mxu1 %vm1504_vm6, %v5925_v47  ;;  %v6099_v13 = vrot.slane %v3559_v31, 9  ;;  %v3673_v40 = vrot.slane %v2850_v43, 5  ;;  %v2857_v31 = vld [vmem:[#allocation2 + $0x8c] sm:$0x1] }
  0xe7   : > { %1006 = vst [vmem:[#allocation2 + $0xb4] sm:$0xf] %v1005_v17  ;;  %v3663_v16 = vsel %vm7638_vm15, %v3661_v45, %v3662_v53  ;;  %v3667_v59 = vsel %vm7638_vm15, %v6098_v48, %v3666_v57  ;;  %v3668_v46 = vrot.slane %v3666_v57, 4  ;;  %v7930_v34 = vld [vmem:[#allocation2 + $0xa8] sm:$0xf]  ;;  %v833_v14 = vsel %vm7354_vm10, %v825_v0, %v832_v22 }
  0xe8   : > { %v1009_v19 = vsel %vm7366_vm12, %v834_v20, %v1008_v23  ;;  %v6114_v2 = vcombine.low %v3660_v55, %v3663_v16  ;;  %v7936_v61 = vld [vmem:[#allocation2 + $0xac] sm:$0xf]  ;;  %v7938_v27 = vld [vmem:[#allocation2 + $0xb0] sm:$0x1]  ;;  %v1407_v38 = vshrl.u32 %v7930_v34, 16  ;;  %v1410_v51 = vshll.u32 %v7930_v34, 16 }
  0xe9   : > { %1007 = vst.msk [vmem:[#allocation2 + $0xb8] sm:$0xf] %vm425_vm1, %v833_v14  ;;  %1010 = vst [vmem:[#allocation2 + $0xbc] sm:$0x1] %v1009_v19  ;;  %v3670_v32 = vsel %vm7638_vm15, %v3668_v46, %v3669_v8  ;;  %v1416_v11 = vshll.u32 %v7936_v61, 16  ;;  %v1420_v6 = vshrl.u32 %v7936_v61, 16  ;;  %v3674_v1 = vsel %vm7638_vm15, %v6099_v13, %v3673_v40 }
  0xea   : > { %v1426_v25 = vshll.u32 %v7938_v27, 16  ;;  %6628 = vmatprep.mubr.msk.bf16.mxu0 %vm1504_vm6, %v6114_v2  ;;  %v6115_v7 = vcombine.low %v3667_v59, %v3670_v32  ;;  %v1409_v49 = vrot.slane %v1407_v38, 4  ;;  %v1412_v35 = vrot.slane %v1410_v51, 5  ;;  %v3560_v0 = vld [vmem:[#allocation2 + $0x78] sm:$0xe] }
  0xeb   : > { %v1418_v30 = vrot.slane %v1416_v11, 5  ;;  %v1422_v10 = vrot.slane %v1420_v6, 4  ;;  %v3676_v24 = vrot.slane %v2851_v4, 5  ;;  %v3675_v60 = vrot.slane %v3673_v40, 4  ;;  %v7962_v45 = vld [vmem:[#allocation2 + $0x7c] sm:$0xf] }
  0xec   : > { %6629 = vmatmul.mubr.msk.bf16.gmra.mrb[12].mxu0 %vm1504_vm6, %v6115_v7  ;;  %v1413_v54 = vor.u32 %v1412_v35, %v1409_v49  ;;  %v1428_v33 = vrot.slane %v1426_v25, 5  ;;  %v7964_v57 = vld [vmem:[#allocation2 + $0x80] sm:$0x1]  ;;  %v2856_v16 = vld [vmem:[#allocation2 + $0x88] sm:$0xf]  ;;  %v6100_v51 = vrot.slane %v3560_v0, 9 }
  0xed   : > { %v1423_v36 = vor.u32 %v1422_v10, %v1418_v30  ;;  %v3677_v9 = vsel %vm7638_vm15, %v3675_v60, %v3676_v24  ;;  %v3561_v14 = vld [vmem:[#allocation2 + $0x84] sm:$0xe]  ;;  %v3562_v32 = vld [vmem:[#allocation2 + $0x90] sm:$0xe]  ;;  %v3680_v6 = vrot.slane %v7962_v45, 5  ;;  %v3683_v25 = vrot.slane %v7964_v57, 5 }
  0xee   : > { %v7952_v41 = vld [vmem:[#allocation2 + $0xb4] sm:$0xf]  ;;  %v1414_v53 = vrot.slane %v1413_v54, 4  ;;  %v6116_v55 = vcombine.low %v3674_v1, %v3677_v9  ;;  %v6101_v7 = vrot.slane %v3561_v14, 9  ;;  %v3687_v40 = vrot.slane %v2856_v16, 5 }
  0xef   : > { %v1431_v48 = vshrl.u32 %v7952_v41, 16  ;;  %v1434_v42 = vshll.u32 %v7952_v41, 16  ;;  %v1424_v26 = vrot.slane %v1423_v36, 4  ;;  %v2859_v49 = vld [vmem:[#allocation2 + $0x94] sm:$0xf]  ;;  %v3681_v54 = vsel %vm7638_vm15, %v6100_v51, %v3680_v6 }
  0xf0   : > { %v7958_v47 = vld [vmem:[#allocation2 + $0xb8] sm:$0xf]  ;;  %v7960_v23 = vld [vmem:[#allocation2 + $0xbc] sm:$0x1]  ;;  %v1419_v22 = vsel %vm7251_vm5, %v1414_v53, %v1418_v30  ;;  %6632 = vmatprep.mubr.msk.bf16.mxu0 %vm1504_vm6, %v6116_v55  ;;  %v3690_v30 = vrot.slane %v2857_v31, 5  ;;  %v3682_v1 = vrot.slane %v3680_v6, 4  ;;  %v3688_v53 = vsel %vm7638_vm15, %v6101_v7, %v3687_v40 }
  0xf1   : > { %v1433_v20 = vrot.slane %v1431_v48, 4  ;;  %v1436_v17 = vrot.slane %v1434_v42, 5  ;;  %v1440_v8 = vshll.u32 %v7958_v47, 16  ;;  %v1429_v59 = vsel %vm7251_vm5, %v1424_v26, %v1428_v33  ;;  %v2860_v10 = vld [vmem:[#allocation2 + $0x98] sm:$0x1]  ;;  %v294_v7 = vld [vmem:[%s7273_s14 + $0xf0] sm:$0xff] }
  0xf2   : > { %v1444_v46 = vshrl.u32 %v7958_v47, 16  ;;  %v1450_v43 = vshll.u32 %v7960_v23, 16  ;;  %v5926_v19 = vcombine.low %v1419_v22, %v1429_v59  ;;  %v6102_v60 = vrot.slane %v3562_v32, 9  ;;  %v3563_v36 = vld [vmem:[#allocation2 + $0x9c] sm:$0xe] }
  0xf3   : > { %v1437_v2 = vor.u32 %v1436_v17, %v1433_v20  ;;  %v1442_v4 = vrot.slane %v1440_v8, 5  ;;  %v3689_v48 = vrot.slane %v3687_v40, 4  ;;  %v3694_v42 = vrot.slane %v2859_v49, 5  ;;  %v2862_v9 = vld [vmem:[#allocation2 + $0xa0] sm:$0xf]  ;;  %v295_v49 = vld [vmem:[%s7273_s14 + $0xf8] sm:$0xff] }
  0xf4   : > { %v1446_v38 = vrot.slane %v1444_v46, 4  ;;  %6474 = vmatprep.mubr.msk.bf16.mxu1 %vm1504_vm6, %v5926_v19  ;;  %v1452_v13 = vrot.slane %v1450_v43, 5  ;;  %v3684_v0 = vsel %vm7638_vm15, %v3682_v1, %v3683_v25  ;;  %v3697_v26 = vrot.slane %v2860_v10, 5  ;;  %v2863_v55 = vld [vmem:[#allocation2 + $0xa4] sm:$0x1] }
  0xf5   : > { %v1438_v11 = vrot.slane %v1437_v2, 4  ;;  %v2865_v22 = vld [vmem:[#allocation2 + $0xac] sm:$0xf]  ;;  %v7061_v17 = vld [vmem:[#allocation2] sm:$0xf]  ;;  %v6117_v59 = vcombine.low %v3681_v54, %v3684_v0  ;;  %v3691_v46 = vsel %vm7638_vm15, %v3689_v48, %v3690_v30  ;;  %v3696_v14 = vrot.slane %v3694_v42, 4 }
  0xf6   : > { %v1447_v35 = vor.u32 %v1446_v38, %v1442_v4  ;;  %v7987_v8 = vld [vmem:[#allocation2 + $0x4] sm:$0xf]  ;;  %v6118_v31 = vcombine.low %v3688_v53, %v3691_v46  ;;  %v6103_v19 = vrot.slane %v3563_v36, 9  ;;  %v2866_v2 = vld [vmem:[#allocation2 + $0xb0] sm:$0x1]  ;;  %v3695_v38 = vsel %vm7638_vm15, %v6102_v60, %v3694_v42 }
  0xf7   : > { %v1443_v24 = vsel %vm7251_vm5, %v1438_v11, %v1442_v4  ;;  %v5944_v16 = vcombine.low %v7061_v17, %v7987_v8  ;;  %v3564_v4 = vld [vmem:[#allocation2 + $0xa8] sm:$0xe]  ;;  %6633 = vmatmul.mubr.msk.bf16.gmra.mrb[16].mxu0 %vm1504_vm6, %v6117_v59  ;;  %v3701_v51 = vrot.slane %v2862_v9, 5  ;;  %v3704_v32 = vrot.slane %v2863_v55, 5  ;;  %v2868_v6 = vld [vmem:[#allocation2 + $0xb8] sm:$0xf] }
  0xf8   : > { %v1448_v33 = vrot.slane %v1447_v35, 4  ;;  %v3708_v11 = vrot.slane %v2865_v22, 5  ;;  %6636 = vmatprep.mubr.msk.bf16.mxu0 %vm1504_vm6, %v6118_v31  ;;  %v3698_v25 = vsel %vm7638_vm15, %v3696_v14, %v3697_v26  ;;  %v3565_v40 = vld [vmem:[#allocation2 + $0xb4] sm:$0xe]  ;;  %v6104_v10 = vrot.slane %v3564_v4, 9 }
  0xf9   : > { %v3702_v35 = vsel %vm7638_vm15, %v6103_v19, %v3701_v51  ;;  %v6119_v30 = vcombine.low %v3695_v38, %v3698_v25  ;;  %v2869_v54 = vld [vmem:[#allocation2 + $0xbc] sm:$0x1]  ;;  %v3715_v1 = vrot.slane %v2868_v6, 5  ;;  %v354_v53 = vmul.f32 %v7280_v44, %v295_v49  ;;  %v7063_v48 = vld [vmem:[#allocation2 + $0xc] sm:$0xf] }
  0xfa   : > { %v1453_v20 = vsel %vm7251_vm5, %v1448_v33, %v1452_v13  ;;  %v3703_v13 = vrot.slane %v3701_v51, 4  ;;  %v3710_v36 = vrot.slane %v3708_v11, 4  ;;  %v353_v33 = vmul.f32 %v7280_v44, %v294_v7  ;;  %v8008_v42 = vld [vmem:[#allocation2 + $0x10] sm:$0xf]  ;;  %v7065_v0 = vld [vmem:[#allocation2 + $0x18] sm:$0xf] }
  0xfb   : > { %v5927_v43 = vcombine.low %v1443_v24, %v1453_v20  ;;  %v3711_v24 = vrot.slane %v2866_v2, 5  ;;  %v5945_v9 = vcombine.low %v7063_v48, %v8008_v42  ;;  %v8011_v26 = vld [vmem:[#allocation2 + $0x1c] sm:$0xf]  ;;  %v6105_v20 = vrot.slane %v3565_v40, 9  ;;  %v8019_v44 = vld [vmem:[%s9186_s4 + $0x6] sm:$0x3] }
  0xfc   : > { %v3705_v60 = vsel %vm7638_vm15, %v3703_v13, %v3704_v32  ;;  %v5946_v55 = vcombine.low %v7065_v0, %v8011_v26  ;;  %v3717_v17 = vrot.slane %v3715_v1, 4  ;;  %v391_v59 = vadd.f32 %v7317_v12, %v353_v33  ;;  %v8039_v13 = vld [vmem:[#allocation2 + $0x28] sm:$0xf] }
  0xfd   : > { %6475 = vmatmul.mubr.msk.bf16.gmra.mrb[28].mxu1 %vm1504_vm6, %v5927_v43  ;;  %v6120_v22 = vcombine.low %v3702_v35, %v3705_v60  ;;  %v392_v46 = vadd.f32 %v7317_v12, %v354_v53  ;;  %v7067_v43 = vld [vmem:[%s9186_s4 + $0x4] sm:$0x3]  ;;  %v3709_v14 = vsel %vm7638_vm15, %v6104_v10, %v3708_v11  ;;  %v3712_v19 = vsel %vm7638_vm15, %v3710_v36, %v3711_v24  ;;  %v7070_v10 = vld [vmem:[#allocation2 + $0x30] sm:$0xf]  ;;  %v8042_v24 = vld [vmem:[#allocation2 + $0x34] sm:$0xf] }
  0xfe   : > { %6480 = vmatprep.mubr.msk.bf16.mxu1 %vm1504_vm6, %v5944_v16  ;;  %v3718_v16 = vrot.slane %v2869_v54, 5  ;;  %v2272_v31 = vsel %vm1553_vm0, %v7067_v43, 0  ;;  %v423_v12 = vmax.f32 %v391_v59, 0.0  ;;  %v3716_v4 = vsel %vm7638_vm15, %v6105_v20, %v3715_v1  ;;  %v7068_v35 = vld [vmem:[#allocation2 + $0x24] sm:$0xf] }
  0xff   : > { %6637 = vmatmul.mubr.msk.bf16.gmra.mrb[20].mxu0 %vm1504_vm6, %v6119_v30  ;;  %v424_v2 = vmax.f32 %v392_v46, 0.0  ;;  %v6121_v11 = vcombine.low %v3709_v14, %v3712_v19  ;;  %v5947_v40 = vcombine.low %v7068_v35, %v8039_v13  ;;  %v5948_v54 = vcombine.low %v7070_v10, %v8042_v24  ;;  %v1011_v36 = vld [vmem:[#allocation2 + $0xc0] sm:$0xf]  ;;  %v1015_v33 = vld [vmem:[#allocation2 + $0xc8] sm:$0x1] }
 0x100   : > { %6640 = vmatprep.mubr.msk.bf16.mxu0 %vm1504_vm6, %v6120_v22  ;;  %v3719_v38 = vsel %vm7638_vm15, %v3717_v17, %v3718_v16  ;;  %v6289_v51 = vpack.c.bf16 %v423_v12, %v423_v12  ;;  %v8056_v17 = vld [vmem:[#allocation2 + $0x40] sm:$0xf]  ;;  %v7073_v16 = vld [vmem:[#allocation2 + $0x3c] sm:$0xf]  ;;  %v7074_v46 = vld [vmem:[#allocation2 + $0x48] sm:$0xf] }
 0x101   : > { %v6290_v32 = vpack.c.bf16 %v424_v2, %v424_v2  ;;  %v6122_v30 = vcombine.low %v3716_v4, %v3719_v38  ;;  %v5949_v59 = vcombine.low %v7073_v16, %v8056_v17  ;;  %v8059_v43 = vld [vmem:[#allocation2 + $0x4c] sm:$0xf]  ;;  %v3099_v2 = vshll.u32 %v7962_v45, 16  ;;  %v7076_v38 = vld [vmem:[#allocation2 + $0x54] sm:$0xf] }
 0x102   : > { %v836_v6 = vshrl.u32 %v6289_v51, 16  ;;  %v839_v25 = vshll.u32 %v6289_v51, 16  ;;  %v5950_v50 = vcombine.low %v7074_v46, %v8059_v43  ;;  %v3103_v4 = vshrl.u32 %v7962_v45, 16  ;;  %v8066_v51 = vld [vmem:[#allocation2 + $0x58] sm:$0xf] }
 0x103   : > { %v844_v7 = vshrl.u32 %v6290_v32, 16  ;;  %v847_v49 = vshll.u32 %v6290_v32, 16  ;;  %v5951_v32 = vcombine.low %v7076_v38, %v8066_v51  ;;  %v3109_v35 = vshll.u32 %v7964_v57, 16  ;;  %v7027_v45 = vld [vmem:[#allocation2 + $0x18] sm:$0xff]   ;;  %v8093_v16 = vld [vmem:[#allocation2 + $0x70] sm:$0xf] }
 0x104   : > { %v838_v1 = vrot.slane %v836_v6, 7  ;;  %v8079_v10 = vrot.slane %v3103_v4, 4  ;;  %v2012_v57 = vld [vmem:[#allocation2 + $0x18] sm:$0xe]  ;;  %v2091_v38 = vrot.slane %v8042_v24, 5 }
 0x105   : > { %6481 = vmatmul.mubr.msk.bf16.vlgmr.msra.gmra.mrb[0].mxu1 %vm1504_vm6, %v5945_v9  ;;  %v846_v60 = vrot.slane %v844_v7, 7  ;;  %v8071_v7 = vld [vmem:[#allocation2 + $0x64] sm:$0xf] }
 0x106   : > { %6513 = vmatpush3.bf16.msra.mxu1 %v2272_v31  ;;  %6484 = vmatprep.mubr.msk.bf16.mxu1 %vm1504_vm6, %v5946_v55  ;;  %v841_v53 = vor.u32 %v839_v25, %v838_v1  ;;  %v842_v48 = vrot.slane %v838_v1, 4  ;;  %v7078_v25 = vld [vmem:[#allocation2 + $0x60] sm:$0xf] }
 0x107   : > { %7011 = vmatprep.subr.msk.bf16.mxu1 %vm1553_vm0, %v8019_v44  ;;  %6641 = vmatmul.mubr.msk.bf16.gmra.mrb[24].mxu0 %vm1504_vm6, %v6121_v11  ;;  %v849_v9 = vor.u32 %v847_v49, %v846_v60  ;;  %v851_v0 = vrot.slane %v846_v60, 4  ;;  %v5952_v49 = vcombine.low %v7078_v25, %v8071_v7  ;;  %v2010_v1 = vld [vmem:[#allocation2] sm:$0xe]  ;;  %v2070_v60 = vrot.slane %v8008_v42, 5 }
 0x108   : > { %6644 = vmatprep.mubr.msk.bf16.mxu0 %vm1504_vm6, %v6122_v30  ;;  %v1012_v22 = vsel %vm7360_vm11, %v841_v53, %v1011_v36  ;;  %v8077_v30 = vrot.slane %v3099_v2, 5  ;;  %v2063_v36 = vrot.slane %v7987_v8, 5  ;;  %v2077_v53 = vrot.slane %v8011_v26, 5  ;;  %v7084_v2 = vld [vmem:[#allocation2 + $0x20] sm:$0x1] }
 0x109   : > { %v850_v55 = vsel %vm7354_vm10, %v842_v48, %v849_v9  ;;  %v1016_v20 = vsel %vm7366_vm12, %v851_v0, %v1015_v33  ;;  %1013 = vst [vmem:[#allocation2 + $0xc0] sm:$0xf] %v1012_v22  ;;  %v2011_v33 = vld [vmem:[#allocation2 + $0xc] sm:$0xe]  ;;  %v7080_v48 = vld [vmem:[#allocation2 + $0x8] sm:$0x1] }
 0x10a   : > { %1014 = vst.msk [vmem:[#allocation2 + $0xc4] sm:$0xf] %vm425_vm1, %v850_v55  ;;  %1017 = vst [vmem:[#allocation2 + $0xc8] sm:$0x1] %v1016_v20  ;;  %v2066_v9 = vrot.slane %v7080_v48, 5  ;;  %v8087_v22 = vrot.slane %v3109_v35, 5 }
 0x10b   : > { %v7081_v0 = vld [vmem:[#allocation2 + $0x14] sm:$0x1]  ;;  %v2084_v42 = vrot.slane %v8039_v13, 5  ;;  %v7082_v20 = vld [vmem:[#allocation2 + $0x6c] sm:$0xf]  ;;  %v5976_v46 = vrot.slane %v2010_v1, 9  ;;  %v5954_v13 = vcombine.low %v7801_v62, %v7810_v52  ;;  %v5957_v62 = vcombine.low %v7893_v5, %v7899_v15 }
 0x10c   : > { %v2073_v55 = vrot.slane %v7081_v0, 5  ;;  %9212 = vst [vmem:[#allocation4_spill] sm:$0xff] %v8087_v22  ;;  %v5977_v26 = vrot.slane %v2011_v33, 9  ;;  %v2080_v4 = vrot.slane %v7084_v2, 5  ;;  %v2014_v35 = vld [vmem:[#allocation2 + $0x30] sm:$0xe]  ;;  %v9213_v5 = vcombine.low %v7930_v34, %v7936_v61 }
 0x10d   : > { %6485 = vmatmul.mubr.msk.bf16.gmra.mrb[4].mxu1 %vm1504_vm6, %v5947_v40  ;;  %v2086_v25 = vrot.slane %v2084_v42, 4  ;;  %v8109_v52 = vsel %vm7638_vm15, %v5976_v46, %v2063_v36  ;;  %v2098_v1 = vrot.slane %v8056_v17, 5  ;;  %v5980_v33 = vrot.slane %v2014_v35, 9  ;;  %v7086_v48 = vld [vmem:[#allocation2 + $0x38] sm:$0x1] }
 0x10e   : > { %6488 = vmatprep.mubr.msk.bf16.mxu1 %vm1504_vm6, %v5948_v54  ;;  %v8113_v24 = vsel %vm7638_vm15, %v5977_v26, %v2070_v60  ;;  %v7089_v8 = vld [vmem:[#allocation2 + $0x5c] sm:$0x1]  ;;  %v8234_v15 = vsel %vm1553_vm0, %v8019_v44, 0  ;;  %vm5780_vm1 = vcmask 25600  }
 0x10f   : > { %v7092_v44 = vld [vmem:[#allocation2 + $0x7c] sm:$0xf] }
 0x110   : > { %v3566_v31 = vld [vmem:[#allocation2 + $0xc0] sm:$0xe] }
 0x111   : > { %v2871_v58 = vld [vmem:[#allocation2 + $0xc4] sm:$0xf]  ;;  %v2872_v63 = vld [vmem:[#allocation2 + $0xc8] sm:$0x1]  ;;  %v6106_v14 = vrot.slane %v3566_v31, 9  ;;  %v2072_v31 = vrot.slane %v2070_v60, 4 }
 0x112   : > { %v3722_v19 = vrot.slane %v2871_v58, 5  ;;  %v3725_v12 = vrot.slane %v2872_v63, 5  ;;  %v4911_v58 = vsel %vm1553_vm0, %v7775_v37, 0  ;;  %v2065_v63 = vrot.slane %v2063_v36, 4  ;;  %v8132_v60 = vld [vmem:[%s9186_s4 + $0x10] sm:$0x3] }
 0x114   : > { %v3723_v11 = vsel %vm7638_vm15, %v6106_v14, %v3722_v19  ;;  %v3724_v6 = vrot.slane %v3722_v19, 4  ;;  %v5978_v14 = vrot.slane %v2012_v57, 9  ;;  %v7028_v19 = vld [vmem:[#allocation2 + $0x24] sm:$0xff]   ;;  %v2093_v57 = vrot.slane %v2091_v38, 4 }
 0x115   : > { %6489 = vmatmul.mubr.msk.bf16.gmra.mrb[8].mxu1 %vm1504_vm6, %v5949_v59  ;;  %v5953_v59 = vcombine.low %v7082_v20, %v8093_v16  ;;  %v2105_v20 = vrot.slane %v8059_v43, 5  ;;  %v4384_v43 = vld [vmem:[#allocation2 + $0x28] sm:$0xf] }
 0x116   : > { %6492 = vmatprep.mubr.msk.bf16.mxu1 %vm1504_vm6, %v5950_v50  ;;  %v3726_v40 = vsel %vm7638_vm15, %v3724_v6, %v3725_v12  ;;  %v2013_v50 = vld [vmem:[#allocation2 + $0x24] sm:$0xe]  ;;  %v2079_v12 = vrot.slane %v2077_v53, 4 }
 0x117   : > { %v6123_v54 = vcombine.low %v3723_v11, %v3726_v40  ;;  %v7029_v11 = vld [vmem:[#allocation2 + $0x30] sm:$0xff]   ;;  %v5979_v6 = vrot.slane %v2013_v50, 9  ;;  %v5956_v40 = vcombine.low %v7869_v56, %v7887_v29  ;;  %v8122_v56 = vsel %vm7638_vm15, %v2072_v31, %v2073_v55  ;;  %v2016_v55 = vld [vmem:[#allocation2 + $0x48] sm:$0xe]  ;;  %v7087_v31 = vld [vmem:[#allocation2 + $0x44] sm:$0x1] }
 0x118   : > { %v8126_v29 = vsel %vm7638_vm15, %v5978_v14, %v2077_v53  ;;  %v8138_v36 = vsel %vm7638_vm15, %v2079_v12, %v2080_v4  ;;  %v2094_v53 = vrot.slane %v7086_v48, 5  ;;  %v2017_v50 = vld [vmem:[#allocation2 + $0x54] sm:$0xe]  ;;  %v2101_v14 = vrot.slane %v7087_v31, 5  ;;  %v4383_v48 = vld [vmem:[#allocation2 + $0x24] sm:$0xf] }
 0x119   : > { %6645 = vmatmul.mubr.msk.bf16.gmra.mrb[28].mxu0 %vm1504_vm6, %v6123_v54  ;;  %v8118_v54 = vsel %vm7638_vm15, %v2065_v63, %v2066_v9  ;;  %v8143_v17 = vsel %vm7638_vm15, %v5979_v6, %v2084_v42  ;;  %v2112_v42 = vrot.slane %v8066_v51, 5  ;;  %v2100_v63 = vrot.slane %v2098_v1, 4  ;;  %v7031_v6 = vld [vmem:[#allocation2 + $0x48] sm:$0xff]  }
 0x11a   : > { %6650 = vmatprep.mubr.msk.bf16.mxu0 %vm1504_vm6, %v7027_v45  ;;  %v2015_v45 = vld [vmem:[#allocation2 + $0x3c] sm:$0xe]  ;;  %v8167_v51 = vsel %vm7638_vm15, %v5980_v33, %v2091_v38  ;;  %v8171_v2 = vsel %vm7638_vm15, %v2093_v57, %v2094_v53  ;;  %v5982_v4 = vrot.slane %v2016_v55, 9  ;;  %v2115_v38 = vrot.slane %v7089_v8, 5 }
 0x11b   : > { %v5981_v0 = vrot.slane %v2015_v45, 9  ;;  %v5983_v45 = vrot.slane %v2017_v50, 9  ;;  %v2114_v31 = vrot.slane %v2112_v42, 4  ;;  %v8185_v57 = vsel %vm7638_vm15, %v2100_v63, %v2101_v14  ;;  %v2019_v63 = vld [vmem:[#allocation2 + $0x6c] sm:$0xe] }
 0x11c   : > { %v8191_v8 = vsel %vm7638_vm15, %v5982_v4, %v2105_v20  ;;  %v4456_v55 = vshll.u32 %v4383_v48, 16  ;;  %v2126_v14 = vrot.slane %v8093_v16, 5  ;;  %v4385_v16 = vld [vmem:[#allocation2 + $0x2c] sm:$0x1]  ;;  %v5985_v26 = vrot.slane %v2019_v63, 9 }
 0x11d   : > { %6493 = vmatmul.mubr.msk.bf16.gmra.mrb[12].mxu1 %vm1504_vm6, %v5951_v32  ;;  %v5955_v32 = vcombine.low %v7826_v39, %v7828_v18  ;;  %v2018_v39 = vld [vmem:[#allocation2 + $0x60] sm:$0xe]  ;;  %v2119_v18 = vrot.slane %v8071_v7, 5  ;;  %v8197_v50 = vsel %vm7638_vm15, %v5983_v45, %v2112_v42  ;;  %v8206_v7 = vsel %vm7638_vm15, %v2114_v31, %v2115_v38  ;;  %v2020_v63 = vld [vmem:[#allocation2 + $0x78] sm:$0xe] }
 0x11e   : > { %6496 = vmatprep.mubr.msk.bf16.mxu1 %vm1504_vm6, %v5952_v49  ;;  %v7085_v49 = vld [vmem:[#allocation2 + $0x2c] sm:$0x1]  ;;  %v2128_v46 = vrot.slane %v2126_v14, 4 }
 0x11f   : > { %v2087_v37 = vrot.slane %v7085_v49, 5  ;;  %v2107_v49 = vrot.slane %v2105_v20, 4 }
 0x121   : > { %6651 = vmatmul.mubr.msk.bf16.vlgmr.msra.gmra.mrb[0].mxu0 %vm1504_vm6, %v7028_v19  ;;  %v8147_v9 = vsel %vm7638_vm15, %v2086_v25, %v2087_v37  ;;  %v4380_v19 = vld [vmem:[#allocation2 + $0x18] sm:$0xf]  ;;  %v8175_v25 = vsel %vm7638_vm15, %v5981_v0, %v2098_v1  ;;  %v7088_v37 = vld [vmem:[#allocation2 + $0x50] sm:$0x1] }
 0x122   : > { %6683 = vmatpush3.bf16.msra.mxu0 %v4911_v58  ;;  %6654 = vmatprep.mubr.msk.bf16.mxu0 %vm1504_vm6, %v7029_v11  ;;  %v4381_v11 = vld [vmem:[#allocation2 + $0x1c] sm:$0xf]  ;;  %v2108_v35 = vrot.slane %v7088_v37, 5  ;;  %v4429_v33 = vshrl.u32 %v4380_v19, 16  ;;  %v4432_v12 = vshll.u32 %v4380_v19, 16  ;;  %v4462_v19 = vshll.u32 %v4384_v43, 16 }
 0x123   : > { %7017 = vmatprep.subr.msk.bf16.mxu0 %vm1553_vm0, %v8132_v60  ;;  %v4438_v53 = vshll.u32 %v4381_v11, 16  ;;  %v4442_v0 = vshrl.u32 %v4381_v11, 16  ;;  %v7090_v37 = vld [vmem:[#allocation2 + $0x68] sm:$0x1]  ;;  %v7032_v1 = vld [vmem:[#allocation2 + $0x54] sm:$0xff]  }
 0x124   : > { %v8202_v20 = vsel %vm7638_vm15, %v2107_v49, %v2108_v35  ;;  %v4431_v4 = vrot.slane %v4429_v33, 4  ;;  %v4434_v11 = vrot.slane %v4432_v12, 5  ;;  %v2122_v42 = vrot.slane %v7090_v37, 5  ;;  %v7033_v35 = vld [vmem:[#allocation2 + $0x60] sm:$0xff]  }
 0x125   : > { %6497 = vmatmul.mubr.msk.bf16.gmra.mrb[16].mxu1 %vm1504_vm6, %v5953_v59  ;;  %v8208_v45 = vrot.slane %v4438_v53, 5  ;;  %v4458_v49 = vrot.slane %v4456_v55, 5  ;;  %v7091_v59 = vld [vmem:[#allocation2 + $0x74] sm:$0x1]  ;;  %v8210_v38 = vrot.slane %v4462_v19, 5  ;;  %v4472_v37 = vshll.u32 %v4385_v16, 16 }
 0x126   : > { %6500 = vmatprep.mubr.msk.bf16.mxu1 %vm1504_vm6, %v5954_v13  ;;  %v7030_v13 = vld [vmem:[#allocation2 + $0x3c] sm:$0xff]   ;;  %v2129_v31 = vrot.slane %v7091_v59, 5  ;;  %v7034_v16 = vld [vmem:[#allocation2 + $0x6c] sm:$0xff]  }
 0x128   : > { %v8247_v34 = vsel %vm7638_vm15, %v2128_v46, %v2129_v31 }
 0x129   : > { %6655 = vmatmul.mubr.msk.bf16.gmra.mrb[4].mxu0 %vm1504_vm6, %v7030_v13  ;;  %v4382_v13 = vld [vmem:[#allocation2 + $0x20] sm:$0x1] }
 0x12a   : > { %6658 = vmatprep.mubr.msk.bf16.mxu0 %vm1504_vm6, %v7031_v6  ;;  %v5984_v6 = vrot.slane %v2018_v39, 9  ;;  %v4435_v39 = vor.u32 %v4434_v11, %v4431_v4  ;;  %v4448_v53 = vshll.u32 %v4382_v13, 16  ;;  %v2133_v13 = vrot.slane %v7092_v44, 5  ;;  %v2021_v4 = vld [vmem:[#allocation2 + $0x84] sm:$0xe] }
 0x12b   : > { %v7093_v11 = vld [vmem:[#allocation2 + $0x88] sm:$0xf]  ;;  %v5987_v59 = vrot.slane %v2021_v4, 9  ;;  %v8265_v4 = vld [vmem:[#allocation2 + $0x38] sm:$0x1] }
 0x12c   : > { %v2135_v3 = vrot.slane %v2133_v13, 4  ;;  %9215 = vst [vmem:[#allocation6_spill] sm:$0xff] %v8265_v4 }
 0x12d   : > { %6501 = vmatmul.mubr.msk.bf16.gmra.mrb[20].mxu1 %vm1504_vm6, %v5955_v32  ;;  %v4453_v32 = vshrl.u32 %v4383_v48, 16  ;;  %v4444_v48 = vrot.slane %v4442_v0, 4  ;;  %v4389_v0 = vld [vmem:[#allocation2 + $0x3c] sm:$0xf] }
 0x12e   : > { %6504 = vmatprep.mubr.msk.bf16.mxu1 %vm1504_vm6, %v5956_v40  ;;  %v4466_v40 = vshrl.u32 %v4384_v43, 16  ;;  %v2121_v43 = vrot.slane %v2119_v18, 4 }
 0x12f   : > { %v4455_v58 = vrot.slane %v4453_v32, 4  ;;  %v8224_v32 = vsel %vm7638_vm15, %v5984_v6, %v2119_v18  ;;  %v4445_v55 = vor.u32 %v4444_v48, %v8208_v45  ;;  %v8242_v18 = vsel %vm7638_vm15, %v5985_v26, %v2126_v14 }
 0x130   : > { %v4468_v33 = vrot.slane %v4466_v40, 4  ;;  %v4386_v40 = vld [vmem:[#allocation2 + $0x30] sm:$0xf]  ;;  %v2140_v6 = vrot.slane %v7093_v11, 5  ;;  %v4436_v48 = vrot.slane %v4435_v39, 4  ;;  %v4450_v26 = vrot.slane %v4448_v53, 5 }
 0x131   : > { %6659 = vmatmul.mubr.msk.bf16.gmra.mrb[8].mxu0 %vm1504_vm6, %v7032_v1  ;;  %v4459_v19 = vor.u32 %v4458_v49, %v4455_v58  ;;  %v4474_v14 = vrot.slane %v4472_v37, 5  ;;  %v5986_v58 = vrot.slane %v2020_v63, 9  ;;  %v7094_v49 = vld [vmem:[#allocation2 + $0x80] sm:$0x1]  ;;  %v4480_v46 = vshll.u32 %v4386_v40, 16  ;;  %v7035_v11 = vld [vmem:[#allocation2 + $0x78] sm:$0xff]  }
 0x132   : > { %6662 = vmatprep.mubr.msk.bf16.mxu0 %vm1504_vm6, %v7033_v35  ;;  %v4469_v1 = vor.u32 %v4468_v33, %v8210_v38  ;;  %v2136_v35 = vrot.slane %v7094_v49, 5  ;;  %v2142_v39 = vrot.slane %v2140_v6, 4  ;;  %v7095_v53 = vld [vmem:[#allocation2 + $0x8c] sm:$0x1]  ;;  %v4501_v63 = vshrl.u32 %v4389_v0, 16 }
 0x133   : > { %v4460_v31 = vrot.slane %v4459_v19, 4  ;;  %v2143_v37 = vrot.slane %v7095_v53, 5  ;;  %v4441_v19 = vsel %vm7251_vm5, %v4436_v48, %v8208_v45  ;;  %v4482_v53 = vrot.slane %v4480_v46, 5 }
 0x134   : > { %v4470_v12 = vrot.slane %v4469_v1, 4  ;;  %v9216_v1 = vcombine.low %v7952_v41, %v7958_v47  ;;  %v9218_v45 = vcombine.low %v8109_v52, %v8118_v54  ;;  %v8290_v52 = vsel %vm7638_vm15, %v2135_v3, %v2136_v35  ;;  %v7036_v35 = vld [vmem:[#allocation2 + $0x84] sm:$0xff]  }
 0x135   : > { %6505 = vmatmul.mubr.msk.bf16.gmra.mrb[24].mxu1 %vm1504_vm6, %v5957_v62  ;;  %v8238_v62 = vsel %vm7638_vm15, %v2121_v43, %v2122_v42  ;;  %v8250_v42 = vld [vmem:[#allocation2 + $0x34] sm:$0xf]  ;;  %v4446_v43 = vrot.slane %v4445_v55, 4  ;;  %v8271_v55 = vld [vmem:[#allocation2 + $0x40] sm:$0xf]  ;;  %v4465_v41 = vsel %vm7251_vm5, %v4460_v31, %v8210_v38  ;;  %v8294_v54 = vsel %vm7638_vm15, %v5987_v59, %v2140_v6 }
 0x136   : > { %6508 = vmatprep.mubr.msk.bf16.mxu1 %vm1504_vm6, %v9213_v5  ;;  %9214 = vst [vmem:[#allocation5_spill] sm:$0xff] %v8250_v42  ;;  %v4477_v5 = vshrl.u32 %v4386_v40, 16  ;;  %v4486_v33 = vshll.u32 %v8250_v42, 16  ;;  %v4490_v44 = vshrl.u32 %v8250_v42, 16  ;;  %v8263_v40 = vsel %vm7638_vm15, %v5986_v58, %v2133_v13  ;;  %9217 = vst [vmem:[#allocation7_spill] sm:$0xff] %v8271_v55  ;;  %v7037_v31 = vld [vmem:[#allocation2 + $0x90] sm:$0xff]  }
 0x137   : > { %v4504_v42 = vshll.u32 %v4389_v0, 16  ;;  %v4451_v13 = vsel %vm7251_vm5, %v4446_v43, %v4450_v26  ;;  %v4475_v0 = vsel %vm7251_vm5, %v4470_v12, %v4474_v14  ;;  %v8298_v26 = vsel %vm7638_vm15, %v2142_v39, %v2143_v37  ;;  %v4392_v38 = vld [vmem:[#allocation2 + $0x48] sm:$0xf]  ;;  %v8307_v14 = vld [vmem:[#allocation2 + $0x4c] sm:$0xf] }
 0x138   : > { %v4479_v49 = vrot.slane %v4477_v5, 4  ;;  %v8283_v48 = vrot.slane %v4486_v33, 5  ;;  %v4492_v58 = vrot.slane %v4490_v44, 4  ;;  %v4496_v43 = vshll.u32 %v8265_v4, 16  ;;  %9219 = vst [vmem:[#allocation8_spill] sm:$0xff] %v8307_v14 }
 0x139   : > { %6663 = vmatmul.mubr.msk.bf16.gmra.mrb[12].mxu0 %vm1504_vm6, %v7034_v16  ;;  %v8302_v16 = vsel %vm1553_vm0, %v8132_v60, 0  ;;  %v4510_v12 = vshll.u32 %v8271_v55, 16  ;;  %v4514_v3 = vshrl.u32 %v8271_v55, 16  ;;  %v8309_v59 = vcombine.low %v4441_v19, %v4451_v13  ;;  %v8318_v39 = vld [vmem:[#allocation2 + $0x44] sm:$0x1] }
 0x13a   : > { %6666 = vmatprep.mubr.msk.bf16.mxu0 %vm1504_vm6, %v7035_v11  ;;  %v4483_v6 = vor.u32 %v4482_v53, %v4479_v49  ;;  %v4503_v5 = vrot.slane %v4501_v63, 4  ;;  %v4506_v46 = vrot.slane %v4504_v42, 5  ;;  %v8311_v33 = vcombine.low %v4465_v41, %v4475_v0  ;;  %9220 = vst [vmem:[#allocation9_spill] sm:$0xff] %v8318_v39  ;;  %v4395_v37 = vld [vmem:[#allocation2 + $0x54] sm:$0xf] }
 0x13b   : > { %v4493_v11 = vor.u32 %v4492_v58, %v8283_v48  ;;  %v4528_v19 = vshll.u32 %v4392_v38, 16  ;;  %v4534_v49 = vshll.u32 %v8307_v14, 16  ;;  %v4538_v42 = vshrl.u32 %v8307_v14, 16  ;;  %v8322_v63 = vld [vmem:[#allocation2 + $0x58] sm:$0xf] }
 0x13c   : > { %9221 = vst [vmem:[#allocation10_spill] sm:$0xff] %v8322_v63  ;;  %v4498_v53 = vrot.slane %v4496_v43, 5  ;;  %v4516_v13 = vrot.slane %v4514_v3, 4  ;;  %v7096_v41 = vld [vmem:[#allocation2 + $0x94] sm:$0xf]  ;;  %v9222_v58 = vcombine.low %v8113_v24, %v8122_v56  ;;  %v4484_v44 = vrot.slane %v4483_v6, 4 }
 0x13d   : > { %6509 = vmatmul.mubr.msk.bf16.gmra.mrb[28].mxu1 %vm1504_vm6, %v9216_v1  ;;  %v4525_v1 = vshrl.u32 %v4392_v38, 16  ;;  %v2147_v0 = vrot.slane %v7096_v41, 5  ;;  %v4507_v60 = vor.u32 %v4506_v46, %v4503_v5  ;;  %v2022_v38 = vld [vmem:[#allocation2 + $0x90] sm:$0xe]  ;;  %v4549_v55 = vshrl.u32 %v4395_v37, 16 }
 0x13e   : > { %6514 = vmatprep.mubr.msk.bf16.mxu1 %vm1504_vm6, %v9218_v45  ;;  %v8324_v45 = vrot.slane %v4510_v12, 5  ;;  %v4552_v4 = vshll.u32 %v4395_v37, 16  ;;  %v4494_v43 = vrot.slane %v4493_v11, 4  ;;  %v4520_v12 = vshll.u32 %v8318_v39, 16  ;;  %v7097_v37 = vld [vmem:[#allocation2 + $0x98] sm:$0x1] }
 0x13f   : > { %v4558_v3 = vshll.u32 %v8322_v63, 16  ;;  %v4562_v41 = vshrl.u32 %v8322_v63, 16  ;;  %v9223_v24 = vcombine.low %v8126_v29, %v8138_v36  ;;  %v4527_v56 = vrot.slane %v4525_v1, 4  ;;  %v8343_v39 = vld [vmem:[#allocation2 + $0x50] sm:$0x1]  ;;  %v7039_v63 = vld [vmem:[#allocation2 + $0xa8] sm:$0xff]  }
 0x140   : > { %v4530_v6 = vrot.slane %v4528_v19, 5  ;;  %v8340_v5 = vrot.slane %v4534_v49, 5  ;;  %v5988_v46 = vrot.slane %v2022_v38, 9  ;;  %v2149_v11 = vrot.slane %v2147_v0, 4  ;;  %v7098_v29 = vld [vmem:[%s9186_s4 + $0x8] sm:$0x3] }
 0x141   : > { %6667 = vmatmul.mubr.msk.bf16.gmra.mrb[16].mxu0 %vm1504_vm6, %v7036_v35  ;;  %v4517_v35 = vor.u32 %v4516_v13, %v8324_v45  ;;  %v4489_v36 = vsel %vm7251_vm5, %v4484_v44, %v8283_v48  ;;  %v2023_v1 = vld [vmem:[#allocation2 + $0x9c] sm:$0xe]  ;;  %v4551_v19 = vrot.slane %v4549_v55, 4  ;;  %v4554_v49 = vrot.slane %v4552_v4, 5  ;;  %v7099_v38 = vld [vmem:[#allocation2 + $0xa0] sm:$0xf] }
 0x142   : > { %6670 = vmatprep.mubr.msk.bf16.mxu0 %vm1504_vm6, %v7037_v31  ;;  %v8352_v31 = vrot.slane %v4507_v60, 4  ;;  %v4499_v13 = vsel %vm7251_vm5, %v4494_v43, %v4498_v53  ;;  %v4564_v22 = vrot.slane %v4562_v41, 4  ;;  %v4531_v14 = vor.u32 %v4530_v6, %v4527_v56  ;;  %v8362_v44 = vld [vmem:[#allocation2 + $0x5c] sm:$0x1]  ;;  %v2024_v43 = vld [vmem:[#allocation2 + $0xa8] sm:$0xe] }
 0x143   : > { %v4544_v60 = vshll.u32 %v8343_v39, 16  ;;  %v8364_v55 = vrot.slane %v4517_v35, 4  ;;  %v8368_v4 = vsel %vm7638_vm15, %v5988_v46, %v2147_v0  ;;  %v5989_v53 = vrot.slane %v2023_v1, 9  ;;  %v7100_v6 = vld [vmem:[#allocation2 + $0xa4] sm:$0x1] }
 0x144   : > { %v8375_v41 = vcombine.low %v4489_v36, %v4499_v13  ;;  %v4555_v35 = vor.u32 %v4554_v49, %v4551_v19  ;;  %v9225_v0 = vcombine.low %v8167_v51, %v8171_v2  ;;  %v4568_v46 = vshll.u32 %v8362_v44, 16  ;;  %v8393_v51 = vld [vmem:[#allocation2 + $0x64] sm:$0xf] }
 0x145   : > { %6515 = vmatmul.mubr.msk.bf16.vlgmr.msra.gmra.mrb[0].mxu1 %vm1504_vm6, %v9222_v58  ;;  %v2150_v58 = vrot.slane %v7097_v37, 5  ;;  %v8356_v37 = vrot.slane %v4558_v3, 5  ;;  %v2161_v3 = vrot.slane %v7936_v61, 5  ;;  %v4513_v61 = vsel %vm7251_vm5, %v8352_v31, %v8324_v45  ;;  %v2025_v31 = vld [vmem:[#allocation2 + $0xb4] sm:$0xe] }
 0x146   : > { %6547 = vmatpush3.bf16.msra.mxu1 %v8234_v15  ;;  %6518 = vmatprep.mubr.msk.bf16.mxu1 %vm1504_vm6, %v9223_v24  ;;  %v4540_v15 = vrot.slane %v4538_v42, 4  ;;  %v7038_v42 = vld [vmem:[#allocation2 + $0x9c] sm:$0xff]   ;;  %v2154_v24 = vrot.slane %v7099_v38, 5  ;;  %v4546_v1 = vrot.slane %v4544_v60, 5  ;;  %v5990_v19 = vrot.slane %v2024_v43, 9  ;;  %v7040_v38 = vld [vmem:[#allocation2 + $0xb4] sm:$0xff]  }
 0x147   : > { %7013 = vmatprep.subr.msk.bf16.mxu1 %vm1553_vm0, %v7098_v29  ;;  %v8358_v29 = vrot.slane %v4520_v12, 5  ;;  %v9224_v12 = vcombine.low %v8143_v17, %v8147_v9  ;;  %v8379_v56 = vsel %vm7638_vm15, %v2149_v11, %v2150_v58  ;;  %v4565_v9 = vor.u32 %v4564_v22, %v8356_v37  ;;  %v4398_v11 = vld [vmem:[#allocation2 + $0x60] sm:$0xf] }
 0x148   : > { %v4541_v48 = vor.u32 %v4540_v15, %v8340_v5  ;;  %v2157_v15 = vrot.slane %v7100_v6, 5  ;;  %v2156_v17 = vrot.slane %v2154_v24, 4  ;;  %v4532_v58 = vrot.slane %v4531_v14, 4  ;;  %v7041_v43 = vld [vmem:[#allocation2 + $0xc0] sm:$0xff]  }
 0x149   : > { %6671 = vmatmul.mubr.msk.bf16.gmra.mrb[20].mxu0 %vm1504_vm6, %v7038_v42  ;;  %v8397_v2 = vsel %vm7638_vm15, %v5989_v53, %v2154_v24  ;;  %v2163_v49 = vrot.slane %v2161_v3, 4  ;;  %v2164_v45 = vrot.slane %v7938_v27, 5  ;;  %v2168_v22 = vrot.slane %v7958_v47, 5 }
 0x14a   : > { %6674 = vmatprep.mubr.msk.bf16.mxu0 %vm1504_vm6, %v7039_v63  ;;  %v4542_v36 = vrot.slane %v4541_v48, 4  ;;  %v4523_v63 = vsel %vm7251_vm5, %v8364_v55, %v8358_v29  ;;  %v4556_v14 = vrot.slane %v4555_v35, 4  ;;  %v4573_v42 = vshrl.u32 %v4398_v11, 16 }
 0x14b   : > { %v4576_v13 = vshll.u32 %v4398_v11, 16  ;;  %v4566_v48 = vrot.slane %v4565_v9, 4  ;;  %v4570_v60 = vrot.slane %v4568_v46, 5  ;;  %v4582_v24 = vshll.u32 %v8393_v51, 16  ;;  %v8434_v9 = vld [vmem:[#allocation2 + $0x68] sm:$0x1] }
 0x14c   : > { %v4586_v53 = vshrl.u32 %v8393_v51, 16  ;;  %v8409_v27 = vsel %vm7638_vm15, %v2156_v17, %v2157_v15  ;;  %v4537_v47 = vsel %vm7251_vm5, %v4532_v58, %v8340_v5  ;;  %v4547_v29 = vsel %vm7251_vm5, %v4542_v36, %v4546_v1  ;;  %v8447_v36 = vld [vmem:[#allocation2 + $0x70] sm:$0xf] }
 0x14d   : > { %6519 = vmatmul.mubr.msk.bf16.gmra.mrb[4].mxu1 %vm1504_vm6, %v9224_v12  ;;  %v8418_v55 = vsel %vm7638_vm15, %v5990_v19, %v2161_v3  ;;  %v4401_v12 = vld [vmem:[#allocation2 + $0x6c] sm:$0xf]  ;;  %v8422_v6 = vsel %vm7638_vm15, %v2163_v49, %v2164_v45  ;;  %v5991_v35 = vrot.slane %v2025_v31, 9  ;;  %v2171_v15 = vrot.slane %v7960_v23, 5  ;;  %9228 = vst [vmem:[#allocation11_spill] sm:$0xff] %v8447_v36 }
 0x14e   : > { %6522 = vmatprep.mubr.msk.bf16.mxu1 %vm1504_vm6, %v9225_v0  ;;  %v2170_v0 = vrot.slane %v2168_v22, 4  ;;  %v9226_v17 = vcombine.low %v8175_v25, %v8185_v57  ;;  %v4561_v3 = vsel %vm7251_vm5, %v4556_v14, %v8356_v37  ;;  %v4575_v46 = vrot.slane %v4573_v42, 4  ;;  %v8458_v49 = vld [vmem:[#allocation2 + $0x74] sm:$0x1]  ;;  %v4404_v45 = vld [vmem:[#allocation2 + $0x78] sm:$0xf] }
 0x14f   : > { %v4578_v11 = vrot.slane %v4576_v13, 5  ;;  %v9227_v23 = vcombine.low %v8191_v8, %v8202_v20  ;;  %v4571_v25 = vsel %vm7251_vm5, %v4566_v48, %v4570_v60  ;;  %v8443_v57 = vrot.slane %v4582_v24, 5  ;;  %9229 = vst [vmem:[#allocation12_spill] sm:$0xff] %v8458_v49  ;;  %v8469_v42 = vld [vmem:[#allocation2 + $0x7c] sm:$0xf] }
 0x150   : > { %v8445_v58 = vrot.slane %v4586_v53, 4  ;;  %v4597_v37 = vshrl.u32 %v4401_v12, 16  ;;  %v8450_v1 = vcombine.low %v4513_v61, %v4523_v63  ;;  %v8454_v8 = vcombine.low %v4537_v47, %v4547_v29  ;;  %9230 = vst [vmem:[#allocation13_spill] sm:$0xff] %v8469_v42  ;;  %v4407_v13 = vld [vmem:[#allocation2 + $0x84] sm:$0xf] }
 0x151   : > { %6675 = vmatmul.mubr.msk.bf16.gmra.mrb[24].mxu0 %vm1504_vm6, %v7040_v38  ;;  %v8462_v14 = vsel %vm7638_vm15, %v5991_v35, %v2168_v22  ;;  %v8466_v31 = vsel %vm7638_vm15, %v2170_v0, %v2171_v15  ;;  %v4592_v61 = vshll.u32 %v8434_v9, 16  ;;  %v4600_v63 = vshll.u32 %v4401_v12, 16  ;;  %v8475_v53 = vld [vmem:[#allocation2 + $0x88] sm:$0xf]  ;;  %v4410_v22 = vld [vmem:[#allocation2 + $0x90] sm:$0xf] }
 0x152   : > { %6678 = vmatprep.mubr.msk.bf16.mxu0 %vm1504_vm6, %v7041_v43  ;;  %v8471_v38 = vcombine.low %v4561_v3, %v4571_v25  ;;  %v4579_v48 = vor.u32 %v4578_v11, %v4575_v46  ;;  %v4606_v60 = vshll.u32 %v8447_v36, 16  ;;  %v4610_v24 = vshrl.u32 %v8447_v36, 16  ;;  %9231 = vst [vmem:[#allocation14_spill] sm:$0xff] %v8475_v53  ;;  %v7042_v43 = vld [vmem:[#allocation2 + $0xcc] sm:$0xff]   ;;  %v8479_v0 = vld [vmem:[#allocation2 + $0x94] sm:$0xf] }
 0x153   : > { %v4589_v47 = vor.u32 %v8445_v58, %v8443_v57  ;;  %v4599_v29 = vrot.slane %v4597_v37, 4  ;;  %v4621_v35 = vshrl.u32 %v4404_v45, 16  ;;  %v4624_v12 = vshll.u32 %v4404_v45, 16  ;;  %9232 = vst [vmem:[#allocation15_spill] sm:$0xff] %v8479_v0  ;;  %v4413_v36 = vld [vmem:[#allocation2 + $0x9c] sm:$0xf] }
 0x154   : > { %v4630_v15 = vshll.u32 %v8469_v42, 16  ;;  %v4645_v3 = vshrl.u32 %v4407_v13, 16  ;;  %v4648_v46 = vshll.u32 %v4407_v13, 16  ;;  %v4602_v11 = vrot.slane %v4600_v63, 5 }
 0x155   : > { %6523 = vmatmul.mubr.msk.bf16.gmra.mrb[8].mxu1 %vm1504_vm6, %v9226_v17  ;;  %v4634_v17 = vshrl.u32 %v8469_v42, 16  ;;  %v4654_v25 = vshll.u32 %v8475_v53, 16  ;;  %v4658_v20 = vshrl.u32 %v8475_v53, 16  ;;  %v9233_v58 = vcombine.low %v8197_v50, %v8206_v7  ;;  %v8501_v7 = vld [vmem:[#allocation2 + $0x80] sm:$0x1] }
 0x156   : > { %6526 = vmatprep.mubr.msk.bf16.mxu1 %vm1504_vm6, %v9227_v23  ;;  %v4616_v23 = vshll.u32 %v8458_v49, 16  ;;  %v4669_v37 = vshrl.u32 %v4410_v22, 16  ;;  %v4672_v45 = vshll.u32 %v4410_v22, 16  ;;  %v4678_v19 = vshll.u32 %v8479_v0, 16 }
 0x157   : > { %v4682_v5 = vshrl.u32 %v8479_v0, 16  ;;  %v9234_v63 = vcombine.low %v8224_v32, %v8238_v62  ;;  %v8497_v13 = vrot.slane %v4606_v60, 5  ;;  %v4612_v53 = vrot.slane %v4610_v24, 4  ;;  %v8509_v62 = vld [vmem:[#allocation2 + $0x8c] sm:$0x1] }
 0x158   : > { %v4623_v42 = vrot.slane %v4621_v35, 4  ;;  %v4626_v50 = vrot.slane %v4624_v12, 5  ;;  %v8503_v22 = vrot.slane %v4630_v15, 5  ;;  %v4647_v0 = vrot.slane %v4645_v3, 4 }
 0x159   : > { %6679 = vmatmul.mubr.msk.bf16.gmra.mrb[28].mxu0 %vm1504_vm6, %v7042_v43  ;;  %v4650_v43 = vrot.slane %v4648_v46, 5  ;;  %v8505_v49 = vrot.slane %v4579_v48, 4  ;;  %v8507_v32 = vrot.slane %v4592_v61, 5  ;;  %v8511_v60 = vrot.slane %v4654_v25, 5  ;;  %v8520_v61 = vld [vmem:[#allocation2 + $0x98] sm:$0x1] }
 0x15a   : > { %6684 = vmatprep.mubr.msk.bf16.mxu0 %vm1504_vm6, %v8309_v59  ;;  %v4660_v24 = vrot.slane %v4658_v20, 4  ;;  %v4671_v35 = vrot.slane %v4669_v37, 4  ;;  %v4674_v12 = vrot.slane %v4672_v45, 5  ;;  %v4684_v59 = vrot.slane %v4682_v5, 4  ;;  %v8524_v45 = vld [vmem:[#allocation2 + $0xa0] sm:$0xf] }
 0x15b   : > { %v8515_v15 = vrot.slane %v4589_v47, 4  ;;  %v4613_v3 = vor.u32 %v4612_v53, %v8497_v13  ;;  %v8518_v48 = vrot.slane %v4616_v23, 5  ;;  %v4627_v46 = vor.u32 %v4626_v50, %v4623_v42 }
 0x15c   : > { %v4640_v20 = vshll.u32 %v8501_v7, 16  ;;  %v4651_v37 = vor.u32 %v4650_v43, %v4647_v0  ;;  %v4661_v5 = vor.u32 %v4660_v24, %v8511_v60  ;;  %v4693_v47 = vshrl.u32 %v4413_v36, 16 }
 0x15d   : > { %6527 = vmatmul.mubr.msk.bf16.gmra.mrb[12].mxu1 %vm1504_vm6, %v9233_v58  ;;  %v4636_v58 = vrot.slane %v4634_v17, 4  ;;  %v4603_v17 = vor.u32 %v4602_v11, %v4599_v29  ;;  %v4696_v29 = vshll.u32 %v4413_v36, 16  ;;  %v9235_v53 = vcombine.low %v8242_v18, %v8247_v34 }
 0x15e   : > { %6530 = vmatprep.mubr.msk.bf16.mxu1 %vm1504_vm6, %v9234_v63  ;;  %v8513_v63 = vrot.slane %v4678_v19, 5  ;;  %v4664_v19 = vshll.u32 %v8509_v62, 16  ;;  %v4585_v42 = vsel %vm7251_vm5, %v8505_v49, %v8443_v57  ;;  %v4675_v11 = vor.u32 %v4674_v12, %v4671_v35 }
 0x15f   : > { %v4637_v25 = vor.u32 %v4636_v58, %v8503_v22  ;;  %v4688_v23 = vshll.u32 %v8520_v61, 16  ;;  %v9236_v36 = vcombine.low %v8263_v40, %v8290_v52  ;;  %v4604_v18 = vrot.slane %v4603_v17, 4  ;;  %v8549_v40 = vld [vmem:[#allocation2 + $0xa4] sm:$0x1] }
 0x160   : > { %v4685_v0 = vor.u32 %v4684_v59, %v8513_v63  ;;  %v4614_v34 = vrot.slane %v4613_v3, 4  ;;  %v4702_v50 = vshll.u32 %v8524_v45, 16  ;;  %v4706_v58 = vshrl.u32 %v8524_v45, 16 }
 0x161   : > { %6685 = vmatmul.mubr.msk.bf16.vlgmr.msra.gmra.mrb[0].mxu0 %vm1504_vm6, %v8311_v33  ;;  %v4628_v57 = vrot.slane %v4627_v46, 4  ;;  %v4638_v49 = vrot.slane %v4637_v25, 4  ;;  %v4642_v43 = vrot.slane %v4640_v20, 5  ;;  %v4652_v33 = vrot.slane %v4651_v37, 4  ;;  %v8563_v37 = vld [vmem:[#allocation2 + $0xac] sm:$0xf] }
 0x162   : > { %6717 = vmatpush3.bf16.msra.mxu0 %v8302_v16  ;;  %6688 = vmatprep.mubr.msk.bf16.mxu0 %vm1504_vm6, %v8375_v41  ;;  %v4662_v24 = vrot.slane %v4661_v5, 4  ;;  %v4666_v35 = vrot.slane %v4664_v19, 5  ;;  %v4695_v52 = vrot.slane %v4693_v47, 4  ;;  %v4698_v12 = vrot.slane %v4696_v29, 5 }
 0x163   : > { %v4595_v59 = vsel %vm7251_vm5, %v8515_v15, %v8507_v32  ;;  %v4676_v17 = vrot.slane %v4675_v11, 4  ;;  %v4686_v16 = vrot.slane %v4685_v0, 4  ;;  %v4690_v3 = vrot.slane %v4688_v23, 5 }
 0x164   : > { %v4609_v41 = vsel %vm7251_vm5, %v4604_v18, %v8497_v13  ;;  %v4619_v46 = vsel %vm7251_vm5, %v4614_v34, %v8518_v48  ;;  %v8561_v25 = vrot.slane %v4702_v50, 5  ;;  %v4708_v20 = vrot.slane %v4706_v58, 4  ;;  %v5110_v50 = vld [vmem:[#allocation2 + $0x48] sm:$0xe] }
 0x165   : > { %6531 = vmatmul.mubr.msk.bf16.gmra.mrb[16].mxu1 %vm1504_vm6, %v9235_v53  ;;  %v4416_v53 = vld [vmem:[#allocation2 + $0xa8] sm:$0xf]  ;;  %v4633_v32 = vsel %vm7251_vm5, %v4628_v57, %v8503_v22  ;;  %v4643_v15 = vsel %vm7251_vm5, %v4638_v49, %v4642_v43  ;;  %v4657_v13 = vsel %vm7251_vm5, %v4652_v33, %v8511_v60  ;;  %v4712_v5 = vshll.u32 %v8549_v40, 16 }
 0x166   : > { %6534 = vmatprep.mubr.msk.bf16.mxu1 %vm1504_vm6, %v9236_v36  ;;  %v4667_v48 = vsel %vm7251_vm5, %v4662_v24, %v4666_v35  ;;  %v4699_v19 = vor.u32 %v4698_v12, %v4695_v52  ;;  %v4717_v47 = vshrl.u32 %v4416_v53, 16  ;;  %v4720_v29 = vshll.u32 %v4416_v53, 16  ;;  %v5111_v24 = vld [vmem:[#allocation2 + $0x54] sm:$0xe]  ;;  %v9240_v12 = vld [vmem:[#allocation8_spill] sm:$0xff] }
 0x167   : > { %v9237_v11 = vcombine.low %v8294_v54, %v8298_v26  ;;  %v4681_v22 = vsel %vm7251_vm5, %v4676_v17, %v8513_v63  ;;  %v4691_v60 = vsel %vm7251_vm5, %v4686_v16, %v4690_v3  ;;  %v4726_v0 = vshll.u32 %v8563_v37, 16  ;;  %v5112_v17 = vld [vmem:[#allocation2 + $0x60] sm:$0xe] }
 0x168   : > { %v4730_v23 = vshrl.u32 %v8563_v37, 16  ;;  %v9238_v36 = vor.u32 %v8079_v10, %v8077_v30  ;;  %v9239_v54 = vcombine.low %v8368_v4, %v8379_v56  ;;  %v6008_v26 = vcombine.low %v8462_v14, %v8466_v31  ;;  %v8611_v4 = vld [vmem:[#allocation2 + $0xb0] sm:$0x1]  ;;  %v4419_v56 = vld [vmem:[#allocation2 + $0xb4] sm:$0xf]  ;;  %v9247_v14 = vld [vmem:[#allocation13_spill] sm:$0xff] }
 0x169   : > { %6689 = vmatmul.mubr.msk.bf16.gmra.mrb[4].mxu0 %vm1504_vm6, %v8450_v1  ;;  %v6180_v63 = vcombine.low %v4585_v42, %v4595_v59  ;;  %v4709_v34 = vor.u32 %v4708_v20, %v8561_v25  ;;  %v8603_v10 = vcombine.low %v4609_v41, %v4619_v46  ;;  %v8605_v58 = vcombine.low %v4633_v32, %v4643_v15  ;;  %v9241_v15 = vld [vmem:[#allocation10_spill] sm:$0xff] }
 0x16a   : > { %v8590_v18 = vrot.slane %v9238_v36, 4  ;;  %6692 = vmatprep.mubr.msk.bf16.mxu0 %vm1504_vm6, %v8454_v8  ;;  %v8607_v1 = vcombine.low %v4657_v13, %v4667_v48  ;;  %v8609_v57 = vrot.slane %v4712_v5, 5  ;;  %v8613_v49 = vcombine.low %v4681_v22, %v4691_v60  ;;  %v8635_v22 = vld [vmem:[#allocation2 + $0xb8] sm:$0xf] }
 0x16b   : > { %v8615_v42 = vrot.slane %v4699_v19, 4  ;;  %v4719_v43 = vrot.slane %v4717_v47, 4  ;;  %v4722_v33 = vrot.slane %v4720_v29, 5  ;;  %v8617_v35 = vrot.slane %v4726_v0, 5  ;;  %v5113_v29 = vld [vmem:[#allocation2 + $0x6c] sm:$0xe] }
 0x16c   : > { %v4732_v8 = vrot.slane %v4730_v23, 4  ;;  %v6210_v52 = vrot.slane %v5110_v50, 9  ;;  %v5200_v59 = vrot.slane %v9240_v12, 5  ;;  %v8620_v16 = vrot.slane %v4709_v34, 4  ;;  %v9245_v34 = vld [vmem:[#allocation12_spill] sm:$0xff] }
 0x16d   : > { %6535 = vmatmul.mubr.msk.bf16.gmra.mrb[20].mxu1 %vm1504_vm6, %v9237_v11  ;;  %v4736_v3 = vshll.u32 %v8611_v4, 16  ;;  %v4741_v53 = vshrl.u32 %v4419_v56, 16  ;;  %v5203_v41 = vrot.slane %v8343_v39, 5  ;;  %v6211_v32 = vrot.slane %v5111_v24, 9 }
 0x16e   : > { %6538 = vmatprep.mubr.msk.bf16.mxu1 %vm1504_vm6, %v9239_v54  ;;  %v8626_v46 = vsel %vm7638_vm15, %v6210_v52, %v5200_v59  ;;  %v5202_v20 = vrot.slane %v5200_v59, 4  ;;  %v5207_v13 = vrot.slane %v9241_v15, 5  ;;  %v4744_v5 = vshll.u32 %v4419_v56, 16  ;;  %v7043_v59 = vld [vmem:[#allocation2 + $0xc] sm:$0xff]   ;;  %v5114_v15 = vld [vmem:[#allocation2 + $0x78] sm:$0xe] }
 0x16f   : > { %v5210_v48 = vrot.slane %v8362_v44, 5  ;;  %v6212_v19 = vrot.slane %v5112_v17, 9  ;;  %v5214_v47 = vrot.slane %v8393_v51, 5  ;;  %v9242_v11 = vcombine.low %v8397_v2, %v8409_v27 }
 0x170   : > { %v4723_v39 = vor.u32 %v4722_v33, %v4719_v43  ;;  %v8639_v60 = vsel %vm7638_vm15, %v5202_v20, %v5203_v41  ;;  %v8643_v0 = vsel %vm7638_vm15, %v6211_v32, %v5207_v13  ;;  %v5209_v44 = vrot.slane %v5207_v13, 4 }
 0x171   : > { %6693 = vmatmul.mubr.msk.bf16.gmra.mrb[8].mxu0 %vm1504_vm6, %v8471_v38  ;;  %v9243_v51 = vcombine.low %v8418_v55, %v8422_v6  ;;  %v6227_v2 = vcombine.low %v8626_v46, %v8639_v60  ;;  %v8655_v27 = vsel %vm7638_vm15, %v6212_v19, %v5214_v47  ;;  %v5216_v23 = vrot.slane %v5214_v47, 4  ;;  %v9244_v55 = vld [vmem:[#allocation11_spill] sm:$0xff]  ;;  %v7108_v60 = vld [vmem:[#allocation2 + $0x8c] sm:$0x1] }
 0x172   : > { %v5217_v36 = vrot.slane %v8434_v9, 5  ;;  %6696 = vmatprep.mubr.msk.bf16.mxu0 %vm1504_vm6, %v6180_v63  ;;  %v8661_v38 = vsel %vm7638_vm15, %v5209_v44, %v5210_v48  ;;  %v6213_v54 = vrot.slane %v5113_v29, 9  ;;  %v5221_v6 = vrot.slane %v9244_v55, 5  ;;  %v2852_v63 = vld [vmem:[#allocation2 + $0x78] sm:$0xf] }
 0x173   : > { %v5224_v50 = vrot.slane %v9245_v34, 5  ;;  %v4733_v56 = vor.u32 %v4732_v8, %v8617_v35  ;;  %v4750_v43 = vshll.u32 %v8635_v22, 16  ;;  %v6228_v33 = vcombine.low %v8643_v0, %v8661_v38  ;;  %v4422_v48 = vld [vmem:[#allocation2 + $0xc0] sm:$0xf] }
 0x174   : > { %v8671_v9 = vsel %vm7638_vm15, %v5216_v23, %v5217_v36  ;;  %v4705_v24 = vsel %vm7251_vm5, %v8615_v42, %v8561_v25  ;;  %v8681_v8 = vsel %vm7638_vm15, %v6213_v54, %v5221_v6  ;;  %v5223_v12 = vrot.slane %v5221_v6, 4  ;;  %v9246_v54 = vld [vmem:[#allocation4_spill] sm:$0xff] }
 0x175   : > { %6539 = vmatmul.mubr.msk.bf16.gmra.mrb[24].mxu1 %vm1504_vm6, %v9242_v11  ;;  %v6229_v52 = vcombine.low %v8655_v27, %v8671_v9  ;;  %v4715_v17 = vsel %vm7251_vm5, %v8620_v16, %v8609_v57  ;;  %v8687_v41 = vrot.slane %v4736_v3, 5  ;;  %v8689_v20 = vrot.slane %v4741_v53, 4  ;;  %v9250_v16 = vld [vmem:[#allocation15_spill] sm:$0xff]  ;;  %v7112_v9 = vld [vmem:[#allocation2 + $0xa4] sm:$0x1] }
 0x176   : > { %6542 = vmatprep.mubr.msk.bf16.mxu1 %vm1504_vm6, %v9243_v51  ;;  %v8691_v32 = vrot.slane %v4744_v5, 5  ;;  %v4754_v13 = vshrl.u32 %v8635_v22, 16  ;;  %v8696_v19 = vsel %vm7638_vm15, %v5223_v12, %v5224_v50  ;;  %v3090_v47 = vshrl.u32 %v2852_v63, 16  ;;  %v5115_v5 = vld [vmem:[#allocation2 + $0x84] sm:$0xe] }
 0x177   : > { %v3093_v29 = vshll.u32 %v2852_v63, 16  ;;  %v8698_v11 = vrot.slane %v4723_v39, 4  ;;  %v8700_v44 = vrot.slane %v4733_v56, 4  ;;  %v8702_v3 = vrot.slane %v4750_v43, 5  ;;  %v8710_v51 = vld [vmem:[#allocation2 + $0xc4] sm:$0xf] }
 0x178   : > { %v6230_v53 = vcombine.low %v8681_v8, %v8696_v19  ;;  %v3092_v23 = vrot.slane %v3090_v47, 4  ;;  %v3112_v39 = vsel %vm7251_vm5, %v8590_v18, %v9246_v54  ;;  %v6214_v55 = vrot.slane %v5114_v15, 9  ;;  %v9248_v43 = vld [vmem:[#allocation14_spill] sm:$0xff]  ;;  %v8725_v12 = vld [vmem:[#allocation2 + $0xbc] sm:$0x1] }
 0x179   : > { %v3095_v36 = vrot.slane %v3093_v29, 5  ;;  %6697 = vmatmul.mubr.msk.bf16.gmra.mrb[12].mxu0 %vm1504_vm6, %v8603_v10  ;;  %v4765_v6 = vshrl.u32 %v4422_v48, 16  ;;  %v4768_v34 = vshll.u32 %v4422_v48, 16  ;;  %v5228_v31 = vrot.slane %v9247_v14, 5  ;;  %v7044_v48 = vld [vmem:[#allocation2 + $0x18] sm:$0xff]   ;;  %v7045_v14 = vld [vmem:[#allocation2 + $0x24] sm:$0xff]  }
 0x17a   : > { %6700 = vmatprep.mubr.msk.bf16.mxu0 %vm1504_vm6, %v8605_v58  ;;  %v6215_v56 = vrot.slane %v5115_v5, 9  ;;  %v5235_v63 = vrot.slane %v9248_v43, 5  ;;  %v5238_v18 = vrot.slane %v8509_v62, 5  ;;  %v4774_v10 = vshll.u32 %v8710_v51, 16  ;;  %v7114_v19 = vld [vmem:[#allocation2 + $0xb8] sm:$0xf] }
 0x17b   : > { %v3096_v50 = vor.u32 %v3095_v36, %v3092_v23  ;;  %v8731_v15 = vsel %vm7638_vm15, %v6214_v55, %v5228_v31  ;;  %v4756_v47 = vrot.slane %v4754_v13, 4  ;;  %v4747_v62 = vor.u32 %v8691_v32, %v8689_v20  ;;  %v8739_v23 = vld [vmem:[#allocation2 + $0xc8] sm:$0x1] }
 0x17c   : > { %v8735_v29 = vsel %vm7638_vm15, %v6215_v56, %v5235_v63  ;;  %v5237_v5 = vrot.slane %v5235_v63, 4  ;;  %v4767_v36 = vrot.slane %v4765_v6, 4  ;;  %v4770_v54 = vrot.slane %v4768_v34, 5  ;;  %v8757_v34 = vld [vmem:[#allocation2 + $0xd0] sm:$0xf] }
 0x17d   : > { %6543 = vmatmul.mubr.msk.bf16.gmra.mrb[28].mxu1 %vm1504_vm6, %v6008_v26  ;;  %v5231_v26 = vrot.slane %v8501_v7, 5  ;;  %v5230_v7 = vrot.slane %v5228_v31, 4  ;;  %v3097_v58 = vrot.slane %v3096_v50, 4  ;;  %v4760_v13 = vshll.u32 %v8725_v12, 16  ;;  %v4425_v31 = vld [vmem:[#allocation2 + $0xcc] sm:$0xf] }
 0x17e   : > { %6548 = vmatprep.mubr.msk.bf16.mxu1 %vm1504_vm6, %v7043_v59  ;;  %v4778_v59 = vshrl.u32 %v8710_v51, 16  ;;  %v8753_v20 = vsel %vm7638_vm15, %v5237_v5, %v5238_v18  ;;  %v8755_v32 = vrot.slane %v4774_v10, 5  ;;  %v4739_v63 = vsel %vm7251_vm5, %v8700_v44, %v8687_v41  ;;  %v9249_v10 = vld [vmem:[#allocation3_spill] sm:$0xff] }
 0x17f   : > { %v8743_v55 = vsel %vm7638_vm15, %v5230_v7, %v5231_v26  ;;  %v3102_v50 = vsel %vm7251_vm5, %v3097_v58, %v8077_v30  ;;  %v6232_v43 = vcombine.low %v8735_v29, %v8753_v20  ;;  %v4729_v30 = vsel %vm7251_vm5, %v8698_v11, %v8617_v35  ;;  %v5116_v58 = vld [vmem:[#allocation2 + $0x90] sm:$0xe]  ;;  %v5117_v5 = vld [vmem:[#allocation2 + $0x9c] sm:$0xe] }
 0x180   : > { %v6231_v56 = vcombine.low %v8731_v15, %v8743_v55  ;;  %v4780_v6 = vrot.slane %v4778_v59, 4  ;;  %v8759_v26 = vcombine.low %v3102_v50, %v3112_v39  ;;  %v4757_v18 = vor.u32 %v4756_v47, %v8702_v3  ;;  %v7047_v50 = vld [vmem:[#allocation2 + $0x3c] sm:$0xff]  }
 0x181   : > { %v4784_v39 = vshll.u32 %v8739_v23, 16  ;;  %6701 = vmatmul.mubr.msk.bf16.gmra.mrb[16].mxu0 %vm1504_vm6, %v8607_v1  ;;  %v4771_v59 = vor.u32 %v4770_v54, %v4767_v36  ;;  %v4789_v7 = vshrl.u32 %v4425_v31, 16  ;;  %v6185_v1 = vcombine.low %v4705_v24, %v4715_v17  ;;  %v7046_v36 = vld [vmem:[#allocation2 + $0x30] sm:$0xff]   ;;  %v2870_v55 = vld [vmem:[#allocation2 + $0xc0] sm:$0xf] }
 0x182   : > { %6704 = vmatprep.mubr.msk.bf16.mxu0 %vm1504_vm6, %v8613_v49  ;;  %v4798_v35 = vshll.u32 %v8757_v34, 16  ;;  %v4802_v41 = vshrl.u32 %v8757_v34, 16  ;;  %v6186_v11 = vcombine.low %v4729_v30, %v4739_v63  ;;  %v4748_v44 = vrot.slane %v4747_v62, 4 }
 0x183   : > { %v4762_v47 = vrot.slane %v4760_v13, 5  ;;  %v4781_v49 = vor.u32 %v4780_v6, %v8755_v32  ;;  %v4758_v54 = vrot.slane %v4757_v18, 4  ;;  %v6216_v57 = vrot.slane %v5116_v58, 9  ;;  %v8797_v6 = vld [vmem:[#allocation2 + $0xd4] sm:$0x1] }
 0x184   : > { %v4791_v25 = vrot.slane %v4789_v7, 4  ;;  %v5245_v24 = vrot.slane %v8520_v61, 5  ;;  %v8795_v17 = vrot.slane %v4798_v35, 5  ;;  %v4804_v30 = vrot.slane %v4802_v41, 4  ;;  %v5106_v41 = vld [vmem:[#allocation2 + $0x18] sm:$0xe] }
 0x185   : > { %6549 = vmatmul.mubr.msk.bf16.vlgmr.msra.gmra.mrb[0].mxu1 %vm1504_vm6, %v7044_v48  ;;  %v4792_v48 = vshll.u32 %v4425_v31, 16  ;;  %v5242_v31 = vrot.slane %v9250_v16, 5  ;;  %v6217_v13 = vrot.slane %v5117_v5, 9  ;;  %v4782_v63 = vrot.slane %v4781_v49, 4  ;;  %v7049_v16 = vld [vmem:[#allocation2 + $0x54] sm:$0xff]  }
 0x186   : > { %6751 = vmatpush3.bf16.msra.mxu1 %v9249_v10  ;;  %6552 = vmatprep.mubr.msk.bf16.mxu1 %vm1504_vm6, %v7045_v14  ;;  %v4786_v14 = vrot.slane %v4784_v39, 5  ;;  %v4772_v10 = vrot.slane %v4771_v59, 4  ;;  %v5249_v39 = vrot.slane %v8524_v45, 5  ;;  %v5252_v59 = vrot.slane %v8549_v40, 5 }
 0x187   : > { %v4794_v42 = vrot.slane %v4792_v48, 5  ;;  %v5244_v62 = vrot.slane %v5242_v31, 4  ;;  %v8801_v18 = vsel %vm7638_vm15, %v6216_v57, %v5242_v31  ;;  %v4753_v7 = vsel %vm7251_vm5, %v4748_v44, %v8702_v3 }
 0x188   : > { %v4763_v48 = vsel %vm7251_vm5, %v4758_v54, %v4762_v47  ;;  %v5251_v58 = vrot.slane %v5249_v39, 4  ;;  %v4805_v40 = vor.u32 %v4804_v30, %v8795_v17  ;;  %v4808_v35 = vshll.u32 %v8797_v6, 16 }
 0x189   : > { %v8808_v61 = vsel %vm7638_vm15, %v5244_v62, %v5245_v24  ;;  %6705 = vmatmul.mubr.msk.bf16.gmra.mrb[20].mxu0 %vm1504_vm6, %v6185_v1  ;;  %v4795_v45 = vor.u32 %v4794_v42, %v4791_v25  ;;  %v8824_v49 = vsel %vm7638_vm15, %v6217_v13, %v5249_v39  ;;  %v4777_v3 = vsel %vm7251_vm5, %v4772_v10, %v8755_v32  ;;  %v5118_v25 = vld [vmem:[#allocation2 + $0xa8] sm:$0xe] }
 0x18a   : > { %6708 = vmatprep.mubr.msk.bf16.mxu0 %vm1504_vm6, %v6186_v11  ;;  %v6233_v1 = vcombine.low %v8801_v18, %v8808_v61  ;;  %v4787_v44 = vsel %vm7251_vm5, %v4782_v63, %v4786_v14  ;;  %v7101_v11 = vld [vmem:[#allocation2 + $0x1c] sm:$0xf]  ;;  %v8833_v5 = vsel %vm7638_vm15, %v5251_v58, %v5252_v59  ;;  %v6187_v57 = vcombine.low %v4753_v7, %v4763_v48  ;;  %v7102_v14 = vld [vmem:[#allocation2 + $0x20] sm:$0x1]  ;;  %v5119_v63 = vld [vmem:[#allocation2 + $0xb4] sm:$0xe] }
 0x18b   : > { %v5172_v47 = vrot.slane %v7101_v11, 5  ;;  %v6234_v54 = vcombine.low %v8824_v49, %v8833_v5  ;;  %v4796_v31 = vrot.slane %v4795_v45, 4  ;;  %v6188_v42 = vcombine.low %v4777_v3, %v4787_v44  ;;  %v5107_v7 = vld [vmem:[#allocation2 + $0x24] sm:$0xe]  ;;  %v7103_v48 = vld [vmem:[#allocation2 + $0x28] sm:$0xf] }
 0x18c   : > { %v4806_v32 = vrot.slane %v4805_v40, 4  ;;  %v4810_v10 = vrot.slane %v4808_v35, 5  ;;  %v5175_v30 = vrot.slane %v7102_v14, 5  ;;  %v6218_v62 = vrot.slane %v5118_v25, 9  ;;  %v5108_v58 = vld [vmem:[#allocation2 + $0x30] sm:$0xe] }
 0x18d   : > { %6553 = vmatmul.mubr.msk.bf16.gmra.mrb[4].mxu1 %vm1504_vm6, %v7046_v36  ;;  %v7048_v36 = vld [vmem:[#allocation2 + $0x48] sm:$0xff]   ;;  %v5174_v24 = vrot.slane %v5172_v47, 4  ;;  %v5256_v13 = vrot.slane %v8563_v37, 5  ;;  %v4801_v39 = vsel %vm7251_vm5, %v4796_v31, %v8795_v17  ;;  %v5179_v45 = vrot.slane %v7103_v48, 5 }
 0x18e   : > { %6556 = vmatprep.mubr.msk.bf16.mxu1 %vm1504_vm6, %v7047_v50  ;;  %v6206_v50 = vrot.slane %v5106_v41, 9  ;;  %v5259_v40 = vrot.slane %v8611_v4, 5  ;;  %v4811_v37 = vsel %vm7251_vm5, %v4806_v32, %v4810_v10  ;;  %v9251_v35 = vld [vmem:[#allocation5_spill] sm:$0xff]  ;;  %v6219_v11 = vrot.slane %v5119_v63, 9 }
 0x18f   : > { %v5186_v41 = vrot.slane %v9251_v35, 5  ;;  %v8853_v3 = vsel %vm7638_vm15, %v6218_v62, %v5256_v13  ;;  %v5258_v17 = vrot.slane %v5256_v13, 4  ;;  %v5176_v44 = vsel %vm7638_vm15, %v5174_v24, %v5175_v30  ;;  %v7051_v32 = vld [vmem:[#allocation2 + $0x6c] sm:$0xff]  }
 0x190   : > { %v5173_v59 = vsel %vm7638_vm15, %v6206_v50, %v5172_v47  ;;  %v5263_v47 = vrot.slane %v8635_v22, 5  ;;  %v5266_v4 = vrot.slane %v8725_v12, 5  ;;  %v6208_v50 = vrot.slane %v5108_v58, 9  ;;  %v9252_v62 = vld [vmem:[#allocation6_spill] sm:$0xff] }
 0x191   : > { %6709 = vmatmul.mubr.msk.bf16.gmra.mrb[24].mxu0 %vm1504_vm6, %v6187_v57  ;;  %v6207_v57 = vrot.slane %v5107_v7, 9  ;;  %v8861_v25 = vsel %vm7638_vm15, %v5258_v17, %v5259_v40  ;;  %v6223_v12 = vcombine.low %v5173_v59, %v5176_v44  ;;  %v5181_v14 = vrot.slane %v5179_v45, 4  ;;  %v5109_v7 = vld [vmem:[#allocation2 + $0x3c] sm:$0xe]  ;;  %v5121_v17 = vld [vmem:[#allocation2 + $0xcc] sm:$0xe] }
 0x192   : > { %6712 = vmatprep.mubr.msk.bf16.mxu0 %vm1504_vm6, %v6188_v42  ;;  %v6189_v42 = vcombine.low %v4801_v39, %v4811_v37  ;;  %v6235_v10 = vcombine.low %v8853_v3, %v8861_v25  ;;  %v8867_v24 = vsel %vm7638_vm15, %v6219_v11, %v5263_v47  ;;  %v5265_v22 = vrot.slane %v5263_v47, 4  ;;  %v9253_v37 = vld [vmem:[#allocation7_spill] sm:$0xff]  ;;  %v2849_v44 = vld [vmem:[#allocation2 + $0x6c] sm:$0xf] }
 0x193   : > { %v5188_v30 = vrot.slane %v5186_v41, 4  ;;  %v5189_v13 = vrot.slane %v9252_v62, 5  ;;  %v5180_v59 = vsel %vm7638_vm15, %v6207_v57, %v5179_v45  ;;  %v5187_v58 = vsel %vm7638_vm15, %v6208_v50, %v5186_v41  ;;  %v7052_v11 = vld [vmem:[#allocation2 + $0x78] sm:$0xff]   ;;  %v7053_v45 = vld [vmem:[#allocation2 + $0x84] sm:$0xff]   ;;  %v7105_v50 = vld [vmem:[#allocation2 + $0x70] sm:$0xf] }
 0x194   : > { %v8872_v63 = vsel %vm7638_vm15, %v5265_v22, %v5266_v4  ;;  %v5193_v35 = vrot.slane %v9253_v37, 5  ;;  %v6209_v47 = vrot.slane %v5109_v7, 9  ;;  %v9254_v57 = vld [vmem:[#allocation9_spill] sm:$0xff]  ;;  %v3069_v22 = vshll.u32 %v2849_v44, 16 }
 0x195   : > { %6557 = vmatmul.mubr.msk.bf16.gmra.mrb[8].mxu1 %vm1504_vm6, %v7048_v36  ;;  %v7050_v36 = vld [vmem:[#allocation2 + $0x60] sm:$0xff]   ;;  %v6236_v39 = vcombine.low %v8867_v24, %v8872_v63  ;;  %v5190_v40 = vsel %vm7638_vm15, %v5188_v30, %v5189_v13  ;;  %v5277_v41 = vrot.slane %v8757_v34, 5  ;;  %v5280_v13 = vrot.slane %v8797_v6, 5 }
 0x196   : > { %6560 = vmatprep.mubr.msk.bf16.mxu1 %vm1504_vm6, %v7049_v16  ;;  %v7104_v16 = vld [vmem:[#allocation2 + $0x2c] sm:$0x1]  ;;  %v5270_v29 = vrot.slane %v8710_v51, 5  ;;  %vm5778_vm0 = vcmask 1040384  }
 0x197   : > { %v5182_v31 = vrot.slane %v7104_v16, 5  ;;  %v5196_v16 = vrot.slane %v9254_v57, 5  ;;  %v5279_v62 = vrot.slane %v5277_v41, 4 }
 0x199   : > { %6713 = vmatmul.mubr.msk.bf16.gmra.mrb[28].mxu0 %vm1504_vm6, %v6189_v42  ;;  %v5183_v48 = vsel %vm7638_vm15, %v5181_v14, %v5182_v31  ;;  %v6221_v42 = vrot.slane %v5121_v17, 9  ;;  %v3066_v31 = vshrl.u32 %v2849_v44, 16  ;;  %v3079_v14 = vshrl.u32 %v7105_v50, 16  ;;  %v7054_v17 = vld [vmem:[#allocation2 + $0x90] sm:$0xff]  }
 0x19a   : > { %6718 = vmatprep.mubr.msk.bf16.mxu0 %vm1504_vm6, %v6223_v12  ;;  %v6224_v4 = vcombine.low %v5180_v59, %v5183_v48  ;;  %v3075_v12 = vshll.u32 %v7105_v50, 16  ;;  %v5194_v59 = vsel %vm7638_vm15, %v6209_v47, %v5193_v35  ;;  %v3071_v48 = vrot.slane %v3069_v22, 5 }
 0x19b   : > { %v8894_v30 = vsel %vm7638_vm15, %v6221_v42, %v5277_v41  ;;  %v3068_v7 = vrot.slane %v3066_v31, 4  ;;  %v3081_v6 = vrot.slane %v3079_v14, 4  ;;  %v7107_v42 = vld [vmem:[#allocation2 + $0x88] sm:$0xf]  ;;  %v2858_v41 = vld [vmem:[#allocation2 + $0x90] sm:$0xf] }
 0x19c   : > { %v3127_v31 = vshrl.u32 %v7107_v42, 16  ;;  %v7056_v14 = vld [vmem:[#allocation2 + $0xa8] sm:$0xff]  }
 0x19d   : > { %6561 = vmatmul.mubr.msk.bf16.gmra.mrb[12].mxu1 %vm1504_vm6, %v7050_v36  ;;  %v6225_v36 = vcombine.low %v5187_v58, %v5190_v40  ;;  %v8906_v58 = vsel %vm7638_vm15, %v5279_v62, %v5280_v13  ;;  %v3077_v40 = vrot.slane %v3075_v12, 5  ;;  %v3072_v47 = vor.u32 %v3071_v48, %v3068_v7  ;;  %v7057_v62 = vld [vmem:[#allocation2 + $0xb4] sm:$0xff]  }
 0x19e   : > { %6564 = vmatprep.mubr.msk.bf16.mxu1 %vm1504_vm6, %v7051_v32  ;;  %v5195_v32 = vrot.slane %v5193_v35, 4  ;;  %v6238_v37 = vcombine.low %v8894_v30, %v8906_v58  ;;  %v2855_v35 = vld [vmem:[#allocation2 + $0x84] sm:$0xf]  ;;  %v3129_v7 = vrot.slane %v3127_v31, 4  ;;  %v3138_v48 = vshrl.u32 %v2858_v41, 16 }
 0x19f   : > { %v3114_v57 = vshrl.u32 %v2855_v35, 16  ;;  %v3073_v22 = vrot.slane %v3072_v47, 4 }
 0x1a0   : > { %v5197_v34 = vsel %vm7638_vm15, %v5195_v32, %v5196_v16  ;;  %v3117_v16 = vshll.u32 %v2855_v35, 16  ;;  %v3123_v32 = vshll.u32 %v7107_v42, 16 }
 0x1a1   : > { %6719 = vmatmul.mubr.msk.bf16.vlgmr.msra.gmra.mrb[0].mxu0 %vm1504_vm6, %v6224_v4  ;;  %v6226_v44 = vcombine.low %v5194_v59, %v5197_v34  ;;  %v3082_v4 = vor.u32 %v3081_v6, %v3077_v40  ;;  %v3116_v13 = vrot.slane %v3114_v57, 4  ;;  %v3141_v6 = vshll.u32 %v2858_v41, 16 }
 0x1a2   : > { %6722 = vmatprep.mubr.msk.bf16.mxu0 %vm1504_vm6, %v6225_v36  ;;  %v3119_v59 = vrot.slane %v3117_v16, 5  ;;  %v8917_v34 = vrot.slane %v3123_v32, 5  ;;  %v3140_v32 = vrot.slane %v3138_v48, 4 }
 0x1a3   : > { %v3083_v50 = vrot.slane %v3082_v4, 4  ;;  %v3143_v31 = vrot.slane %v3141_v6, 5  ;;  %v7111_v6 = vld [vmem:[#allocation2 + $0x98] sm:$0x1] }
 0x1a4   : > { %v3130_v42 = vor.u32 %v3129_v7, %v8917_v34 }
 0x1a5   : > { %6565 = vmatmul.mubr.msk.bf16.gmra.mrb[16].mxu1 %vm1504_vm6, %v7052_v11  ;;  %v7055_v11 = vld [vmem:[#allocation2 + $0x9c] sm:$0xff]   ;;  %v3144_v48 = vor.u32 %v3143_v31, %v3140_v32 }
 0x1a6   : > { %6568 = vmatprep.mubr.msk.bf16.mxu1 %vm1504_vm6, %v7053_v45  ;;  %v7106_v45 = vld [vmem:[#allocation2 + $0x74] sm:$0x1]  ;;  %v3131_v7 = vrot.slane %v3130_v42, 4  ;;  %v3223_v42 = vshrl.u32 %v7114_v19, 16 }
 0x1a7   : > { %v3085_v36 = vshll.u32 %v7106_v45, 16 }
 0x1a8   : > { %v3225_v15 = vrot.slane %v3223_v42, 4  ;;  %v5273_v42 = vrot.slane %v8739_v23, 5 }
 0x1a9   : > { %6723 = vmatmul.mubr.msk.bf16.gmra.mrb[4].mxu0 %vm1504_vm6, %v6226_v44  ;;  %v3087_v12 = vrot.slane %v3085_v36, 5  ;;  %v3078_v44 = vsel %vm7251_vm5, %v3073_v22, %v3077_v40  ;;  %v7110_v36 = vld [vmem:[#allocation2 + $0xa0] sm:$0xf]  ;;  %v3120_v40 = vor.u32 %v3119_v59, %v3116_v13  ;;  %v2864_v13 = vld [vmem:[#allocation2 + $0xa8] sm:$0xf] }
 0x1aa   : > { %6726 = vmatprep.mubr.msk.bf16.mxu0 %vm1504_vm6, %v6227_v2  ;;  %v3133_v2 = vshll.u32 %v7108_v60, 16  ;;  %v3171_v57 = vshll.u32 %v7110_v36, 16  ;;  %v3175_v16 = vshrl.u32 %v7110_v36, 16  ;;  %v7058_v22 = vld [vmem:[#allocation2 + $0xc0] sm:$0xff]   ;;  %v2867_v60 = vld [vmem:[#allocation2 + $0xb4] sm:$0xf] }
 0x1ab   : > { %v3088_v46 = vsel %vm7251_vm5, %v3083_v50, %v3087_v12  ;;  %v3121_v59 = vrot.slane %v3120_v40, 4  ;;  %v3210_v40 = vshrl.u32 %v2867_v60, 16  ;;  %v3213_v8 = vshll.u32 %v2867_v60, 16 }
 0x1ac   : > { %v6067_v41 = vcombine.low %v3078_v44, %v3088_v46  ;;  %v3135_v50 = vrot.slane %v3133_v2, 5  ;;  %v3186_v44 = vshrl.u32 %v2864_v13, 16  ;;  %v3189_v46 = vshll.u32 %v2864_v13, 16 }
 0x1ad   : > { %6569 = vmatmul.mubr.msk.bf16.gmra.mrb[20].mxu1 %vm1504_vm6, %v7054_v17  ;;  %v2861_v17 = vld [vmem:[#allocation2 + $0x9c] sm:$0xf]  ;;  %v3215_v13 = vrot.slane %v3213_v8, 5 }
 0x1ae   : > { %6572 = vmatprep.mubr.msk.bf16.mxu1 %vm1504_vm6, %v7055_v11  ;;  %v7109_v11 = vld [vmem:[#allocation2 + $0x94] sm:$0xf]  ;;  %v3162_v4 = vshrl.u32 %v2861_v17, 16  ;;  %v3165_v45 = vshll.u32 %v2861_v17, 16  ;;  %v3157_v17 = vshll.u32 %v7111_v6, 16  ;;  %v3136_v36 = vsel %vm7251_vm5, %v3131_v7, %v3135_v50 }
 0x1af   : > { %v3147_v35 = vshll.u32 %v7109_v11, 16  ;;  %v3151_v47 = vshrl.u32 %v7109_v11, 16 }
 0x1b0   : > { %v3164_v38 = vrot.slane %v3162_v4, 4 }
 0x1b1   : > { %6727 = vmatmul.mubr.msk.bf16.gmra.mrb[8].mxu0 %vm1504_vm6, %v6228_v33  ;;  %v8934_v12 = vrot.slane %v3147_v35, 5  ;;  %v3153_v0 = vrot.slane %v3151_v47, 4  ;;  %v3167_v33 = vrot.slane %v3165_v45, 5  ;;  %v7113_v35 = vld [vmem:[#allocation2 + $0xac] sm:$0xf]  ;;  %v3126_v45 = vsel %vm7251_vm5, %v3121_v59, %v8917_v34 }
 0x1b2   : > { %6730 = vmatprep.mubr.msk.bf16.mxu0 %vm1504_vm6, %v6229_v52  ;;  %v3181_v52 = vshll.u32 %v7112_v9, 16  ;;  %v3195_v47 = vshll.u32 %v7113_v35, 16  ;;  %v3199_v4 = vshrl.u32 %v7113_v35, 16 }
 0x1b3   : > { %v3154_v27 = vor.u32 %v3153_v0, %v8934_v12  ;;  %v3168_v2 = vor.u32 %v3167_v33, %v3164_v38  ;;  %v6069_v33 = vcombine.low %v3126_v45, %v3136_v36  ;;  %v5120_v36 = vld [vmem:[#allocation2 + $0xc0] sm:$0xe] }
 0x1b4   : > { %v3183_v31 = vrot.slane %v3181_v52, 5  ;;  %v3197_v38 = vrot.slane %v3195_v47, 5  ;;  %v3201_v50 = vrot.slane %v3199_v4, 4 }
 0x1b5   : > { %6573 = vmatmul.mubr.msk.bf16.gmra.mrb[24].mxu1 %vm1504_vm6, %v7056_v14  ;;  %v8936_v14 = vrot.slane %v3171_v57, 5  ;;  %v3145_v57 = vrot.slane %v3144_v48, 4  ;;  %v3155_v32 = vrot.slane %v3154_v27, 4  ;;  %v3169_v34 = vrot.slane %v3168_v2, 4  ;;  %v7115_v48 = vld [vmem:[#allocation2 + $0xb0] sm:$0x1] }
 0x1b6   : > { %6576 = vmatprep.mubr.msk.bf16.mxu1 %vm1504_vm6, %v7057_v62  ;;  %v3177_v62 = vrot.slane %v3175_v16, 4  ;;  %v3159_v16 = vrot.slane %v3157_v17, 5  ;;  %v3205_v6 = vshll.u32 %v7115_v48, 16  ;;  %v3202_v52 = vor.u32 %v3201_v50, %v3197_v38 }
 0x1b7   : > { %v3174_v17 = vsel %vm7251_vm5, %v3169_v34, %v8936_v14 }
 0x1b8   : > { %v3178_v11 = vor.u32 %v3177_v62, %v8936_v14  ;;  %v3212_v62 = vrot.slane %v3210_v40, 4  ;;  %v3160_v7 = vsel %vm7251_vm5, %v3155_v32, %v3159_v16  ;;  %v3203_v4 = vrot.slane %v3202_v52, 4 }
 0x1b9   : > { %6731 = vmatmul.mubr.msk.bf16.gmra.mrb[12].mxu0 %vm1504_vm6, %v6230_v53  ;;  %v3219_v53 = vshll.u32 %v7114_v19, 16  ;;  %v3207_v45 = vrot.slane %v3205_v6, 5 }
 0x1ba   : > { %6734 = vmatprep.mubr.msk.bf16.mxu0 %vm1504_vm6, %v6231_v56  ;;  %v3179_v0 = vrot.slane %v3178_v11, 4  ;;  %v3150_v56 = vsel %vm7251_vm5, %v3145_v57, %v8934_v12  ;;  %v3234_v12 = vshrl.u32 %v2870_v55, 16  ;;  %v3216_v14 = vor.u32 %v3215_v13, %v3212_v62  ;;  %v7117_v11 = vld [vmem:[#allocation2 + $0xbc] sm:$0x1] }
 0x1bb   : > { %v3221_v59 = vrot.slane %v3219_v53, 5  ;;  %v3229_v35 = vshll.u32 %v7117_v11, 16  ;;  %v6070_v47 = vcombine.low %v3150_v56, %v3160_v7  ;;  %v5272_v53 = vrot.slane %v5270_v29, 4 }
 0x1bc   : > { %v3184_v27 = vsel %vm7251_vm5, %v3179_v0, %v3183_v31  ;;  %v3236_v57 = vrot.slane %v3234_v12, 4  ;;  %v3217_v19 = vrot.slane %v3216_v14, 4  ;;  %v3208_v32 = vsel %vm7251_vm5, %v3203_v4, %v3207_v45 }
 0x1bd   : > { %6577 = vmatmul.mubr.msk.bf16.gmra.mrb[28].mxu1 %vm1504_vm6, %v7058_v22  ;;  %v3188_v22 = vrot.slane %v3186_v44, 4  ;;  %v3237_v44 = vshll.u32 %v2870_v55, 16  ;;  %v3226_v2 = vor.u32 %v3225_v15, %v3221_v59  ;;  %v6071_v20 = vcombine.low %v3174_v17, %v3184_v27 }
 0x1be   : > { %6598 = vmatprep.mubr.msk.bf16.mxu1 %vm1504_vm6, %v6067_v41  ;;  %v3191_v41 = vrot.slane %v3189_v46, 5  ;;  %v7116_v46 = vld [vmem:[#allocation2 + $0xc4] sm:$0xf]  ;;  %v3231_v61 = vrot.slane %v3229_v35, 5  ;;  %v3222_v23 = vsel %vm7251_vm5, %v3217_v19, %v3221_v59 }
 0x1bf   : > { %v3247_v60 = vshrl.u32 %v7116_v46, 16  ;;  %v3239_v16 = vrot.slane %v3237_v44, 5  ;;  %v3227_v18 = vrot.slane %v3226_v2, 4 }
 0x1c0   : > { %v3192_v9 = vor.u32 %v3191_v41, %v3188_v22  ;;  %v7118_v41 = vld [vmem:[#allocation2 + $0xc8] sm:$0x1] }
 0x1c1   : > { %6735 = vmatmul.mubr.msk.bf16.gmra.mrb[16].mxu0 %vm1504_vm6, %v6232_v43  ;;  %v3249_v8 = vrot.slane %v3247_v60, 4  ;;  %v3240_v31 = vor.u32 %v3239_v16, %v3236_v57  ;;  %v3253_v34 = vshll.u32 %v7118_v41, 16  ;;  %v3232_v49 = vsel %vm7251_vm5, %v3227_v18, %v3231_v61 }
 0x1c2   : > { %6738 = vmatprep.mubr.msk.bf16.mxu0 %vm1504_vm6, %v6233_v1  ;;  %v3193_v43 = vrot.slane %v3192_v9, 4  ;;  %v6220_v1 = vrot.slane %v5120_v36, 9 }
 0x1c3   : > { %v3241_v50 = vrot.slane %v3240_v31, 4  ;;  %v3255_v62 = vrot.slane %v3253_v34, 5 }
 0x1c4   : > { %v3198_v51 = vsel %vm7251_vm5, %v3193_v43, %v3197_v38  ;;  %v5271_v5 = vsel %vm7638_vm15, %v6220_v1, %v5270_v29  ;;  %v6073_v38 = vcombine.low %v3222_v23, %v3232_v49 }
 0x1c5   : > { %6599 = vmatmul.mubr.msk.bf16.vlgmr.msra.gmra.mrb[16].mxu1 %vm1504_vm6, %v8759_v26  ;;  %v3243_v26 = vshll.u32 %v7116_v46, 16  ;;  %v6072_v0 = vcombine.low %v3198_v51, %v3208_v32 }
 0x1c6   : > { %6602 = vmatprep.mubr.msk.bf16.mxu1 %vm1504_vm6, %v6069_v33 }
 0x1c7   : > { %v3245_v40 = vrot.slane %v3243_v26, 5 }
 0x1c9   : > { %6739 = vmatmul.mubr.msk.bf16.gmra.mrb[20].mxu0 %vm1504_vm6, %v6234_v54  ;;  %v3250_v22 = vor.u32 %v3249_v8, %v3245_v40  ;;  %v5274_v54 = vsel %vm7638_vm15, %v5272_v53, %v5273_v42  ;;  %v3246_v25 = vsel %vm7251_vm5, %v3241_v50, %v3245_v40 }
 0x1ca   : > { %6742 = vmatprep.mubr.msk.bf16.mxu0 %vm1504_vm6, %v6235_v10  ;;  %v6237_v3 = vcombine.low %v5271_v5, %v5274_v54 }
 0x1cb   : > { %v3251_v33 = vrot.slane %v3250_v22, 4 }
 0x1cd   : > { %6603 = vmatmul.mubr.msk.bf16.gmra.mrb[20].mxu1 %vm1504_vm6, %v6070_v47  ;;  %v3256_v21 = vsel %vm7251_vm5, %v3251_v33, %v3255_v62 }
 0x1ce   : > { %6606 = vmatprep.mubr.msk.bf16.mxu1 %vm1504_vm6, %v6071_v20  ;;  %v6074_v10 = vcombine.low %v3246_v25, %v3256_v21 }
 0x1d1   : > { %6743 = vmatmul.mubr.msk.bf16.gmra.mrb[24].mxu0 %vm1504_vm6, %v6236_v39 }
 0x1d2   : > { %6746 = vmatprep.mubr.msk.bf16.mxu0 %vm1504_vm6, %v6237_v3 }
 0x1d5   : > { %6607 = vmatmul.mubr.msk.bf16.gmra.mrb[24].mxu1 %vm1504_vm6, %v6072_v0 }
 0x1d6   : > { %6610 = vmatprep.mubr.msk.bf16.mxu1 %vm1504_vm6, %v6073_v38 }
 0x1d9   : > { %6747 = vmatmul.mubr.msk.bf16.gmra.mrb[28].mxu0 %vm1504_vm6, %v6238_v37 }
 0x1dd   : > { %6611 = vmatmul.mubr.msk.bf16.gmra.mrb[28].mxu1 %vm1504_vm6, %v6074_v10 }
 0x258   : > { %v6550_v24 = vpop.f32.mrb[0].mxu1 }
 0x259   : > { %v2666_v63 = vpop.f32.mrb[1].mxu1 }
 0x25a   : > { %v6551_v39 = vpop.f32.mrb[2].mxu1 }
 0x25b   : > { %v2669_v13 = vpop.f32.mrb[3].mxu1 }
 0x260   : > { %v6554_v59 = vpop.f32.mrb[4].mxu1 }
 0x261   : > { %v2682_v15 = vpop.f32.mrb[5].mxu1 }
 0x262   : > { %v6555_v55 = vpop.f32.mrb[6].mxu1 }
 0x263   : > { %v2685_v28 = vpop.f32.mrb[7].mxu1 }
 0x268   : > { %v9016_v56 = vpop.f32.mrb[8].mxu1 }
 0x269   : > { %v9018_v7 = vpop.f32.mrb[9].mxu1 }
 0x26a   : > { %v9020_v48 = vpop.f32.mrb[10].mxu1 }
 0x26b   : > { %v9022_v6 = vpop.f32.mrb[11].mxu1 }
 0x270   : > { %v9024_v30 = vpop.f32.mrb[12].mxu1 }
 0x271   : > { %v9026_v58 = vpop.f32.mrb[13].mxu1 }
 0x272   : > { %v9028_v37 = vpop.f32.mrb[14].mxu1 }
 0x273   : > { %v9030_v17 = vpop.f32.mrb[15].mxu1 }
 0x274   : > { %v6720_v27 = vpop.f32.mrb[0].mxu0 }
 0x275   : > { %v6752_v9 = vadd.f32 %v6720_v27, %v6550_v24  ;;  %v5417_v52 = vpop.f32.mrb[1].mxu0 }
 0x276   : > { %v6753_v12 = vadd.f32 %v5417_v52, %v2666_v63  ;;  %v6721_v44 = vpop.f32.mrb[2].mxu0 }
 0x277   : > { %5578 = vst.msk [vmem:[%s9037_s12 + $0x10] sm:$0xff] %vm1504_vm6, %v6752_v9  ;;  %v6754_v46 = vadd.f32 %v6721_v44, %v6551_v39  ;;  %v5420_v26 = vpop.f32.mrb[3].mxu0  ;;  %v5679_v2 = vmul.f32 %v6752_v9, %v6752_v9  ;;  %v5611_v43 = vsel %vm1504_vm6, %v6752_v9, 0.0 }
 0x278   : > { %5576 = vst.msk [vmem:[%s9037_s12] sm:$0xff] %vm1504_vm6, %v6753_v12  ;;  %v5677_v60 = vmul.f32 %v6753_v12, %v6753_v12  ;;  %v6755_v14 = vadd.f32 %v5420_v26, %v2669_v13  ;;  %v5608_v11 = vsel %vm1504_vm6, %v6753_v12, 0.0 }
 0x279   : > { %5579 = vst.msk [vmem:[%s9037_s12 + $0x18] sm:$0xff] %vm1504_vm6, %v6754_v46  ;;  %v5680_v29 = vmul.f32 %v6754_v46, %v6754_v46  ;;  %v5712_v19 = vsel %vm1504_vm6, %v5679_v2, 0.0  ;;  %v5613_v18 = vsel %vm1504_vm6, %v6754_v46, 0.0 }
 0x27a   : > { %5577 = vst.msk [vmem:[%s9037_s12 + $0x8] sm:$0xff] %vm1504_vm6, %v6755_v14  ;;  %v5609_v35 = vsel %vm1504_vm6, %v6755_v14, 0.0  ;;  %v5678_v47 = vmul.f32 %v6755_v14, %v6755_v14  ;;  %v5709_v4 = vsel %vm1504_vm6, %v5677_v60, 0.0 }
 0x27b   : > { %v5610_v20 = vadd.f32 %v5609_v35, %v5608_v11  ;;  %v5714_v53 = vsel %vm1504_vm6, %v5680_v29, 0.0 }
 0x27c   : > { %v5710_v45 = vsel %vm1504_vm6, %v5678_v47, 0.0  ;;  %v6724_v36 = vpop.f32.mrb[4].mxu0 }
 0x27d   : > { %v5612_v57 = vadd.f32 %v5611_v43, %v5610_v20  ;;  %v5711_v16 = vadd.f32 %v5710_v45, %v5709_v4  ;;  %v6756_v40 = vadd.f32 %v6724_v36, %v6554_v59  ;;  %v5433_v8 = vpop.f32.mrb[5].mxu0 }
 0x27e   : > { %v6757_v61 = vadd.f32 %v5433_v8, %v2682_v15  ;;  %v6725_v1 = vpop.f32.mrb[6].mxu0 }
 0x27f   : > { %v5713_v42 = vadd.f32 %v5712_v19, %v5711_v16  ;;  %5582 = vst.msk [vmem:[%s9037_s12 + $0x30] sm:$0xff] %vm1504_vm6, %v6756_v40  ;;  %v5614_v51 = vadd.f32 %v5613_v18, %v5612_v57  ;;  %v5436_v32 = vpop.f32.mrb[7].mxu0  ;;  %v6758_v41 = vadd.f32 %v6725_v1, %v6555_v55  ;;  %v5683_v0 = vmul.f32 %v6756_v40, %v6756_v40 }
 0x280   : > { %5580 = vst.msk [vmem:[%s9037_s12 + $0x20] sm:$0xff] %vm1504_vm6, %v6757_v61  ;;  %v5615_v31 = vsel %vm1504_vm6, %v6757_v61, 0.0  ;;  %v5681_v22 = vmul.f32 %v6757_v61, %v6757_v61  ;;  %v6759_v34 = vadd.f32 %v5436_v32, %v2685_v28  ;;  %v5619_v62 = vsel %vm1504_vm6, %v6756_v40, 0.0 }
 0x281   : > { %v5616_v23 = vadd.f32 %v5615_v31, %v5614_v51  ;;  %v5715_v49 = vadd.f32 %v5714_v53, %v5713_v42  ;;  %5583 = vst.msk [vmem:[%s9037_s12 + $0x38] sm:$0xff] %vm1504_vm6, %v6758_v41  ;;  %v5684_v25 = vmul.f32 %v6758_v41, %v6758_v41  ;;  %v5621_v39 = vsel %vm1504_vm6, %v6758_v41, 0.0 }
 0x282   : > { %v5716_v5 = vsel %vm1504_vm6, %v5681_v22, 0.0  ;;  %5581 = vst.msk [vmem:[%s9037_s12 + $0x28] sm:$0xff] %vm1504_vm6, %v6759_v34  ;;  %v5617_v54 = vsel %vm1504_vm6, %v6759_v34, 0.0  ;;  %v5682_v33 = vmul.f32 %v6759_v34, %v6759_v34  ;;  %v5720_v55 = vsel %vm1504_vm6, %v5683_v0, 0.0 }
 0x283   : > { %v5717_v38 = vadd.f32 %v5716_v5, %v5715_v49  ;;  %v5618_v50 = vadd.f32 %v5617_v54, %v5616_v23 }
 0x284   : > { %v6728_v3 = vpop.f32.mrb[8].mxu0  ;;  %v5718_v10 = vsel %vm1504_vm6, %v5682_v33, 0.0 }
 0x285   : > { %v5620_v21 = vadd.f32 %v5619_v62, %v5618_v50  ;;  %v6760_v24 = vadd.f32 %v6728_v3, %v9016_v56  ;;  %v5449_v63 = vpop.f32.mrb[9].mxu0  ;;  %v5719_v13 = vadd.f32 %v5718_v10, %v5717_v38 }
 0x286   : > { %v6761_v59 = vadd.f32 %v5449_v63, %v9018_v7  ;;  %v6729_v15 = vpop.f32.mrb[10].mxu0  ;;  %v5722_v7 = vsel %vm1504_vm6, %v5684_v25, 0.0 }
 0x287   : > { %5586 = vst.msk [vmem:[%s9037_s12 + $0x50] sm:$0xff] %vm1504_vm6, %v6760_v24  ;;  %v5622_v28 = vadd.f32 %v5621_v39, %v5620_v21  ;;  %v6762_v27 = vadd.f32 %v6729_v15, %v9020_v48  ;;  %v5452_v9 = vpop.f32.mrb[11].mxu0  ;;  %v5721_v52 = vadd.f32 %v5720_v55, %v5719_v13  ;;  %v5687_v2 = vmul.f32 %v6760_v24, %v6760_v24 }
 0x288   : > { %5584 = vst.msk [vmem:[%s9037_s12 + $0x40] sm:$0xff] %vm1504_vm6, %v6761_v59  ;;  %v5623_v56 = vsel %vm1504_vm6, %v6761_v59, 0.0  ;;  %v5685_v12 = vmul.f32 %v6761_v59, %v6761_v59  ;;  %v6763_v44 = vadd.f32 %v5452_v9, %v9022_v6  ;;  %v5627_v35 = vsel %vm1504_vm6, %v6760_v24, 0.0 }
 0x289   : > { %v5624_v46 = vadd.f32 %v5623_v56, %v5622_v28  ;;  %5587 = vst.msk [vmem:[%s9037_s12 + $0x58] sm:$0xff] %vm1504_vm6, %v6762_v27  ;;  %v5723_v26 = vadd.f32 %v5722_v7, %v5721_v52  ;;  %v5688_v20 = vmul.f32 %v6762_v27, %v6762_v27  ;;  %v5629_v36 = vsel %vm1504_vm6, %v6762_v27, 0.0 }
 0x28a   : > { %v5724_v60 = vsel %vm1504_vm6, %v5685_v12, 0.0  ;;  %5585 = vst.msk [vmem:[%s9037_s12 + $0x48] sm:$0xff] %vm1504_vm6, %v6763_v44  ;;  %v5625_v48 = vsel %vm1504_vm6, %v6763_v44, 0.0  ;;  %v5686_v14 = vmul.f32 %v6763_v44, %v6763_v44  ;;  %v5728_v8 = vsel %vm1504_vm6, %v5687_v2, 0.0 }
 0x28b   : > { %v5626_v11 = vadd.f32 %v5625_v48, %v5624_v46  ;;  %v5725_v47 = vadd.f32 %v5724_v60, %v5723_v26 }
 0x28c   : > { %v5726_v6 = vsel %vm1504_vm6, %v5686_v14, 0.0  ;;  %v6732_v29 = vpop.f32.mrb[12].mxu0 }
 0x28d   : > { %v5628_v43 = vadd.f32 %v5627_v35, %v5626_v11  ;;  %v6764_v4 = vadd.f32 %v6732_v29, %v9024_v30  ;;  %v5465_v45 = vpop.f32.mrb[13].mxu0  ;;  %v5727_v57 = vadd.f32 %v5726_v6, %v5725_v47 }
 0x28e   : > { %v6765_v16 = vadd.f32 %v5465_v45, %v9026_v58  ;;  %v6733_v40 = vpop.f32.mrb[14].mxu0  ;;  %v5730_v58 = vsel %vm1504_vm6, %v5688_v20, 0.0 }
 0x28f   : > { %5590 = vst.msk [vmem:[%s9037_s12 + $0x70] sm:$0xff] %vm1504_vm6, %v6764_v4  ;;  %v5630_v19 = vadd.f32 %v5629_v36, %v5628_v43  ;;  %v6766_v18 = vadd.f32 %v6733_v40, %v9028_v37  ;;  %v5468_v61 = vpop.f32.mrb[15].mxu0  ;;  %v5729_v1 = vadd.f32 %v5728_v8, %v5727_v57  ;;  %v5691_v41 = vmul.f32 %v6764_v4, %v6764_v4 }
 0x290   : > { %5588 = vst.msk [vmem:[%s9037_s12 + $0x60] sm:$0xff] %vm1504_vm6, %v6765_v16  ;;  %v5631_v30 = vsel %vm1504_vm6, %v6765_v16, 0.0  ;;  %v5689_v53 = vmul.f32 %v6765_v16, %v6765_v16  ;;  %v6767_v42 = vadd.f32 %v5468_v61, %v9030_v17  ;;  %v5635_v49 = vsel %vm1504_vm6, %v6764_v4, 0.0 }
 0x291   : > { %v5632_v51 = vadd.f32 %v5631_v30, %v5630_v19  ;;  %5591 = vst.msk [vmem:[%s9037_s12 + $0x78] sm:$0xff] %vm1504_vm6, %v6766_v18  ;;  %v5731_v32 = vadd.f32 %v5730_v58, %v5729_v1  ;;  %v5692_v38 = vmul.f32 %v6766_v18, %v6766_v18  ;;  %v5637_v25 = vsel %vm1504_vm6, %v6766_v18, 0.0 }
 0x292   : > { %v5732_v31 = vsel %vm1504_vm6, %v5689_v53, 0.0  ;;  %5589 = vst.msk [vmem:[%s9037_s12 + $0x68] sm:$0xff] %vm1504_vm6, %v6767_v42  ;;  %v5633_v37 = vsel %vm1504_vm6, %v6767_v42, 0.0  ;;  %v5690_v22 = vmul.f32 %v6767_v42, %v6767_v42  ;;  %v5736_v39 = vsel %vm1504_vm6, %v5691_v41, 0.0 }
 0x293   : > { %v5634_v34 = vadd.f32 %v5633_v37, %v5632_v51  ;;  %v5733_v17 = vadd.f32 %v5732_v31, %v5731_v32  ;;  %v5738_v52 = vsel %vm1504_vm6, %v5692_v38, 0.0 }
 0x294   : > { %v5734_v5 = vsel %vm1504_vm6, %v5690_v22, 0.0  ;;  %v6736_v0 = vpop.f32.mrb[16].mxu0 }
 0x295   : > { %v5636_v50 = vadd.f32 %v5635_v49, %v5634_v34  ;;  %v5481_v3 = vpop.f32.mrb[17].mxu0  ;;  %v5735_v21 = vadd.f32 %v5734_v5, %v5733_v17 }
 0x296   : > { %v6737_v63 = vpop.f32.mrb[18].mxu0 }
 0x297   : > { %v5638_v13 = vadd.f32 %v5637_v25, %v5636_v50  ;;  %v5484_v15 = vpop.f32.mrb[19].mxu0  ;;  %v5737_v55 = vadd.f32 %v5736_v39, %v5735_v21 }
 0x298   : > { %v6600_v23 = vpop.f32.mrb[16].mxu1 }
 0x299   : > { %v3456_v54 = vpop.f32.mrb[17].mxu1  ;;  %v6768_v33 = vadd.f32 %v6736_v0, %v6600_v23  ;;  %v5739_v12 = vadd.f32 %v5738_v52, %v5737_v55 }
 0x29a   : > { %v6601_v62 = vpop.f32.mrb[18].mxu1  ;;  %v6769_v10 = vadd.f32 %v5481_v3, %v3456_v54 }
 0x29b   : > { %v3459_v24 = vpop.f32.mrb[19].mxu1  ;;  %5594 = vst.msk [vmem:[%s9037_s12 + $0x90] sm:$0xff] %vm1504_vm6, %v6768_v33  ;;  %v6770_v59 = vadd.f32 %v6737_v63, %v6601_v62  ;;  %v5695_v26 = vmul.f32 %v6768_v33, %v6768_v33  ;;  %v5643_v14 = vsel %vm1504_vm6, %v6768_v33, 0.0 }
 0x29c   : > { %5592 = vst.msk [vmem:[%s9037_s12 + $0x80] sm:$0xff] %vm1504_vm6, %v6769_v10  ;;  %v5639_v28 = vsel %vm1504_vm6, %v6769_v10, 0.0  ;;  %v5693_v27 = vmul.f32 %v6769_v10, %v6769_v10  ;;  %v6771_v9 = vadd.f32 %v5484_v15, %v3459_v24  ;;  %v6740_v47 = vpop.f32.mrb[20].mxu0 }
 0x29d   : > { %v5640_v56 = vadd.f32 %v5639_v28, %v5638_v13  ;;  %5595 = vst.msk [vmem:[%s9037_s12 + $0x98] sm:$0xff] %vm1504_vm6, %v6770_v59  ;;  %v5696_v6 = vmul.f32 %v6770_v59, %v6770_v59  ;;  %v5497_v4 = vpop.f32.mrb[21].mxu0  ;;  %v5645_v45 = vsel %vm1504_vm6, %v6770_v59, 0.0  ;;  %v5744_v8 = vsel %vm1504_vm6, %v5695_v26, 0.0 }
 0x29e   : > { %v5740_v44 = vsel %vm1504_vm6, %v5693_v27, 0.0  ;;  %5593 = vst.msk [vmem:[%s9037_s12 + $0x88] sm:$0xff] %vm1504_vm6, %v6771_v9  ;;  %v5641_v7 = vsel %vm1504_vm6, %v6771_v9, 0.0  ;;  %v5694_v46 = vmul.f32 %v6771_v9, %v6771_v9  ;;  %v6741_v40 = vpop.f32.mrb[22].mxu0 }
 0x29f   : > { %v5642_v60 = vadd.f32 %v5641_v7, %v5640_v56  ;;  %v5741_v2 = vadd.f32 %v5740_v44, %v5739_v12  ;;  %v5500_v61 = vpop.f32.mrb[23].mxu0  ;;  %v5746_v58 = vsel %vm1504_vm6, %v5696_v6, 0.0 }
 0x2a0   : > { %v6604_v48 = vpop.f32.mrb[20].mxu1  ;;  %v5742_v11 = vsel %vm1504_vm6, %v5694_v46, 0.0 }
 0x2a1   : > { %v3472_v35 = vpop.f32.mrb[21].mxu1  ;;  %v5644_v29 = vadd.f32 %v5643_v14, %v5642_v60  ;;  %v6772_v20 = vadd.f32 %v6740_v47, %v6604_v48  ;;  %v5743_v36 = vadd.f32 %v5742_v11, %v5741_v2 }
 0x2a2   : > { %v6605_v43 = vpop.f32.mrb[22].mxu1  ;;  %v6773_v57 = vadd.f32 %v5497_v4, %v3472_v35 }
 0x2a3   : > { %v3475_v16 = vpop.f32.mrb[23].mxu1  ;;  %5598 = vst.msk [vmem:[%s9037_s12 + $0xb0] sm:$0xff] %vm1504_vm6, %v6772_v20  ;;  %v5646_v19 = vadd.f32 %v5645_v45, %v5644_v29  ;;  %v6774_v18 = vadd.f32 %v6741_v40, %v6605_v43  ;;  %v5745_v1 = vadd.f32 %v5744_v8, %v5743_v36  ;;  %v5699_v41 = vmul.f32 %v6772_v20, %v6772_v20 }
 0x2a4   : > { %5596 = vst.msk [vmem:[%s9037_s12 + $0xa0] sm:$0xff] %vm1504_vm6, %v6773_v57  ;;  %v5647_v30 = vsel %vm1504_vm6, %v6773_v57, 0.0  ;;  %v5697_v53 = vmul.f32 %v6773_v57, %v6773_v57  ;;  %v6775_v42 = vadd.f32 %v5500_v61, %v3475_v16  ;;  %v5651_v49 = vsel %vm1504_vm6, %v6772_v20, 0.0  ;;  %v6744_v0 = vpop.f32.mrb[24].mxu0 }
 0x2a5   : > { %v5648_v51 = vadd.f32 %v5647_v30, %v5646_v19  ;;  %5599 = vst.msk [vmem:[%s9037_s12 + $0xb8] sm:$0xff] %vm1504_vm6, %v6774_v18  ;;  %v5747_v32 = vadd.f32 %v5746_v58, %v5745_v1  ;;  %v5700_v38 = vmul.f32 %v6774_v18, %v6774_v18  ;;  %v5513_v3 = vpop.f32.mrb[25].mxu0  ;;  %v5653_v25 = vsel %vm1504_vm6, %v6774_v18, 0.0 }
 0x2a6   : > { %v5748_v31 = vsel %vm1504_vm6, %v5697_v53, 0.0  ;;  %5597 = vst.msk [vmem:[%s9037_s12 + $0xa8] sm:$0xff] %vm1504_vm6, %v6775_v42  ;;  %v5649_v37 = vsel %vm1504_vm6, %v6775_v42, 0.0  ;;  %v5698_v22 = vmul.f32 %v6775_v42, %v6775_v42  ;;  %v6745_v63 = vpop.f32.mrb[26].mxu0  ;;  %v5752_v39 = vsel %vm1504_vm6, %v5699_v41, 0.0 }
 0x2a7   : > { %v5650_v34 = vadd.f32 %v5649_v37, %v5648_v51  ;;  %v5749_v17 = vadd.f32 %v5748_v31, %v5747_v32  ;;  %v5516_v15 = vpop.f32.mrb[27].mxu0  ;;  %v5754_v52 = vsel %vm1504_vm6, %v5700_v38, 0.0 }
 0x2a8   : > { %v6608_v23 = vpop.f32.mrb[24].mxu1  ;;  %v5750_v5 = vsel %vm1504_vm6, %v5698_v22, 0.0 }
 0x2a9   : > { %v3488_v54 = vpop.f32.mrb[25].mxu1  ;;  %v5652_v50 = vadd.f32 %v5651_v49, %v5650_v34  ;;  %v6776_v33 = vadd.f32 %v6744_v0, %v6608_v23  ;;  %v5751_v21 = vadd.f32 %v5750_v5, %v5749_v17 }
 0x2aa   : > { %v6609_v62 = vpop.f32.mrb[26].mxu1  ;;  %v6777_v10 = vadd.f32 %v5513_v3, %v3488_v54 }
 0x2ab   : > { %v3491_v24 = vpop.f32.mrb[27].mxu1  ;;  %5602 = vst.msk [vmem:[%s9037_s12 + $0xd0] sm:$0xff] %vm1504_vm6, %v6776_v33  ;;  %v5654_v13 = vadd.f32 %v5653_v25, %v5652_v50  ;;  %v6778_v59 = vadd.f32 %v6745_v63, %v6609_v62  ;;  %v5753_v55 = vadd.f32 %v5752_v39, %v5751_v21  ;;  %v5703_v26 = vmul.f32 %v6776_v33, %v6776_v33 }
 0x2ac   : > { %5600 = vst.msk [vmem:[%s9037_s12 + $0xc0] sm:$0xff] %vm1504_vm6, %v6777_v10  ;;  %v5655_v28 = vsel %vm1504_vm6, %v6777_v10, 0.0  ;;  %v5701_v27 = vmul.f32 %v6777_v10, %v6777_v10  ;;  %v6779_v9 = vadd.f32 %v5516_v15, %v3491_v24  ;;  %v5659_v14 = vsel %vm1504_vm6, %v6776_v33, 0.0  ;;  %v6748_v47 = vpop.f32.mrb[28].mxu0 }
 0x2ad   : > { %v5656_v56 = vadd.f32 %v5655_v28, %v5654_v13  ;;  %5603 = vst.msk [vmem:[%s9037_s12 + $0xd8] sm:$0xff] %vm1504_vm6, %v6778_v59  ;;  %v5755_v12 = vadd.f32 %v5754_v52, %v5753_v55  ;;  %v5704_v6 = vmul.f32 %v6778_v59, %v6778_v59  ;;  %v5529_v4 = vpop.f32.mrb[29].mxu0  ;;  %v5661_v45 = vsel %vm1504_vm6, %v6778_v59, 0.0 }
 0x2ae   : > { %v5756_v44 = vsel %vm1504_vm6, %v5701_v27, 0.0  ;;  %5601 = vst.msk [vmem:[%s9037_s12 + $0xc8] sm:$0xff] %vm1504_vm6, %v6779_v9  ;;  %v5657_v7 = vsel %vm1504_vm6, %v6779_v9, 0.0  ;;  %v5702_v46 = vmul.f32 %v6779_v9, %v6779_v9  ;;  %v6749_v40 = vpop.f32.mrb[30].mxu0  ;;  %v5760_v8 = vsel %vm1504_vm6, %v5703_v26, 0.0 }
 0x2af   : > { %v5658_v60 = vadd.f32 %v5657_v7, %v5656_v56  ;;  %v5757_v2 = vadd.f32 %v5756_v44, %v5755_v12  ;;  %v5532_v61 = vpop.f32.mrb[31].mxu0  ;;  %v5762_v58 = vsel %vm1504_vm6, %v5704_v6, 0.0 }
 0x2b0   : > { %v6612_v48 = vpop.f32.mrb[28].mxu1  ;;  %v5758_v11 = vsel %vm1504_vm6, %v5702_v46, 0.0 }
 0x2b1   : > { %v3504_v35 = vpop.f32.mrb[29].mxu1  ;;  %v5660_v29 = vadd.f32 %v5659_v14, %v5658_v60  ;;  %v6780_v20 = vadd.f32 %v6748_v47, %v6612_v48  ;;  %v5759_v36 = vadd.f32 %v5758_v11, %v5757_v2 }
 0x2b2   : > { %v6613_v43 = vpop.f32.mrb[30].mxu1  ;;  %v6781_v57 = vadd.f32 %v5529_v4, %v3504_v35 }
 0x2b3   : > { %v3507_v16 = vpop.f32.mrb[31].mxu1  ;;  %5606 = vst.msk [vmem:[%s9037_s12 + $0xf0] sm:$0xff] %vm1504_vm6, %v6780_v20  ;;  %v5662_v19 = vadd.f32 %v5661_v45, %v5660_v29  ;;  %v6782_v18 = vadd.f32 %v6749_v40, %v6613_v43  ;;  %v5761_v1 = vadd.f32 %v5760_v8, %v5759_v36  ;;  %v5707_v41 = vmul.f32 %v6780_v20, %v6780_v20 }
 0x2b4   : > { %5604 = vst.msk [vmem:[%s9037_s12 + $0xe0] sm:$0xff] %vm1504_vm6, %v6781_v57  ;;  %v5663_v30 = vsel %vm1504_vm6, %v6781_v57, 0.0  ;;  %v5705_v53 = vmul.f32 %v6781_v57, %v6781_v57  ;;  %v6783_v42 = vadd.f32 %v5532_v61, %v3507_v16  ;;  %v5667_v23 = vsel %vm1504_vm6, %v6780_v20, 0.0 }
 0x2b5   : > { %v5664_v51 = vadd.f32 %v5663_v30, %v5662_v19  ;;  %5607 = vst.msk [vmem:[%s9037_s12 + $0xf8] sm:$0xff] %vm1504_vm6, %v6782_v18  ;;  %v5763_v32 = vadd.f32 %v5762_v58, %v5761_v1  ;;  %v5708_v5 = vmul.f32 %v6782_v18, %v6782_v18  ;;  %v5669_v0 = vsel %vm1504_vm6, %v6782_v18, 0.0 }
 0x2b6   : > { %v5764_v31 = vsel %vm1504_vm6, %v5705_v53, 0.0  ;;  %5605 = vst.msk [vmem:[%s9037_s12 + $0xe8] sm:$0xff] %vm1504_vm6, %v6783_v42  ;;  %v5665_v37 = vsel %vm1504_vm6, %v6783_v42, 0.0  ;;  %v5706_v22 = vmul.f32 %v6783_v42, %v6783_v42  ;;  %v5768_v50 = vsel %vm1504_vm6, %v5707_v41, 0.0 }
 0x2b7   : > { %v5666_v34 = vadd.f32 %v5665_v37, %v5664_v51  ;;  %v5765_v49 = vadd.f32 %v5764_v31, %v5763_v32  ;;  %v5770_v3 = vsel %vm1504_vm6, %v5708_v5, 0.0 }
 0x2b8   : > { %v5766_v17 = vsel %vm1504_vm6, %v5706_v22, 0.0 }
 0x2b9   : > { %v5668_v54 = vadd.f32 %v5667_v23, %v5666_v34  ;;  %v5767_v38 = vadd.f32 %v5766_v17, %v5765_v49 }
 0x2bb   : > { %v5670_v33 = vadd.f32 %v5669_v0, %v5668_v54  ;;  %v5769_v62 = vadd.f32 %v5768_v50, %v5767_v38 }
 0x2bd   : > { %v5671_v25 = vrot.slane %v5670_v33, 4  ;;  %v5771_v21 = vadd.f32 %v5770_v3, %v5769_v62 }
 0x2bf   : > { %v5672_v10 = vadd.f32 %v5671_v25, %v5670_v33  ;;  %v5772_v24 = vrot.slane %v5771_v21, 4 }
 0x2c1   : > { %v5673_v63 = vrot.slane %v5672_v10, 2  ;;  %v5773_v39 = vadd.f32 %v5772_v24, %v5771_v21 }
 0x2c3   : > { %v5674_v13 = vadd.f32 %v5673_v63, %v5672_v10  ;;  %v5774_v59 = vrot.slane %v5773_v39, 2 }
 0x2c5   : > { %v5675_v15 = vrot.slane %v5674_v13, 1  ;;  %v5775_v55 = vadd.f32 %v5774_v59, %v5773_v39 }
 0x2c7   : > { %v5776_v28 = vrot.slane %v5775_v55, 1  ;;  %v5676_v27 = vadd.f32 %v5675_v15, %v5674_v13 }
 0x2c9   : > { %v5777_v9 = vadd.f32 %v5776_v28, %v5775_v55 }
 0x2cb   : > { %v5779_v52 = vsel %vm5778_vm0, %v5676_v27, %v5777_v9 }
 0x2cc   : > { %5781 = vst.msk [vmem:[%s262_s15] sm:$0x3] %vm5780_vm1, %v5779_v52 }
 0x2cd PF: > { %s17_s21 = sadd.s32 1, %s7125_s21  }
 0x2ce   : > { %p14_p4 = scmp.ge.s32.totalorder %s17_s21, 4  }
 0x2d0   :  { %16 = sbr.rel (!%p14_p4) target bundleno = 1 (0x1), region = 92 }

</bundles_post_ra>
